<compile_context>
chip_gen: v7x
topology: tpu7x:2x2x1
jax: 0.10.0
libtpu: 0.0.40
codegen_flags: <defaults>
</compile_context>

<pallas_src>
import functools

import jax
import jax.numpy as jnp
from jax.experimental import pallas as pl
from jax.experimental.pallas import tpu as pltpu


def _round_up(x, m):
    return (x + m - 1) // m * m


def _cdiv(a, b):
    return (a + b - 1) // b


# ---------------------------------------------------------------------------
# Kernel 1: grouped matmul + bias + optional ReLU (conv hot path, MXU).
#   patches: (G, Mp, Kp) bf16, weights: (G, Kp, Np) bf16, bias: (G, 1, Np) f32.
#   grid = (G, Mp/tm, Np/tn); whole-K -> a single dot per output tile.
#   Output is written directly in merged (Mp, G*Np) layout.
# ---------------------------------------------------------------------------
def _gmatmul_kernel(x_ref, w_ref, b_ref, o_ref, *, apply_relu):
    y = jnp.dot(x_ref[...], w_ref[...], preferred_element_type=jnp.float32)
    y = y + b_ref[...]
    if apply_relu:
        y = jnp.maximum(y, 0.0)
    o_ref[...] = y.astype(o_ref.dtype)


def grouped_matmul_bias_act(x, w, b, *, apply_relu, out_dtype):
    """x: (G, M, Kp) bf16 with Kp % 128 == 0 (K tail zero-padded by the caller),
    w: (G, K, Ng), b: (G, Ng).
    Returns ((M, G*Np) out_dtype, Np); per-group channels padded to Np with
    exact zeros (zero weights + zero bias + ReLU)."""
    G, M, Kp = x.shape
    _, K, Ng = w.shape
    assert Kp % 128 == 0 and Kp >= K

    Np = _round_up(Ng, 128)
    tn = Np if Np <= 512 else 256            # whole-N tile for every layer here
    n_n = Np // tn

    n_m = _cdiv(M, 512)
    tm = _round_up(_cdiv(M, n_m), 16)        # 16: bf16 sublane packing, no relayout
    Mp = _round_up(M, tm)                    # pads M by < 16 rows per tile
    grid_m = Mp // tm

    xp = jnp.pad(x, ((0, 0), (0, Mp - M), (0, 0))) if Mp > M else x
    wp = jnp.pad(w, ((0, 0), (0, Kp - K), (0, Np - Ng))).astype(jnp.bfloat16)
    bp = jnp.pad(b, ((0, 0), (0, Np - Ng))).reshape(G, 1, Np).astype(jnp.float32)

    kernel = functools.partial(_gmatmul_kernel, apply_relu=apply_relu)
    out = pl.pallas_call(
        kernel,
        out_shape=jax.ShapeDtypeStruct((Mp, G * Np), out_dtype),
        grid_spec=pltpu.PrefetchScalarGridSpec(
            num_scalar_prefetch=0,
            grid=(G, grid_m, n_n),
            in_specs=[
                pl.BlockSpec((None, tm, Kp), lambda g, i, j: (g, i, 0)),
                pl.BlockSpec((None, Kp, tn), lambda g, i, j: (g, 0, j)),
                pl.BlockSpec((None, 1, tn), lambda g, i, j: (g, 0, j)),
            ],
            out_specs=pl.BlockSpec((tm, tn), lambda g, i, j: (i, g * n_n + j)),
        ),
        compiler_params=pltpu.CompilerParams(
            dimension_semantics=("parallel", "parallel", "parallel"),
            vmem_limit_bytes=48 * 1024 * 1024),
    )(xp, wp, bp)
    return out[:M], Np


# ---------------------------------------------------------------------------
# Kernel 2: fused MaxPool2d(3, 2, ceil_mode=True) + optional LocalResponseNorm.
#   Inputs are four parity-split views (even/odd rows x even/odd cols) of the
#   (-inf padded) feature map; all 9 pooling taps and the 5-wide LRN channel
#   window are computed whole-block in VMEM.  One image per grid step.
# ---------------------------------------------------------------------------
def _pool_lrn_kernel(ee_ref, eo_ref, oe_ref, oo_ref, o_ref, *,
                     apply_lrn, size, alpha, k_const):
    oh, ow, c = o_ref.shape
    # Whole-block loads; compute in f32 (HBM side may be bf16).
    ee = ee_ref[...].astype(jnp.float32)   # rows 2r,   cols 2c   : (OH+1, OW+1, C)
    eo = eo_ref[...].astype(jnp.float32)   # rows 2r,   cols 2c+1 : (OH+1, OW,   C)
    oe = oe_ref[...].astype(jnp.float32)   # rows 2r+1, cols 2c   : (OH,   OW+1, C)
    oo = oo_ref[...].astype(jnp.float32)   # rows 2r+1, cols 2c+1 : (OH,   OW,   C)

    m = oo
    m = jnp.maximum(m, eo[:oh])            # (2r,   2c+1)
    m = jnp.maximum(m, eo[1:])             # (2r+2, 2c+1)
    m = jnp.maximum(m, oe[:, :ow])         # (2r+1, 2c)
    m = jnp.maximum(m, oe[:, 1:])          # (2r+1, 2c+2)
    m = jnp.maximum(m, ee[:oh, :ow])       # (2r,   2c)
    m = jnp.maximum(m, ee[:oh, 1:])        # (2r,   2c+2)
    m = jnp.maximum(m, ee[1:, :ow])        # (2r+2, 2c)
    m = jnp.maximum(m, ee[1:, 1:])         # (2r+2, 2c+2)

    if apply_lrn:
        half = (size - 1) // 2
        sq = m * m
        lane = jax.lax.broadcasted_iota(jnp.int32, (oh, ow, c), 2)   # built once
        acc = sq
        for d in range(1, half + 1):
            up = pltpu.roll(sq, c - d, axis=2)            # channel j+d -> position j
            acc = acc + jnp.where(lane < c - d, up, 0.0)
            dn = pltpu.roll(sq, d, axis=2)                # channel j-d -> position j
            acc = acc + jnp.where(lane >= d, dn, 0.0)
        t = k_const + (alpha / size) * acc
        denom = jnp.sqrt(jnp.sqrt(t * t * t))             # t ** 0.75,  t >= k > 0
        m = m * pl.reciprocal(denom, approx=True)         # divide on the EUP slot
    o_ref[...] = m.astype(o_ref.dtype)


def maxpool_lrn(x, *, apply_lrn, out_dtype, size=5, alpha=1e-4, beta=0.75, k=1.0):
    """x: NHWC. MaxPool(3,2,ceil_mode=True) then (optionally) LRN over channels.
    Padded (zero) channels are preserved exactly, so a 128-padded channel dim can
    be carried straight through."""
    assert beta == 0.75  # kernel uses exact sqrt(sqrt(t^3)) for t**0.75
    N, H, W, C = x.shape
    s, kk = 2, 3
    OH = -((H - kk) // -s) + 1
    OW = -((W - kk) // -s) + 1
    if (OH - 1) * s >= H:   # ceil_mode: drop a window starting entirely outside
        OH -= 1
    if (OW - 1) * s >= W:
        OW -= 1
    Hp, Wp = 2 * OH + 1, 2 * OW + 1
    xp = x
    if Hp > H or Wp > W:
        xp = jnp.pad(x, ((0, 0), (0, Hp - H), (0, Wp - W), (0, 0)),
                     constant_values=-jnp.inf)
    # parity split (total bytes ~= input; no 9x window materialization)
    ee = xp[:, 0::2, 0::2, :]   # (N, OH+1, OW+1, C)
    eo = xp[:, 0::2, 1::2, :]   # (N, OH+1, OW,   C)
    oe = xp[:, 1::2, 0::2, :]   # (N, OH,   OW+1, C)
    oo = xp[:, 1::2, 1::2, :]   # (N, OH,   OW,   C)

    kernel = functools.partial(_pool_lrn_kernel, apply_lrn=apply_lrn,
                               size=size, alpha=alpha, k_const=k)
    out = pl.pallas_call(
        kernel,
        out_shape=jax.ShapeDtypeStruct((N, OH, OW, C), out_dtype),
        grid_spec=pltpu.PrefetchScalarGridSpec(
            num_scalar_prefetch=0,
            grid=(N,),
            in_specs=[
                pl.BlockSpec((None, OH + 1, OW + 1, C), lambda n: (n, 0, 0, 0)),
                pl.BlockSpec((None, OH + 1, OW, C), lambda n: (n, 0, 0, 0)),
                pl.BlockSpec((None, OH, OW + 1, C), lambda n: (n, 0, 0, 0)),
                pl.BlockSpec((None, OH, OW, C), lambda n: (n, 0, 0, 0)),
            ],
            out_specs=pl.BlockSpec((None, OH, OW, C), lambda n: (n, 0, 0, 0)),
        ),
        compiler_params=pltpu.CompilerParams(dimension_semantics=("parallel",)),
    )(ee, eo, oe, oo)
    return out


# ---------------------------------------------------------------------------
# Conv via bf16 im2col (glue) + grouped Pallas matmul kernel
# ---------------------------------------------------------------------------
def conv2d_act(x, w, b, *, stride, padding, groups, apply_relu, out_dtype,
               in_group_stride=None):
    """x: NHWC (layout channel dim may be >= real channels; padded tail ignored),
    w: PyTorch layout (Cout, Cin/groups, KH, KW), b: (Cout,).
    Returns ((N, OH, OW, groups*Np), Np): per-group channels padded to Np with
    exact zeros."""
    N, H, W, _ = x.shape
    Cout, Cin_g, KH, KW = w.shape
    assert Cout % groups == 0
    cout_g = Cout // groups
    gs = Cin_g if in_group_stride is None else in_group_stride
    OH = (H + 2 * padding - KH) // stride + 1
    OW = (W + 2 * padding - KW) // stride + 1
    M = N * OH * OW
    Kg = KH * KW * Cin_g
    Kp = _round_up(Kg, 128)

    # bf16 BEFORE im2col: the patches array (largest tensor in the net) is built
    # and written in bf16.
    xb = x.astype(jnp.bfloat16)
    if padding:
        xb = jnp.pad(xb, ((0, 0), (padding, padding), (padding, padding), (0, 0)))

    patch_groups = []
    for g in range(groups):
        xg = xb[..., g * gs: g * gs + Cin_g]
        cols = []
        for i in range(KH):
            for j in range(KW):
                cols.append(xg[:, i:i + stride * (OH - 1) + 1:stride,
                                  j:j + stride * (OW - 1) + 1:stride, :])
        if Kp > Kg:   # zero K-pad folded into the same concatenate (no extra pass)
            cols.append(jnp.zeros((N, OH, OW, Kp - Kg), jnp.bfloat16))
        patch_groups.append(jnp.concatenate(cols, axis=-1).reshape(M, Kp))
    patches = jnp.stack(patch_groups, axis=0)                    # (G, M, Kp) bf16

    wg = w.reshape(groups, cout_g, Cin_g, KH, KW)
    wmat = jnp.transpose(wg, (0, 3, 4, 2, 1)).reshape(groups, Kg, cout_g)
    bg = b.reshape(groups, cout_g)

    y, Np = grouped_matmul_bias_act(patches, wmat, bg,
                                    apply_relu=apply_relu, out_dtype=out_dtype)
    return y.reshape(N, OH, OW, groups * Np), Np


# ---------------------------------------------------------------------------
# Full forward pass of `features`
# ---------------------------------------------------------------------------
def features_forward(x_nchw, params):
    x = jnp.transpose(x_nchw, (0, 2, 3, 1)).astype(jnp.float32)        # NHWC
    # fold the 57.6 input scale into conv1's (linear) weights
    w1 = params["conv1_w"] * 57.6
    x, _ = conv2d_act(x, w1, params["conv1_b"], stride=4, padding=0, groups=1,
                      apply_relu=True, out_dtype=jnp.bfloat16)
    # channels stay padded 96 -> 128 (exact zeros) through pool1/LRN1: lane-dense
    x = maxpool_lrn(x, apply_lrn=True, out_dtype=jnp.bfloat16)
    x, _ = conv2d_act(x, params["conv2_w"], params["conv2_b"], stride=1,
                      padding=2, groups=2, apply_relu=True,
                      out_dtype=jnp.bfloat16)          # group stride 48 (default)
    x = maxpool_lrn(x, apply_lrn=True, out_dtype=jnp.bfloat16)
    x, _ = conv2d_act(x, params["conv3_w"], params["conv3_b"], stride=1,
                      padding=1, groups=1, apply_relu=True,
                      out_dtype=jnp.bfloat16)
    x, np4 = conv2d_act(x, params["conv4_w"], params["conv4_b"], stride=1,
                        padding=1, groups=2, apply_relu=True,
                        out_dtype=jnp.bfloat16)
    # conv4's per-group channels are padded 192 -> 256 zeros; conv5 reads with
    # that layout stride (no repack pass).
    x, _ = conv2d_act(x, params["conv5_w"], params["conv5_b"], stride=1,
                      padding=1, groups=2, apply_relu=True,
                      out_dtype=jnp.float32, in_group_stride=np4)
    x = maxpool_lrn(x, apply_lrn=False, out_dtype=jnp.float32)
    x_nchw_out = jnp.transpose(x, (0, 3, 1, 2))   # back to NCHW for torch .view
    return x_nchw_out.reshape(x_nchw_out.shape[0], -1)


def init_params(key):
    shapes = {
        "conv1": (96, 3, 11, 11),
        "conv2": (256, 48, 5, 5),     # groups=2
        "conv3": (384, 256, 3, 3),
        "conv4": (384, 192, 3, 3),    # groups=2
        "conv5": (256, 192, 3, 3),    # groups=2
    }
    params = {}
    for name, shp in shapes.items():
        key, kw, kb = jax.random.split(key, 3)
        fan_in = shp[1] * shp[2] * shp[3]
        scale = 1.0 / jnp.sqrt(jnp.float32(fan_in))
        params[name + "_w"] = jax.random.normal(kw, shp, jnp.float32) * scale
        params[name + "_b"] = jax.random.normal(kb, (shp[0],), jnp.float32) * 0.01
    return params


if __name__ == "__main__":
    key = jax.random.PRNGKey(0)
    kx, kp = jax.random.split(key)
    params = init_params(kp)
    # Smallest spatial size that survives the stride/pool chain: 67 -> 15 -> 7
    # -> 7 -> 3 -> 3 -> 1  => flattened feature dim 256*1*1 = 256.
    x = jax.random.uniform(kx, (2, 3, 67, 67), jnp.float32)   # NCHW like PyTorch
    out = jax.jit(features_forward)(x, params)
    out = jax.block_until_ready(out)
    assert out.shape == (2, 256), out.shape
    assert bool(jnp.all(jnp.isfinite(out)))
    print("KERNEL_OK")
</pallas_src>

<mosaic_0001>
module attributes {stable_mosaic.version = 11 : i64} {
  func.func @_gmatmul_kernel(%arg0: i32, %arg1: i32, %arg2: i32, %arg3: memref<1x464x384xbf16, #tpu.memory_space<vmem>>, %arg4: memref<1x384x128xbf16, #tpu.memory_space<vmem>>, %arg5: memref<1x1x128xf32, #tpu.memory_space<vmem>>, %arg6: memref<464x128xbf16, #tpu.memory_space<vmem>>) attributes {dimension_semantics = [#tpu.dimension_semantics<parallel>, #tpu.dimension_semantics<parallel>, #tpu.dimension_semantics<parallel>], iteration_bounds = array<i64: 1, 1, 1>, scalar_prefetch = 0 : i64, scratch_operands = 0 : i64, tpu.core_type = #tpu.core_type<tc>, window_params = [{transform_indices = @transform_0, window_bounds = array<i64: 1, 464, 384>}, {transform_indices = @transform_1, window_bounds = array<i64: 1, 384, 128>}, {transform_indices = @transform_2, window_bounds = array<i64: 1, 1, 128>}, {transform_indices = @transform_3, window_bounds = array<i64: 464, 128>}]} {
    %c0 = arith.constant 0 : index
    %c0_0 = arith.constant 0 : index
    %c0_1 = arith.constant 0 : index
    %0 = vector.load %arg3[%c0, %c0_0, %c0_1] : memref<1x464x384xbf16, #tpu.memory_space<vmem>>, vector<1x464x384xbf16>
    %1 = vector.shape_cast %0 : vector<1x464x384xbf16> to vector<464x384xbf16>
    %c0_2 = arith.constant 0 : index
    %c0_3 = arith.constant 0 : index
    %c0_4 = arith.constant 0 : index
    %2 = vector.load %arg4[%c0_2, %c0_3, %c0_4] : memref<1x384x128xbf16, #tpu.memory_space<vmem>>, vector<1x384x128xbf16>
    %3 = vector.shape_cast %2 : vector<1x384x128xbf16> to vector<384x128xbf16>
    %cst = arith.constant dense<0.000000e+00> : vector<464x128xf32>
    %4 = tpu.matmul %1, %3, %cst {dimension_numbers = #tpu.dot_dimension_numbers<[1], [0], [0], [1], [0, 0, 1, 1], [], []>} : vector<464x384xbf16>, vector<384x128xbf16>, vector<464x128xf32> -> vector<464x128xf32>
    %c0_5 = arith.constant 0 : index
    %c0_6 = arith.constant 0 : index
    %c0_7 = arith.constant 0 : index
    %5 = vector.load %arg5[%c0_5, %c0_6, %c0_7] : memref<1x1x128xf32, #tpu.memory_space<vmem>>, vector<1x1x128xf32>
    %6 = vector.shape_cast %5 : vector<1x1x128xf32> to vector<1x128xf32>
    %7 = vector.broadcast %6 : vector<1x128xf32> to vector<464x128xf32>
    %8 = arith.addf %4, %7 : vector<464x128xf32>
    %cst_8 = arith.constant 0.000000e+00 : f32
    %9 = vector.broadcast %cst_8 : f32 to vector<464x128xf32>
    %10 = arith.maximumf %8, %9 : vector<464x128xf32>
    %11 = arith.truncf %10 : vector<464x128xf32> to vector<464x128xbf16>
    %c0_9 = arith.constant 0 : index
    %c0_10 = arith.constant 0 : index
    %12 = vector.load %arg6[%c0_9, %c0_10] : memref<464x128xbf16, #tpu.memory_space<vmem>>, vector<464x128xbf16>
    tpu.vector_store %arg6[%c0_9, %c0_10], %11 {strides = array<i32>} : memref<464x128xbf16, #tpu.memory_space<vmem>>, vector<464x128xbf16>,
    return
  }
  func.func @transform_0(%arg0: i32, %arg1: i32, %arg2: i32) -> (i32, i32, i32) {
    %c0_i32 = arith.constant 0 : i32
    %c0_i32_0 = arith.constant 0 : i32
    return %arg0, %arg1, %c0_i32 : i32, i32, i32
  }
  func.func @transform_1(%arg0: i32, %arg1: i32, %arg2: i32) -> (i32, i32, i32) {
    %c0_i32 = arith.constant 0 : i32
    %c0_i32_0 = arith.constant 0 : i32
    return %arg0, %c0_i32, %arg2 : i32, i32, i32
  }
  func.func @transform_2(%arg0: i32, %arg1: i32, %arg2: i32) -> (i32, i32, i32) {
    %c0_i32 = arith.constant 0 : i32
    %c0_i32_0 = arith.constant 0 : i32
    return %arg0, %c0_i32, %arg2 : i32, i32, i32
  }
  func.func @transform_3(%arg0: i32, %arg1: i32, %arg2: i32) -> (i32, i32) {
    %c1_i32 = arith.constant 1 : i32
    %0 = arith.muli %arg0, %c1_i32 : i32
    %1 = arith.addi %0, %arg2 : i32
    %c0_i32 = arith.constant 0 : i32
    return %arg1, %1 : i32, i32
  }
}

module attributes {stable_mosaic.version = 11 : i64} {
  func.func @_pool_lrn_kernel(%arg0: i32, %arg1: memref<1x8x8x128xbf16, #tpu.memory_space<vmem>>, %arg2: memref<1x8x7x128xbf16, #tpu.memory_space<vmem>>, %arg3: memref<1x7x8x128xbf16, #tpu.memory_space<vmem>>, %arg4: memref<1x7x7x128xbf16, #tpu.memory_space<vmem>>, %arg5: memref<1x7x7x128xbf16, #tpu.memory_space<vmem>>) attributes {dimension_semantics = [#tpu.dimension_semantics<parallel>], iteration_bounds = array<i64: 2>, scalar_prefetch = 0 : i64, scratch_operands = 0 : i64, tpu.core_type = #tpu.core_type<tc>, window_params = [{transform_indices = @transform_0, window_bounds = array<i64: 1, 8, 8, 128>}, {transform_indices = @transform_1, window_bounds = array<i64: 1, 8, 7, 128>}, {transform_indices = @transform_2, window_bounds = array<i64: 1, 7, 8, 128>}, {transform_indices = @transform_3, window_bounds = array<i64: 1, 7, 7, 128>}, {transform_indices = @transform_4, window_bounds = array<i64: 1, 7, 7, 128>}]} {
    %c0 = arith.constant 0 : index
    %c0_0 = arith.constant 0 : index
    %c0_1 = arith.constant 0 : index
    %c0_2 = arith.constant 0 : index
    %0 = vector.load %arg1[%c0, %c0_0, %c0_1, %c0_2] : memref<1x8x8x128xbf16, #tpu.memory_space<vmem>>, vector<1x8x8x128xbf16>
    %1 = vector.shape_cast %0 : vector<1x8x8x128xbf16> to vector<8x8x128xbf16>
    %2 = arith.extf %1 : vector<8x8x128xbf16> to vector<8x8x128xf32>
    %c0_3 = arith.constant 0 : index
    %c0_4 = arith.constant 0 : index
    %c0_5 = arith.constant 0 : index
    %c0_6 = arith.constant 0 : index
    %3 = vector.load %arg2[%c0_3, %c0_4, %c0_5, %c0_6] : memref<1x8x7x128xbf16, #tpu.memory_space<vmem>>, vector<1x8x7x128xbf16>
    %4 = vector.shape_cast %3 : vector<1x8x7x128xbf16> to vector<8x7x128xbf16>
    %5 = arith.extf %4 : vector<8x7x128xbf16> to vector<8x7x128xf32>
    %c0_7 = arith.constant 0 : index
    %c0_8 = arith.constant 0 : index
    %c0_9 = arith.constant 0 : index
    %c0_10 = arith.constant 0 : index
    %6 = vector.load %arg3[%c0_7, %c0_8, %c0_9, %c0_10] : memref<1x7x8x128xbf16, #tpu.memory_space<vmem>>, vector<1x7x8x128xbf16>
    %7 = vector.shape_cast %6 : vector<1x7x8x128xbf16> to vector<7x8x128xbf16>
    %8 = arith.extf %7 : vector<7x8x128xbf16> to vector<7x8x128xf32>
    %c0_11 = arith.constant 0 : index
    %c0_12 = arith.constant 0 : index
    %c0_13 = arith.constant 0 : index
    %c0_14 = arith.constant 0 : index
    %9 = vector.load %arg4[%c0_11, %c0_12, %c0_13, %c0_14] : memref<1x7x7x128xbf16, #tpu.memory_space<vmem>>, vector<1x7x7x128xbf16>
    %10 = vector.shape_cast %9 : vector<1x7x7x128xbf16> to vector<7x7x128xbf16>
    %11 = arith.extf %10 : vector<7x7x128xbf16> to vector<7x7x128xf32>
    %12 = vector.extract_strided_slice %5 {offsets = [0, 0, 0], sizes = [7, 7, 128], strides = [1, 1, 1]} : vector<8x7x128xf32> to vector<7x7x128xf32>
    %13 = arith.maximumf %11, %12 : vector<7x7x128xf32>
    %14 = vector.extract_strided_slice %5 {offsets = [1, 0, 0], sizes = [7, 7, 128], strides = [1, 1, 1]} : vector<8x7x128xf32> to vector<7x7x128xf32>
    %15 = arith.maximumf %13, %14 : vector<7x7x128xf32>
    %16 = vector.extract_strided_slice %8 {offsets = [0, 0, 0], sizes = [7, 7, 128], strides = [1, 1, 1]} : vector<7x8x128xf32> to vector<7x7x128xf32>
    %17 = arith.maximumf %15, %16 : vector<7x7x128xf32>
    %18 = vector.extract_strided_slice %8 {offsets = [0, 1, 0], sizes = [7, 7, 128], strides = [1, 1, 1]} : vector<7x8x128xf32> to vector<7x7x128xf32>
    %19 = arith.maximumf %17, %18 : vector<7x7x128xf32>
    %20 = vector.extract_strided_slice %2 {offsets = [0, 0, 0], sizes = [7, 7, 128], strides = [1, 1, 1]} : vector<8x8x128xf32> to vector<7x7x128xf32>
    %21 = arith.maximumf %19, %20 : vector<7x7x128xf32>
    %22 = vector.extract_strided_slice %2 {offsets = [0, 1, 0], sizes = [7, 7, 128], strides = [1, 1, 1]} : vector<8x8x128xf32> to vector<7x7x128xf32>
    %23 = arith.maximumf %21, %22 : vector<7x7x128xf32>
    %24 = vector.extract_strided_slice %2 {offsets = [1, 0, 0], sizes = [7, 7, 128], strides = [1, 1, 1]} : vector<8x8x128xf32> to vector<7x7x128xf32>
    %25 = arith.maximumf %23, %24 : vector<7x7x128xf32>
    %26 = vector.extract_strided_slice %2 {offsets = [1, 1, 0], sizes = [7, 7, 128], strides = [1, 1, 1]} : vector<8x8x128xf32> to vector<7x7x128xf32>
    %27 = arith.maximumf %25, %26 : vector<7x7x128xf32>
    %28 = arith.mulf %27, %27 : vector<7x7x128xf32>
    %29 = tpu.iota {dimensions = array<i32: 2>} : vector<7x7x128xi32>
    %c127_i32 = arith.constant 127 : i32
    %30 = tpu.dynamic_rotate %28 by %c127_i32 dim 2 : vector<7x7x128xf32>, i32 -> vector<7x7x128xf32>
    %c127_i32_15 = arith.constant 127 : i32
    %31 = vector.broadcast %c127_i32_15 : i32 to vector<7x7x128xi32>
    %32 = arith.cmpi slt, %29, %31 : vector<7x7x128xi32>
    %cst = arith.constant 0.000000e+00 : f32
    %33 = vector.broadcast %cst : f32 to vector<7x7x128xf32>
    %34 = arith.select %32, %30, %33 : vector<7x7x128xi1>, vector<7x7x128xf32>
    %35 = arith.addf %28, %34 : vector<7x7x128xf32>
    %c1_i32 = arith.constant 1 : i32
    %36 = tpu.dynamic_rotate %28 by %c1_i32 dim 2 : vector<7x7x128xf32>, i32 -> vector<7x7x128xf32>
    %c1_i32_16 = arith.constant 1 : i32
    %37 = vector.broadcast %c1_i32_16 : i32 to vector<7x7x128xi32>
    %38 = arith.cmpi sge, %29, %37 : vector<7x7x128xi32>
    %cst_17 = arith.constant 0.000000e+00 : f32
    %39 = vector.broadcast %cst_17 : f32 to vector<7x7x128xf32>
    %40 = arith.select %38, %36, %39 : vector<7x7x128xi1>, vector<7x7x128xf32>
    %41 = arith.addf %35, %40 : vector<7x7x128xf32>
    %c126_i32 = arith.constant 126 : i32
    %42 = tpu.dynamic_rotate %28 by %c126_i32 dim 2 : vector<7x7x128xf32>, i32 -> vector<7x7x128xf32>
    %c126_i32_18 = arith.constant 126 : i32
    %43 = vector.broadcast %c126_i32_18 : i32 to vector<7x7x128xi32>
    %44 = arith.cmpi slt, %29, %43 : vector<7x7x128xi32>
    %cst_19 = arith.constant 0.000000e+00 : f32
    %45 = vector.broadcast %cst_19 : f32 to vector<7x7x128xf32>
    %46 = arith.select %44, %42, %45 : vector<7x7x128xi1>, vector<7x7x128xf32>
    %47 = arith.addf %41, %46 : vector<7x7x128xf32>
    %c2_i32 = arith.constant 2 : i32
    %48 = tpu.dynamic_rotate %28 by %c2_i32 dim 2 : vector<7x7x128xf32>, i32 -> vector<7x7x128xf32>
    %c2_i32_20 = arith.constant 2 : i32
    %49 = vector.broadcast %c2_i32_20 : i32 to vector<7x7x128xi32>
    %50 = arith.cmpi sge, %29, %49 : vector<7x7x128xi32>
    %cst_21 = arith.constant 0.000000e+00 : f32
    %51 = vector.broadcast %cst_21 : f32 to vector<7x7x128xf32>
    %52 = arith.select %50, %48, %51 : vector<7x7x128xi1>, vector<7x7x128xf32>
    %53 = arith.addf %47, %52 : vector<7x7x128xf32>
    %cst_22 = arith.constant 2.000000e-05 : f32
    %54 = vector.broadcast %cst_22 : f32 to vector<7x7x128xf32>
    %55 = arith.mulf %54, %53 : vector<7x7x128xf32>
    %cst_23 = arith.constant 1.000000e+00 : f32
    %56 = vector.broadcast %cst_23 : f32 to vector<7x7x128xf32>
    %57 = arith.addf %56, %55 : vector<7x7x128xf32>
    %58 = arith.mulf %57, %57 : vector<7x7x128xf32>
    %59 = arith.mulf %58, %57 : vector<7x7x128xf32>
    %60 = math.sqrt %59 : vector<7x7x128xf32>
    %61 = math.sqrt %60 : vector<7x7x128xf32>
    %62 = tpu.reciprocal %61 {approx = true} : vector<7x7x128xf32> -> vector<7x7x128xf32>
    %63 = arith.mulf %27, %62 : vector<7x7x128xf32>
    %64 = arith.truncf %63 : vector<7x7x128xf32> to vector<7x7x128xbf16>
    %c0_24 = arith.constant 0 : index
    %c0_25 = arith.constant 0 : index
    %c0_26 = arith.constant 0 : index
    %c0_27 = arith.constant 0 : index
    %65 = vector.load %arg5[%c0_24, %c0_25, %c0_26, %c0_27] : memref<1x7x7x128xbf16, #tpu.memory_space<vmem>>, vector<1x7x7x128xbf16>
    %66 = vector.shape_cast %65 : vector<1x7x7x128xbf16> to vector<7x7x128xbf16>
    %67 = vector.shape_cast %64 : vector<7x7x128xbf16> to vector<1x7x7x128xbf16>
    tpu.vector_store %arg5[%c0_24, %c0_25, %c0_26, %c0_27], %67 {strides = array<i32>} : memref<1x7x7x128xbf16, #tpu.memory_space<vmem>>, vector<1x7x7x128xbf16>,
    return
  }
  func.func @transform_0(%arg0: i32) -> (i32, i32, i32, i32) {
    %c0_i32 = arith.constant 0 : i32
    %c0_i32_0 = arith.constant 0 : i32
    %c0_i32_1 = arith.constant 0 : i32
    %c0_i32_2 = arith.constant 0 : i32
    return %arg0, %c0_i32, %c0_i32_0, %c0_i32_1 : i32, i32, i32, i32
  }
  func.func @transform_1(%arg0: i32) -> (i32, i32, i32, i32) {
    %c0_i32 = arith.constant 0 : i32
    %c0_i32_0 = arith.constant 0 : i32
    %c0_i32_1 = arith.constant 0 : i32
    %c0_i32_2 = arith.constant 0 : i32
    return %arg0, %c0_i32, %c0_i32_0, %c0_i32_1 : i32, i32, i32, i32
  }
  func.func @transform_2(%arg0: i32) -> (i32, i32, i32, i32) {
    %c0_i32 = arith.constant 0 : i32
    %c0_i32_0 = arith.constant 0 : i32
    %c0_i32_1 = arith.constant 0 : i32
    %c0_i32_2 = arith.constant 0 : i32
    return %arg0, %c0_i32, %c0_i32_0, %c0_i32_1 : i32, i32, i32, i32
  }
  func.func @transform_3(%arg0: i32) -> (i32, i32, i32, i32) {
    %c0_i32 = arith.constant 0 : i32
    %c0_i32_0 = arith.constant 0 : i32
    %c0_i32_1 = arith.constant 0 : i32
    %c0_i32_2 = arith.constant 0 : i32
    return %arg0, %c0_i32, %c0_i32_0, %c0_i32_1 : i32, i32, i32, i32
  }
  func.func @transform_4(%arg0: i32) -> (i32, i32, i32, i32) {
    %c0_i32 = arith.constant 0 : i32
    %c0_i32_0 = arith.constant 0 : i32
    %c0_i32_1 = arith.constant 0 : i32
    %c0_i32_2 = arith.constant 0 : i32
    return %arg0, %c0_i32, %c0_i32_0, %c0_i32_1 : i32, i32, i32, i32
  }
}

module attributes {stable_mosaic.version = 11 : i64} {
  func.func @_gmatmul_kernel(%arg0: i32, %arg1: i32, %arg2: i32, %arg3: memref<1x112x1280xbf16, #tpu.memory_space<vmem>>, %arg4: memref<1x1280x128xbf16, #tpu.memory_space<vmem>>, %arg5: memref<1x1x128xf32, #tpu.memory_space<vmem>>, %arg6: memref<112x128xbf16, #tpu.memory_space<vmem>>) attributes {dimension_semantics = [#tpu.dimension_semantics<parallel>, #tpu.dimension_semantics<parallel>, #tpu.dimension_semantics<parallel>], iteration_bounds = array<i64: 2, 1, 1>, scalar_prefetch = 0 : i64, scratch_operands = 0 : i64, tpu.core_type = #tpu.core_type<tc>, window_params = [{transform_indices = @transform_0, window_bounds = array<i64: 1, 112, 1280>}, {transform_indices = @transform_1, window_bounds = array<i64: 1, 1280, 128>}, {transform_indices = @transform_2, window_bounds = array<i64: 1, 1, 128>}, {transform_indices = @transform_3, window_bounds = array<i64: 112, 128>}]} {
    %c0 = arith.constant 0 : index
    %c0_0 = arith.constant 0 : index
    %c0_1 = arith.constant 0 : index
    %0 = vector.load %arg3[%c0, %c0_0, %c0_1] : memref<1x112x1280xbf16, #tpu.memory_space<vmem>>, vector<1x112x1280xbf16>
    %1 = vector.shape_cast %0 : vector<1x112x1280xbf16> to vector<112x1280xbf16>
    %c0_2 = arith.constant 0 : index
    %c0_3 = arith.constant 0 : index
    %c0_4 = arith.constant 0 : index
    %2 = vector.load %arg4[%c0_2, %c0_3, %c0_4] : memref<1x1280x128xbf16, #tpu.memory_space<vmem>>, vector<1x1280x128xbf16>
    %3 = vector.shape_cast %2 : vector<1x1280x128xbf16> to vector<1280x128xbf16>
    %cst = arith.constant dense<0.000000e+00> : vector<112x128xf32>
    %4 = tpu.matmul %1, %3, %cst {dimension_numbers = #tpu.dot_dimension_numbers<[1], [0], [0], [1], [0, 0, 1, 1], [], []>} : vector<112x1280xbf16>, vector<1280x128xbf16>, vector<112x128xf32> -> vector<112x128xf32>
    %c0_5 = arith.constant 0 : index
    %c0_6 = arith.constant 0 : index
    %c0_7 = arith.constant 0 : index
    %5 = vector.load %arg5[%c0_5, %c0_6, %c0_7] : memref<1x1x128xf32, #tpu.memory_space<vmem>>, vector<1x1x128xf32>
    %6 = vector.shape_cast %5 : vector<1x1x128xf32> to vector<1x128xf32>
    %7 = vector.broadcast %6 : vector<1x128xf32> to vector<112x128xf32>
    %8 = arith.addf %4, %7 : vector<112x128xf32>
    %cst_8 = arith.constant 0.000000e+00 : f32
    %9 = vector.broadcast %cst_8 : f32 to vector<112x128xf32>
    %10 = arith.maximumf %8, %9 : vector<112x128xf32>
    %11 = arith.truncf %10 : vector<112x128xf32> to vector<112x128xbf16>
    %c0_9 = arith.constant 0 : index
    %c0_10 = arith.constant 0 : index
    %12 = vector.load %arg6[%c0_9, %c0_10] : memref<112x128xbf16, #tpu.memory_space<vmem>>, vector<112x128xbf16>
    tpu.vector_store %arg6[%c0_9, %c0_10], %11 {strides = array<i32>} : memref<112x128xbf16, #tpu.memory_space<vmem>>, vector<112x128xbf16>,
    return
  }
  func.func @transform_0(%arg0: i32, %arg1: i32, %arg2: i32) -> (i32, i32, i32) {
    %c0_i32 = arith.constant 0 : i32
    %c0_i32_0 = arith.constant 0 : i32
    return %arg0, %arg1, %c0_i32 : i32, i32, i32
  }
  func.func @transform_1(%arg0: i32, %arg1: i32, %arg2: i32) -> (i32, i32, i32) {
    %c0_i32 = arith.constant 0 : i32
    %c0_i32_0 = arith.constant 0 : i32
    return %arg0, %c0_i32, %arg2 : i32, i32, i32
  }
  func.func @transform_2(%arg0: i32, %arg1: i32, %arg2: i32) -> (i32, i32, i32) {
    %c0_i32 = arith.constant 0 : i32
    %c0_i32_0 = arith.constant 0 : i32
    return %arg0, %c0_i32, %arg2 : i32, i32, i32
  }
  func.func @transform_3(%arg0: i32, %arg1: i32, %arg2: i32) -> (i32, i32) {
    %c1_i32 = arith.constant 1 : i32
    %0 = arith.muli %arg0, %c1_i32 : i32
    %1 = arith.addi %0, %arg2 : i32
    %c0_i32 = arith.constant 0 : i32
    return %arg1, %1 : i32, i32
  }
}

module attributes {stable_mosaic.version = 11 : i64} {
  func.func @_pool_lrn_kernel(%arg0: i32, %arg1: memref<1x4x4x256xbf16, #tpu.memory_space<vmem>>, %arg2: memref<1x4x3x256xbf16, #tpu.memory_space<vmem>>, %arg3: memref<1x3x4x256xbf16, #tpu.memory_space<vmem>>, %arg4: memref<1x3x3x256xbf16, #tpu.memory_space<vmem>>, %arg5: memref<1x3x3x256xbf16, #tpu.memory_space<vmem>>) attributes {dimension_semantics = [#tpu.dimension_semantics<parallel>], iteration_bounds = array<i64: 2>, scalar_prefetch = 0 : i64, scratch_operands = 0 : i64, tpu.core_type = #tpu.core_type<tc>, window_params = [{transform_indices = @transform_0, window_bounds = array<i64: 1, 4, 4, 256>}, {transform_indices = @transform_1, window_bounds = array<i64: 1, 4, 3, 256>}, {transform_indices = @transform_2, window_bounds = array<i64: 1, 3, 4, 256>}, {transform_indices = @transform_3, window_bounds = array<i64: 1, 3, 3, 256>}, {transform_indices = @transform_4, window_bounds = array<i64: 1, 3, 3, 256>}]} {
    %c0 = arith.constant 0 : index
    %c0_0 = arith.constant 0 : index
    %c0_1 = arith.constant 0 : index
    %c0_2 = arith.constant 0 : index
    %0 = vector.load %arg1[%c0, %c0_0, %c0_1, %c0_2] : memref<1x4x4x256xbf16, #tpu.memory_space<vmem>>, vector<1x4x4x256xbf16>
    %1 = vector.shape_cast %0 : vector<1x4x4x256xbf16> to vector<4x4x256xbf16>
    %2 = arith.extf %1 : vector<4x4x256xbf16> to vector<4x4x256xf32>
    %c0_3 = arith.constant 0 : index
    %c0_4 = arith.constant 0 : index
    %c0_5 = arith.constant 0 : index
    %c0_6 = arith.constant 0 : index
    %3 = vector.load %arg2[%c0_3, %c0_4, %c0_5, %c0_6] : memref<1x4x3x256xbf16, #tpu.memory_space<vmem>>, vector<1x4x3x256xbf16>
    %4 = vector.shape_cast %3 : vector<1x4x3x256xbf16> to vector<4x3x256xbf16>
    %5 = arith.extf %4 : vector<4x3x256xbf16> to vector<4x3x256xf32>
    %c0_7 = arith.constant 0 : index
    %c0_8 = arith.constant 0 : index
    %c0_9 = arith.constant 0 : index
    %c0_10 = arith.constant 0 : index
    %6 = vector.load %arg3[%c0_7, %c0_8, %c0_9, %c0_10] : memref<1x3x4x256xbf16, #tpu.memory_space<vmem>>, vector<1x3x4x256xbf16>
    %7 = vector.shape_cast %6 : vector<1x3x4x256xbf16> to vector<3x4x256xbf16>
    %8 = arith.extf %7 : vector<3x4x256xbf16> to vector<3x4x256xf32>
    %c0_11 = arith.constant 0 : index
    %c0_12 = arith.constant 0 : index
    %c0_13 = arith.constant 0 : index
    %c0_14 = arith.constant 0 : index
    %9 = vector.load %arg4[%c0_11, %c0_12, %c0_13, %c0_14] : memref<1x3x3x256xbf16, #tpu.memory_space<vmem>>, vector<1x3x3x256xbf16>
    %10 = vector.shape_cast %9 : vector<1x3x3x256xbf16> to vector<3x3x256xbf16>
    %11 = arith.extf %10 : vector<3x3x256xbf16> to vector<3x3x256xf32>
    %12 = vector.extract_strided_slice %5 {offsets = [0, 0, 0], sizes = [3, 3, 256], strides = [1, 1, 1]} : vector<4x3x256xf32> to vector<3x3x256xf32>
    %13 = arith.maximumf %11, %12 : vector<3x3x256xf32>
    %14 = vector.extract_strided_slice %5 {offsets = [1, 0, 0], sizes = [3, 3, 256], strides = [1, 1, 1]} : vector<4x3x256xf32> to vector<3x3x256xf32>
    %15 = arith.maximumf %13, %14 : vector<3x3x256xf32>
    %16 = vector.extract_strided_slice %8 {offsets = [0, 0, 0], sizes = [3, 3, 256], strides = [1, 1, 1]} : vector<3x4x256xf32> to vector<3x3x256xf32>
    %17 = arith.maximumf %15, %16 : vector<3x3x256xf32>
    %18 = vector.extract_strided_slice %8 {offsets = [0, 1, 0], sizes = [3, 3, 256], strides = [1, 1, 1]} : vector<3x4x256xf32> to vector<3x3x256xf32>
    %19 = arith.maximumf %17, %18 : vector<3x3x256xf32>
    %20 = vector.extract_strided_slice %2 {offsets = [0, 0, 0], sizes = [3, 3, 256], strides = [1, 1, 1]} : vector<4x4x256xf32> to vector<3x3x256xf32>
    %21 = arith.maximumf %19, %20 : vector<3x3x256xf32>
    %22 = vector.extract_strided_slice %2 {offsets = [0, 1, 0], sizes = [3, 3, 256], strides = [1, 1, 1]} : vector<4x4x256xf32> to vector<3x3x256xf32>
    %23 = arith.maximumf %21, %22 : vector<3x3x256xf32>
    %24 = vector.extract_strided_slice %2 {offsets = [1, 0, 0], sizes = [3, 3, 256], strides = [1, 1, 1]} : vector<4x4x256xf32> to vector<3x3x256xf32>
    %25 = arith.maximumf %23, %24 : vector<3x3x256xf32>
    %26 = vector.extract_strided_slice %2 {offsets = [1, 1, 0], sizes = [3, 3, 256], strides = [1, 1, 1]} : vector<4x4x256xf32> to vector<3x3x256xf32>
    %27 = arith.maximumf %25, %26 : vector<3x3x256xf32>
    %28 = arith.mulf %27, %27 : vector<3x3x256xf32>
    %29 = tpu.iota {dimensions = array<i32: 2>} : vector<3x3x256xi32>
    %c255_i32 = arith.constant 255 : i32
    %30 = tpu.dynamic_rotate %28 by %c255_i32 dim 2 : vector<3x3x256xf32>, i32 -> vector<3x3x256xf32>
    %c255_i32_15 = arith.constant 255 : i32
    %31 = vector.broadcast %c255_i32_15 : i32 to vector<3x3x256xi32>
    %32 = arith.cmpi slt, %29, %31 : vector<3x3x256xi32>
    %cst = arith.constant 0.000000e+00 : f32
    %33 = vector.broadcast %cst : f32 to vector<3x3x256xf32>
    %34 = arith.select %32, %30, %33 : vector<3x3x256xi1>, vector<3x3x256xf32>
    %35 = arith.addf %28, %34 : vector<3x3x256xf32>
    %c1_i32 = arith.constant 1 : i32
    %36 = tpu.dynamic_rotate %28 by %c1_i32 dim 2 : vector<3x3x256xf32>, i32 -> vector<3x3x256xf32>
    %c1_i32_16 = arith.constant 1 : i32
    %37 = vector.broadcast %c1_i32_16 : i32 to vector<3x3x256xi32>
    %38 = arith.cmpi sge, %29, %37 : vector<3x3x256xi32>
    %cst_17 = arith.constant 0.000000e+00 : f32
    %39 = vector.broadcast %cst_17 : f32 to vector<3x3x256xf32>
    %40 = arith.select %38, %36, %39 : vector<3x3x256xi1>, vector<3x3x256xf32>
    %41 = arith.addf %35, %40 : vector<3x3x256xf32>
    %c254_i32 = arith.constant 254 : i32
    %42 = tpu.dynamic_rotate %28 by %c254_i32 dim 2 : vector<3x3x256xf32>, i32 -> vector<3x3x256xf32>
    %c254_i32_18 = arith.constant 254 : i32
    %43 = vector.broadcast %c254_i32_18 : i32 to vector<3x3x256xi32>
    %44 = arith.cmpi slt, %29, %43 : vector<3x3x256xi32>
    %cst_19 = arith.constant 0.000000e+00 : f32
    %45 = vector.broadcast %cst_19 : f32 to vector<3x3x256xf32>
    %46 = arith.select %44, %42, %45 : vector<3x3x256xi1>, vector<3x3x256xf32>
    %47 = arith.addf %41, %46 : vector<3x3x256xf32>
    %c2_i32 = arith.constant 2 : i32
    %48 = tpu.dynamic_rotate %28 by %c2_i32 dim 2 : vector<3x3x256xf32>, i32 -> vector<3x3x256xf32>
    %c2_i32_20 = arith.constant 2 : i32
    %49 = vector.broadcast %c2_i32_20 : i32 to vector<3x3x256xi32>
    %50 = arith.cmpi sge, %29, %49 : vector<3x3x256xi32>
    %cst_21 = arith.constant 0.000000e+00 : f32
    %51 = vector.broadcast %cst_21 : f32 to vector<3x3x256xf32>
    %52 = arith.select %50, %48, %51 : vector<3x3x256xi1>, vector<3x3x256xf32>
    %53 = arith.addf %47, %52 : vector<3x3x256xf32>
    %cst_22 = arith.constant 2.000000e-05 : f32
    %54 = vector.broadcast %cst_22 : f32 to vector<3x3x256xf32>
    %55 = arith.mulf %54, %53 : vector<3x3x256xf32>
    %cst_23 = arith.constant 1.000000e+00 : f32
    %56 = vector.broadcast %cst_23 : f32 to vector<3x3x256xf32>
    %57 = arith.addf %56, %55 : vector<3x3x256xf32>
    %58 = arith.mulf %57, %57 : vector<3x3x256xf32>
    %59 = arith.mulf %58, %57 : vector<3x3x256xf32>
    %60 = math.sqrt %59 : vector<3x3x256xf32>
    %61 = math.sqrt %60 : vector<3x3x256xf32>
    %62 = tpu.reciprocal %61 {approx = true} : vector<3x3x256xf32> -> vector<3x3x256xf32>
    %63 = arith.mulf %27, %62 : vector<3x3x256xf32>
    %64 = arith.truncf %63 : vector<3x3x256xf32> to vector<3x3x256xbf16>
    %c0_24 = arith.constant 0 : index
    %c0_25 = arith.constant 0 : index
    %c0_26 = arith.constant 0 : index
    %c0_27 = arith.constant 0 : index
    %65 = vector.load %arg5[%c0_24, %c0_25, %c0_26, %c0_27] : memref<1x3x3x256xbf16, #tpu.memory_space<vmem>>, vector<1x3x3x256xbf16>
    %66 = vector.shape_cast %65 : vector<1x3x3x256xbf16> to vector<3x3x256xbf16>
    %67 = vector.shape_cast %64 : vector<3x3x256xbf16> to vector<1x3x3x256xbf16>
    tpu.vector_store %arg5[%c0_24, %c0_25, %c0_26, %c0_27], %67 {strides = array<i32>} : memref<1x3x3x256xbf16, #tpu.memory_space<vmem>>, vector<1x3x3x256xbf16>,
    return
  }
  func.func @transform_0(%arg0: i32) -> (i32, i32, i32, i32) {
    %c0_i32 = arith.constant 0 : i32
    %c0_i32_0 = arith.constant 0 : i32
    %c0_i32_1 = arith.constant 0 : i32
    %c0_i32_2 = arith.constant 0 : i32
    return %arg0, %c0_i32, %c0_i32_0, %c0_i32_1 : i32, i32, i32, i32
  }
  func.func @transform_1(%arg0: i32) -> (i32, i32, i32, i32) {
    %c0_i32 = arith.constant 0 : i32
    %c0_i32_0 = arith.constant 0 : i32
    %c0_i32_1 = arith.constant 0 : i32
    %c0_i32_2 = arith.constant 0 : i32
    return %arg0, %c0_i32, %c0_i32_0, %c0_i32_1 : i32, i32, i32, i32
  }
  func.func @transform_2(%arg0: i32) -> (i32, i32, i32, i32) {
    %c0_i32 = arith.constant 0 : i32
    %c0_i32_0 = arith.constant 0 : i32
    %c0_i32_1 = arith.constant 0 : i32
    %c0_i32_2 = arith.constant 0 : i32
    return %arg0, %c0_i32, %c0_i32_0, %c0_i32_1 : i32, i32, i32, i32
  }
  func.func @transform_3(%arg0: i32) -> (i32, i32, i32, i32) {
    %c0_i32 = arith.constant 0 : i32
    %c0_i32_0 = arith.constant 0 : i32
    %c0_i32_1 = arith.constant 0 : i32
    %c0_i32_2 = arith.constant 0 : i32
    return %arg0, %c0_i32, %c0_i32_0, %c0_i32_1 : i32, i32, i32, i32
  }
  func.func @transform_4(%arg0: i32) -> (i32, i32, i32, i32) {
    %c0_i32 = arith.constant 0 : i32
    %c0_i32_0 = arith.constant 0 : i32
    %c0_i32_1 = arith.constant 0 : i32
    %c0_i32_2 = arith.constant 0 : i32
    return %arg0, %c0_i32, %c0_i32_0, %c0_i32_1 : i32, i32, i32, i32
  }
}

module attributes {stable_mosaic.version = 11 : i64} {
  func.func @_gmatmul_kernel(%arg0: i32, %arg1: i32, %arg2: i32, %arg3: memref<1x32x2304xbf16, #tpu.memory_space<vmem>>, %arg4: memref<1x2304x384xbf16, #tpu.memory_space<vmem>>, %arg5: memref<1x1x384xf32, #tpu.memory_space<vmem>>, %arg6: memref<32x384xbf16, #tpu.memory_space<vmem>>) attributes {dimension_semantics = [#tpu.dimension_semantics<parallel>, #tpu.dimension_semantics<parallel>, #tpu.dimension_semantics<parallel>], iteration_bounds = array<i64: 1, 1, 1>, scalar_prefetch = 0 : i64, scratch_operands = 0 : i64, tpu.core_type = #tpu.core_type<tc>, window_params = [{transform_indices = @transform_0, window_bounds = array<i64: 1, 32, 2304>}, {transform_indices = @transform_1, window_bounds = array<i64: 1, 2304, 384>}, {transform_indices = @transform_2, window_bounds = array<i64: 1, 1, 384>}, {transform_indices = @transform_3, window_bounds = array<i64: 32, 384>}]} {
    %c0 = arith.constant 0 : index
    %c0_0 = arith.constant 0 : index
    %c0_1 = arith.constant 0 : index
    %0 = vector.load %arg3[%c0, %c0_0, %c0_1] : memref<1x32x2304xbf16, #tpu.memory_space<vmem>>, vector<1x32x2304xbf16>
    %1 = vector.shape_cast %0 : vector<1x32x2304xbf16> to vector<32x2304xbf16>
    %c0_2 = arith.constant 0 : index
    %c0_3 = arith.constant 0 : index
    %c0_4 = arith.constant 0 : index
    %2 = vector.load %arg4[%c0_2, %c0_3, %c0_4] : memref<1x2304x384xbf16, #tpu.memory_space<vmem>>, vector<1x2304x384xbf16>
    %3 = vector.shape_cast %2 : vector<1x2304x384xbf16> to vector<2304x384xbf16>
    %cst = arith.constant dense<0.000000e+00> : vector<32x384xf32>
    %4 = tpu.matmul %1, %3, %cst {dimension_numbers = #tpu.dot_dimension_numbers<[1], [0], [0], [1], [0, 0, 1, 1], [], []>} : vector<32x2304xbf16>, vector<2304x384xbf16>, vector<32x384xf32> -> vector<32x384xf32>
    %c0_5 = arith.constant 0 : index
    %c0_6 = arith.constant 0 : index
    %c0_7 = arith.constant 0 : index
    %5 = vector.load %arg5[%c0_5, %c0_6, %c0_7] : memref<1x1x384xf32, #tpu.memory_space<vmem>>, vector<1x1x384xf32>
    %6 = vector.shape_cast %5 : vector<1x1x384xf32> to vector<1x384xf32>
    %7 = vector.broadcast %6 : vector<1x384xf32> to vector<32x384xf32>
    %8 = arith.addf %4, %7 : vector<32x384xf32>
    %cst_8 = arith.constant 0.000000e+00 : f32
    %9 = vector.broadcast %cst_8 : f32 to vector<32x384xf32>
    %10 = arith.maximumf %8, %9 : vector<32x384xf32>
    %11 = arith.truncf %10 : vector<32x384xf32> to vector<32x384xbf16>
    %c0_9 = arith.constant 0 : index
    %c0_10 = arith.constant 0 : index
    %12 = vector.load %arg6[%c0_9, %c0_10] : memref<32x384xbf16, #tpu.memory_space<vmem>>, vector<32x384xbf16>
    tpu.vector_store %arg6[%c0_9, %c0_10], %11 {strides = array<i32>} : memref<32x384xbf16, #tpu.memory_space<vmem>>, vector<32x384xbf16>,
    return
  }
  func.func @transform_0(%arg0: i32, %arg1: i32, %arg2: i32) -> (i32, i32, i32) {
    %c0_i32 = arith.constant 0 : i32
    %c0_i32_0 = arith.constant 0 : i32
    return %arg0, %arg1, %c0_i32 : i32, i32, i32
  }
  func.func @transform_1(%arg0: i32, %arg1: i32, %arg2: i32) -> (i32, i32, i32) {
    %c0_i32 = arith.constant 0 : i32
    %c0_i32_0 = arith.constant 0 : i32
    return %arg0, %c0_i32, %arg2 : i32, i32, i32
  }
  func.func @transform_2(%arg0: i32, %arg1: i32, %arg2: i32) -> (i32, i32, i32) {
    %c0_i32 = arith.constant 0 : i32
    %c0_i32_0 = arith.constant 0 : i32
    return %arg0, %c0_i32, %arg2 : i32, i32, i32
  }
  func.func @transform_3(%arg0: i32, %arg1: i32, %arg2: i32) -> (i32, i32) {
    %c1_i32 = arith.constant 1 : i32
    %0 = arith.muli %arg0, %c1_i32 : i32
    %1 = arith.addi %0, %arg2 : i32
    %c0_i32 = arith.constant 0 : i32
    return %arg1, %1 : i32, i32
  }
}

module attributes {stable_mosaic.version = 11 : i64} {
  func.func @_gmatmul_kernel(%arg0: i32, %arg1: i32, %arg2: i32, %arg3: memref<1x32x1792xbf16, #tpu.memory_space<vmem>>, %arg4: memref<1x1792x256xbf16, #tpu.memory_space<vmem>>, %arg5: memref<1x1x256xf32, #tpu.memory_space<vmem>>, %arg6: memref<32x256xbf16, #tpu.memory_space<vmem>>) attributes {dimension_semantics = [#tpu.dimension_semantics<parallel>, #tpu.dimension_semantics<parallel>, #tpu.dimension_semantics<parallel>], iteration_bounds = array<i64: 2, 1, 1>, scalar_prefetch = 0 : i64, scratch_operands = 0 : i64, tpu.core_type = #tpu.core_type<tc>, window_params = [{transform_indices = @transform_0, window_bounds = array<i64: 1, 32, 1792>}, {transform_indices = @transform_1, window_bounds = array<i64: 1, 1792, 256>}, {transform_indices = @transform_2, window_bounds = array<i64: 1, 1, 256>}, {transform_indices = @transform_3, window_bounds = array<i64: 32, 256>}]} {
    %c0 = arith.constant 0 : index
    %c0_0 = arith.constant 0 : index
    %c0_1 = arith.constant 0 : index
    %0 = vector.load %arg3[%c0, %c0_0, %c0_1] : memref<1x32x1792xbf16, #tpu.memory_space<vmem>>, vector<1x32x1792xbf16>
    %1 = vector.shape_cast %0 : vector<1x32x1792xbf16> to vector<32x1792xbf16>
    %c0_2 = arith.constant 0 : index
    %c0_3 = arith.constant 0 : index
    %c0_4 = arith.constant 0 : index
    %2 = vector.load %arg4[%c0_2, %c0_3, %c0_4] : memref<1x1792x256xbf16, #tpu.memory_space<vmem>>, vector<1x1792x256xbf16>
    %3 = vector.shape_cast %2 : vector<1x1792x256xbf16> to vector<1792x256xbf16>
    %cst = arith.constant dense<0.000000e+00> : vector<32x256xf32>
    %4 = tpu.matmul %1, %3, %cst {dimension_numbers = #tpu.dot_dimension_numbers<[1], [0], [0], [1], [0, 0, 1, 1], [], []>} : vector<32x1792xbf16>, vector<1792x256xbf16>, vector<32x256xf32> -> vector<32x256xf32>
    %c0_5 = arith.constant 0 : index
    %c0_6 = arith.constant 0 : index
    %c0_7 = arith.constant 0 : index
    %5 = vector.load %arg5[%c0_5, %c0_6, %c0_7] : memref<1x1x256xf32, #tpu.memory_space<vmem>>, vector<1x1x256xf32>
    %6 = vector.shape_cast %5 : vector<1x1x256xf32> to vector<1x256xf32>
    %7 = vector.broadcast %6 : vector<1x256xf32> to vector<32x256xf32>
    %8 = arith.addf %4, %7 : vector<32x256xf32>
    %cst_8 = arith.constant 0.000000e+00 : f32
    %9 = vector.broadcast %cst_8 : f32 to vector<32x256xf32>
    %10 = arith.maximumf %8, %9 : vector<32x256xf32>
    %11 = arith.truncf %10 : vector<32x256xf32> to vector<32x256xbf16>
    %c0_9 = arith.constant 0 : index
    %c0_10 = arith.constant 0 : index
    %12 = vector.load %arg6[%c0_9, %c0_10] : memref<32x256xbf16, #tpu.memory_space<vmem>>, vector<32x256xbf16>
    tpu.vector_store %arg6[%c0_9, %c0_10], %11 {strides = array<i32>} : memref<32x256xbf16, #tpu.memory_space<vmem>>, vector<32x256xbf16>,
    return
  }
  func.func @transform_0(%arg0: i32, %arg1: i32, %arg2: i32) -> (i32, i32, i32) {
    %c0_i32 = arith.constant 0 : i32
    %c0_i32_0 = arith.constant 0 : i32
    return %arg0, %arg1, %c0_i32 : i32, i32, i32
  }
  func.func @transform_1(%arg0: i32, %arg1: i32, %arg2: i32) -> (i32, i32, i32) {
    %c0_i32 = arith.constant 0 : i32
    %c0_i32_0 = arith.constant 0 : i32
    return %arg0, %c0_i32, %arg2 : i32, i32, i32
  }
  func.func @transform_2(%arg0: i32, %arg1: i32, %arg2: i32) -> (i32, i32, i32) {
    %c0_i32 = arith.constant 0 : i32
    %c0_i32_0 = arith.constant 0 : i32
    return %arg0, %c0_i32, %arg2 : i32, i32, i32
  }
  func.func @transform_3(%arg0: i32, %arg1: i32, %arg2: i32) -> (i32, i32) {
    %c1_i32 = arith.constant 1 : i32
    %0 = arith.muli %arg0, %c1_i32 : i32
    %1 = arith.addi %0, %arg2 : i32
    %c0_i32 = arith.constant 0 : i32
    return %arg1, %1 : i32, i32
  }
}

module attributes {stable_mosaic.version = 11 : i64} {
  func.func @_gmatmul_kernel(%arg0: i32, %arg1: i32, %arg2: i32, %arg3: memref<1x32x1792xbf16, #tpu.memory_space<vmem>>, %arg4: memref<1x1792x128xbf16, #tpu.memory_space<vmem>>, %arg5: memref<1x1x128xf32, #tpu.memory_space<vmem>>, %arg6: memref<32x128xf32, #tpu.memory_space<vmem>>) attributes {dimension_semantics = [#tpu.dimension_semantics<parallel>, #tpu.dimension_semantics<parallel>, #tpu.dimension_semantics<parallel>], iteration_bounds = array<i64: 2, 1, 1>, scalar_prefetch = 0 : i64, scratch_operands = 0 : i64, tpu.core_type = #tpu.core_type<tc>, window_params = [{transform_indices = @transform_0, window_bounds = array<i64: 1, 32, 1792>}, {transform_indices = @transform_1, window_bounds = array<i64: 1, 1792, 128>}, {transform_indices = @transform_2, window_bounds = array<i64: 1, 1, 128>}, {transform_indices = @transform_3, window_bounds = array<i64: 32, 128>}]} {
    %c0 = arith.constant 0 : index
    %c0_0 = arith.constant 0 : index
    %c0_1 = arith.constant 0 : index
    %0 = vector.load %arg3[%c0, %c0_0, %c0_1] : memref<1x32x1792xbf16, #tpu.memory_space<vmem>>, vector<1x32x1792xbf16>
    %1 = vector.shape_cast %0 : vector<1x32x1792xbf16> to vector<32x1792xbf16>
    %c0_2 = arith.constant 0 : index
    %c0_3 = arith.constant 0 : index
    %c0_4 = arith.constant 0 : index
    %2 = vector.load %arg4[%c0_2, %c0_3, %c0_4] : memref<1x1792x128xbf16, #tpu.memory_space<vmem>>, vector<1x1792x128xbf16>
    %3 = vector.shape_cast %2 : vector<1x1792x128xbf16> to vector<1792x128xbf16>
    %cst = arith.constant dense<0.000000e+00> : vector<32x128xf32>
    %4 = tpu.matmul %1, %3, %cst {dimension_numbers = #tpu.dot_dimension_numbers<[1], [0], [0], [1], [0, 0, 1, 1], [], []>} : vector<32x1792xbf16>, vector<1792x128xbf16>, vector<32x128xf32> -> vector<32x128xf32>
    %c0_5 = arith.constant 0 : index
    %c0_6 = arith.constant 0 : index
    %c0_7 = arith.constant 0 : index
    %5 = vector.load %arg5[%c0_5, %c0_6, %c0_7] : memref<1x1x128xf32, #tpu.memory_space<vmem>>, vector<1x1x128xf32>
    %6 = vector.shape_cast %5 : vector<1x1x128xf32> to vector<1x128xf32>
    %7 = vector.broadcast %6 : vector<1x128xf32> to vector<32x128xf32>
    %8 = arith.addf %4, %7 : vector<32x128xf32>
    %cst_8 = arith.constant 0.000000e+00 : f32
    %9 = vector.broadcast %cst_8 : f32 to vector<32x128xf32>
    %10 = arith.maximumf %8, %9 : vector<32x128xf32>
    %c0_9 = arith.constant 0 : index
    %c0_10 = arith.constant 0 : index
    %11 = vector.load %arg6[%c0_9, %c0_10] : memref<32x128xf32, #tpu.memory_space<vmem>>, vector<32x128xf32>
    tpu.vector_store %arg6[%c0_9, %c0_10], %10 {strides = array<i32>} : memref<32x128xf32, #tpu.memory_space<vmem>>, vector<32x128xf32>,
    return
  }
  func.func @transform_0(%arg0: i32, %arg1: i32, %arg2: i32) -> (i32, i32, i32) {
    %c0_i32 = arith.constant 0 : i32
    %c0_i32_0 = arith.constant 0 : i32
    return %arg0, %arg1, %c0_i32 : i32, i32, i32
  }
  func.func @transform_1(%arg0: i32, %arg1: i32, %arg2: i32) -> (i32, i32, i32) {
    %c0_i32 = arith.constant 0 : i32
    %c0_i32_0 = arith.constant 0 : i32
    return %arg0, %c0_i32, %arg2 : i32, i32, i32
  }
  func.func @transform_2(%arg0: i32, %arg1: i32, %arg2: i32) -> (i32, i32, i32) {
    %c0_i32 = arith.constant 0 : i32
    %c0_i32_0 = arith.constant 0 : i32
    return %arg0, %c0_i32, %arg2 : i32, i32, i32
  }
  func.func @transform_3(%arg0: i32, %arg1: i32, %arg2: i32) -> (i32, i32) {
    %c1_i32 = arith.constant 1 : i32
    %0 = arith.muli %arg0, %c1_i32 : i32
    %1 = arith.addi %0, %arg2 : i32
    %c0_i32 = arith.constant 0 : i32
    return %arg1, %1 : i32, i32
  }
}

module attributes {stable_mosaic.version = 11 : i64} {
  func.func @_pool_lrn_kernel(%arg0: i32, %arg1: memref<1x2x2x256xf32, #tpu.memory_space<vmem>>, %arg2: memref<1x2x1x256xf32, #tpu.memory_space<vmem>>, %arg3: memref<1x1x2x256xf32, #tpu.memory_space<vmem>>, %arg4: memref<1x1x1x256xf32, #tpu.memory_space<vmem>>, %arg5: memref<1x1x1x256xf32, #tpu.memory_space<vmem>>) attributes {dimension_semantics = [#tpu.dimension_semantics<parallel>], iteration_bounds = array<i64: 2>, scalar_prefetch = 0 : i64, scratch_operands = 0 : i64, tpu.core_type = #tpu.core_type<tc>, window_params = [{transform_indices = @transform_0, window_bounds = array<i64: 1, 2, 2, 256>}, {transform_indices = @transform_1, window_bounds = array<i64: 1, 2, 1, 256>}, {transform_indices = @transform_2, window_bounds = array<i64: 1, 1, 2, 256>}, {transform_indices = @transform_3, window_bounds = array<i64: 1, 1, 1, 256>}, {transform_indices = @transform_4, window_bounds = array<i64: 1, 1, 1, 256>}]} {
    %c0 = arith.constant 0 : index
    %c0_0 = arith.constant 0 : index
    %c0_1 = arith.constant 0 : index
    %c0_2 = arith.constant 0 : index
    %0 = vector.load %arg1[%c0, %c0_0, %c0_1, %c0_2] : memref<1x2x2x256xf32, #tpu.memory_space<vmem>>, vector<1x2x2x256xf32>
    %1 = vector.shape_cast %0 : vector<1x2x2x256xf32> to vector<2x2x256xf32>
    %c0_3 = arith.constant 0 : index
    %c0_4 = arith.constant 0 : index
    %c0_5 = arith.constant 0 : index
    %c0_6 = arith.constant 0 : index
    %2 = vector.load %arg2[%c0_3, %c0_4, %c0_5, %c0_6] : memref<1x2x1x256xf32, #tpu.memory_space<vmem>>, vector<1x2x1x256xf32>
    %3 = vector.shape_cast %2 : vector<1x2x1x256xf32> to vector<2x1x256xf32>
    %c0_7 = arith.constant 0 : index
    %c0_8 = arith.constant 0 : index
    %c0_9 = arith.constant 0 : index
    %c0_10 = arith.constant 0 : index
    %4 = vector.load %arg3[%c0_7, %c0_8, %c0_9, %c0_10] : memref<1x1x2x256xf32, #tpu.memory_space<vmem>>, vector<1x1x2x256xf32>
    %5 = vector.shape_cast %4 : vector<1x1x2x256xf32> to vector<1x2x256xf32>
    %c0_11 = arith.constant 0 : index
    %c0_12 = arith.constant 0 : index
    %c0_13 = arith.constant 0 : index
    %c0_14 = arith.constant 0 : index
    %6 = vector.load %arg4[%c0_11, %c0_12, %c0_13, %c0_14] : memref<1x1x1x256xf32, #tpu.memory_space<vmem>>, vector<1x1x1x256xf32>
    %7 = vector.shape_cast %6 : vector<1x1x1x256xf32> to vector<1x1x256xf32>
    %8 = vector.extract_strided_slice %3 {offsets = [0, 0, 0], sizes = [1, 1, 256], strides = [1, 1, 1]} : vector<2x1x256xf32> to vector<1x1x256xf32>
    %9 = arith.maximumf %7, %8 : vector<1x1x256xf32>
    %10 = vector.extract_strided_slice %3 {offsets = [1, 0, 0], sizes = [1, 1, 256], strides = [1, 1, 1]} : vector<2x1x256xf32> to vector<1x1x256xf32>
    %11 = arith.maximumf %9, %10 : vector<1x1x256xf32>
    %12 = vector.extract_strided_slice %5 {offsets = [0, 0, 0], sizes = [1, 1, 256], strides = [1, 1, 1]} : vector<1x2x256xf32> to vector<1x1x256xf32>
    %13 = arith.maximumf %11, %12 : vector<1x1x256xf32>
    %14 = vector.extract_strided_slice %5 {offsets = [0, 1, 0], sizes = [1, 1, 256], strides = [1, 1, 1]} : vector<1x2x256xf32> to vector<1x1x256xf32>
    %15 = arith.maximumf %13, %14 : vector<1x1x256xf32>
    %16 = vector.extract_strided_slice %1 {offsets = [0, 0, 0], sizes = [1, 1, 256], strides = [1, 1, 1]} : vector<2x2x256xf32> to vector<1x1x256xf32>
    %17 = arith.maximumf %15, %16 : vector<1x1x256xf32>
    %18 = vector.extract_strided_slice %1 {offsets = [0, 1, 0], sizes = [1, 1, 256], strides = [1, 1, 1]} : vector<2x2x256xf32> to vector<1x1x256xf32>
    %19 = arith.maximumf %17, %18 : vector<1x1x256xf32>
    %20 = vector.extract_strided_slice %1 {offsets = [1, 0, 0], sizes = [1, 1, 256], strides = [1, 1, 1]} : vector<2x2x256xf32> to vector<1x1x256xf32>
    %21 = arith.maximumf %19, %20 : vector<1x1x256xf32>
    %22 = vector.extract_strided_slice %1 {offsets = [1, 1, 0], sizes = [1, 1, 256], strides = [1, 1, 1]} : vector<2x2x256xf32> to vector<1x1x256xf32>
    %23 = arith.maximumf %21, %22 : vector<1x1x256xf32>
    %c0_15 = arith.constant 0 : index
    %c0_16 = arith.constant 0 : index
    %c0_17 = arith.constant 0 : index
    %c0_18 = arith.constant 0 : index
    %24 = vector.load %arg5[%c0_15, %c0_16, %c0_17, %c0_18] : memref<1x1x1x256xf32, #tpu.memory_space<vmem>>, vector<1x1x1x256xf32>
    %25 = vector.shape_cast %24 : vector<1x1x1x256xf32> to vector<1x1x256xf32>
    %26 = vector.shape_cast %23 : vector<1x1x256xf32> to vector<1x1x1x256xf32>
    tpu.vector_store %arg5[%c0_15, %c0_16, %c0_17, %c0_18], %26 {strides = array<i32>} : memref<1x1x1x256xf32, #tpu.memory_space<vmem>>, vector<1x1x1x256xf32>,
    return
  }
  func.func @transform_0(%arg0: i32) -> (i32, i32, i32, i32) {
    %c0_i32 = arith.constant 0 : i32
    %c0_i32_0 = arith.constant 0 : i32
    %c0_i32_1 = arith.constant 0 : i32
    %c0_i32_2 = arith.constant 0 : i32
    return %arg0, %c0_i32, %c0_i32_0, %c0_i32_1 : i32, i32, i32, i32
  }
  func.func @transform_1(%arg0: i32) -> (i32, i32, i32, i32) {
    %c0_i32 = arith.constant 0 : i32
    %c0_i32_0 = arith.constant 0 : i32
    %c0_i32_1 = arith.constant 0 : i32
    %c0_i32_2 = arith.constant 0 : i32
    return %arg0, %c0_i32, %c0_i32_0, %c0_i32_1 : i32, i32, i32, i32
  }
  func.func @transform_2(%arg0: i32) -> (i32, i32, i32, i32) {
    %c0_i32 = arith.constant 0 : i32
    %c0_i32_0 = arith.constant 0 : i32
    %c0_i32_1 = arith.constant 0 : i32
    %c0_i32_2 = arith.constant 0 : i32
    return %arg0, %c0_i32, %c0_i32_0, %c0_i32_1 : i32, i32, i32, i32
  }
  func.func @transform_3(%arg0: i32) -> (i32, i32, i32, i32) {
    %c0_i32 = arith.constant 0 : i32
    %c0_i32_0 = arith.constant 0 : i32
    %c0_i32_1 = arith.constant 0 : i32
    %c0_i32_2 = arith.constant 0 : i32
    return %arg0, %c0_i32, %c0_i32_0, %c0_i32_1 : i32, i32, i32, i32
  }
  func.func @transform_4(%arg0: i32) -> (i32, i32, i32, i32) {
    %c0_i32 = arith.constant 0 : i32
    %c0_i32_0 = arith.constant 0 : i32
    %c0_i32_1 = arith.constant 0 : i32
    %c0_i32_2 = arith.constant 0 : i32
    return %arg0, %c0_i32, %c0_i32_0, %c0_i32_1 : i32, i32, i32, i32
  }
}

</mosaic_0001>

<bundles_post_ra>
// kernel: features_forward.9
= control target key start
LH: loop header
LB: loop body
LE: loop exit
PB: predicated region body
PF: predicated region fallthrough
CT: control target
= control target key end

     0   :  { %s980_s15 = smov 0   ;;  %s1286_s0 = inlined_call_operand.vmem [shape: bf16[2,8,8,128], index: 0, kind: input, shape index: {}]   ;;  %s1287_s1 = inlined_call_operand.vmem [shape: bf16[2,8,7,128], index: 1, kind: input, shape index: {}]   ;;  %s1288_s2 = inlined_call_operand.vmem [shape: bf16[2,7,8,128], index: 2, kind: input, shape index: {}]   ;;  %s1289_s3 = inlined_call_operand.vmem [shape: bf16[2,7,7,128], index: 3, kind: input, shape index: {}]   ;;  %s1290_s4 = inlined_call_operand.vmem [shape: bf16[2,7,7,128], index: 4, kind: output, shape index: {}]  }
   0x1 LB: > { %s806_s16 = sadd.s32 4294967295, %s949_s15   ;;  %p810_p0 = scmp.ge.s32.totalorder %s949_s15, 1  ;;  %s949_s15 = sphi %s980_s15, %s14_s15  }
   0x2   : > { %p192_p1 = scmp.lt.s32.totalorder %s949_s15, 3 }
   0x4   : > { %p193_p2 = pnand %p810_p0, %p192_p1 }
   0x5   : > { %p233_p3 = scmp.lt.s32.totalorder (!%p193_p2), %s806_s16, 1  ;;  %s951_s5 = smov (!%p193_p2), 127  }
   0x6   : > { %196 = sbr.rel (%p193_p2) target bundleno = 273 (0x111), region = 36  ;;  %s952_s6 = smov (!%p193_p2), 1  }
   0x7   : > { %s953_s7 = smov (!%p193_p2), 126   ;;  %s954_s8 = smov (!%p193_p2), 2  }
   0xd   : > { %s1294_s16 = smov (!%p233_p3, %s806_s16), 1 }
   0xe   : > { %s820_s17 = sshll.u32 %s1294_s16, 5  ;;  %s988_s18 = smul.u32 28, %s1294_s16 }
   0xf   : > { %s993_s21 = scalar_lea.vmem %s1286_s0, %s820_s17  ;;  %s998_s24 = scalar_lea.vmem %s1287_s1, %s820_s17 }
  0x10   : > { %s1004_s27 = scalar_lea.vmem %s1288_s2, %s988_s18  ;;  %s1010_s30 = scalar_lea.vmem %s1289_s3, %s988_s18  ;;  %v878_v0 = vld [vmem:[%s993_s21 + $0x8] sm:$0xff]   ;;  %v1015_v2 = vld [vmem:[%s993_s21] sm:$0xff]   ;;  %v879_v16 = vld [vmem:[%s993_s21 + $0x10] sm:$0xff]  }
  0x11   : > { %v881_v1 = vld [vmem:[%s998_s24 + $0x8] sm:$0xff]   ;;  %v1017_v3 = vunpack.c.l.bf16 %v878_v0  ;;  %v1019_v4 = vunpack.c.h.bf16 %v878_v0  ;;  %v839_v9 = vld [vmem:[%s998_s24] sm:$0xff]   ;;  %v824_v12 = vunpack.c.l.bf16 %v1015_v2  ;;  %v1026_v13 = vunpack.c.h.bf16 %v1015_v2  ;;  %v1032_v22 = vld [vmem:[%s998_s24 + $0x10] sm:$0xff]   ;;  %s1241_s11 = scalar_lea.vmem %s1290_s4, %s988_s18 }
  0x12   : > { %v844_v5 = vunpack.c.l.bf16 %v881_v1  ;;  %v845_v6 = vunpack.c.h.bf16 %v881_v1  ;;  %v884_v7 = vld [vmem:[%s1004_s27 + $0x8] sm:$0xff]   ;;  %v855_v14 = vld [vmem:[%s1004_s27] sm:$0xff]   ;;  %v840_v17 = vunpack.c.l.bf16 %v839_v9  ;;  %v841_v19 = vunpack.c.h.bf16 %v839_v9  ;;  %v1041_v39 = vld [vmem:[%s998_s24 + $0x18] sm:$0xff]  }
  0x13   : > { %v886_v8 = vld [vmem:[%s1010_s30 + $0x8] sm:$0xff]   ;;  %v860_v10 = vunpack.c.l.bf16 %v884_v7  ;;  %v867_v15 = vld [vmem:[%s1010_s30] sm:$0xff]   ;;  %v856_v20 = vunpack.c.l.bf16 %v855_v14  ;;  %v383_v24 = vrot.slane %v1017_v3, 1  ;;  %v384_v25 = vrot.slane %v1019_v4, 1  ;;  %v885_v40 = vld [vmem:[%s1004_s27 + $0x10] sm:$0xff]  }
  0x14   : > { %v872_v11 = vunpack.c.l.bf16 %v886_v8  ;;  %v868_v21 = vunpack.c.l.bf16 %v867_v15  ;;  %v1036_v26 = vunpack.c.l.bf16 %v879_v16  ;;  %v381_v29 = vrot.slane %v824_v12, 1  ;;  %v887_v41 = vld [vmem:[%s1010_s30 + $0x10] sm:$0xff]   ;;  %v1050_v50 = vld [vmem:[%s993_s21 + $0x18] sm:$0xff]  }
  0x15   : > { %v348_v23 = vrot.slane %v860_v10, 1  ;;  %v382_v30 = vrot.slane %v1026_v13, 1  ;;  %v346_v31 = vrot.slane %v856_v20, 1  ;;  %v848_v32 = vunpack.c.l.bf16 %v1032_v22 }
  0x16   : > { %v320_v18 = vmax.f32 %v872_v11, %v844_v5  ;;  %v318_v28 = vmax.f32 %v868_v21, %v840_v17  ;;  %v861_v33 = vunpack.c.h.bf16 %v884_v7  ;;  %v873_v34 = vunpack.c.h.bf16 %v886_v8 }
  0x17   : > { %v857_v37 = vunpack.c.h.bf16 %v855_v14  ;;  %v869_v38 = vunpack.c.h.bf16 %v867_v15  ;;  %v1045_v42 = vunpack.c.h.bf16 %v879_v16  ;;  %v385_v44 = vrot.slane %v1036_v26, 1  ;;  %v296_v15 = vld [vmem:[%s1004_s27 + $0x18] sm:$0xf] }
  0x18   : > { %v327_v27 = vmax.f32 %v320_v18, %v845_v6  ;;  %v325_v36 = vmax.f32 %v318_v28, %v841_v19  ;;  %v321_v43 = vmax.f32 %v873_v34, %v845_v6  ;;  %v849_v45 = vunpack.c.h.bf16 %v1032_v22  ;;  %v310_v16 = vld [vmem:[%s1010_s30 + $0x18] sm:$0xf] }
  0x19   : > { %v349_v48 = vrot.slane %v861_v33, 1  ;;  %v319_v49 = vmax.f32 %v869_v38, %v841_v19  ;;  %v852_v52 = vunpack.c.l.bf16 %v1041_v39  ;;  %v865_v53 = vunpack.c.h.bf16 %v885_v40 }
  0x1a   : > { %v334_v35 = vmax.f32 %v327_v27, %v860_v10  ;;  %v332_v47 = vmax.f32 %v325_v36, %v856_v20  ;;  %v328_v51 = vmax.f32 %v321_v43, %v848_v32  ;;  %v877_v54 = vunpack.c.h.bf16 %v887_v41 }
  0x1b   : > { %v326_v57 = vmax.f32 %v319_v49, %v844_v5  ;;  %v347_v58 = vrot.slane %v857_v37, 1  ;;  %v1055_v60 = vunpack.c.l.bf16 %v1050_v50  ;;  %v864_v62 = vunpack.c.l.bf16 %v885_v40 }
  0x1c   : > { %v362_v46 = vmax.f32 %v334_v35, %v348_v23  ;;  %v360_v56 = vmax.f32 %v332_v47, %v346_v31  ;;  %v335_v59 = vmax.f32 %v328_v51, %v861_v33  ;;  %v323_v61 = vmax.f32 %v877_v54, %v849_v45 }
  0x1d   : > { %v333_v1 = vmax.f32 %v326_v57, %v857_v37  ;;  %v876_v2 = vunpack.c.l.bf16 %v887_v41  ;;  %v351_v8 = vrot.slane %v865_v53, 1  ;;  %v386_v5 = vrot.slane %v1045_v42, 1 }
  0x1e   : > { %v369_v55 = vmax.f32 %v362_v46, %v1017_v3  ;;  %v367_v0 = vmax.f32 %v360_v56, %v824_v12  ;;  %v363_v6 = vmax.f32 %v335_v59, %v349_v48  ;;  %v330_v7 = vmax.f32 %v323_v61, %v852_v52 }
  0x1f   : > { %v361_v11 = vmax.f32 %v333_v1, %v347_v58  ;;  %v322_v14 = vmax.f32 %v876_v2, %v848_v32  ;;  %v350_v19 = vrot.slane %v864_v62, 1  ;;  %v853_v12 = vunpack.c.h.bf16 %v1041_v39 }
  0x20   : > { %v397_v63 = vmax.f32 %v369_v55, %v383_v24  ;;  %v395_v10 = vmax.f32 %v367_v0, %v381_v29  ;;  %v370_v17 = vmax.f32 %v363_v6, %v1019_v4  ;;  %v337_v18 = vmax.f32 %v330_v7, %v865_v53 }
  0x21   : > { %v368_v22 = vmax.f32 %v361_v11, %v1026_v13  ;;  %v329_v23 = vmax.f32 %v322_v14, %v849_v45  ;;  %v303_v29 = vunpack.c.l.bf16 %v296_v15  ;;  %v317_v31 = vunpack.c.l.bf16 %v310_v16 }
  0x22   : > { %v404_v9 = vmax.f32 %v397_v63, %v1019_v4  ;;  %v402_v21 = vmax.f32 %v395_v10, %v1026_v13  ;;  %v398_v27 = vmax.f32 %v370_v17, %v384_v25  ;;  %v365_v28 = vmax.f32 %v337_v18, %v351_v8 }
  0x23   : > { %v396_v33 = vmax.f32 %v368_v22, %v382_v30  ;;  %v336_v34 = vmax.f32 %v329_v23, %v864_v62  ;;  %v324_v37 = vmax.f32 %v317_v31, %v852_v52  ;;  %v387_v38 = vrot.slane %v1055_v60, 1 }
  0x24   : > { %v1065_v20 = vmax.f32 %v404_v9, %v384_v25  ;;  %v1073_v4 = vmax.f32 %v402_v21, %v382_v30  ;;  %v405_v35 = vmax.f32 %v398_v27, %v1036_v26  ;;  %v372_v36 = vmax.f32 %v365_v28, %v1045_v42 }
  0x25   : > { %v403_v25 = vmax.f32 %v396_v33, %v1017_v3  ;;  %v364_v39 = vmax.f32 %v336_v34, %v350_v19  ;;  %v331_v41 = vmax.f32 %v324_v37, %v853_v12  ;;  %v352_v43 = vrot.slane %v303_v29, 1 }
  0x26   : > { %v1071_v32 = vmul.f32 %v1065_v20, %v1065_v20  ;;  %v1081_v13 = vmul.f32 %v1073_v4, %v1073_v4  ;;  %v1087_v30 = vmax.f32 %v405_v35, %v385_v44  ;;  %v400_v40 = vmax.f32 %v372_v36, %v386_v5 }
  0x27   : > { %v1093_v45 = vmax.f32 %v403_v25, %v383_v24  ;;  %v371_v46 = vmax.f32 %v364_v39, %v1036_v26  ;;  %v338_v49 = vmax.f32 %v331_v41, %v303_v29  ;;  %v837_v24 = vunpack.c.h.bf16 %v1050_v50 }
  0x28   : > { %432 = vrot.lane.b32.xlu1 %v1071_v32, %s951_s5  ;;  %428 = vrot.lane.b32.xlu0 %v1081_v13, %s951_s5  ;;  %v1098_v47 = vmul.f32 %v1087_v30, %v1087_v30  ;;  %v407_v48 = vmax.f32 %v400_v40, %v1055_v60  ;;  %v426_v9 = vlaneseq }
  0x29   : > { %v1103_v51 = vmul.f32 %v1093_v45, %v1093_v45  ;;  %v399_v52 = vmax.f32 %v371_v46, %v385_v44  ;;  %v366_v53 = vmax.f32 %v338_v49, %v352_v43  ;;  %v410_v57 = vrot.slane %v837_v24, 1 }
  0x2a   : > { %v1109_v3 = vmax.f32 %v407_v48, %v387_v38  ;;  %v1161_v14 = vand.u32 127, %v426_v9 }
  0x2b   : > { %v406_v54 = vmax.f32 %v399_v52, %v1045_v42  ;;  %v373_v26 = vmax.f32 %v366_v53, %v1055_v60 }
  0x2c   : > { %434 = vrot.lane.b32.xlu1 %v1098_v47, %s951_s5  ;;  %430 = vrot.lane.b32.xlu0 %v1103_v51, %s951_s5  ;;  %v1117_v55 = vmul.f32 %v1109_v3, %v1109_v3  ;;  %vm442_vm0 = vcmp.lt.s32.totalorder %v1161_v14, 127  ;;  %vm471_vm1 = vcmp.ge.s32.totalorder %v1161_v14, 1  ;;  %vm500_vm2 = vcmp.lt.s32.totalorder %v1161_v14, 126 }
  0x2d   : > { %v1120_v44 = vmax.f32 %v406_v54, %v386_v5  ;;  %v401_v56 = vmax.f32 %v373_v26, %v387_v38  ;;  %vm529_vm3 = vcmp.ge.s32.totalorder %v1161_v14, 2 }
  0x2f   : > { %v1126_v50 = vmul.f32 %v1120_v44, %v1120_v44  ;;  %v408_v58 = vmax.f32 %v401_v56, %v837_v24 }
  0x30   : > { %438 = vrot.lane.b32.xlu1 %v1117_v55, %s951_s5 }
  0x31   : > { %436 = vrot.lane.b32.xlu0 %v1126_v50, %s951_s5  ;;  %v1131_v42 = vmax.f32 %v408_v58, %v410_v57 }
  0x33   : > { %v1135_v59 = vmul.f32 %v1131_v42, %v1131_v42 }
  0x34   : > { %457 = vrot.lane.b32.xlu1 %v1081_v13, %s952_s6 }
  0x35   : > { %440 = vrot.lane.b32.xlu0 %v1135_v59, %s951_s5 }
  0x38   : > { %461 = vrot.lane.b32.xlu1 %v1071_v32, %s952_s6 }
  0x39   : > { %459 = vrot.lane.b32.xlu0 %v1103_v51, %s952_s6 }
  0x3c   : > { %465 = vrot.lane.b32.xlu1 %v1126_v50, %s952_s6 }
  0x3d   : > { %463 = vrot.lane.b32.xlu0 %v1098_v47, %s952_s6 }
  0x40   : > { %469 = vrot.lane.b32.xlu1 %v1135_v59, %s952_s6 }
  0x41   : > { %467 = vrot.lane.b32.xlu0 %v1117_v55, %s952_s6 }
  0x44   : > { %488 = vrot.lane.b32.xlu1 %v1103_v51, %s953_s7 }
  0x45   : > { %486 = vrot.lane.b32.xlu0 %v1081_v13, %s953_s7 }
  0x48   : > { %492 = vrot.lane.b32.xlu1 %v1098_v47, %s953_s7 }
  0x49   : > { %490 = vrot.lane.b32.xlu0 %v1071_v32, %s953_s7 }
  0x4c   : > { %496 = vrot.lane.b32.xlu1 %v1117_v55, %s953_s7 }
  0x4d   : > { %494 = vrot.lane.b32.xlu0 %v1126_v50, %s953_s7 }
  0x50   : > { %515 = vrot.lane.b32.xlu1 %v1081_v13, %s954_s8 }
  0x51   : > { %498 = vrot.lane.b32.xlu0 %v1135_v59, %s953_s7 }
  0x54   : > { %519 = vrot.lane.b32.xlu1 %v1071_v32, %s954_s8 }
  0x55   : > { %517 = vrot.lane.b32.xlu0 %v1103_v51, %s954_s8 }
  0x58   : > { %523 = vrot.lane.b32.xlu1 %v1126_v50, %s954_s8 }
  0x59   : > { %521 = vrot.lane.b32.xlu0 %v1098_v47, %s954_s8 }
  0x5c   : > { %527 = vrot.lane.b32.xlu1 %v1135_v59, %s954_s8 }
  0x5d   : > { %525 = vrot.lane.b32.xlu0 %v1117_v55, %s954_s8 }
  0x9a   : > { %v433_v60 = vpop.permute.xlu1 %432  ;;  %v429_v61 = vpop.permute.xlu0 %428 }
  0x9b   : > { %v443_v19 = vsel %vm442_vm0, %v429_v61, 0.0  ;;  %v445_v27 = vsel %vm442_vm0, %v433_v60, 0.0 }
  0x9c   : > { %v450_v21 = vadd.f32 %v443_v19, %v1081_v13  ;;  %v452_v34 = vadd.f32 %v445_v27, %v1071_v32 }
  0x9e   : > { %v435_v62 = vpop.permute.xlu1 %434  ;;  %v431_v63 = vpop.permute.xlu0 %430 }
  0x9f   : > { %v446_v31 = vsel %vm442_vm0, %v435_v62, 0.0  ;;  %v444_v35 = vsel %vm442_vm0, %v431_v63, 0.0 }
  0xa0   : > { %v453_v40 = vadd.f32 %v446_v31, %v1098_v47  ;;  %v451_v46 = vadd.f32 %v444_v35, %v1103_v51 }
  0xa2   : > { %v1159_v0 = vpop.permute.xlu1 %438 }
  0xa3   : > { %v437_v1 = vpop.permute.xlu0 %436  ;;  %v448_v27 = vsel %vm442_vm0, %v1159_v0, 0.0 }
  0xa4   : > { %v447_v36 = vsel %vm442_vm0, %v437_v1, 0.0 }
  0xa5   : > { %v454_v48 = vadd.f32 %v447_v36, %v1126_v50 }
  0xa6   : > { %v458_v2 = vpop.permute.xlu1 %457 }
  0xa7   : > { %v441_v6 = vpop.permute.xlu0 %440  ;;  %v472_v12 = vsel %vm471_vm1, %v458_v2, 0.0 }
  0xa8   : > { %v479_v29 = vadd.f32 %v472_v12, %v450_v21  ;;  %v449_v32 = vsel %vm442_vm0, %v441_v6, 0.0 }
  0xa9   : > { %v456_v51 = vadd.f32 %v449_v32, %v1135_v59 }
  0xaa   : > { %v462_v7 = vpop.permute.xlu1 %461 }
  0xab   : > { %v460_v8 = vpop.permute.xlu0 %459  ;;  %v474_v33 = vsel %vm471_vm1, %v462_v7, 0.0 }
  0xac   : > { %v481_v41 = vadd.f32 %v474_v33, %v452_v34  ;;  %v473_v49 = vsel %vm471_vm1, %v460_v8, 0.0 }
  0xad   : > { %v480_v60 = vadd.f32 %v473_v49, %v451_v46 }
  0xae   : > { %v466_v5 = vpop.permute.xlu1 %465 }
  0xaf   : > { %v464_v10 = vpop.permute.xlu0 %463  ;;  %v476_v52 = vsel %vm471_vm1, %v466_v5, 0.0 }
  0xb0   : > { %v475_v24 = vsel %vm471_vm1, %v464_v10, 0.0  ;;  %v483_v61 = vadd.f32 %v476_v52, %v454_v48 }
  0xb1   : > { %v482_v1 = vadd.f32 %v475_v24, %v453_v40 }
  0xb2   : > { %v470_v11 = vpop.permute.xlu1 %469 }
  0xb3   : > { %v1163_v15 = vpop.permute.xlu0 %467  ;;  %v478_v47 = vsel %vm471_vm1, %v470_v11, 0.0 }
  0xb4   : > { %v485_v2 = vadd.f32 %v478_v47, %v456_v51 }
  0xb6   : > { %v489_v16 = vpop.permute.xlu1 %488 }
  0xb7   : > { %v487_v17 = vpop.permute.xlu0 %486  ;;  %v502_v57 = vsel %vm500_vm2, %v489_v16, 0.0 }
  0xb8   : > { %v501_v28 = vsel %vm500_vm2, %v487_v17, 0.0  ;;  %v509_v6 = vadd.f32 %v502_v57, %v480_v60 }
  0xb9   : > { %v508_v37 = vadd.f32 %v501_v28, %v479_v29 }
  0xba   : > { %v493_v18 = vpop.permute.xlu1 %492 }
  0xbb   : > { %v491_v22 = vpop.permute.xlu0 %490  ;;  %v504_v10 = vsel %vm500_vm2, %v493_v18, 0.0 }
  0xbc   : > { %v503_v38 = vsel %vm500_vm2, %v491_v22, 0.0  ;;  %v511_v28 = vadd.f32 %v504_v10, %v482_v1 }
  0xbd   : > { %v510_v53 = vadd.f32 %v503_v38, %v481_v41 }
  0xbe   : > { %v1173_v23 = vpop.permute.xlu1 %496 }
  0xbf   : > { %v495_v13 = vpop.permute.xlu0 %494  ;;  %v506_v41 = vsel %vm500_vm2, %v1173_v23, 0.0 }
  0xc0   : > { %v505_v50 = vsel %vm500_vm2, %v495_v13, 0.0  ;;  %v477_v13 = vsel %vm471_vm1, %v1163_v15, 0.0 }
  0xc1   : > { %v512_v7 = vadd.f32 %v505_v50, %v483_v61 }
  0xc2   : > { %v516_v25 = vpop.permute.xlu1 %515 }
  0xc3   : > { %v530_v39 = vsel %vm529_vm3, %v516_v25, 0.0  ;;  %v499_v26 = vpop.permute.xlu0 %498 }
  0xc4   : > { %v537_v43 = vadd.f32 %v530_v39, %v508_v37  ;;  %v507_v11 = vsel %vm500_vm2, %v499_v26, 0.0  ;;  %v455_v37 = vadd.f32 %v448_v27, %v1117_v55 }
  0xc5   : > { %v514_v18 = vadd.f32 %v507_v11, %v485_v2 }
  0xc6   : > { %v544_v54 = vmul.f32 2e-05, %v537_v43  ;;  %v520_v56 = vpop.permute.xlu1 %519  ;;  %v484_v48 = vadd.f32 %v477_v13, %v455_v37 }
  0xc7   : > { %v532_v58 = vsel %vm529_vm3, %v520_v56, 0.0  ;;  %v518_v59 = vpop.permute.xlu0 %517 }
  0xc8   : > { %v551_v62 = vadd.f32 1.0, %v544_v54  ;;  %v539_v63 = vadd.f32 %v532_v58, %v510_v53  ;;  %v531_v16 = vsel %vm529_vm3, %v518_v59, 0.0  ;;  %v513_v24 = vadd.f32 %v506_v41, %v484_v48 }
  0xc9   : > { %v538_v21 = vadd.f32 %v531_v16, %v509_v6 }
  0xca   : > { %v558_v8 = vmul.f32 %v551_v62, %v551_v62  ;;  %v546_v5 = vmul.f32 2e-05, %v539_v63  ;;  %v524_v9 = vpop.permute.xlu1 %523 }
  0xcb   : > { %v534_v17 = vsel %vm529_vm3, %v524_v9, 0.0  ;;  %v522_v29 = vpop.permute.xlu0 %521  ;;  %v545_v34 = vmul.f32 2e-05, %v538_v21 }
  0xcc   : > { %v565_v19 = vmul.f32 %v558_v8, %v551_v62  ;;  %v553_v12 = vadd.f32 1.0, %v546_v5  ;;  %v541_v22 = vadd.f32 %v534_v17, %v512_v7  ;;  %v533_v36 = vsel %vm529_vm3, %v522_v29, 0.0 }
  0xcd   : > { %v540_v25 = vadd.f32 %v533_v36, %v511_v28  ;;  %v552_v39 = vadd.f32 1.0, %v545_v34 }
  0xce   : > { %901 = vrsqrt.f32 %v565_v19  ;;  %v528_v31 = vpop.permute.xlu1 %527  ;;  %v560_v33 = vmul.f32 %v553_v12, %v553_v12  ;;  %v548_v35 = vmul.f32 2e-05, %v541_v22  ;;  %vm574_vm4 = vcmp.eq.f32.partialorder %v565_v19, inf }
  0xcf   : > { %v536_v0 = vsel %vm529_vm3, %v528_v31, 0.0  ;;  %v547_v43 = vmul.f32 2e-05, %v540_v25  ;;  %v526_v46 = vpop.permute.xlu0 %525  ;;  %v559_v55 = vmul.f32 %v552_v39, %v552_v39  ;;  %v577_v50 = vand.u32 2147483648, %v565_v19 }
  0xd0   : > { %v567_v38 = vmul.f32 %v560_v33, %v553_v12  ;;  %v555_v40 = vadd.f32 1.0, %v548_v35  ;;  %v543_v32 = vadd.f32 %v536_v0, %v514_v18  ;;  %v535_v47 = vsel %vm529_vm3, %v526_v46, 0.0 }
  0xd1   : > { %v554_v52 = vadd.f32 1.0, %v547_v43  ;;  %v566_v53 = vmul.f32 %v559_v55, %v552_v39  ;;  %v542_v51 = vadd.f32 %v535_v47, %v513_v24  ;;  %vm576_vm5 = vcmp.eq.f32.partialorder %v565_v19, 0.0 }
  0xd2   : > { %903 = vrsqrt.f32 %v567_v38  ;;  %v562_v49 = vmul.f32 %v555_v40, %v555_v40  ;;  %v550_v15 = vmul.f32 2e-05, %v543_v32  ;;  %vm588_vm6 = vcmp.eq.f32.partialorder %v567_v38, inf }
  0xd3   : > { %v561_v26 = vmul.f32 %v554_v52, %v554_v52  ;;  %905 = vrsqrt.f32 %v566_v53  ;;  %v549_v61 = vmul.f32 2e-05, %v542_v51  ;;  %v591_v7 = vand.u32 2147483648, %v567_v38 }
  0xd4   : > { %v569_v54 = vmul.f32 %v562_v49, %v555_v40  ;;  %v557_v56 = vadd.f32 1.0, %v550_v15  ;;  %vm590_vm7 = vcmp.eq.f32.partialorder %v567_v38, 0.0  ;;  %vm581_vm8 = vcmp.eq.f32.partialorder %v566_v53, inf }
  0xd5   : > { %v568_v58 = vmul.f32 %v561_v26, %v554_v52  ;;  %v556_v6 = vadd.f32 1.0, %v549_v61  ;;  %v584_v17 = vand.u32 2147483648, %v566_v53  ;;  %vm583_vm9 = vcmp.eq.f32.partialorder %v566_v53, 0.0 }
  0xd6   : > { %907 = vrsqrt.f32 %v569_v54  ;;  %v564_v60 = vmul.f32 %v557_v56, %v557_v56  ;;  %vm602_vm10 = vcmp.eq.f32.partialorder %v569_v54, inf  ;;  %v605_v28 = vand.u32 2147483648, %v569_v54 }
  0xd7   : > { %909 = vrsqrt.f32 %v568_v58  ;;  %v563_v59 = vmul.f32 %v556_v6, %v556_v6  ;;  %vm604_vm11 = vcmp.eq.f32.partialorder %v569_v54, 0.0  ;;  %vm595_vm12 = vcmp.eq.f32.partialorder %v568_v58, inf }
  0xd8   : > { %v902_v57 = vpop.eup %901  ;;  %v571_v2 = vmul.f32 %v564_v60, %v557_v56  ;;  %v598_v35 = vand.u32 2147483648, %v568_v58  ;;  %vm597_vm15 = vcmp.eq.f32.partialorder %v568_v58, 0.0 }
  0xd9   : > { %v573_v23 = vmul.f32 %v902_v57, %v565_v19  ;;  %v570_v16 = vmul.f32 %v563_v59, %v556_v6 }
  0xda   : > { %vm616_vm0 = vcmp.eq.f32.partialorder %v571_v2, inf  ;;  %v619_v40 = vand.u32 2147483648, %v571_v2  ;;  %vm618_vm1 = vcmp.eq.f32.partialorder %v571_v2, 0.0 }
  0xdb   : > { %v575_v62 = vsel %vm574_vm4, %v565_v19, %v573_v23  ;;  %vm609_vm4 = vcmp.eq.f32.partialorder %v570_v16, inf  ;;  %v612_v24 = vand.u32 2147483648, %v570_v16 }
  0xdc   : > { %v578_v63 = vsel %vm576_vm5, %v577_v50, %v575_v62  ;;  %v904_v14 = vpop.eup %903  ;;  %vm611_vm5 = vcmp.eq.f32.partialorder %v570_v16, 0.0 }
  0xdd   : > { %911 = vrsqrt.f32 %v578_v63  ;;  %v587_v1 = vmul.f32 %v904_v14, %v567_v38  ;;  %v906_v9 = vpop.eup %905  ;;  %vm623_vm13 = vcmp.eq.f32.partialorder %v578_v63, inf  ;;  %v626_v34 = vand.u32 2147483648, %v578_v63 }
  0xde   : > { %913 = vrsqrt.f32 %v571_v2  ;;  %v580_v11 = vmul.f32 %v906_v9, %v566_v53  ;;  %vm625_vm14 = vcmp.eq.f32.partialorder %v578_v63, 0.0 }
  0xdf   : > { %v589_v8 = vsel %vm588_vm6, %v567_v38, %v587_v1  ;;  %vm691_vm6 = vcmask 1043456   ;;  %v694_v1 = vld [vmem:[%s1241_s11] sm:$0xf] }
  0xe0   : > { %v592_v5 = vsel %vm590_vm7, %v591_v7, %v589_v8  ;;  %v908_v10 = vpop.eup %907  ;;  %v582_v12 = vsel %vm581_vm8, %v566_v53, %v580_v11 }
  0xe1   : > { %915 = vrsqrt.f32 %v592_v5  ;;  %v601_v19 = vmul.f32 %v908_v10, %v569_v54  ;;  %v910_v21 = vpop.eup %909  ;;  %v585_v22 = vsel %vm583_vm9, %v584_v17, %v582_v12  ;;  %vm637_vm2 = vcmp.eq.f32.partialorder %v592_v5, inf }
  0xe2   : > { %917 = vrsqrt.f32 %v570_v16  ;;  %v594_v33 = vmul.f32 %v910_v21, %v568_v58  ;;  %v640_v43 = vand.u32 2147483648, %v592_v5  ;;  %vm639_vm3 = vcmp.eq.f32.partialorder %v592_v5, 0.0 }
  0xe3   : > { %v603_v27 = vsel %vm602_vm10, %v569_v54, %v601_v19  ;;  %919 = vrsqrt.f32 %v585_v22  ;;  %vm630_vm7 = vcmp.eq.f32.partialorder %v585_v22, inf  ;;  %v633_v26 = vand.u32 2147483648, %v585_v22  ;;  %v700_v19 = vld [vmem:[%s1241_s11 + $0x8] sm:$0xf] }
  0xe4   : > { %v606_v31 = vsel %vm604_vm11, %v605_v28, %v603_v27  ;;  %v596_v13 = vsel %vm595_vm12, %v568_v58, %v594_v33  ;;  %vm632_vm8 = vcmp.eq.f32.partialorder %v585_v22, 0.0  ;;  %vm692_vm9 = vsmask.f32 3328 }
  0xe5   : > { %921 = vrsqrt.f32 %v606_v31  ;;  %v599_v0 = vsel %vm597_vm15, %v598_v35, %v596_v13  ;;  %vm651_vm10 = vcmp.eq.f32.partialorder %v606_v31, inf  ;;  %v654_v50 = vand.u32 2147483648, %v606_v31  ;;  %vm1245_vm12 = vmand %vm691_vm6, %vm692_vm9  ;;  %v706_v13 = vld [vmem:[%s1241_s11 + $0x10] sm:$0xf] }
  0xe6   : > { %vm653_vm11 = vcmp.eq.f32.partialorder %v606_v31, 0.0  ;;  %v647_v8 = vand.u32 2147483648, %v599_v0 }
  0xe7   : > { %v912_v18 = vpop.eup %911 }
  0xe8   : > { %v622_v29 = vmul.f32 %v912_v18, %v578_v63  ;;  %v914_v36 = vpop.eup %913 }
  0xe9   : > { %v615_v38 = vmul.f32 %v914_v36, %v571_v2 }
  0xea   : > { %v624_v37 = vsel %vm623_vm13, %v578_v63, %v622_v29  ;;  %vm644_vm13 = vcmp.eq.f32.partialorder %v599_v0, inf }
  0xeb   : > { %v627_v25 = vsel %vm625_vm14, %v626_v34, %v624_v37  ;;  %v916_v39 = vpop.eup %915  ;;  %v617_v41 = vsel %vm616_vm0, %v571_v2, %v615_v38  ;;  %vm646_vm14 = vcmp.eq.f32.partialorder %v599_v0, 0.0  ;;  %v697_v34 = vld [vmem:[%s1241_s11 + $0x4] sm:$0xf] }
  0xec   : > { %923 = vrcp.f32 %v627_v25  ;;  %v636_v32 = vmul.f32 %v916_v39, %v592_v5  ;;  %v620_v46 = vsel %vm618_vm1, %v619_v40, %v617_v41  ;;  %v918_v48 = vpop.eup %917 }
  0xed   : > { %925 = vrsqrt.f32 %v599_v0  ;;  %v608_v52 = vmul.f32 %v918_v48, %v570_v16  ;;  %v920_v15 = vpop.eup %919  ;;  %vm665_vm15 = vcmp.eq.f32.partialorder %v620_v46, inf  ;;  %v668_v11 = vand.u32 2147483648, %v620_v46 }
  0xee   : > { %v638_v55 = vsel %vm637_vm2, %v592_v5, %v636_v32  ;;  %927 = vrsqrt.f32 %v620_v46  ;;  %v629_v47 = vmul.f32 %v920_v15, %v585_v22  ;;  %vm667_vm0 = vcmp.eq.f32.partialorder %v620_v46, 0.0 }
  0xef   : > { %v641_v49 = vsel %vm639_vm3, %v640_v43, %v638_v55  ;;  %v610_v53 = vsel %vm609_vm4, %v570_v16, %v608_v52  ;;  %v922_v54 = vpop.eup %921  ;;  %v712_v43 = vld [vmem:[%s1241_s11 + $0x18] sm:$0xf]  ;;  %v709_v52 = vld [vmem:[%s1241_s11 + $0x14] sm:$0xf] }
  0xf0   : > { %929 = vrcp.f32 %v641_v49  ;;  %v613_v56 = vsel %vm611_vm5, %v612_v24, %v610_v53  ;;  %v631_v51 = vsel %vm630_vm7, %v585_v22, %v629_v47  ;;  %v650_v57 = vmul.f32 %v922_v54, %v606_v31 }
  0xf1   : > { %931 = vrsqrt.f32 %v613_v56  ;;  %v634_v23 = vsel %vm632_vm8, %v633_v26, %v631_v51  ;;  %vm658_vm1 = vcmp.eq.f32.partialorder %v613_v56, inf  ;;  %v661_v29 = vand.u32 2147483648, %v613_v56 }
  0xf2   : > { %933 = vrcp.f32 %v634_v23  ;;  %v652_v60 = vsel %vm651_vm10, %v606_v31, %v650_v57  ;;  %vm660_vm2 = vcmp.eq.f32.partialorder %v613_v56, 0.0 }
  0xf3   : > { %v655_v63 = vsel %vm653_vm11, %v654_v50, %v652_v60 }
  0xf4   : > { %935 = vrcp.f32 %v655_v63 }
  0xf6   : > { %v924_v58 = vpop.eup %923 }
  0xf7   : > { %v926_v61 = vpop.eup %925  ;;  %v677_v62 = vmul.f32 %v924_v58, %v1073_v4 }
  0xf8   : > { %v643_v2 = vmul.f32 %v926_v61, %v599_v0  ;;  %v928_v6 = vpop.eup %927 }
  0xf9   : > { %v684_v7 = vpack.c.bf16 %v677_v62, %v677_v62  ;;  %v664_v59 = vmul.f32 %v928_v6, %v620_v46 }
  0xfa   : > { %v645_v5 = vsel %vm644_vm13, %v599_v0, %v643_v2  ;;  %v930_v9 = vpop.eup %929 }
  0xfb   : > { %v695_v4 = vsel %vm1245_vm12, %v684_v7, %v694_v1  ;;  %v648_v10 = vsel %vm646_vm14, %v647_v8, %v645_v5  ;;  %v679_v16 = vmul.f32 %v930_v9, %v1065_v20  ;;  %v666_v17 = vsel %vm665_vm15, %v620_v46, %v664_v59  ;;  %v932_v21 = vpop.eup %931 }
  0xfc   : > { %696 = vst [vmem:[%s1241_s11] sm:$0xf] %v695_v4  ;;  %937 = vrcp.f32 %v648_v10  ;;  %v669_v12 = vsel %vm667_vm0, %v668_v11, %v666_v17  ;;  %v657_v27 = vmul.f32 %v932_v21, %v613_v56  ;;  %v934_v28 = vpop.eup %933 }
  0xfd   : > { %v686_v22 = vpack.c.bf16 %v679_v16, %v679_v16  ;;  %939 = vrcp.f32 %v669_v12  ;;  %v678_v20 = vmul.f32 %v934_v28, %v1093_v45 }
  0xfe   : > { %v659_v31 = vsel %vm658_vm1, %v613_v56, %v657_v27  ;;  %v936_v33 = vpop.eup %935 }
  0xff   : > { %v701_v18 = vsel %vm1245_vm12, %v686_v22, %v700_v19  ;;  %v662_v35 = vsel %vm660_vm2, %v661_v29, %v659_v31  ;;  %v685_v36 = vpack.c.bf16 %v678_v20, %v678_v20  ;;  %v681_v37 = vmul.f32 %v936_v33, %v1120_v44  ;;  %v703_v44 = vld [vmem:[%s1241_s11 + $0xc] sm:$0xf] }
 0x100   : > { %702 = vst [vmem:[%s1241_s11 + $0x8] sm:$0xf] %v701_v18  ;;  %941 = vrcp.f32 %v662_v35 }
 0x101   : > { %v698_v25 = vsel %vm1245_vm12, %v685_v36, %v697_v34  ;;  %v688_v0 = vpack.c.bf16 %v681_v37, %v681_v37 }
 0x102   : > { %699 = vst [vmem:[%s1241_s11 + $0x4] sm:$0xf] %v698_v25 }
 0x103   : > { %v707_v38 = vsel %vm1245_vm12, %v688_v0, %v706_v13 }
 0x104   : > { %708 = vst [vmem:[%s1241_s11 + $0x10] sm:$0xf] %v707_v38 }
 0x106   : > { %v938_v45 = vpop.eup %937 }
 0x107   : > { %v680_v39 = vmul.f32 %v938_v45, %v1087_v30  ;;  %v940_v40 = vpop.eup %939 }
 0x108   : > { %v683_v41 = vmul.f32 %v940_v40, %v1131_v42 }
 0x109   : > { %v687_v32 = vpack.c.bf16 %v680_v39, %v680_v39 }
 0x10a   : > { %v690_v48 = vpack.c.bf16 %v683_v41, %v683_v41  ;;  %v942_v55 = vpop.eup %941 }
 0x10b   : > { %v704_v46 = vsel %vm1245_vm12, %v687_v32, %v703_v44  ;;  %v682_v30 = vmul.f32 %v942_v55, %v1109_v3 }
 0x10c   : > { %705 = vst [vmem:[%s1241_s11 + $0xc] sm:$0xf] %v704_v46  ;;  %v713_v49 = vsel %vm1245_vm12, %v690_v48, %v712_v43 }
 0x10d   : > { %714 = vst [vmem:[%s1241_s11 + $0x18] sm:$0xf] %v713_v49  ;;  %v689_v15 = vpack.c.bf16 %v682_v30, %v682_v30 }
 0x10f   : > { %v710_v24 = vsel %vm1245_vm12, %v689_v15, %v709_v52 }
 0x110   : > { %711 = vst [vmem:[%s1241_s11 + $0x14] sm:$0xf] %v710_v24 }
 0x111 PF: > { %s14_s15 = sadd.s32 1, %s949_s15  }
 0x112   : > { %p11_p4 = scmp.ge.s32.totalorder %s14_s15, 4  }
 0x114   :  { %13 = sbr.rel (!%p11_p4) target bundleno = 1 (0x1), region = 75 }

// kernel: features_forward.8
= control target key start
LH: loop header
LB: loop body
LE: loop exit
PB: predicated region body
PF: predicated region fallthrough
CT: control target
= control target key end

     0   :  { %v2535_v0 = vmov 0   ;;  %v2536_v2 = vmov 0.0   ;;  %vm2537_vm0 = vmmov 0   ;;  %s3123_s1 = inlined_call_operand.vmem [shape: bf16[1,384,128], index: 1, kind: input, shape index: {}]   ;;  %s3124_s0 = inlined_call_operand.vmem [shape: bf16[1,464,384], index: 0, kind: input, shape index: {}]   ;;  %s3125_s2 = inlined_call_operand.vmem [shape: f32[1,1,128], index: 2, kind: input, shape index: {}]   ;;  %s3126_s3 = inlined_call_operand.vmem [shape: bf16[464,128], index: 3, kind: output, shape index: {}]  }
   0x1   :  { %805 = vmatprep.subr.bf16.mxu1 %v2535_v0  ;;  %v2395_v1 = vld [vmem:[%s3123_s1] sm:$0xff]   ;;  %2144 = vmatprep.subr.bf16.mxu0 %v2536_v2  ;;  %v2396_v3 = vld [vmem:[%s3123_s1 + $0x8] sm:$0xff]   ;;  %v2397_v4 = vld [vmem:[%s3123_s1 + $0x10] sm:$0xff]  }
   0x2   :  { %2160 = vmatprep.mubr.msk.bf16.mxu0 %vm2537_vm0, %v2536_v2  ;;  %806 = vmatpush1.bf16.msra.mxu1 %v2395_v1  ;;  %v2403_v5 = vld [vmem:[%s3123_s1 + $0x80] sm:$0xff]   ;;  %v2398_v6 = vld [vmem:[%s3123_s1 + $0x18] sm:$0xff]   ;;  %v2405_v7 = vld [vmem:[%s3123_s1 + $0x88] sm:$0xff]  }
   0x3   :  { %807 = vmatprep.subr.bf16.mxu1 %v2535_v0  ;;  %2145 = vmatpush3.bf16.msra.mxu0 %v2403_v5  ;;  %v2399_v8 = vld [vmem:[%s3123_s1 + $0x20] sm:$0xff]   ;;  %v2407_v9 = vld [vmem:[%s3123_s1 + $0x90] sm:$0xff]   ;;  %v2400_v10 = vld [vmem:[%s3123_s1 + $0x28] sm:$0xff]  }
   0x4   :  { %2146 = vmatprep.subr.bf16.mxu0 %v2536_v2  ;;  %v2409_v11 = vld [vmem:[%s3123_s1 + $0x98] sm:$0xff]   ;;  %v2401_v12 = vld [vmem:[%s3123_s1 + $0x30] sm:$0xff]   ;;  %v2411_v13 = vld [vmem:[%s3123_s1 + $0xa0] sm:$0xff]  }
   0x5   :  { %v2402_v14 = vld [vmem:[%s3123_s1 + $0x38] sm:$0xff]   ;;  %v2421_v15 = vld [vmem:[%s3124_s0 + $0x4] ss:$12 sps:$4 sm:$0xff]   ;;  %v2413_v16 = vld [vmem:[%s3123_s1 + $0xa8] sm:$0xff]  }
   0x6   :  { %808 = vmatpush1.bf16.msra.mxu1 %v2396_v3  ;;  %837 = vmatprep.mubr.bf16.mxu1 %v2421_v15  ;;  %v2404_v17 = vld [vmem:[%s3123_s1 + $0x40] sm:$0xff]   ;;  %v2415_v18 = vld [vmem:[%s3123_s1 + $0xb0] sm:$0xff]   ;;  %v2406_v19 = vld [vmem:[%s3123_s1 + $0x48] sm:$0xff]  }
   0x7   :  { %809 = vmatprep.subr.bf16.mxu1 %v2535_v0  ;;  %2147 = vmatpush3.bf16.msra.mxu0 %v2405_v7  ;;  %v2417_v20 = vld [vmem:[%s3123_s1 + $0xb8] sm:$0xff]   ;;  %v2422_v21 = vld [vmem:[%s3124_s0 + $0x8] ss:$12 sps:$4 sm:$0xff]   ;;  %v2425_v24 = vld [vmem:[%s3124_s0 + $0x20] ss:$12 sps:$4 sm:$0xff]  }
   0x8   :  { %2148 = vmatprep.subr.bf16.mxu0 %v2536_v2  ;;  %v2408_v22 = vld [vmem:[%s3123_s1 + $0x50] sm:$0xff]   ;;  %v2410_v23 = vld [vmem:[%s3123_s1 + $0x58] sm:$0xff]   ;;  %v2412_v25 = vld [vmem:[%s3123_s1 + $0x60] sm:$0xff]  }
   0x9   :  { %v2414_v26 = vld [vmem:[%s3123_s1 + $0x68] sm:$0xff]   ;;  %v2429_v27 = vld [vmem:[%s3124_s0 + $0x38] ss:$12 sps:$4 sm:$0xff]   ;;  %v2416_v28 = vld [vmem:[%s3123_s1 + $0x70] sm:$0xff]  }
   0xa   :  { %810 = vmatpush1.bf16.msra.mxu1 %v2397_v4  ;;  %v2418_v29 = vld [vmem:[%s3123_s1 + $0x78] sm:$0xff]   ;;  %v2419_v30 = vld [vmem:[%s3124_s0] ss:$12 sps:$4 sm:$0xff]   ;;  %v2437_v34 = vld [vmem:[%s3124_s0 + $0x68] ss:$12 sps:$4 sm:$0xff]  }
   0xb   :  { %811 = vmatprep.subr.bf16.mxu1 %v2535_v0  ;;  %2149 = vmatpush3.bf16.msra.mxu0 %v2407_v9  ;;  %v2433_v31 = vld [vmem:[%s3124_s0 + $0x50] ss:$12 sps:$4 sm:$0xff]   ;;  %v2426_v33 = vld [vmem:[%s3124_s0 + $0x18] ss:$12 sps:$4 sm:$0xff]   ;;  %v2427_v35 = vld [vmem:[%s3124_s0 + $0x34] ss:$12 sps:$4 sm:$0xff]  }
   0xc   :  { %2150 = vmatprep.subr.bf16.mxu0 %v2536_v2  ;;  %v2423_v32 = vld [vmem:[%s3124_s0 + $0x1c] ss:$12 sps:$4 sm:$0xff]   ;;  %v2441_v37 = vld [vmem:[%s3124_s0 + $0x80] ss:$12 sps:$4 sm:$0xff]   ;;  %v2445_v40 = vld [vmem:[%s3124_s0 + $0x98] ss:$12 sps:$4 sm:$0xff]  }
   0xd   :  { %v2430_v36 = vld [vmem:[%s3124_s0 + $0x30] ss:$12 sps:$4 sm:$0xff]   ;;  %v2431_v38 = vld [vmem:[%s3124_s0 + $0x4c] ss:$12 sps:$4 sm:$0xff]   ;;  %v2434_v39 = vld [vmem:[%s3124_s0 + $0x48] ss:$12 sps:$4 sm:$0xff]  }
   0xe   :  { %812 = vmatpush1.bf16.msra.mxu1 %v2398_v6  ;;  %v2435_v41 = vld [vmem:[%s3124_s0 + $0x64] ss:$12 sps:$4 sm:$0xff]   ;;  %v2438_v42 = vld [vmem:[%s3124_s0 + $0x60] ss:$12 sps:$4 sm:$0xff]   ;;  %v2439_v44 = vld [vmem:[%s3124_s0 + $0x7c] ss:$12 sps:$4 sm:$0xff]  }
   0xf   :  { %813 = vmatprep.subr.bf16.mxu1 %v2535_v0  ;;  %2151 = vmatpush3.bf16.msra.mxu0 %v2409_v11  ;;  %v2449_v43 = vld [vmem:[%s3124_s0 + $0xb0] ss:$12 sps:$4 sm:$0xff]   ;;  %v2442_v45 = vld [vmem:[%s3124_s0 + $0x78] ss:$12 sps:$4 sm:$0xff]   ;;  %v2453_v46 = vld [vmem:[%s3124_s0 + $0xc8] ss:$12 sps:$4 sm:$0xff]  }
  0x10   :  { %2152 = vmatprep.subr.bf16.mxu0 %v2536_v2  ;;  %v2443_v47 = vld [vmem:[%s3124_s0 + $0x94] ss:$12 sps:$4 sm:$0xff]   ;;  %v2446_v48 = vld [vmem:[%s3124_s0 + $0x90] ss:$12 sps:$4 sm:$0xff]   ;;  %v2447_v50 = vld [vmem:[%s3124_s0 + $0xac] ss:$12 sps:$4 sm:$0xff]  }
  0x11   :  { %v2457_v49 = vld [vmem:[%s3124_s0 + $0xe0] ss:$12 sps:$4 sm:$0xff]   ;;  %v2450_v51 = vld [vmem:[%s3124_s0 + $0xa8] ss:$12 sps:$4 sm:$0xff]   ;;  %v2461_v52 = vld [vmem:[%s3124_s0 + $0xf8] ss:$12 sps:$4 sm:$0xff]  }
  0x12   :  { %814 = vmatpush1.bf16.msra.mxu1 %v2399_v8  ;;  %v2451_v53 = vld [vmem:[%s3124_s0 + $0xc4] ss:$12 sps:$4 sm:$0xff]   ;;  %v2454_v54 = vld [vmem:[%s3124_s0 + $0xc0] ss:$12 sps:$4 sm:$0xff]   ;;  %v2455_v56 = vld [vmem:[%s3124_s0 + $0xdc] ss:$12 sps:$4 sm:$0xff]  }
  0x13   :  { %815 = vmatprep.subr.bf16.mxu1 %v2535_v0  ;;  %2153 = vmatpush3.bf16.msra.mxu0 %v2411_v13  ;;  %v2465_v55 = vld [vmem:[%s3124_s0 + $0x110] ss:$12 sps:$4 sm:$0xff]   ;;  %v2458_v57 = vld [vmem:[%s3124_s0 + $0xd8] ss:$12 sps:$4 sm:$0xff]   ;;  %v2469_v58 = vld [vmem:[%s3124_s0 + $0x128] ss:$12 sps:$4 sm:$0xff]  }
  0x14   :  { %2154 = vmatprep.subr.bf16.mxu0 %v2536_v2  ;;  %v2459_v59 = vld [vmem:[%s3124_s0 + $0xf4] ss:$12 sps:$4 sm:$0xff]   ;;  %v2462_v60 = vld [vmem:[%s3124_s0 + $0xf0] ss:$12 sps:$4 sm:$0xff]   ;;  %v2463_v62 = vld [vmem:[%s3124_s0 + $0x10c] ss:$12 sps:$4 sm:$0xff]  }
  0x15   :  { %v2473_v61 = vld [vmem:[%s3124_s0 + $0x140] ss:$12 sps:$4 sm:$0xff]   ;;  %v2466_v63 = vld [vmem:[%s3124_s0 + $0x108] ss:$12 sps:$4 sm:$0xff]   ;;  %v2467_v1 = vld [vmem:[%s3124_s0 + $0x124] ss:$12 sps:$4 sm:$0xff]  }
  0x16   :  { %816 = vmatpush1.bf16.msra.mxu1 %v2400_v10  ;;  %v2470_v3 = vld [vmem:[%s3124_s0 + $0x120] ss:$12 sps:$4 sm:$0xff]   ;;  %v2481_v4 = vld [vmem:[%s3124_s0 + $0x170] ss:$12 sps:$4 sm:$0xff]   ;;  %v2474_v6 = vld [vmem:[%s3124_s0 + $0x138] ss:$12 sps:$4 sm:$0xff]  }
  0x17   :  { %817 = vmatprep.subr.bf16.mxu1 %v2535_v0  ;;  %2155 = vmatpush3.bf16.msra.mxu0 %v2413_v16  ;;  %v2471_v5 = vld [vmem:[%s3124_s0 + $0x13c] ss:$12 sps:$4 sm:$0xff]   ;;  %v2475_v8 = vld [vmem:[%s3124_s0 + $0x154] ss:$12 sps:$4 sm:$0xff]   ;;  %v2479_v11 = vld [vmem:[%s3124_s0 + $0x16c] ss:$12 sps:$4 sm:$0xff]  }
  0x18   :  { %2156 = vmatprep.subr.bf16.mxu0 %v2536_v2  ;;  %v2485_v7 = vld [vmem:[%s3124_s0 + $0x188] ss:$12 sps:$4 sm:$0xff]   ;;  %v2478_v9 = vld [vmem:[%s3124_s0 + $0x150] ss:$12 sps:$4 sm:$0xff]   ;;  %v2489_v10 = vld [vmem:[%s3124_s0 + $0x1a0] ss:$12 sps:$4 sm:$0xff]  }
  0x19   :  { %v2493_v13 = vld [vmem:[%s3124_s0 + $0x1b8] ss:$12 sps:$4 sm:$0xff]   ;;  %v2486_v15 = vld [vmem:[%s3124_s0 + $0x180] ss:$12 sps:$4 sm:$0xff]   ;;  %v2497_v16 = vld [vmem:[%s3124_s0 + $0x1d0] ss:$12 sps:$4 sm:$0xff]  }
  0x1a   :  { %818 = vmatpush1.bf16.msra.mxu1 %v2401_v12  ;;  %v2482_v12 = vld [vmem:[%s3124_s0 + $0x168] ss:$12 sps:$4 sm:$0xff]  }
  0x1b   :  { %819 = vmatprep.subr.bf16.mxu1 %v2535_v0  ;;  %2157 = vmatpush3.bf16.msra.mxu0 %v2415_v18  ;;  %v2490_v18 = vld [vmem:[%s3124_s0 + $0x198] ss:$12 sps:$4 sm:$0xff]  }
  0x1c   :  { %2158 = vmatprep.subr.bf16.mxu0 %v2536_v2 }
  0x1e   :  { %820 = vmatpush1.bf16.msra.mxu1 %v2402_v14  ;;  %v2483_v14 = vld [vmem:[%s3124_s0 + $0x184] ss:$12 sps:$4 sm:$0xff]  }
  0x1f   :  { %821 = vmatprep.subr.bf16.mxu1 %v2535_v0  ;;  %2159 = vmatpush3.bf16.msra.mxu0 %v2417_v20  ;;  %v2491_v20 = vld [vmem:[%s3124_s0 + $0x1b4] ss:$12 sps:$4 sm:$0xff]  }
  0x22   :  { %822 = vmatpush1.bf16.msra.mxu1 %v2404_v17  ;;  %2161 = vmatmul.mubr.bf16.vlgmr.msra.gmra.mrb[0].mxu0 %v2422_v21  ;;  %v2487_v17 = vld [vmem:[%s3124_s0 + $0x19c] ss:$12 sps:$4 sm:$0xff]  }
  0x23   :  { %823 = vmatprep.subr.bf16.mxu1 %v2535_v0  ;;  %2164 = vmatprep.mubr.msk.bf16.mxu0 %vm2537_vm0, %v2536_v2  ;;  %v2494_v21 = vld [vmem:[%s3124_s0 + $0x1b0] ss:$12 sps:$4 sm:$0xff]  }
  0x26   :  { %824 = vmatpush1.bf16.msra.mxu1 %v2406_v19  ;;  %v2501_v19 = vld [vmem:[%s3124_s0 + $0x1e8] ss:$12 sps:$4 sm:$0xff]  }
  0x27   :  { %825 = vmatprep.subr.bf16.mxu1 %v2535_v0 }
  0x2a   :  { %826 = vmatpush1.bf16.msra.mxu1 %v2408_v22  ;;  %2165 = vmatmul.mubr.bf16.gmra.mrb[4].mxu0 %v2425_v24  ;;  %v2505_v22 = vld [vmem:[%s3124_s0 + $0x200] ss:$12 sps:$4 sm:$0xff]   ;;  %v2498_v24 = vld [vmem:[%s3124_s0 + $0x1c8] ss:$12 sps:$4 sm:$0xff]  }
  0x2b   :  { %827 = vmatprep.subr.bf16.mxu1 %v2535_v0  ;;  %2168 = vmatprep.mubr.msk.bf16.mxu0 %vm2537_vm0, %v2536_v2 }
  0x2e   :  { %828 = vmatpush1.bf16.msra.mxu1 %v2410_v23  ;;  %v2495_v23 = vld [vmem:[%s3124_s0 + $0x1cc] ss:$12 sps:$4 sm:$0xff]  }
  0x2f   :  { %829 = vmatprep.subr.bf16.mxu1 %v2535_v0 }
  0x32   :  { %830 = vmatpush1.bf16.msra.mxu1 %v2412_v25  ;;  %2169 = vmatmul.mubr.bf16.gmra.mrb[8].mxu0 %v2429_v27  ;;  %v2509_v25 = vld [vmem:[%s3124_s0 + $0x218] ss:$12 sps:$4 sm:$0xff]   ;;  %v2502_v27 = vld [vmem:[%s3124_s0 + $0x1e0] ss:$12 sps:$4 sm:$0xff]  }
  0x33   :  { %831 = vmatprep.subr.bf16.mxu1 %v2535_v0  ;;  %2172 = vmatprep.mubr.msk.bf16.mxu0 %vm2537_vm0, %v2536_v2 }
  0x36   :  { %832 = vmatpush1.bf16.msra.mxu1 %v2414_v26  ;;  %v2499_v26 = vld [vmem:[%s3124_s0 + $0x1e4] ss:$12 sps:$4 sm:$0xff]  }
  0x37   :  { %833 = vmatprep.subr.bf16.mxu1 %v2535_v0 }
  0x3a   :  { %834 = vmatpush1.bf16.msra.mxu1 %v2416_v28  ;;  %2173 = vmatmul.mubr.bf16.gmra.mrb[12].mxu0 %v2433_v31  ;;  %v2513_v28 = vld [vmem:[%s3124_s0 + $0x230] ss:$12 sps:$4 sm:$0xff]   ;;  %v2517_v31 = vld [vmem:[%s3124_s0 + $0x248] ss:$12 sps:$4 sm:$0xff]  }
  0x3b   :  { %835 = vmatprep.subr.bf16.mxu1 %v2535_v0  ;;  %2176 = vmatprep.mubr.msk.bf16.mxu0 %vm2537_vm0, %v2536_v2  ;;  %v2477_v0 = vld [vmem:[%s3124_s0 + $0x158] ss:$12 sps:$4 sm:$0xff]  }
  0x3e   :  { %836 = vmatpush1.bf16.msra.mxu1 %v2418_v29  ;;  %v2503_v29 = vld [vmem:[%s3124_s0 + $0x1fc] ss:$12 sps:$4 sm:$0xff]  }
  0x41   :  { %838 = vmatmul.mubr.bf16.vlgmr.msra.gmra.mrb[0].mxu1 %v2419_v30  ;;  %v2506_v30 = vld [vmem:[%s3124_s0 + $0x1f8] ss:$12 sps:$4 sm:$0xff]  }
  0x42   :  { %845 = vmatprep.mubr.bf16.mxu1 %v2423_v32  ;;  %2177 = vmatmul.mubr.bf16.gmra.mrb[16].mxu0 %v2437_v34  ;;  %v2507_v32 = vld [vmem:[%s3124_s0 + $0x214] ss:$12 sps:$4 sm:$0xff]  }
  0x43   :  { %2180 = vmatprep.mubr.msk.bf16.mxu0 %vm2537_vm0, %v2536_v2  ;;  %v2521_v34 = vld [vmem:[%s3124_s0 + $0x260] ss:$12 sps:$4 sm:$0xff]  }
  0x49   :  { %846 = vmatmul.mubr.bf16.gmra.mrb[4].mxu1 %v2426_v33  ;;  %v2510_v33 = vld [vmem:[%s3124_s0 + $0x210] ss:$12 sps:$4 sm:$0xff]  }
  0x4a   :  { %853 = vmatprep.mubr.bf16.mxu1 %v2427_v35  ;;  %2181 = vmatmul.mubr.bf16.gmra.mrb[20].mxu0 %v2441_v37  ;;  %v2511_v35 = vld [vmem:[%s3124_s0 + $0x22c] ss:$12 sps:$4 sm:$0xff]  }
  0x4b   :  { %2184 = vmatprep.mubr.msk.bf16.mxu0 %vm2537_vm0, %v2536_v2  ;;  %v2525_v37 = vld [vmem:[%s3124_s0 + $0x278] ss:$12 sps:$4 sm:$0xff]  }
  0x51   :  { %854 = vmatmul.mubr.bf16.gmra.mrb[8].mxu1 %v2430_v36  ;;  %v2514_v36 = vld [vmem:[%s3124_s0 + $0x228] ss:$12 sps:$4 sm:$0xff]  }
  0x52   :  { %861 = vmatprep.mubr.bf16.mxu1 %v2431_v38  ;;  %2185 = vmatmul.mubr.bf16.gmra.mrb[24].mxu0 %v2445_v40  ;;  %v2515_v38 = vld [vmem:[%s3124_s0 + $0x244] ss:$12 sps:$4 sm:$0xff]   ;;  %v2518_v40 = vld [vmem:[%s3124_s0 + $0x240] ss:$12 sps:$4 sm:$0xff]  }
  0x53   :  { %2188 = vmatprep.mubr.msk.bf16.mxu0 %vm2537_vm0, %v2536_v2 }
  0x59   :  { %862 = vmatmul.mubr.bf16.gmra.mrb[12].mxu1 %v2434_v39 }
  0x5a   :  { %869 = vmatprep.mubr.bf16.mxu1 %v2435_v41  ;;  %2189 = vmatmul.mubr.bf16.gmra.mrb[28].mxu0 %v2449_v43  ;;  %v2519_v43 = vld [vmem:[%s3124_s0 + $0x25c] ss:$12 sps:$4 sm:$0xff]  }
  0x5b   :  { %2192 = vmatprep.mubr.msk.bf16.mxu0 %vm2537_vm0, %v2536_v2 }
  0x61   :  { %870 = vmatmul.mubr.bf16.gmra.mrb[16].mxu1 %v2438_v42  ;;  %v2529_v42 = vld [vmem:[%s3124_s0 + $0x290] ss:$12 sps:$4 sm:$0xff]  }
  0x62   :  { %877 = vmatprep.mubr.bf16.mxu1 %v2439_v44  ;;  %2193 = vmatmul.mubr.bf16.gmra.mrb[32].mxu0 %v2453_v46 }
  0x63   :  { %2196 = vmatprep.mubr.msk.bf16.mxu0 %vm2537_vm0, %v2536_v2 }
  0x69   :  { %878 = vmatmul.mubr.bf16.gmra.mrb[20].mxu1 %v2442_v45 }
  0x6a   :  { %885 = vmatprep.mubr.bf16.mxu1 %v2443_v47  ;;  %2197 = vmatmul.mubr.bf16.gmra.mrb[36].mxu0 %v2457_v49  ;;  %v2522_v47 = vld [vmem:[%s3124_s0 + $0x258] ss:$12 sps:$4 sm:$0xff]   ;;  %v2533_v49 = vld [vmem:[%s3124_s0 + $0x2a8] ss:$12 sps:$4 sm:$0xff]  }
  0x6b   :  { %2200 = vmatprep.mubr.msk.bf16.mxu0 %vm2537_vm0, %v2536_v2 }
  0x71   :  { %886 = vmatmul.mubr.bf16.gmra.mrb[24].mxu1 %v2446_v48 }
  0x72   :  { %893 = vmatprep.mubr.bf16.mxu1 %v2447_v50  ;;  %2201 = vmatmul.mubr.bf16.gmra.mrb[40].mxu0 %v2461_v52  ;;  %v2523_v50 = vld [vmem:[%s3124_s0 + $0x274] ss:$12 sps:$4 sm:$0xff]  }
  0x73   :  { %2204 = vmatprep.mubr.msk.bf16.mxu0 %vm2537_vm0, %v2536_v2 }
  0x79   :  { %894 = vmatmul.mubr.bf16.gmra.mrb[28].mxu1 %v2450_v51 }
  0x7a   :  { %901 = vmatprep.mubr.bf16.mxu1 %v2451_v53  ;;  %2205 = vmatmul.mubr.bf16.gmra.mrb[44].mxu0 %v2465_v55  ;;  %v2526_v53 = vld [vmem:[%s3124_s0 + $0x270] ss:$12 sps:$4 sm:$0xff]   ;;  %v2527_v55 = vld [vmem:[%s3124_s0 + $0x28c] ss:$12 sps:$4 sm:$0xff]  }
  0x7b   :  { %2208 = vmatprep.mubr.msk.bf16.mxu0 %vm2537_vm0, %v2536_v2 }
  0x81   :  { %902 = vmatmul.mubr.bf16.gmra.mrb[32].mxu1 %v2454_v54 }
  0x82   :  { %909 = vmatprep.mubr.bf16.mxu1 %v2455_v56  ;;  %2209 = vmatmul.mubr.bf16.gmra.mrb[48].mxu0 %v2469_v58  ;;  %v2967_v58 = vld [vmem:[%s3125_s2] ss:$0 sm:$0xff] }
  0x83   :  { %2212 = vmatprep.mubr.msk.bf16.mxu0 %vm2537_vm0, %v2536_v2 }
  0x89   :  { %910 = vmatmul.mubr.bf16.gmra.mrb[36].mxu1 %v2458_v57 }
  0x8a   :  { %917 = vmatprep.mubr.bf16.mxu1 %v2459_v59  ;;  %2213 = vmatmul.mubr.bf16.gmra.mrb[52].mxu0 %v2473_v61 }
  0x8b   :  { %2216 = vmatprep.mubr.msk.bf16.mxu0 %vm2537_vm0, %v2536_v2 }
  0x91   :  { %918 = vmatmul.mubr.bf16.gmra.mrb[40].mxu1 %v2462_v60 }
  0x92   :  { %925 = vmatprep.mubr.bf16.mxu1 %v2463_v62  ;;  %2217 = vmatmul.mubr.bf16.gmra.mrb[56].mxu0 %v2477_v0 }
  0x93   :  { %2220 = vmatprep.mubr.msk.bf16.mxu0 %vm2537_vm0, %v2536_v2 }
  0x99   :  { %926 = vmatmul.mubr.bf16.gmra.mrb[44].mxu1 %v2466_v63  ;;  %v2530_v63 = vld [vmem:[%s3124_s0 + $0x288] ss:$12 sps:$4 sm:$0xff]  }
  0x9a   :  { %933 = vmatprep.mubr.bf16.mxu1 %v2467_v1  ;;  %2221 = vmatmul.mubr.bf16.gmra.mrb[60].mxu0 %v2481_v4 }
  0x9b   :  { %2224 = vmatprep.mubr.msk.bf16.mxu0 %vm2537_vm0, %v2536_v2 }
  0xa1   :  { %934 = vmatmul.mubr.bf16.gmra.mrb[48].mxu1 %v2470_v3  ;;  %v2531_v3 = vld [vmem:[%s3124_s0 + $0x2a4] ss:$12 sps:$4 sm:$0xff]  }
  0xa2   :  { %941 = vmatprep.mubr.bf16.mxu1 %v2471_v5  ;;  %2225 = vmatmul.mubr.bf16.gmra.mrb[64].mxu0 %v2485_v7 }
  0xa3   :  { %2228 = vmatprep.mubr.msk.bf16.mxu0 %vm2537_vm0, %v2536_v2 }
  0xa9   :  { %942 = vmatmul.mubr.bf16.gmra.mrb[52].mxu1 %v2474_v6 }
  0xaa   :  { %949 = vmatprep.mubr.bf16.mxu1 %v2475_v8  ;;  %2229 = vmatmul.mubr.bf16.gmra.mrb[68].mxu0 %v2489_v10 }
  0xab   :  { %2232 = vmatprep.mubr.msk.bf16.mxu0 %vm2537_vm0, %v2536_v2 }
  0xb1   :  { %950 = vmatmul.mubr.bf16.gmra.mrb[56].mxu1 %v2478_v9 }
  0xb2   :  { %957 = vmatprep.mubr.bf16.mxu1 %v2479_v11  ;;  %2233 = vmatmul.mubr.bf16.gmra.mrb[72].mxu0 %v2493_v13 }
  0xb3   :  { %2236 = vmatprep.mubr.msk.bf16.mxu0 %vm2537_vm0, %v2536_v2 }
  0xb9   :  { %958 = vmatmul.mubr.bf16.gmra.mrb[60].mxu1 %v2482_v12 }
  0xba   :  { %965 = vmatprep.mubr.bf16.mxu1 %v2483_v14  ;;  %2237 = vmatmul.mubr.bf16.gmra.mrb[76].mxu0 %v2497_v16 }
  0xbb   :  { %2240 = vmatprep.mubr.msk.bf16.mxu0 %vm2537_vm0, %v2536_v2 }
  0xc1   :  { %966 = vmatmul.mubr.bf16.gmra.mrb[64].mxu1 %v2486_v15 }
  0xc2   :  { %973 = vmatprep.mubr.bf16.mxu1 %v2487_v17  ;;  %2241 = vmatmul.mubr.bf16.gmra.mrb[80].mxu0 %v2501_v19  ;;  %v2534_v17 = vld [vmem:[%s3124_s0 + $0x2a0] ss:$12 sps:$4 sm:$0xff]  }
  0xc3   :  { %2244 = vmatprep.mubr.msk.bf16.mxu0 %vm2537_vm0, %v2536_v2 }
  0xc9   :  { %974 = vmatmul.mubr.bf16.gmra.mrb[68].mxu1 %v2490_v18 }
  0xca   :  { %981 = vmatprep.mubr.bf16.mxu1 %v2491_v20  ;;  %2245 = vmatmul.mubr.bf16.gmra.mrb[84].mxu0 %v2505_v22 }
  0xcb   :  { %2248 = vmatprep.mubr.msk.bf16.mxu0 %vm2537_vm0, %v2536_v2 }
  0xd1   :  { %982 = vmatmul.mubr.bf16.gmra.mrb[72].mxu1 %v2494_v21 }
  0xd2   :  { %989 = vmatprep.mubr.bf16.mxu1 %v2495_v23  ;;  %2249 = vmatmul.mubr.bf16.gmra.mrb[88].mxu0 %v2509_v25 }
  0xd3   :  { %2252 = vmatprep.mubr.msk.bf16.mxu0 %vm2537_vm0, %v2536_v2 }
  0xd9   :  { %990 = vmatmul.mubr.bf16.gmra.mrb[76].mxu1 %v2498_v24 }
  0xda   :  { %997 = vmatprep.mubr.bf16.mxu1 %v2499_v26  ;;  %2253 = vmatmul.mubr.bf16.gmra.mrb[92].mxu0 %v2513_v28 }
  0xdb   :  { %2256 = vmatprep.mubr.msk.bf16.mxu0 %vm2537_vm0, %v2536_v2 }
  0xe1   :  { %998 = vmatmul.mubr.bf16.gmra.mrb[80].mxu1 %v2502_v27 }
  0xe2   :  { %1005 = vmatprep.mubr.bf16.mxu1 %v2503_v29  ;;  %2257 = vmatmul.mubr.bf16.gmra.mrb[96].mxu0 %v2517_v31 }
  0xe3   :  { %2260 = vmatprep.mubr.msk.bf16.mxu0 %vm2537_vm0, %v2536_v2 }
  0xe9   :  { %1006 = vmatmul.mubr.bf16.gmra.mrb[84].mxu1 %v2506_v30 }
  0xea   :  { %1013 = vmatprep.mubr.bf16.mxu1 %v2507_v32  ;;  %2261 = vmatmul.mubr.bf16.gmra.mrb[100].mxu0 %v2521_v34 }
  0xeb   :  { %2264 = vmatprep.mubr.msk.bf16.mxu0 %vm2537_vm0, %v2536_v2 }
  0xf1   :  { %1014 = vmatmul.mubr.bf16.gmra.mrb[88].mxu1 %v2510_v33 }
  0xf2   :  { %1021 = vmatprep.mubr.bf16.mxu1 %v2511_v35  ;;  %2265 = vmatmul.mubr.bf16.gmra.mrb[104].mxu0 %v2525_v37 }
  0xf3   :  { %2268 = vmatprep.mubr.msk.bf16.mxu0 %vm2537_vm0, %v2536_v2 }
  0xf5   :  { %v1104_v39 = vpop.f32.mrb[0].mxu0 }
  0xf6   :  { %v2162_v41 = vpop.f32.mrb[1].mxu0 }
  0xf7   :  { %v1107_v44 = vpop.f32.mrb[2].mxu0 }
  0xf8   :  { %v2163_v45 = vpop.f32.mrb[3].mxu0 }
  0xf9   :  { %1022 = vmatmul.mubr.bf16.gmra.mrb[92].mxu1 %v2514_v36 }
  0xfa   :  { %1029 = vmatprep.mubr.bf16.mxu1 %v2515_v38  ;;  %2269 = vmatmul.mubr.bf16.gmra.mrb[108].mxu0 %v2529_v42 }
  0xfb   :  { %2272 = vmatprep.mubr.msk.bf16.mxu0 %vm2537_vm0, %v2536_v2 }
  0xfd   :  { %v1112_v46 = vpop.f32.mrb[4].mxu0 }
  0xfe   :  { %v2166_v48 = vpop.f32.mrb[5].mxu0 }
  0xff   :  { %v1115_v51 = vpop.f32.mrb[6].mxu0 }
 0x100   :  { %v2167_v52 = vpop.f32.mrb[7].mxu0 }
 0x101   :  { %1030 = vmatmul.mubr.bf16.gmra.mrb[96].mxu1 %v2518_v40 }
 0x102   :  { %1037 = vmatprep.mubr.bf16.mxu1 %v2519_v43  ;;  %2273 = vmatmul.mubr.bf16.gmra.mrb[112].mxu0 %v2533_v49 }
 0x105   :  { %v1120_v2 = vpop.f32.mrb[8].mxu0 }
 0x106   :  { %v2170_v54 = vpop.f32.mrb[9].mxu0 }
 0x107   :  { %v1123_v56 = vpop.f32.mrb[10].mxu0 }
 0x108   :  { %v2171_v57 = vpop.f32.mrb[11].mxu0 }
 0x109   :  { %1038 = vmatmul.mubr.bf16.gmra.mrb[100].mxu1 %v2522_v47 }
 0x10a   :  { %1045 = vmatprep.mubr.bf16.mxu1 %v2523_v50 }
 0x10d   :  { %v1128_v60 = vpop.f32.mrb[12].mxu0 }
 0x10e   :  { %v2174_v0 = vpop.f32.mrb[13].mxu0 }
 0x10f   :  { %v1131_v4 = vpop.f32.mrb[14].mxu0 }
 0x110   :  { %v2175_v8 = vpop.f32.mrb[15].mxu0 }
 0x111   :  { %1046 = vmatmul.mubr.bf16.gmra.mrb[104].mxu1 %v2526_v53 }
 0x112   :  { %1053 = vmatprep.mubr.bf16.mxu1 %v2527_v55 }
 0x114   :  { %v839_v59 = vpop.f32.mrb[0].mxu1 }
 0x115   :  { %v840_v61 = vadd.f32 %v2967_v58, %v839_v59  ;;  %v841_v62 = vpop.f32.mrb[1].mxu1  ;;  %v1136_v13 = vpop.f32.mrb[16].mxu0 }
 0x116   :  { %v842_v1 = vpop.f32.mrb[2].mxu1  ;;  %v2178_v18 = vpop.f32.mrb[17].mxu0 }
 0x117   :  { %v1105_v5 = vadd.f32 %v1104_v39, %v840_v61  ;;  %v843_v6 = vadd.f32 %v2967_v58, %v842_v1  ;;  %v844_v7 = vpop.f32.mrb[3].mxu1  ;;  %v1139_v20 = vpop.f32.mrb[18].mxu0 }
 0x118   :  { %v2179_v24 = vpop.f32.mrb[19].mxu0 }
 0x119   :  { %v1108_v9 = vadd.f32 %v1107_v44, %v843_v6  ;;  %1054 = vmatmul.mubr.bf16.gmra.mrb[108].mxu1 %v2530_v63  ;;  %v1335_v10 = vmax.f32 %v1105_v5, 0.0 }
 0x11a   :  { %1061 = vmatprep.mubr.bf16.mxu1 %v2531_v3 }
 0x11b   :  { %v1336_v11 = vmax.f32 %v1108_v9, 0.0 }
 0x11c   :  { %v847_v12 = vpop.f32.mrb[4].mxu1 }
 0x11d   :  { %v1937_v14 = vpack.c.bf16 %v1336_v11, %v1335_v10  ;;  %v848_v15 = vadd.f32 %v2967_v58, %v847_v12  ;;  %v849_v16 = vpop.f32.mrb[5].mxu1  ;;  %v1144_v29 = vpop.f32.mrb[20].mxu0 }
 0x11e   :  { %v850_v19 = vpop.f32.mrb[6].mxu1  ;;  %v2182_v33 = vpop.f32.mrb[21].mxu0 }
 0x11f   :  { %1938 = vst [vmem:[%s3126_s3] sm:$0xff] %v1937_v14   ;;  %v1113_v21 = vadd.f32 %v1112_v46, %v848_v15  ;;  %v851_v22 = vadd.f32 %v2967_v58, %v850_v19  ;;  %v852_v23 = vpop.f32.mrb[7].mxu1  ;;  %v1147_v35 = vpop.f32.mrb[22].mxu0 }
 0x120   :  { %v2183_v39 = vpop.f32.mrb[23].mxu0 }
 0x121   :  { %v1116_v25 = vadd.f32 %v1115_v51, %v851_v22  ;;  %1062 = vmatmul.mubr.bf16.gmra.mrb[112].mxu1 %v2534_v17  ;;  %v1337_v26 = vmax.f32 %v1113_v21, 0.0 }
 0x123   :  { %v1338_v27 = vmax.f32 %v1116_v25, 0.0 }
 0x124   :  { %v855_v28 = vpop.f32.mrb[8].mxu1 }
 0x125   :  { %v1942_v30 = vpack.c.bf16 %v1338_v27, %v1337_v26  ;;  %v856_v31 = vadd.f32 %v2967_v58, %v855_v28  ;;  %v857_v32 = vpop.f32.mrb[9].mxu1  ;;  %v1152_v44 = vpop.f32.mrb[24].mxu0 }
 0x126   :  { %v858_v34 = vpop.f32.mrb[10].mxu1  ;;  %v2186_v48 = vpop.f32.mrb[25].mxu0 }
 0x127   :  { %2079 = vst [vmem:[%s3126_s3 + $0x8] sm:$0xff] %v1942_v30   ;;  %v1121_v36 = vadd.f32 %v1120_v2, %v856_v31  ;;  %v859_v37 = vadd.f32 %v2967_v58, %v858_v34  ;;  %v860_v38 = vpop.f32.mrb[11].mxu1  ;;  %v1155_v50 = vpop.f32.mrb[26].mxu0 }
 0x128   :  { %v2187_v53 = vpop.f32.mrb[27].mxu0 }
 0x129   :  { %v1124_v40 = vadd.f32 %v1123_v56, %v859_v37  ;;  %v1339_v41 = vmax.f32 %v1121_v36, 0.0 }
 0x12b   :  { %v1340_v42 = vmax.f32 %v1124_v40, 0.0 }
 0x12c   :  { %v863_v43 = vpop.f32.mrb[12].mxu1 }
 0x12d   :  { %v1947_v45 = vpack.c.bf16 %v1340_v42, %v1339_v41  ;;  %v864_v46 = vadd.f32 %v2967_v58, %v863_v43  ;;  %v865_v47 = vpop.f32.mrb[13].mxu1  ;;  %v1160_v59 = vpop.f32.mrb[28].mxu0 }
 0x12e   :  { %v866_v49 = vpop.f32.mrb[14].mxu1  ;;  %v2190_v0 = vpop.f32.mrb[29].mxu0 }
 0x12f   :  { %2080 = vst [vmem:[%s3126_s3 + $0x10] sm:$0xff] %v1947_v45   ;;  %v1129_v51 = vadd.f32 %v1128_v60, %v864_v46  ;;  %v867_v52 = vadd.f32 %v2967_v58, %v866_v49  ;;  %v868_v2 = vpop.f32.mrb[15].mxu1  ;;  %v1163_v3 = vpop.f32.mrb[30].mxu0 }
 0x131   :  { %v1132_v54 = vadd.f32 %v1131_v4, %v867_v52  ;;  %v1341_v55 = vmax.f32 %v1129_v51, 0.0  ;;  %v2191_v4 = vpop.f32.mrb[31].mxu0 }
 0x133   :  { %v1342_v56 = vmax.f32 %v1132_v54, 0.0 }
 0x134   :  { %v871_v57 = vpop.f32.mrb[16].mxu1 }
 0x135   :  { %v1952_v61 = vpack.c.bf16 %v1342_v56, %v1341_v55  ;;  %v872_v62 = vadd.f32 %v2967_v58, %v871_v57  ;;  %v873_v63 = vpop.f32.mrb[17].mxu1  ;;  %v1168_v11 = vpop.f32.mrb[32].mxu0 }
 0x136   :  { %v874_v1 = vpop.f32.mrb[18].mxu1  ;;  %v2194_v16 = vpop.f32.mrb[33].mxu0 }
 0x137   :  { %2081 = vst [vmem:[%s3126_s3 + $0x18] sm:$0xff] %v1952_v61   ;;  %v1137_v60 = vadd.f32 %v1136_v13, %v872_v62  ;;  %v875_v5 = vadd.f32 %v2967_v58, %v874_v1  ;;  %v876_v6 = vpop.f32.mrb[19].mxu1  ;;  %v1171_v18 = vpop.f32.mrb[34].mxu0 }
 0x139   :  { %v1140_v7 = vadd.f32 %v1139_v20, %v875_v5  ;;  %v1343_v8 = vmax.f32 %v1137_v60, 0.0  ;;  %v2195_v20 = vpop.f32.mrb[35].mxu0 }
 0x13b   :  { %v1344_v9 = vmax.f32 %v1140_v7, 0.0 }
 0x13c   :  { %v879_v10 = vpop.f32.mrb[20].mxu1 }
 0x13d   :  { %v1957_v12 = vpack.c.bf16 %v1344_v9, %v1343_v8  ;;  %v880_v14 = vadd.f32 %v2967_v58, %v879_v10  ;;  %v881_v15 = vpop.f32.mrb[21].mxu1  ;;  %v1176_v26 = vpop.f32.mrb[36].mxu0 }
 0x13e   :  { %v882_v17 = vpop.f32.mrb[22].mxu1  ;;  %v2198_v31 = vpop.f32.mrb[37].mxu0 }
 0x13f   :  { %2082 = vst [vmem:[%s3126_s3 + $0x20] sm:$0xff] %v1957_v12   ;;  %v1145_v13 = vadd.f32 %v1144_v29, %v880_v14  ;;  %v883_v19 = vadd.f32 %v2967_v58, %v882_v17  ;;  %v884_v21 = vpop.f32.mrb[23].mxu1  ;;  %v1179_v33 = vpop.f32.mrb[38].mxu0 }
 0x141   :  { %v1148_v22 = vadd.f32 %v1147_v35, %v883_v19  ;;  %v1345_v23 = vmax.f32 %v1145_v13, 0.0  ;;  %v2199_v35 = vpop.f32.mrb[39].mxu0 }
 0x143   :  { %v1346_v24 = vmax.f32 %v1148_v22, 0.0 }
 0x144   :  { %v887_v25 = vpop.f32.mrb[24].mxu1 }
 0x145   :  { %v1962_v27 = vpack.c.bf16 %v1346_v24, %v1345_v23  ;;  %v888_v28 = vadd.f32 %v2967_v58, %v887_v25  ;;  %v889_v30 = vpop.f32.mrb[25].mxu1  ;;  %v1184_v41 = vpop.f32.mrb[40].mxu0 }
 0x146   :  { %v890_v32 = vpop.f32.mrb[26].mxu1  ;;  %v2202_v46 = vpop.f32.mrb[41].mxu0 }
 0x147   :  { %2083 = vst [vmem:[%s3126_s3 + $0x28] sm:$0xff] %v1962_v27   ;;  %v1153_v29 = vadd.f32 %v1152_v44, %v888_v28  ;;  %v891_v34 = vadd.f32 %v2967_v58, %v890_v32  ;;  %v892_v36 = vpop.f32.mrb[27].mxu1  ;;  %v1187_v48 = vpop.f32.mrb[42].mxu0 }
 0x149   :  { %v1156_v37 = vadd.f32 %v1155_v50, %v891_v34  ;;  %v1347_v38 = vmax.f32 %v1153_v29, 0.0  ;;  %v2203_v50 = vpop.f32.mrb[43].mxu0 }
 0x14b   :  { %v1348_v39 = vmax.f32 %v1156_v37, 0.0 }
 0x14c   :  { %v895_v40 = vpop.f32.mrb[28].mxu1 }
 0x14d   :  { %v1967_v42 = vpack.c.bf16 %v1348_v39, %v1347_v38  ;;  %v896_v43 = vadd.f32 %v2967_v58, %v895_v40  ;;  %v897_v45 = vpop.f32.mrb[29].mxu1  ;;  %v1192_v55 = vpop.f32.mrb[44].mxu0 }
 0x14e   :  { %v898_v47 = vpop.f32.mrb[30].mxu1  ;;  %v2206_v62 = vpop.f32.mrb[45].mxu0 }
 0x14f   :  { %2084 = vst [vmem:[%s3126_s3 + $0x30] sm:$0xff] %v1967_v42   ;;  %v1161_v44 = vadd.f32 %v1160_v59, %v896_v43  ;;  %v899_v49 = vadd.f32 %v2967_v58, %v898_v47  ;;  %v900_v51 = vpop.f32.mrb[31].mxu1  ;;  %v1195_v0 = vpop.f32.mrb[46].mxu0 }
 0x151   :  { %v1164_v52 = vadd.f32 %v1163_v3, %v899_v49  ;;  %v1349_v2 = vmax.f32 %v1161_v44, 0.0  ;;  %v2207_v3 = vpop.f32.mrb[47].mxu0 }
 0x153   :  { %v1350_v53 = vmax.f32 %v1164_v52, 0.0 }
 0x154   :  { %v903_v54 = vpop.f32.mrb[32].mxu1 }
 0x155   :  { %v1972_v56 = vpack.c.bf16 %v1350_v53, %v1349_v2  ;;  %v904_v57 = vadd.f32 %v2967_v58, %v903_v54  ;;  %v905_v61 = vpop.f32.mrb[33].mxu1  ;;  %v1200_v8 = vpop.f32.mrb[48].mxu0 }
 0x156   :  { %v906_v63 = vpop.f32.mrb[34].mxu1  ;;  %v2210_v14 = vpop.f32.mrb[49].mxu0 }
 0x157   :  { %2085 = vst [vmem:[%s3126_s3 + $0x38] sm:$0xff] %v1972_v56   ;;  %v1169_v59 = vadd.f32 %v1168_v11, %v904_v57  ;;  %v907_v1 = vadd.f32 %v2967_v58, %v906_v63  ;;  %v908_v60 = vpop.f32.mrb[35].mxu1  ;;  %v1203_v16 = vpop.f32.mrb[50].mxu0 }
 0x159   :  { %v1172_v5 = vadd.f32 %v1171_v18, %v907_v1  ;;  %v1351_v6 = vmax.f32 %v1169_v59, 0.0  ;;  %v2211_v18 = vpop.f32.mrb[51].mxu0 }
 0x15b   :  { %v1352_v4 = vmax.f32 %v1172_v5, 0.0 }
 0x15c   :  { %v911_v7 = vpop.f32.mrb[36].mxu1 }
 0x15d   :  { %v1977_v9 = vpack.c.bf16 %v1352_v4, %v1351_v6  ;;  %v912_v10 = vadd.f32 %v2967_v58, %v911_v7  ;;  %v913_v12 = vpop.f32.mrb[37].mxu1  ;;  %v1208_v23 = vpop.f32.mrb[52].mxu0 }
 0x15e   :  { %v914_v15 = vpop.f32.mrb[38].mxu1  ;;  %v2214_v28 = vpop.f32.mrb[53].mxu0 }
 0x15f   :  { %2086 = vst [vmem:[%s3126_s3 + $0x40] sm:$0xff] %v1977_v9   ;;  %v1177_v11 = vadd.f32 %v1176_v26, %v912_v10  ;;  %v915_v17 = vadd.f32 %v2967_v58, %v914_v15  ;;  %v916_v13 = vpop.f32.mrb[39].mxu1  ;;  %v1211_v31 = vpop.f32.mrb[54].mxu0 }
 0x161   :  { %v1180_v19 = vadd.f32 %v1179_v33, %v915_v17  ;;  %v1353_v21 = vmax.f32 %v1177_v11, 0.0  ;;  %v2215_v33 = vpop.f32.mrb[55].mxu0 }
 0x163   :  { %v1354_v20 = vmax.f32 %v1180_v19, 0.0 }
 0x164   :  { %v919_v22 = vpop.f32.mrb[40].mxu1 }
 0x165   :  { %v1982_v24 = vpack.c.bf16 %v1354_v20, %v1353_v21  ;;  %v920_v25 = vadd.f32 %v2967_v58, %v919_v22  ;;  %v921_v27 = vpop.f32.mrb[41].mxu1  ;;  %v1216_v38 = vpop.f32.mrb[56].mxu0 }
 0x166   :  { %v922_v30 = vpop.f32.mrb[42].mxu1  ;;  %v2218_v43 = vpop.f32.mrb[57].mxu0 }
 0x167   :  { %2087 = vst [vmem:[%s3126_s3 + $0x48] sm:$0xff] %v1982_v24   ;;  %v1185_v26 = vadd.f32 %v1184_v41, %v920_v25  ;;  %v923_v32 = vadd.f32 %v2967_v58, %v922_v30  ;;  %v924_v29 = vpop.f32.mrb[43].mxu1  ;;  %v1219_v46 = vpop.f32.mrb[58].mxu0 }
 0x169   :  { %v1188_v34 = vadd.f32 %v1187_v48, %v923_v32  ;;  %v1355_v36 = vmax.f32 %v1185_v26, 0.0  ;;  %v2219_v48 = vpop.f32.mrb[59].mxu0 }
 0x16b   :  { %v1356_v35 = vmax.f32 %v1188_v34, 0.0 }
 0x16c   :  { %v927_v37 = vpop.f32.mrb[44].mxu1 }
 0x16d   :  { %v1987_v39 = vpack.c.bf16 %v1356_v35, %v1355_v36  ;;  %v928_v40 = vadd.f32 %v2967_v58, %v927_v37  ;;  %v929_v42 = vpop.f32.mrb[45].mxu1  ;;  %v1224_v2 = vpop.f32.mrb[60].mxu0 }
 0x16e   :  { %v930_v45 = vpop.f32.mrb[46].mxu1  ;;  %v2222_v57 = vpop.f32.mrb[61].mxu0 }
 0x16f   :  { %2088 = vst [vmem:[%s3126_s3 + $0x50] sm:$0xff] %v1987_v39   ;;  %v1193_v41 = vadd.f32 %v1192_v55, %v928_v40  ;;  %v931_v47 = vadd.f32 %v2967_v58, %v930_v45  ;;  %v932_v44 = vpop.f32.mrb[47].mxu1  ;;  %v1227_v62 = vpop.f32.mrb[62].mxu0 }
 0x171   :  { %v1196_v49 = vadd.f32 %v1195_v0, %v931_v47  ;;  %v1357_v51 = vmax.f32 %v1193_v41, 0.0  ;;  %v2223_v0 = vpop.f32.mrb[63].mxu0 }
 0x173   :  { %v1358_v50 = vmax.f32 %v1196_v49, 0.0 }
 0x174   :  { %v935_v52 = vpop.f32.mrb[48].mxu1 }
 0x175   :  { %v1992_v53 = vpack.c.bf16 %v1358_v50, %v1357_v51  ;;  %v936_v54 = vadd.f32 %v2967_v58, %v935_v52  ;;  %v937_v56 = vpop.f32.mrb[49].mxu1  ;;  %v1232_v6 = vpop.f32.mrb[64].mxu0 }
 0x176   :  { %v938_v61 = vpop.f32.mrb[50].mxu1  ;;  %v2226_v10 = vpop.f32.mrb[65].mxu0 }
 0x177   :  { %2089 = vst [vmem:[%s3126_s3 + $0x58] sm:$0xff] %v1992_v53   ;;  %v1201_v55 = vadd.f32 %v1200_v8, %v936_v54  ;;  %v939_v63 = vadd.f32 %v2967_v58, %v938_v61  ;;  %v940_v59 = vpop.f32.mrb[51].mxu1  ;;  %v1235_v14 = vpop.f32.mrb[66].mxu0 }
 0x179   :  { %v1204_v1 = vadd.f32 %v1203_v16, %v939_v63  ;;  %v1359_v60 = vmax.f32 %v1201_v55, 0.0  ;;  %v2227_v16 = vpop.f32.mrb[67].mxu0 }
 0x17b   :  { %v1360_v3 = vmax.f32 %v1204_v1, 0.0 }
 0x17c   :  { %v943_v5 = vpop.f32.mrb[52].mxu1 }
 0x17d   :  { %v1997_v4 = vpack.c.bf16 %v1360_v3, %v1359_v60  ;;  %v944_v7 = vadd.f32 %v2967_v58, %v943_v5  ;;  %v945_v9 = vpop.f32.mrb[53].mxu1  ;;  %v1240_v21 = vpop.f32.mrb[68].mxu0 }
 0x17e   :  { %v946_v12 = vpop.f32.mrb[54].mxu1  ;;  %v2230_v25 = vpop.f32.mrb[69].mxu0 }
 0x17f   :  { %2090 = vst [vmem:[%s3126_s3 + $0x60] sm:$0xff] %v1997_v4   ;;  %v1209_v8 = vadd.f32 %v1208_v23, %v944_v7  ;;  %v947_v15 = vadd.f32 %v2967_v58, %v946_v12  ;;  %v948_v11 = vpop.f32.mrb[55].mxu1  ;;  %v1243_v28 = vpop.f32.mrb[70].mxu0 }
 0x181   :  { %v1212_v17 = vadd.f32 %v1211_v31, %v947_v15  ;;  %v1361_v13 = vmax.f32 %v1209_v8, 0.0  ;;  %v2231_v31 = vpop.f32.mrb[71].mxu0 }
 0x183   :  { %v1362_v18 = vmax.f32 %v1212_v17, 0.0 }
 0x184   :  { %v951_v19 = vpop.f32.mrb[56].mxu1 }
 0x185   :  { %v2002_v20 = vpack.c.bf16 %v1362_v18, %v1361_v13  ;;  %v952_v22 = vadd.f32 %v2967_v58, %v951_v19  ;;  %v953_v24 = vpop.f32.mrb[57].mxu1  ;;  %v1248_v36 = vpop.f32.mrb[72].mxu0 }
 0x186   :  { %v954_v27 = vpop.f32.mrb[58].mxu1  ;;  %v2234_v40 = vpop.f32.mrb[73].mxu0 }
 0x187   :  { %2091 = vst [vmem:[%s3126_s3 + $0x68] sm:$0xff] %v2002_v20   ;;  %v1217_v23 = vadd.f32 %v1216_v38, %v952_v22  ;;  %v955_v30 = vadd.f32 %v2967_v58, %v954_v27  ;;  %v956_v26 = vpop.f32.mrb[59].mxu1  ;;  %v1251_v43 = vpop.f32.mrb[74].mxu0 }
 0x189   :  { %v1220_v32 = vadd.f32 %v1219_v46, %v955_v30  ;;  %v1363_v29 = vmax.f32 %v1217_v23, 0.0  ;;  %v2235_v46 = vpop.f32.mrb[75].mxu0 }
 0x18b   :  { %v1364_v33 = vmax.f32 %v1220_v32, 0.0 }
 0x18c   :  { %v959_v34 = vpop.f32.mrb[60].mxu1 }
 0x18d   :  { %v2007_v35 = vpack.c.bf16 %v1364_v33, %v1363_v29  ;;  %v960_v37 = vadd.f32 %v2967_v58, %v959_v34  ;;  %v961_v39 = vpop.f32.mrb[61].mxu1  ;;  %v1256_v51 = vpop.f32.mrb[76].mxu0 }
 0x18e   :  { %v962_v42 = vpop.f32.mrb[62].mxu1  ;;  %v2238_v54 = vpop.f32.mrb[77].mxu0 }
 0x18f   :  { %2092 = vst [vmem:[%s3126_s3 + $0x70] sm:$0xff] %v2007_v35   ;;  %v1225_v38 = vadd.f32 %v1224_v2, %v960_v37  ;;  %v963_v45 = vadd.f32 %v2967_v58, %v962_v42  ;;  %v964_v41 = vpop.f32.mrb[63].mxu1  ;;  %v1259_v57 = vpop.f32.mrb[78].mxu0 }
 0x191   :  { %v1228_v47 = vadd.f32 %v1227_v62, %v963_v45  ;;  %v1365_v44 = vmax.f32 %v1225_v38, 0.0  ;;  %v2239_v62 = vpop.f32.mrb[79].mxu0 }
 0x193   :  { %v1366_v48 = vmax.f32 %v1228_v47, 0.0 }
 0x194   :  { %v967_v49 = vpop.f32.mrb[64].mxu1 }
 0x195   :  { %v2012_v50 = vpack.c.bf16 %v1366_v48, %v1365_v44  ;;  %v968_v52 = vadd.f32 %v2967_v58, %v967_v49  ;;  %v969_v53 = vpop.f32.mrb[65].mxu1  ;;  %v1264_v60 = vpop.f32.mrb[80].mxu0 }
 0x196   :  { %v970_v56 = vpop.f32.mrb[66].mxu1  ;;  %v2242_v7 = vpop.f32.mrb[81].mxu0 }
 0x197   :  { %2093 = vst [vmem:[%s3126_s3 + $0x78] sm:$0xff] %v2012_v50   ;;  %v1233_v2 = vadd.f32 %v1232_v6, %v968_v52  ;;  %v971_v61 = vadd.f32 %v2967_v58, %v970_v56  ;;  %v972_v55 = vpop.f32.mrb[67].mxu1  ;;  %v1267_v10 = vpop.f32.mrb[82].mxu0 }
 0x199   :  { %v1236_v63 = vadd.f32 %v1235_v14, %v971_v61  ;;  %v1367_v59 = vmax.f32 %v1233_v2, 0.0  ;;  %v2243_v14 = vpop.f32.mrb[83].mxu0 }
 0x19b   :  { %v1368_v0 = vmax.f32 %v1236_v63, 0.0 }
 0x19c   :  { %v975_v1 = vpop.f32.mrb[68].mxu1 }
 0x19d   :  { %v2017_v3 = vpack.c.bf16 %v1368_v0, %v1367_v59  ;;  %v976_v5 = vadd.f32 %v2967_v58, %v975_v1  ;;  %v977_v4 = vpop.f32.mrb[69].mxu1  ;;  %v1272_v13 = vpop.f32.mrb[84].mxu0 }
 0x19e   :  { %v978_v9 = vpop.f32.mrb[70].mxu1  ;;  %v2246_v22 = vpop.f32.mrb[85].mxu0 }
 0x19f   :  { %2094 = vst [vmem:[%s3126_s3 + $0x80] sm:$0xff] %v2017_v3   ;;  %v1241_v6 = vadd.f32 %v1240_v21, %v976_v5  ;;  %v979_v12 = vadd.f32 %v2967_v58, %v978_v9  ;;  %v980_v8 = vpop.f32.mrb[71].mxu1  ;;  %v1275_v25 = vpop.f32.mrb[86].mxu0 }
 0x1a1   :  { %v1244_v15 = vadd.f32 %v1243_v28, %v979_v12  ;;  %v1369_v11 = vmax.f32 %v1241_v6, 0.0  ;;  %v2247_v28 = vpop.f32.mrb[87].mxu0 }
 0x1a3   :  { %v1370_v16 = vmax.f32 %v1244_v15, 0.0 }
 0x1a4   :  { %v983_v17 = vpop.f32.mrb[72].mxu1 }
 0x1a5   :  { %v2022_v18 = vpack.c.bf16 %v1370_v16, %v1369_v11  ;;  %v984_v19 = vadd.f32 %v2967_v58, %v983_v17  ;;  %v985_v20 = vpop.f32.mrb[73].mxu1  ;;  %v1280_v29 = vpop.f32.mrb[88].mxu0 }
 0x1a6   :  { %v986_v24 = vpop.f32.mrb[74].mxu1  ;;  %v2250_v37 = vpop.f32.mrb[89].mxu0 }
 0x1a7   :  { %2095 = vst [vmem:[%s3126_s3 + $0x88] sm:$0xff] %v2022_v18   ;;  %v1249_v21 = vadd.f32 %v1248_v36, %v984_v19  ;;  %v987_v27 = vadd.f32 %v2967_v58, %v986_v24  ;;  %v988_v23 = vpop.f32.mrb[75].mxu1  ;;  %v1283_v40 = vpop.f32.mrb[90].mxu0 }
 0x1a9   :  { %v1252_v30 = vadd.f32 %v1251_v43, %v987_v27  ;;  %v1371_v26 = vmax.f32 %v1249_v21, 0.0  ;;  %v2251_v43 = vpop.f32.mrb[91].mxu0 }
 0x1ab   :  { %v1372_v31 = vmax.f32 %v1252_v30, 0.0 }
 0x1ac   :  { %v991_v32 = vpop.f32.mrb[76].mxu1 }
 0x1ad   :  { %v2027_v33 = vpack.c.bf16 %v1372_v31, %v1371_v26  ;;  %v992_v34 = vadd.f32 %v2967_v58, %v991_v32  ;;  %v993_v35 = vpop.f32.mrb[77].mxu1  ;;  %v1288_v44 = vpop.f32.mrb[92].mxu0 }
 0x1ae   :  { %v994_v39 = vpop.f32.mrb[78].mxu1  ;;  %v2254_v52 = vpop.f32.mrb[93].mxu0 }
 0x1af   :  { %2096 = vst [vmem:[%s3126_s3 + $0x90] sm:$0xff] %v2027_v33   ;;  %v1257_v36 = vadd.f32 %v1256_v51, %v992_v34  ;;  %v995_v42 = vadd.f32 %v2967_v58, %v994_v39  ;;  %v996_v38 = vpop.f32.mrb[79].mxu1  ;;  %v1291_v54 = vpop.f32.mrb[94].mxu0 }
 0x1b1   :  { %v1260_v45 = vadd.f32 %v1259_v57, %v995_v42  ;;  %v1373_v41 = vmax.f32 %v1257_v36, 0.0  ;;  %v2255_v57 = vpop.f32.mrb[95].mxu0 }
 0x1b3   :  { %v1374_v46 = vmax.f32 %v1260_v45, 0.0 }
 0x1b4   :  { %v999_v47 = vpop.f32.mrb[80].mxu1 }
 0x1b5   :  { %v2032_v48 = vpack.c.bf16 %v1374_v46, %v1373_v41  ;;  %v1000_v49 = vadd.f32 %v2967_v58, %v999_v47  ;;  %v1001_v50 = vpop.f32.mrb[81].mxu1  ;;  %v1296_v59 = vpop.f32.mrb[96].mxu0 }
 0x1b6   :  { %v1002_v53 = vpop.f32.mrb[82].mxu1  ;;  %v2258_v5 = vpop.f32.mrb[97].mxu0 }
 0x1b7   :  { %2097 = vst [vmem:[%s3126_s3 + $0x98] sm:$0xff] %v2032_v48   ;;  %v1265_v51 = vadd.f32 %v1264_v60, %v1000_v49  ;;  %v1003_v56 = vadd.f32 %v2967_v58, %v1002_v53  ;;  %v1004_v2 = vpop.f32.mrb[83].mxu1  ;;  %v1299_v7 = vpop.f32.mrb[98].mxu0 }
 0x1b9   :  { %v1268_v61 = vadd.f32 %v1267_v10, %v1003_v56  ;;  %v1375_v55 = vmax.f32 %v1265_v51, 0.0  ;;  %v2259_v10 = vpop.f32.mrb[99].mxu0 }
 0x1bb   :  { %v1376_v62 = vmax.f32 %v1268_v61, 0.0 }
 0x1bc   :  { %v1007_v63 = vpop.f32.mrb[84].mxu1 }
 0x1bd   :  { %v2037_v0 = vpack.c.bf16 %v1376_v62, %v1375_v55  ;;  %v1008_v1 = vadd.f32 %v2967_v58, %v1007_v63  ;;  %v1009_v3 = vpop.f32.mrb[85].mxu1  ;;  %v1304_v11 = vpop.f32.mrb[100].mxu0 }
 0x1be   :  { %v1010_v4 = vpop.f32.mrb[86].mxu1  ;;  %v2262_v19 = vpop.f32.mrb[101].mxu0 }
 0x1bf   :  { %2098 = vst [vmem:[%s3126_s3 + $0xa0] sm:$0xff] %v2037_v0   ;;  %v1273_v60 = vadd.f32 %v1272_v13, %v1008_v1  ;;  %v1011_v9 = vadd.f32 %v2967_v58, %v1010_v4  ;;  %v1012_v6 = vpop.f32.mrb[87].mxu1  ;;  %v1307_v22 = vpop.f32.mrb[102].mxu0 }
 0x1c1   :  { %v1276_v12 = vadd.f32 %v1275_v25, %v1011_v9  ;;  %v1377_v8 = vmax.f32 %v1273_v60, 0.0  ;;  %v2263_v25 = vpop.f32.mrb[103].mxu0 }
 0x1c3   :  { %v1378_v14 = vmax.f32 %v1276_v12, 0.0 }
 0x1c4   :  { %v1015_v15 = vpop.f32.mrb[88].mxu1 }
 0x1c5   :  { %v2042_v16 = vpack.c.bf16 %v1378_v14, %v1377_v8  ;;  %v1016_v17 = vadd.f32 %v2967_v58, %v1015_v15  ;;  %v1017_v18 = vpop.f32.mrb[89].mxu1  ;;  %v1312_v26 = vpop.f32.mrb[104].mxu0 }
 0x1c6   :  { %v1018_v20 = vpop.f32.mrb[90].mxu1  ;;  %v2266_v34 = vpop.f32.mrb[105].mxu0 }
 0x1c7   :  { %2099 = vst [vmem:[%s3126_s3 + $0xa8] sm:$0xff] %v2042_v16   ;;  %v1281_v13 = vadd.f32 %v1280_v29, %v1016_v17  ;;  %v1019_v24 = vadd.f32 %v2967_v58, %v1018_v20  ;;  %v1020_v21 = vpop.f32.mrb[91].mxu1  ;;  %v1315_v37 = vpop.f32.mrb[106].mxu0 }
 0x1c9   :  { %v1284_v27 = vadd.f32 %v1283_v40, %v1019_v24  ;;  %v1379_v23 = vmax.f32 %v1281_v13, 0.0  ;;  %v2267_v40 = vpop.f32.mrb[107].mxu0 }
 0x1cb   :  { %v1380_v28 = vmax.f32 %v1284_v27, 0.0 }
 0x1cc   :  { %v1023_v30 = vpop.f32.mrb[92].mxu1 }
 0x1cd   :  { %v2047_v31 = vpack.c.bf16 %v1380_v28, %v1379_v23  ;;  %v1024_v32 = vadd.f32 %v2967_v58, %v1023_v30  ;;  %v1025_v33 = vpop.f32.mrb[93].mxu1  ;;  %v1320_v41 = vpop.f32.mrb[108].mxu0 }
 0x1ce   :  { %v1026_v35 = vpop.f32.mrb[94].mxu1  ;;  %v2270_v49 = vpop.f32.mrb[109].mxu0 }
 0x1cf   :  { %2100 = vst [vmem:[%s3126_s3 + $0xb0] sm:$0xff] %v2047_v31   ;;  %v1289_v29 = vadd.f32 %v1288_v44, %v1024_v32  ;;  %v1027_v39 = vadd.f32 %v2967_v58, %v1026_v35  ;;  %v1028_v36 = vpop.f32.mrb[95].mxu1  ;;  %v1323_v52 = vpop.f32.mrb[110].mxu0 }
 0x1d1   :  { %v1292_v42 = vadd.f32 %v1291_v54, %v1027_v39  ;;  %v1381_v38 = vmax.f32 %v1289_v29, 0.0  ;;  %v2271_v54 = vpop.f32.mrb[111].mxu0 }
 0x1d3   :  { %v1382_v43 = vmax.f32 %v1292_v42, 0.0 }
 0x1d4   :  { %v1031_v45 = vpop.f32.mrb[96].mxu1 }
 0x1d5   :  { %v2052_v46 = vpack.c.bf16 %v1382_v43, %v1381_v38  ;;  %v1032_v47 = vadd.f32 %v2967_v58, %v1031_v45  ;;  %v1033_v48 = vpop.f32.mrb[97].mxu1  ;;  %v1328_v55 = vpop.f32.mrb[112].mxu0 }
 0x1d6   :  { %v1034_v50 = vpop.f32.mrb[98].mxu1  ;;  %v2274_v1 = vpop.f32.mrb[113].mxu0 }
 0x1d7   :  { %2101 = vst [vmem:[%s3126_s3 + $0xb8] sm:$0xff] %v2052_v46   ;;  %v1297_v44 = vadd.f32 %v1296_v59, %v1032_v47  ;;  %v1035_v53 = vadd.f32 %v2967_v58, %v1034_v50  ;;  %v1036_v51 = vpop.f32.mrb[99].mxu1  ;;  %v1331_v5 = vpop.f32.mrb[114].mxu0 }
 0x1d9   :  { %v1300_v56 = vadd.f32 %v1299_v7, %v1035_v53  ;;  %v1383_v2 = vmax.f32 %v1297_v44, 0.0  ;;  %v2275_v7 = vpop.f32.mrb[115].mxu0 }
 0x1db   :  { %v1384_v57 = vmax.f32 %v1300_v56, 0.0 }
 0x1dc   :  { %v1039_v61 = vpop.f32.mrb[100].mxu1 }
 0x1dd   :  { %v2057_v62 = vpack.c.bf16 %v1384_v57, %v1383_v2  ;;  %v1040_v63 = vadd.f32 %v2967_v58, %v1039_v61  ;;  %v1041_v0 = vpop.f32.mrb[101].mxu1 }
 0x1de   :  { %v1042_v3 = vpop.f32.mrb[102].mxu1 }
 0x1df   :  { %2102 = vst [vmem:[%s3126_s3 + $0xc0] sm:$0xff] %v2057_v62   ;;  %v1305_v59 = vadd.f32 %v1304_v11, %v1040_v63  ;;  %v1043_v4 = vadd.f32 %v2967_v58, %v1042_v3  ;;  %v1044_v60 = vpop.f32.mrb[103].mxu1 }
 0x1e1   :  { %v1308_v9 = vadd.f32 %v1307_v22, %v1043_v4  ;;  %v1385_v6 = vmax.f32 %v1305_v59, 0.0 }
 0x1e3   :  { %v1386_v10 = vmax.f32 %v1308_v9, 0.0 }
 0x1e4   :  { %v1047_v12 = vpop.f32.mrb[104].mxu1 }
 0x1e5   :  { %v2062_v8 = vpack.c.bf16 %v1386_v10, %v1385_v6  ;;  %v1048_v14 = vadd.f32 %v2967_v58, %v1047_v12  ;;  %v1049_v15 = vpop.f32.mrb[105].mxu1 }
 0x1e6   :  { %v1050_v16 = vpop.f32.mrb[106].mxu1 }
 0x1e7   :  { %2103 = vst [vmem:[%s3126_s3 + $0xc8] sm:$0xff] %v2062_v8   ;;  %v1313_v17 = vadd.f32 %v1312_v26, %v1048_v14  ;;  %v1051_v11 = vadd.f32 %v2967_v58, %v1050_v16  ;;  %v1052_v18 = vpop.f32.mrb[107].mxu1 }
 0x1e9   :  { %v1316_v19 = vadd.f32 %v1315_v37, %v1051_v11  ;;  %v1387_v20 = vmax.f32 %v1313_v17, 0.0 }
 0x1eb   :  { %v1388_v13 = vmax.f32 %v1316_v19, 0.0 }
 0x1ec   :  { %v1055_v22 = vpop.f32.mrb[108].mxu1 }
 0x1ed   :  { %v2067_v24 = vpack.c.bf16 %v1388_v13, %v1387_v20  ;;  %v1056_v21 = vadd.f32 %v2967_v58, %v1055_v22  ;;  %v1057_v25 = vpop.f32.mrb[109].mxu1 }
 0x1ee   :  { %v1058_v27 = vpop.f32.mrb[110].mxu1 }
 0x1ef   :  { %2104 = vst [vmem:[%s3126_s3 + $0xd0] sm:$0xff] %v2067_v24   ;;  %v1321_v23 = vadd.f32 %v1320_v41, %v1056_v21  ;;  %v1059_v28 = vadd.f32 %v2967_v58, %v1058_v27  ;;  %v1060_v30 = vpop.f32.mrb[111].mxu1 }
 0x1f1   :  { %v1324_v26 = vadd.f32 %v1323_v52, %v1059_v28  ;;  %v1389_v31 = vmax.f32 %v1321_v23, 0.0 }
 0x1f3   :  { %v1390_v32 = vmax.f32 %v1324_v26, 0.0 }
 0x1f4   :  { %v1063_v33 = vpop.f32.mrb[112].mxu1 }
 0x1f5   :  { %v2072_v34 = vpack.c.bf16 %v1390_v32, %v1389_v31  ;;  %v1064_v35 = vadd.f32 %v2967_v58, %v1063_v33  ;;  %v1065_v37 = vpop.f32.mrb[113].mxu1 }
 0x1f6   :  { %v1066_v29 = vpop.f32.mrb[114].mxu1 }
 0x1f7   :  { %2105 = vst [vmem:[%s3126_s3 + $0xd8] sm:$0xff] %v2072_v34   ;;  %v1329_v39 = vadd.f32 %v1328_v55, %v1064_v35  ;;  %v1067_v36 = vadd.f32 %v2967_v58, %v1066_v29  ;;  %v1068_v40 = vpop.f32.mrb[115].mxu1 }
 0x1f9   :  { %v1332_v42 = vadd.f32 %v1331_v5, %v1067_v36  ;;  %v1391_v38 = vmax.f32 %v1329_v39, 0.0 }
 0x1fb   :  { %v1392_v43 = vmax.f32 %v1332_v42, 0.0 }
 0x1fd   :  { %v2077_v45 = vpack.c.bf16 %v1392_v43, %v1391_v38 }
 0x1ff   :  { %2106 = vst [vmem:[%s3126_s3 + $0xe0] sm:$0xff] %v2077_v45  }

// kernel: features_forward.10
= control target key start
LH: loop header
LB: loop body
LE: loop exit
PB: predicated region body
PF: predicated region fallthrough
CT: control target
= control target key end

     0   :  { %s2894_s12 = smov 0   ;;  %s2896_s13 = smov 0   ;;  %s3234_s0 = inlined_call_operand.vmem [shape: bf16[2,112,1280], index: 0, kind: input, shape index: {}]   ;;  %s3235_s1 = inlined_call_operand.vmem [shape: bf16[2,1280,128], index: 1, kind: input, shape index: {}]   ;;  %s3236_s2 = inlined_call_operand.vmem [shape: f32[2,1,128], index: 2, kind: input, shape index: {}]   ;;  %s3237_s3 = inlined_call_operand.vmem [shape: bf16[112,256], index: 3, kind: output, shape index: {}]  }
   0x1   :  { %s2898_s14 = smov 0   ;;  %s2900_s15 = smov 0  }
   0x2   :  { %s2902_s16 = smov 0  }
   0x3 LB: > { %s2070_s17 = sadd.s32 4294967295, %s2872_s16   ;;  %s32_s18 = sadd.s32 1, %s2868_s15  ;;  %s2872_s16 = sphi %s2902_s16, %s13_s16   ;;  %s2868_s15 = sphi %s2900_s15, %s3242_s15   ;;  %s2864_s14 = sphi %s2898_s14, %s3241_s14   ;;  %s2860_s13 = sphi %s2896_s13, %s3240_s13   ;;  %s2856_s12 = sphi %s2894_s12, %s3239_s12  }
   0x4   : > { %p34_p0 = scmp.ge.s32.totalorder %s32_s18, 2  ;;  %s127_s19 = sadd.s32 1, %s2860_s13 }
   0x5   : > { %p137_p1 = scmp.ne.s32.totalorder %s2860_s13, %s2856_s12  ;;  %p138_p2 = scmp.eq.s32.totalorder %s2070_s17, 1 }
   0x6   : > { %s3244_s18 = smov (%p34_p0, %s32_s18), 0  ;;  %p2074_p4 = scmp.ge.s32.totalorder %s2872_s16, 1 }
   0x7   : > { %p2926_p3 = por %p138_p2, %p137_p1  ;;  %s123_s21 = ssub.s32 %s2868_s15, %s3244_s18 }
   0x8   : > { %p196_p5 = scmp.lt.s32.totalorder %s2872_s16, 3  ;;  %p125_p6 = scmp.eq.s32.totalorder %s123_s21, 0 }
   0xa   : > { %p197_p7 = pnand %p2074_p4, %p196_p5 }
   0xb   : > { %s2935_s22 = scalar_select %p125_p6, %s2860_s13, %s127_s19  }
   0xc   : > { %200 = sbr.rel (%p197_p7) target bundleno = 427 (0x1ab), region = 32  ;;  %p239_p8 = scmp.lt.s32.totalorder (!%p197_p7), %s2864_s14, 1 }
   0xd   : > { %s235_s8 = sand.u32 (!%p197_p7), 1, %s2856_s12  }
   0xe   : > { %s2606_s9 = smul.u32 (!%p197_p7), 56, %s235_s8 }
  0x10   : > { %s3179_s10 = scalar_lea.vmem (!%p197_p7), [#allocation2], %s2606_s9 }
  0x13   : > { %s2939_s23 = scalar_select %p239_p8, %s2864_s14, 1 }
  0x14   : > { %s2242_s11 = sshll.u32 (%p2926_p3), %s2864_s14, 2 }
  0x15   : > { %s2608_s24 = smul.u32 640, %s2939_s23  ;;  %s262_s7 = scalar_lea.vmem %s3236_s2, %s2939_s23 }
  0x16   : > { %s2607_s28 = smul.u32 560, %s2939_s23  ;;  %s1874_s19 = scalar_lea.vmem (%p2926_p3), %s3237_s3, %s2242_s11 }
  0x17   : > { %s2945_s27 = scalar_lea.vmem %s3235_s1, %s2608_s24 }
  0x18   : > { %v2649_v0 = vld [vmem:[%s2945_s27 + $0x40] sm:$0xff]   ;;  %v2651_v2 = vld [vmem:[%s2945_s27 + $0x48] sm:$0xff]   ;;  %v2653_v4 = vld [vmem:[%s2945_s27 + $0x50] sm:$0xff]   ;;  %s2960_s4 = scalar_lea.vmem %s3234_s0, %s2607_s28 }
  0x19   : > { %v2650_v1 = vld [vmem:[%s2945_s27] sm:$0xff]   ;;  %2300 = vmatprep.subr.bf16.mxu0 %v2649_v0  ;;  %2590 = vmatprep.subr.bf16.mxu1 %v2649_v0  ;;  %v2652_v3 = vld [vmem:[%s2945_s27 + $0x8] sm:$0xff]   ;;  %v2654_v5 = vld [vmem:[%s2945_s27 + $0x10] sm:$0xff]  }
  0x1a   : > { %2301 = vmatpush3.bf16.msra.mxu0 %v2650_v1  ;;  %2598 = vmatpush3.bf16.msra.mxu1 %v2650_v1  ;;  %v2655_v6 = vld [vmem:[%s2945_s27 + $0x58] sm:$0xff]   ;;  %v2657_v8 = vld [vmem:[%s2945_s27 + $0x60] sm:$0xff]   ;;  %v2659_v10 = vld [vmem:[%s2945_s27 + $0x68] sm:$0xff]  }
  0x1b   : > { %2302 = vmatprep.subr.bf16.mxu0 %v2651_v2  ;;  %2591 = vmatprep.subr.bf16.mxu1 %v2651_v2  ;;  %v2656_v7 = vld [vmem:[%s2945_s27 + $0x18] sm:$0xff]   ;;  %v2658_v9 = vld [vmem:[%s2945_s27 + $0x20] sm:$0xff]   ;;  %v2660_v13 = vld [vmem:[%s2945_s27 + $0x28] sm:$0xff]  }
  0x1c   : > { %v2667_v11 = vld [vmem:[%s2960_s4 + $0x4] ss:$40 sps:$4 sm:$0xff]   ;;  %v2661_v14 = vld [vmem:[%s2945_s27 + $0x70] sm:$0xff]   ;;  %v2663_v16 = vld [vmem:[%s2945_s27 + $0x78] sm:$0xff]  }
  0x1d   : > { %v2670_v12 = vld [vmem:[%s2960_s4 + $0x144] ss:$40 sps:$4 sm:$0xff]   ;;  %1365 = vmatprep.mubr.bf16.mxu0 %v2667_v11  ;;  %v2662_v15 = vld [vmem:[%s2945_s27 + $0x30] sm:$0xff]   ;;  %v2664_v17 = vld [vmem:[%s2945_s27 + $0x38] sm:$0xff]  }
  0x1e   : > { %2303 = vmatpush3.bf16.msra.mxu0 %v2652_v3  ;;  %2599 = vmatpush3.bf16.msra.mxu1 %v2652_v3  ;;  %v2671_v18 = vld [vmem:[%s2945_s27 + $0xc0] sm:$0xff]   ;;  %v2675_v24 = vld [vmem:[%s2945_s27 + $0xc8] sm:$0xff]   ;;  %v2679_v28 = vld [vmem:[%s2960_s4 + $0x54] ss:$40 sps:$4 sm:$0xff]  }
  0x1f   : > { %2304 = vmatprep.subr.bf16.mxu0 %v2653_v4  ;;  %2592 = vmatprep.subr.bf16.mxu1 %v2653_v4  ;;  %v2665_v19 = vld [vmem:[%s2960_s4] ss:$40 sps:$4 sm:$0xff]   ;;  %v2688_v29 = vld [vmem:[%s2960_s4 + $0x194] ss:$40 sps:$4 sm:$0xff]   ;;  %v2681_v31 = vld [vmem:[%s2960_s4 + $0x50] ss:$40 sps:$4 sm:$0xff]  }
  0x20   : > { %1397 = vmatprep.mubr.bf16.mxu1 %v2670_v12  ;;  %v2668_v20 = vld [vmem:[%s2960_s4 + $0x140] ss:$40 sps:$4 sm:$0xff]   ;;  %v2682_v30 = vld [vmem:[%s2945_s27 + $0xd0] sm:$0xff]   ;;  %v2686_v36 = vld [vmem:[%s2945_s27 + $0xd8] sm:$0xff]  }
  0x21   : > { %v2672_v21 = vld [vmem:[%s2945_s27 + $0x140] sm:$0xff]   ;;  %v2676_v25 = vld [vmem:[%s2945_s27 + $0x148] sm:$0xff]   ;;  %v2683_v32 = vld [vmem:[%s2945_s27 + $0x150] sm:$0xff]  }
  0x22   : > { %2305 = vmatpush3.bf16.msra.mxu0 %v2654_v5  ;;  %2600 = vmatpush3.bf16.msra.mxu1 %v2654_v5  ;;  %v2673_v22 = vld [vmem:[%s2945_s27 + $0x80] sm:$0xff]   ;;  %v2677_v26 = vld [vmem:[%s2945_s27 + $0x88] sm:$0xff]   ;;  %v2684_v33 = vld [vmem:[%s2945_s27 + $0x90] sm:$0xff]  }
  0x23   : > { %2306 = vmatprep.subr.bf16.mxu0 %v2655_v6  ;;  %2593 = vmatprep.subr.bf16.mxu1 %v2655_v6  ;;  %v2674_v23 = vld [vmem:[%s2945_s27 + $0x100] sm:$0xff]   ;;  %v2678_v27 = vld [vmem:[%s2945_s27 + $0x108] sm:$0xff]   ;;  %v2685_v34 = vld [vmem:[%s2945_s27 + $0x110] sm:$0xff]  }
  0x24   : > { %v2692_v35 = vld [vmem:[%s2960_s4 + $0x190] ss:$40 sps:$4 sm:$0xff]   ;;  %v2693_v39 = vld [vmem:[%s2960_s4 + $0xa4] ss:$40 sps:$4 sm:$0xff]   ;;  %v2695_v42 = vld [vmem:[%s2960_s4 + $0xa0] ss:$40 sps:$4 sm:$0xff]  }
  0x25   : > { %v2687_v37 = vld [vmem:[%s2945_s27 + $0x158] sm:$0xff]   ;;  %v2696_v41 = vld [vmem:[%s2945_s27 + $0xe0] sm:$0xff]   ;;  %v2700_v47 = vld [vmem:[%s2945_s27 + $0xe8] sm:$0xff]  }
  0x26   : > { %2307 = vmatpush3.bf16.msra.mxu0 %v2656_v7  ;;  %2601 = vmatpush3.bf16.msra.mxu1 %v2656_v7  ;;  %v2690_v38 = vld [vmem:[%s2945_s27 + $0x98] sm:$0xff]   ;;  %v2697_v43 = vld [vmem:[%s2945_s27 + $0x160] sm:$0xff]   ;;  %v2701_v49 = vld [vmem:[%s2945_s27 + $0x168] sm:$0xff]  }
  0x27   : > { %2308 = vmatprep.subr.bf16.mxu0 %v2657_v8  ;;  %2594 = vmatprep.subr.bf16.mxu1 %v2657_v8  ;;  %v2691_v40 = vld [vmem:[%s2945_s27 + $0x118] sm:$0xff]   ;;  %v2698_v44 = vld [vmem:[%s2945_s27 + $0xa0] sm:$0xff]   ;;  %v2704_v50 = vld [vmem:[%s2945_s27 + $0xa8] sm:$0xff]  }
  0x28   : > { %v2702_v45 = vld [vmem:[%s2960_s4 + $0x1e4] ss:$40 sps:$4 sm:$0xff]   ;;  %v2706_v48 = vld [vmem:[%s2960_s4 + $0x1e0] ss:$40 sps:$4 sm:$0xff]   ;;  %v2707_v51 = vld [vmem:[%s2960_s4 + $0xf4] ss:$40 sps:$4 sm:$0xff]  }
  0x29   : > { %v2699_v46 = vld [vmem:[%s2945_s27 + $0x120] sm:$0xff]   ;;  %v2705_v52 = vld [vmem:[%s2945_s27 + $0x128] sm:$0xff]   ;;  %v2710_v53 = vld [vmem:[%s2945_s27 + $0xf0] sm:$0xff]  }
  0x2a   : > { %2309 = vmatpush3.bf16.msra.mxu0 %v2658_v9  ;;  %2602 = vmatpush3.bf16.msra.mxu1 %v2658_v9  ;;  %v2709_v54 = vld [vmem:[%s2960_s4 + $0xf0] ss:$40 sps:$4 sm:$0xff]   ;;  %v2720_v61 = vld [vmem:[%s2960_s4 + $0xc] ss:$40 sps:$4 sm:$0xff]   ;;  %v2724_v2 = vld [vmem:[%s2945_s27 + $0x1c0] sm:$0xff]  }
  0x2b   : > { %2310 = vmatprep.subr.bf16.mxu0 %v2659_v10  ;;  %2595 = vmatprep.subr.bf16.mxu1 %v2659_v10  ;;  %v2711_v55 = vld [vmem:[%s2945_s27 + $0x170] sm:$0xff]   ;;  %v2714_v58 = vld [vmem:[%s2945_s27 + $0xf8] sm:$0xff]   ;;  %v2725_v3 = vld [vmem:[%s2945_s27 + $0x180] sm:$0xff]  }
  0x2c   : > { %v2712_v56 = vld [vmem:[%s2945_s27 + $0xb0] sm:$0xff]   ;;  %v2715_v59 = vld [vmem:[%s2945_s27 + $0x178] sm:$0xff]   ;;  %v2726_v4 = vld [vmem:[%s2945_s27 + $0x240] sm:$0xff]  }
  0x2d   : > { %v2713_v57 = vld [vmem:[%s2945_s27 + $0x130] sm:$0xff]   ;;  %v2716_v60 = vld [vmem:[%s2945_s27 + $0xb8] sm:$0xff]   ;;  %v2727_v5 = vld [vmem:[%s2945_s27 + $0x200] sm:$0xff]  }
  0x2e   : > { %2311 = vmatpush3.bf16.msra.mxu0 %v2660_v13  ;;  %2603 = vmatpush3.bf16.msra.mxu1 %v2660_v13  ;;  %v2717_v62 = vld [vmem:[%s2945_s27 + $0x138] sm:$0xff]   ;;  %v2718_v0 = vld [vmem:[%s2960_s4 + $0x8] ss:$40 sps:$4 sm:$0xff]   ;;  %v2730_v7 = vld [vmem:[%s2960_s4 + $0x64] ss:$40 sps:$4 sm:$0xff]  }
  0x2f   : > { %2312 = vmatprep.subr.bf16.mxu0 %v2661_v14  ;;  %2596 = vmatprep.subr.bf16.mxu1 %v2661_v14  ;;  %v2723_v63 = vld [vmem:[%s2960_s4 + $0x14] ss:$40 sps:$4 sm:$0xff]   ;;  %v2721_v1 = vld [vmem:[%s2960_s4 + $0x10] ss:$40 sps:$4 sm:$0xff]   ;;  %v2732_v8 = vld [vmem:[%s2945_s27 + $0x1c8] sm:$0xff]  }
  0x30   : > { %v2728_v6 = vld [vmem:[%s2960_s4 + $0x5c] ss:$40 sps:$4 sm:$0xff]   ;;  %v2733_v9 = vld [vmem:[%s2960_s4 + $0x58] ss:$40 sps:$4 sm:$0xff]   ;;  %v2735_v11 = vld [vmem:[%s2945_s27 + $0x188] sm:$0xff]  }
  0x31   : > { %v2734_v10 = vld [vmem:[%s2960_s4 + $0x60] ss:$40 sps:$4 sm:$0xff]   ;;  %v2738_v14 = vld [vmem:[%s2945_s27 + $0x1d0] sm:$0xff]  }
  0x32   : > { %2313 = vmatpush3.bf16.msra.mxu0 %v2662_v15  ;;  %2604 = vmatpush3.bf16.msra.mxu1 %v2662_v15  ;;  %v2736_v12 = vld [vmem:[%s2945_s27 + $0x248] sm:$0xff]  }
  0x33   : > { %2314 = vmatprep.subr.bf16.mxu0 %v2663_v16  ;;  %2597 = vmatprep.subr.bf16.mxu1 %v2663_v16  ;;  %v2737_v13 = vld [vmem:[%s2945_s27 + $0x208] sm:$0xff]   ;;  %v2741_v16 = vld [vmem:[%s2960_s4 + $0xb4] ss:$40 sps:$4 sm:$0xff]  }
  0x34   : > { %v2739_v15 = vld [vmem:[%s2960_s4 + $0xac] ss:$40 sps:$4 sm:$0xff]  }
  0x36   : > { %2315 = vmatpush3.bf16.msra.mxu0 %v2664_v17  ;;  %2605 = vmatpush3.bf16.msra.mxu1 %v2664_v17  ;;  %v2743_v17 = vld [vmem:[%s2945_s27 + $0x190] sm:$0xff]  }
  0x37   : > { %2358 = vmatprep.subr.bf16.mxu1 %v2671_v18  ;;  %2416 = vmatprep.subr.bf16.mxu0 %v2672_v21  ;;  %v2744_v18 = vld [vmem:[%s2960_s4 + $0xa8] ss:$40 sps:$4 sm:$0xff]  }
  0x38   : > { %v2747_v21 = vld [vmem:[%s2945_s27 + $0x210] sm:$0xff]  }
  0x39   : > { %1366 = vmatmul.mubr.bf16.vlgmr.msra.gmra.mrb[0].mxu0 %v2665_v19  ;;  %1398 = vmatmul.mubr.bf16.vlgmr.msra.gmra.mrb[0].mxu1 %v2668_v20  ;;  %v2745_v19 = vld [vmem:[%s2960_s4 + $0xb0] ss:$40 sps:$4 sm:$0xff]  }
  0x3a   : > { %2359 = vmatpush3.bf16.msra.mxu1 %v2673_v22  ;;  %2417 = vmatpush3.bf16.msra.mxu0 %v2674_v23  ;;  %v2746_v20 = vld [vmem:[%s2945_s27 + $0x250] sm:$0xff]   ;;  %v2748_v22 = vld [vmem:[%s2945_s27 + $0x1d8] sm:$0xff]  }
  0x3b   : > { %2360 = vmatprep.subr.bf16.mxu1 %v2675_v24  ;;  %2418 = vmatprep.subr.bf16.mxu0 %v2676_v25  ;;  %v2749_v23 = vld [vmem:[%s2945_s27 + $0x198] sm:$0xff]   ;;  %v2752_v25 = vld [vmem:[%s2960_s4 + $0x104] ss:$40 sps:$4 sm:$0xff]  }
  0x3c   : > { %1373 = vmatprep.mubr.bf16.mxu0 %v2679_v28  ;;  %1405 = vmatprep.mubr.bf16.mxu1 %v2688_v29  ;;  %v2750_v24 = vld [vmem:[%s2960_s4 + $0xfc] ss:$40 sps:$4 sm:$0xff]   ;;  %v2755_v28 = vld [vmem:[%s2960_s4 + $0xf8] ss:$40 sps:$4 sm:$0xff]  }
  0x3d   : > { %v2756_v29 = vld [vmem:[%s2960_s4 + $0x100] ss:$40 sps:$4 sm:$0xff]  }
  0x3e   : > { %2361 = vmatpush3.bf16.msra.mxu1 %v2677_v26  ;;  %2419 = vmatpush3.bf16.msra.mxu0 %v2678_v27  ;;  %v2754_v26 = vld [vmem:[%s2945_s27 + $0x258] sm:$0xff]  }
  0x3f   : > { %2362 = vmatprep.subr.bf16.mxu1 %v2682_v30  ;;  %2420 = vmatprep.subr.bf16.mxu0 %v2683_v32  ;;  %v2757_v27 = vld [vmem:[%s2945_s27 + $0x218] sm:$0xff]   ;;  %v2758_v30 = vld [vmem:[%s2945_s27 + $0x1e0] sm:$0xff]  }
  0x40   : > { %v2760_v32 = vld [vmem:[%s2945_s27 + $0x260] sm:$0xff]  }
  0x41   : > { %1374 = vmatmul.mubr.bf16.gmra.mrb[4].mxu0 %v2681_v31  ;;  %1406 = vmatmul.mubr.bf16.gmra.mrb[4].mxu1 %v2692_v35  ;;  %v2759_v31 = vld [vmem:[%s2945_s27 + $0x1a0] sm:$0xff]  }
  0x42   : > { %2363 = vmatpush3.bf16.msra.mxu1 %v2684_v33  ;;  %2421 = vmatpush3.bf16.msra.mxu0 %v2685_v34  ;;  %v2761_v33 = vld [vmem:[%s2960_s4 + $0x14c] ss:$40 sps:$4 sm:$0xff]   ;;  %v2765_v35 = vld [vmem:[%s2945_s27 + $0x220] sm:$0xff]  }
  0x43   : > { %2364 = vmatprep.subr.bf16.mxu1 %v2686_v36  ;;  %2422 = vmatprep.subr.bf16.mxu0 %v2687_v37  ;;  %v2763_v34 = vld [vmem:[%s2960_s4 + $0x154] ss:$40 sps:$4 sm:$0xff]   ;;  %v2768_v36 = vld [vmem:[%s2945_s27 + $0x1e8] sm:$0xff]  }
  0x44   : > { %1381 = vmatprep.mubr.bf16.mxu0 %v2693_v39  ;;  %1413 = vmatprep.mubr.bf16.mxu1 %v2702_v45  ;;  %v2766_v37 = vld [vmem:[%s2960_s4 + $0x148] ss:$40 sps:$4 sm:$0xff]  }
  0x45   : > { %v2769_v39 = vld [vmem:[%s2945_s27 + $0x1a8] sm:$0xff]   ;;  %v2779_v45 = vld [vmem:[%s2945_s27 + $0x1b0] sm:$0xff]  }
  0x46   : > { %2365 = vmatpush3.bf16.msra.mxu1 %v2690_v38  ;;  %2423 = vmatpush3.bf16.msra.mxu0 %v2691_v40  ;;  %v2767_v38 = vld [vmem:[%s2960_s4 + $0x150] ss:$40 sps:$4 sm:$0xff]   ;;  %v2770_v40 = vld [vmem:[%s2945_s27 + $0x268] sm:$0xff]  }
  0x47   : > { %2366 = vmatprep.subr.bf16.mxu1 %v2696_v41  ;;  %2424 = vmatprep.subr.bf16.mxu0 %v2697_v43  ;;  %v2771_v41 = vld [vmem:[%s2945_s27 + $0x228] sm:$0xff]  }
  0x48   : > { %v2774_v43 = vld [vmem:[%s2960_s4 + $0x1a4] ss:$40 sps:$4 sm:$0xff]  }
  0x49   : > { %1382 = vmatmul.mubr.bf16.gmra.mrb[8].mxu0 %v2695_v42  ;;  %1414 = vmatmul.mubr.bf16.gmra.mrb[8].mxu1 %v2706_v48  ;;  %v2772_v42 = vld [vmem:[%s2960_s4 + $0x19c] ss:$40 sps:$4 sm:$0xff]   ;;  %v2781_v48 = vld [vmem:[%s2945_s27 + $0x230] sm:$0xff]  }
  0x4a   : > { %2367 = vmatpush3.bf16.msra.mxu1 %v2698_v44  ;;  %2425 = vmatpush3.bf16.msra.mxu0 %v2699_v46  ;;  %v2778_v44 = vld [vmem:[%s2945_s27 + $0x1f0] sm:$0xff]   ;;  %v2776_v46 = vld [vmem:[%s2960_s4 + $0x198] ss:$40 sps:$4 sm:$0xff]  }
  0x4b   : > { %2368 = vmatprep.subr.bf16.mxu1 %v2700_v47  ;;  %2426 = vmatprep.subr.bf16.mxu0 %v2701_v49  ;;  %v2780_v47 = vld [vmem:[%s2945_s27 + $0x270] sm:$0xff]   ;;  %v2777_v49 = vld [vmem:[%s2960_s4 + $0x1a0] ss:$40 sps:$4 sm:$0xff]  }
  0x4c   : > { %1389 = vmatprep.mubr.bf16.mxu0 %v2707_v51  ;;  %1454 = vmatprep.mubr.bf16.mxu1 %v2720_v61  ;;  %v2784_v51 = vld [vmem:[%s2960_s4 + $0x1f4] ss:$40 sps:$4 sm:$0xff]   ;;  %v2795_v61 = vld [vmem:[%s2960_s4 + $0x20] ss:$40 sps:$4 sm:$0xff]  }
  0x4e   : > { %2369 = vmatpush3.bf16.msra.mxu1 %v2704_v50  ;;  %2427 = vmatpush3.bf16.msra.mxu0 %v2705_v52  ;;  %v2782_v50 = vld [vmem:[%s2960_s4 + $0x1ec] ss:$40 sps:$4 sm:$0xff]   ;;  %v2788_v52 = vld [vmem:[%s2945_s27 + $0x1f8] sm:$0xff]  }
  0x4f   : > { %2370 = vmatprep.subr.bf16.mxu1 %v2710_v53  ;;  %2428 = vmatprep.subr.bf16.mxu0 %v2711_v55  ;;  %v2789_v53 = vld [vmem:[%s2945_s27 + $0x1b8] sm:$0xff]  }
  0x50   : > { %v2791_v55 = vld [vmem:[%s2945_s27 + $0x238] sm:$0xff]  }
  0x51   : > { %1390 = vmatmul.mubr.bf16.gmra.mrb[12].mxu0 %v2709_v54  ;;  %v2790_v54 = vld [vmem:[%s2945_s27 + $0x278] sm:$0xff]  }
  0x52   : > { %2371 = vmatpush3.bf16.msra.mxu1 %v2712_v56  ;;  %2429 = vmatpush3.bf16.msra.mxu0 %v2713_v57  ;;  %v2786_v56 = vld [vmem:[%s2960_s4 + $0x1e8] ss:$40 sps:$4 sm:$0xff]  }
  0x53   : > { %2372 = vmatprep.subr.bf16.mxu1 %v2714_v58  ;;  %2430 = vmatprep.subr.bf16.mxu0 %v2715_v59  ;;  %v2787_v57 = vld [vmem:[%s2960_s4 + $0x1f0] ss:$40 sps:$4 sm:$0xff]   ;;  %v2794_v58 = vld [vmem:[%s2960_s4 + $0x1c] ss:$40 sps:$4 sm:$0xff]  }
  0x54   : > { %1543 = vmatprep.mubr.bf16.mxu0 %v2723_v63  ;;  %v2797_v59 = vld [vmem:[%s2960_s4 + $0x24] ss:$40 sps:$4 sm:$0xff]   ;;  %v2800_v63 = vld [vmem:[%s2960_s4 + $0x74] ss:$40 sps:$4 sm:$0xff]  }
  0x56   : > { %2373 = vmatpush3.bf16.msra.mxu1 %v2716_v60  ;;  %2431 = vmatpush3.bf16.msra.mxu0 %v2717_v62  ;;  %v2792_v60 = vld [vmem:[%s2960_s4 + $0x18] ss:$40 sps:$4 sm:$0xff]   ;;  %v2798_v62 = vld [vmem:[%s2960_s4 + $0x6c] ss:$40 sps:$4 sm:$0xff]  }
  0x57   : > { %2474 = vmatprep.subr.bf16.mxu1 %v2724_v2  ;;  %2532 = vmatprep.subr.bf16.mxu0 %v2726_v4  ;;  %v2804_v2 = vld [vmem:[%s2960_s4 + $0xbc] ss:$40 sps:$4 sm:$0xff]   ;;  %v2808_v4 = vld [vmem:[%s2960_s4 + $0xb8] ss:$40 sps:$4 sm:$0xff]  }
  0x59   : > { %1455 = vmatmul.mubr.bf16.vlgmr.msra.gmra.mrb[12].mxu1 %v2718_v0  ;;  %1544 = vmatmul.mubr.bf16.vlgmr.msra.gmra.mrb[16].mxu0 %v2721_v1  ;;  %v2802_v0 = vld [vmem:[%s2960_s4 + $0x68] ss:$40 sps:$4 sm:$0xff]  }
  0x5a   : > { %2475 = vmatpush3.bf16.msra.mxu1 %v2725_v3  ;;  %2533 = vmatpush3.bf16.msra.mxu0 %v2727_v5  ;;  %v2803_v1 = vld [vmem:[%s2960_s4 + $0x70] ss:$40 sps:$4 sm:$0xff]   ;;  %v2806_v3 = vld [vmem:[%s2960_s4 + $0xc4] ss:$40 sps:$4 sm:$0xff]   ;;  %v2809_v5 = vld [vmem:[%s2960_s4 + $0xc0] ss:$40 sps:$4 sm:$0xff]  }
  0x5b   : > { %1462 = vmatprep.mubr.bf16.mxu1 %v2728_v6  ;;  %1551 = vmatprep.mubr.bf16.mxu0 %v2730_v7  ;;  %v2810_v6 = vld [vmem:[%s2960_s4 + $0x10c] ss:$40 sps:$4 sm:$0xff]  }
  0x5c   : > { %2476 = vmatprep.subr.bf16.mxu1 %v2732_v8  ;;  %2534 = vmatprep.subr.bf16.mxu0 %v2736_v12  ;;  %v2812_v7 = vld [vmem:[%s2960_s4 + $0x114] ss:$40 sps:$4 sm:$0xff]   ;;  %v2814_v8 = vld [vmem:[%s2960_s4 + $0x108] ss:$40 sps:$4 sm:$0xff]   ;;  %v2820_v12 = vld [vmem:[%s2960_s4 + $0x158] ss:$40 sps:$4 sm:$0xff]  }
  0x5e   : > { %2477 = vmatpush3.bf16.msra.mxu1 %v2735_v11  ;;  %2535 = vmatpush3.bf16.msra.mxu0 %v2737_v13  ;;  %v2818_v11 = vld [vmem:[%s2960_s4 + $0x164] ss:$40 sps:$4 sm:$0xff]   ;;  %v2821_v13 = vld [vmem:[%s2960_s4 + $0x160] ss:$40 sps:$4 sm:$0xff]  }
  0x5f   : > { %2478 = vmatprep.subr.bf16.mxu1 %v2738_v14  ;;  %2536 = vmatprep.subr.bf16.mxu0 %v2746_v20  ;;  %v2822_v14 = vld [vmem:[%s2960_s4 + $0x1ac] ss:$40 sps:$4 sm:$0xff]   ;;  %v2832_v20 = vld [vmem:[%s2960_s4 + $0x1f8] ss:$40 sps:$4 sm:$0xff]  }
  0x61   : > { %1463 = vmatmul.mubr.bf16.gmra.mrb[16].mxu1 %v2733_v9  ;;  %1552 = vmatmul.mubr.bf16.gmra.mrb[20].mxu0 %v2734_v10  ;;  %v2815_v9 = vld [vmem:[%s2960_s4 + $0x110] ss:$40 sps:$4 sm:$0xff]   ;;  %v2816_v10 = vld [vmem:[%s2960_s4 + $0x15c] ss:$40 sps:$4 sm:$0xff]  }
  0x62   : > { %1470 = vmatprep.mubr.bf16.mxu1 %v2739_v15  ;;  %1559 = vmatprep.mubr.bf16.mxu0 %v2741_v16  ;;  %v2824_v15 = vld [vmem:[%s2960_s4 + $0x1b4] ss:$40 sps:$4 sm:$0xff]   ;;  %v2826_v16 = vld [vmem:[%s2960_s4 + $0x1a8] ss:$40 sps:$4 sm:$0xff]  }
  0x63   : > { %2479 = vmatpush3.bf16.msra.mxu1 %v2743_v17  ;;  %2537 = vmatpush3.bf16.msra.mxu0 %v2747_v21  ;;  %v2827_v17 = vld [vmem:[%s2960_s4 + $0x1b0] ss:$40 sps:$4 sm:$0xff]   ;;  %v2833_v21 = vld [vmem:[%s2960_s4 + $0x200] ss:$40 sps:$4 sm:$0xff]  }
  0x64   : > { %2480 = vmatprep.subr.bf16.mxu1 %v2748_v22  ;;  %2538 = vmatprep.subr.bf16.mxu0 %v2754_v26 }
  0x67   : > { %2481 = vmatpush3.bf16.msra.mxu1 %v2749_v23  ;;  %2539 = vmatpush3.bf16.msra.mxu0 %v2757_v27 }
  0x68   : > { %2482 = vmatprep.subr.bf16.mxu1 %v2758_v30  ;;  %2540 = vmatprep.subr.bf16.mxu0 %v2760_v32 }
  0x69   : > { %1471 = vmatmul.mubr.bf16.gmra.mrb[20].mxu1 %v2744_v18  ;;  %1560 = vmatmul.mubr.bf16.gmra.mrb[24].mxu0 %v2745_v19  ;;  %v2828_v18 = vld [vmem:[%s2960_s4 + $0x1fc] ss:$40 sps:$4 sm:$0xff]  }
  0x6a   : > { %1478 = vmatprep.mubr.bf16.mxu1 %v2750_v24  ;;  %1567 = vmatprep.mubr.bf16.mxu0 %v2752_v25  ;;  %v2830_v19 = vld [vmem:[%s2960_s4 + $0x204] ss:$40 sps:$4 sm:$0xff]  }
  0x6b   : > { %2483 = vmatpush3.bf16.msra.mxu1 %v2759_v31  ;;  %2541 = vmatpush3.bf16.msra.mxu0 %v2765_v35 }
  0x6c   : > { %2484 = vmatprep.subr.bf16.mxu1 %v2768_v36  ;;  %2542 = vmatprep.subr.bf16.mxu0 %v2770_v40 }
  0x6f   : > { %2485 = vmatpush3.bf16.msra.mxu1 %v2769_v39  ;;  %2543 = vmatpush3.bf16.msra.mxu0 %v2771_v41 }
  0x70   : > { %2486 = vmatprep.subr.bf16.mxu1 %v2778_v44  ;;  %2544 = vmatprep.subr.bf16.mxu0 %v2780_v47 }
  0x71   : > { %1479 = vmatmul.mubr.bf16.gmra.mrb[24].mxu1 %v2755_v28  ;;  %1568 = vmatmul.mubr.bf16.gmra.mrb[28].mxu0 %v2756_v29 }
  0x72   : > { %1486 = vmatprep.mubr.bf16.mxu1 %v2761_v33  ;;  %1575 = vmatprep.mubr.bf16.mxu0 %v2763_v34 }
  0x73   : > { %2487 = vmatpush3.bf16.msra.mxu1 %v2779_v45  ;;  %2545 = vmatpush3.bf16.msra.mxu0 %v2781_v48 }
  0x74   : > { %2488 = vmatprep.subr.bf16.mxu1 %v2788_v52  ;;  %2546 = vmatprep.subr.bf16.mxu0 %v2790_v54 }
  0x77   : > { %2489 = vmatpush3.bf16.msra.mxu1 %v2789_v53  ;;  %2547 = vmatpush3.bf16.msra.mxu0 %v2791_v55 }
  0x79   : > { %1487 = vmatmul.mubr.bf16.gmra.mrb[28].mxu1 %v2766_v37  ;;  %1576 = vmatmul.mubr.bf16.gmra.mrb[32].mxu0 %v2767_v38 }
  0x7a   : > { %1494 = vmatprep.mubr.bf16.mxu1 %v2772_v42  ;;  %1583 = vmatprep.mubr.bf16.mxu0 %v2774_v43 }
  0x81   : > { %1495 = vmatmul.mubr.bf16.gmra.mrb[32].mxu1 %v2776_v46  ;;  %1584 = vmatmul.mubr.bf16.gmra.mrb[36].mxu0 %v2777_v49 }
  0x82   : > { %1502 = vmatprep.mubr.bf16.mxu1 %v2782_v50  ;;  %1591 = vmatprep.mubr.bf16.mxu0 %v2784_v51 }
  0x89   : > { %1503 = vmatmul.mubr.bf16.gmra.mrb[36].mxu1 %v2786_v56  ;;  %1592 = vmatmul.mubr.bf16.gmra.mrb[40].mxu0 %v2787_v57 }
  0x8a   : > { %1632 = vmatprep.mubr.bf16.mxu1 %v2794_v58  ;;  %1721 = vmatprep.mubr.bf16.mxu0 %v2797_v59 }
  0x91   : > { %1633 = vmatmul.mubr.bf16.vlgmr.msra.gmra.mrb[40].mxu1 %v2792_v60  ;;  %1722 = vmatmul.mubr.bf16.vlgmr.msra.gmra.mrb[44].mxu0 %v2795_v61 }
  0x92   : > { %1640 = vmatprep.mubr.bf16.mxu1 %v2798_v62  ;;  %1729 = vmatprep.mubr.bf16.mxu0 %v2800_v63 }
  0x99   : > { %1641 = vmatmul.mubr.bf16.gmra.mrb[44].mxu1 %v2802_v0  ;;  %1730 = vmatmul.mubr.bf16.gmra.mrb[48].mxu0 %v2803_v1  ;;  %v3123_v0 = vld [vmem:[%s262_s7] ss:$0 sm:$0xff] }
  0x9a   : > { %1648 = vmatprep.mubr.bf16.mxu1 %v2804_v2  ;;  %1737 = vmatprep.mubr.bf16.mxu0 %v2806_v3 }
  0xa1   : > { %1649 = vmatmul.mubr.bf16.gmra.mrb[48].mxu1 %v2808_v4  ;;  %1738 = vmatmul.mubr.bf16.gmra.mrb[52].mxu0 %v2809_v5 }
  0xa2   : > { %1656 = vmatprep.mubr.bf16.mxu1 %v2810_v6  ;;  %1745 = vmatprep.mubr.bf16.mxu0 %v2812_v7 }
  0xa9   : > { %1657 = vmatmul.mubr.bf16.gmra.mrb[52].mxu1 %v2814_v8  ;;  %1746 = vmatmul.mubr.bf16.gmra.mrb[56].mxu0 %v2815_v9 }
  0xaa   : > { %1664 = vmatprep.mubr.bf16.mxu1 %v2816_v10  ;;  %1753 = vmatprep.mubr.bf16.mxu0 %v2818_v11 }
  0xb1   : > { %1665 = vmatmul.mubr.bf16.gmra.mrb[56].mxu1 %v2820_v12  ;;  %1754 = vmatmul.mubr.bf16.gmra.mrb[60].mxu0 %v2821_v13 }
  0xb2   : > { %1672 = vmatprep.mubr.bf16.mxu1 %v2822_v14  ;;  %1761 = vmatprep.mubr.bf16.mxu0 %v2824_v15 }
  0xb9   : > { %1673 = vmatmul.mubr.bf16.gmra.mrb[60].mxu1 %v2826_v16  ;;  %1762 = vmatmul.mubr.bf16.gmra.mrb[64].mxu0 %v2827_v17 }
  0xba   : > { %1680 = vmatprep.mubr.bf16.mxu1 %v2828_v18  ;;  %1769 = vmatprep.mubr.bf16.mxu0 %v2830_v19 }
  0xc1   : > { %1681 = vmatmul.mubr.bf16.gmra.mrb[64].mxu1 %v2832_v20  ;;  %1770 = vmatmul.mubr.bf16.gmra.mrb[68].mxu0 %v2833_v21 }
 0x10c   : > { %v2316_v22 = vpop.f32.mrb[0].mxu0  ;;  %v2340_v23 = vpop.f32.mrb[0].mxu1 }
 0x10d   : > { %v2317_v24 = vpop.f32.mrb[1].mxu0  ;;  %v2341_v25 = vpop.f32.mrb[1].mxu1 }
 0x10e   : > { %v2318_v26 = vadd.f32 %v2317_v24, %v2316_v22  ;;  %v3103_v27 = vadd.f32 %v2341_v25, %v2340_v23  ;;  %v2319_v28 = vpop.f32.mrb[2].mxu0  ;;  %v2343_v29 = vpop.f32.mrb[2].mxu1 }
 0x10f   : > { %v2320_v30 = vpop.f32.mrb[3].mxu0  ;;  %v2344_v31 = vpop.f32.mrb[3].mxu1 }
 0x110   : > { %v2321_v32 = vadd.f32 %v2320_v30, %v2319_v28  ;;  %v3105_v33 = vadd.f32 %v2344_v31, %v2343_v29  ;;  %v1368_v5 = vadd.f32 %v2318_v26, %v3123_v0 }
 0x112   : > { %v1371_v12 = vadd.f32 %v2321_v32, %v3123_v0 }
 0x114   : > { %v2322_v34 = vpop.f32.mrb[4].mxu0  ;;  %v2346_v35 = vpop.f32.mrb[4].mxu1 }
 0x115   : > { %v2323_v36 = vpop.f32.mrb[5].mxu0  ;;  %v2347_v37 = vpop.f32.mrb[5].mxu1 }
 0x116   : > { %v2324_v38 = vadd.f32 %v2323_v36, %v2322_v34  ;;  %v2325_v39 = vpop.f32.mrb[6].mxu0  ;;  %v3107_v40 = vadd.f32 %v2347_v37, %v2346_v35  ;;  %v2349_v41 = vpop.f32.mrb[6].mxu1 }
 0x117   : > { %v2326_v42 = vpop.f32.mrb[7].mxu0  ;;  %v2350_v43 = vpop.f32.mrb[7].mxu1 }
 0x118   : > { %v2327_v44 = vadd.f32 %v2326_v42, %v2325_v39  ;;  %v3109_v45 = vadd.f32 %v2350_v43, %v2349_v41  ;;  %v1376_v23 = vadd.f32 %v2324_v38, %v3123_v0 }
 0x11a   : > { %v1379_v31 = vadd.f32 %v2327_v44, %v3123_v0 }
 0x11c   : > { %v2328_v46 = vpop.f32.mrb[8].mxu0  ;;  %v2352_v47 = vpop.f32.mrb[8].mxu1 }
 0x11d   : > { %v2329_v48 = vpop.f32.mrb[9].mxu0  ;;  %v2353_v49 = vpop.f32.mrb[9].mxu1 }
 0x11e   : > { %v2330_v50 = vadd.f32 %v2329_v48, %v2328_v46  ;;  %v2331_v51 = vpop.f32.mrb[10].mxu0  ;;  %v3111_v52 = vadd.f32 %v2353_v49, %v2352_v47  ;;  %v2355_v53 = vpop.f32.mrb[10].mxu1 }
 0x11f   : > { %v2332_v54 = vpop.f32.mrb[11].mxu0  ;;  %v2356_v55 = vpop.f32.mrb[11].mxu1 }
 0x120   : > { %v2333_v56 = vadd.f32 %v2332_v54, %v2331_v51  ;;  %v3113_v57 = vadd.f32 %v2356_v55, %v2355_v53  ;;  %v1384_v46 = vadd.f32 %v2330_v50, %v3123_v0 }
 0x122   : > { %v1387_v54 = vadd.f32 %v2333_v56, %v3123_v0 }
 0x124   : > { %v2334_v58 = vpop.f32.mrb[12].mxu0 }
 0x125   : > { %v2335_v59 = vpop.f32.mrb[13].mxu0 }
 0x126   : > { %v3115_v60 = vadd.f32 %v2335_v59, %v2334_v58  ;;  %v2337_v61 = vpop.f32.mrb[14].mxu0 }
 0x127   : > { %v2338_v62 = vpop.f32.mrb[15].mxu0 }
 0x128   : > { %v3121_v63 = vadd.f32 %v2338_v62, %v2337_v61 }
 0x12c   : > { %v2374_v1 = vpop.f32.mrb[12].mxu1  ;;  %v2432_v2 = vpop.f32.mrb[16].mxu0 }
 0x12d   : > { %v2375_v3 = vpop.f32.mrb[13].mxu1  ;;  %v2433_v4 = vpop.f32.mrb[17].mxu0 }
 0x12e   : > { %v2376_v6 = vadd.f32 %v2375_v3, %v2374_v1  ;;  %v2434_v7 = vadd.f32 %v2433_v4, %v2432_v2  ;;  %v2377_v8 = vpop.f32.mrb[14].mxu1  ;;  %v2435_v9 = vpop.f32.mrb[18].mxu0 }
 0x12f   : > { %v2378_v10 = vpop.f32.mrb[15].mxu1  ;;  %v2436_v11 = vpop.f32.mrb[19].mxu0 }
 0x130   : > { %v1457_v13 = vadd.f32 %v2376_v6, %v1368_v5  ;;  %v2379_v14 = vadd.f32 %v2378_v10, %v2377_v8  ;;  %v2437_v15 = vadd.f32 %v2436_v11, %v2435_v9  ;;  %v1392_v5 = vadd.f32 %v3115_v60, %v3123_v0 }
 0x131   : > { %v1395_v11 = vadd.f32 %v3121_v63, %v3123_v0 }
 0x132   : > { %v3127_v16 = vadd.f32 %v2434_v7, %v1457_v13  ;;  %v1460_v17 = vadd.f32 %v2379_v14, %v1371_v12 }
 0x134   : > { %v3129_v18 = vadd.f32 %v2437_v15, %v1460_v17  ;;  %v2380_v19 = vpop.f32.mrb[16].mxu1  ;;  %v2438_v20 = vpop.f32.mrb[20].mxu0 }
 0x135   : > { %v2381_v21 = vpop.f32.mrb[17].mxu1  ;;  %v2439_v22 = vpop.f32.mrb[21].mxu0 }
 0x136   : > { %v2382_v24 = vadd.f32 %v2381_v21, %v2380_v19  ;;  %v2440_v25 = vadd.f32 %v2439_v22, %v2438_v20  ;;  %v2383_v26 = vpop.f32.mrb[18].mxu1  ;;  %v2441_v28 = vpop.f32.mrb[22].mxu0 }
 0x137   : > { %v2384_v29 = vpop.f32.mrb[19].mxu1  ;;  %v2442_v30 = vpop.f32.mrb[23].mxu0 }
 0x138   : > { %v1465_v32 = vadd.f32 %v2382_v24, %v1376_v23  ;;  %v2385_v34 = vadd.f32 %v2384_v29, %v2383_v26  ;;  %v2443_v35 = vadd.f32 %v2442_v30, %v2441_v28  ;;  %v1400_v23 = vadd.f32 %v3103_v27, %v3123_v0 }
 0x139   : > { %v1403_v30 = vadd.f32 %v3105_v33, %v3123_v0 }
 0x13a   : > { %v3133_v36 = vadd.f32 %v2440_v25, %v1465_v32  ;;  %v1468_v37 = vadd.f32 %v2385_v34, %v1379_v31 }
 0x13c   : > { %v3135_v39 = vadd.f32 %v2443_v35, %v1468_v37  ;;  %v2386_v41 = vpop.f32.mrb[20].mxu1  ;;  %v2444_v42 = vpop.f32.mrb[24].mxu0 }
 0x13d   : > { %v2387_v43 = vpop.f32.mrb[21].mxu1  ;;  %v2445_v38 = vpop.f32.mrb[25].mxu0 }
 0x13e   : > { %v2388_v47 = vadd.f32 %v2387_v43, %v2386_v41  ;;  %v2446_v48 = vadd.f32 %v2445_v38, %v2444_v42  ;;  %v2389_v49 = vpop.f32.mrb[22].mxu1  ;;  %v2447_v51 = vpop.f32.mrb[26].mxu0 }
 0x13f   : > { %v2390_v53 = vpop.f32.mrb[23].mxu1  ;;  %v2448_v44 = vpop.f32.mrb[27].mxu0 }
 0x140   : > { %v1473_v55 = vadd.f32 %v2388_v47, %v1384_v46  ;;  %v2391_v58 = vadd.f32 %v2390_v53, %v2389_v49  ;;  %v2449_v59 = vadd.f32 %v2448_v44, %v2447_v51  ;;  %v1408_v46 = vadd.f32 %v3107_v40, %v3123_v0 }
 0x141   : > { %v1411_v44 = vadd.f32 %v3109_v45, %v3123_v0 }
 0x142   : > { %v3139_v61 = vadd.f32 %v2446_v48, %v1473_v55  ;;  %v1476_v62 = vadd.f32 %v2391_v58, %v1387_v54 }
 0x144   : > { %v3141_v1 = vadd.f32 %v2449_v59, %v1476_v62  ;;  %v2392_v2 = vpop.f32.mrb[24].mxu1  ;;  %v2450_v3 = vpop.f32.mrb[28].mxu0 }
 0x145   : > { %v2393_v4 = vpop.f32.mrb[25].mxu1  ;;  %v2451_v50 = vpop.f32.mrb[29].mxu0 }
 0x146   : > { %v2394_v6 = vadd.f32 %v2393_v4, %v2392_v2  ;;  %v2452_v7 = vadd.f32 %v2451_v50, %v2450_v3  ;;  %v2395_v8 = vpop.f32.mrb[26].mxu1  ;;  %v2453_v9 = vpop.f32.mrb[30].mxu0 }
 0x147   : > { %v2396_v56 = vpop.f32.mrb[27].mxu1  ;;  %v2454_v10 = vpop.f32.mrb[31].mxu0 }
 0x148   : > { %v1481_v12 = vadd.f32 %v2394_v6, %v1392_v5  ;;  %v2397_v13 = vadd.f32 %v2396_v56, %v2395_v8  ;;  %v2455_v14 = vadd.f32 %v2454_v10, %v2453_v9  ;;  %v1416_v5 = vadd.f32 %v3111_v52, %v3123_v0 }
 0x149   : > { %v1419_v10 = vadd.f32 %v3113_v57, %v3123_v0 }
 0x14a   : > { %v3147_v15 = vadd.f32 %v2452_v7, %v1481_v12  ;;  %v1484_v17 = vadd.f32 %v2397_v13, %v1395_v11 }
 0x14c   : > { %v3149_v19 = vadd.f32 %v2455_v14, %v1484_v17  ;;  %v2398_v20 = vpop.f32.mrb[28].mxu1  ;;  %v2456_v21 = vpop.f32.mrb[32].mxu0 }
 0x14d   : > { %v2399_v60 = vpop.f32.mrb[29].mxu1  ;;  %v2457_v22 = vpop.f32.mrb[33].mxu0 }
 0x14e   : > { %v2400_v24 = vadd.f32 %v2399_v60, %v2398_v20  ;;  %v2458_v25 = vadd.f32 %v2457_v22, %v2456_v21  ;;  %v2401_v26 = vpop.f32.mrb[30].mxu1  ;;  %v2459_v28 = vpop.f32.mrb[34].mxu0 }
 0x14f   : > { %v2402_v63 = vpop.f32.mrb[31].mxu1  ;;  %v2460_v29 = vpop.f32.mrb[35].mxu0 }
 0x150   : > { %v1489_v31 = vadd.f32 %v2400_v24, %v1400_v23  ;;  %v2403_v32 = vadd.f32 %v2402_v63, %v2401_v26  ;;  %v2461_v34 = vadd.f32 %v2460_v29, %v2459_v28 }
 0x152   : > { %v3155_v35 = vadd.f32 %v2458_v25, %v1489_v31  ;;  %v1492_v37 = vadd.f32 %v2403_v32, %v1403_v30 }
 0x154   : > { %v3157_v41 = vadd.f32 %v2461_v34, %v1492_v37  ;;  %v2404_v42 = vpop.f32.mrb[32].mxu1  ;;  %v2462_v43 = vpop.f32.mrb[36].mxu0 }
 0x155   : > { %v2405_v27 = vpop.f32.mrb[33].mxu1  ;;  %v2463_v38 = vpop.f32.mrb[37].mxu0 }
 0x156   : > { %v2406_v47 = vadd.f32 %v2405_v27, %v2404_v42  ;;  %v2464_v48 = vadd.f32 %v2463_v38, %v2462_v43  ;;  %v2407_v49 = vpop.f32.mrb[34].mxu1  ;;  %v2465_v51 = vpop.f32.mrb[38].mxu0 }
 0x157   : > { %v2408_v33 = vpop.f32.mrb[35].mxu1  ;;  %v2466_v53 = vpop.f32.mrb[39].mxu0 }
 0x158   : > { %v1497_v54 = vadd.f32 %v2406_v47, %v1408_v46  ;;  %v2409_v55 = vadd.f32 %v2408_v33, %v2407_v49  ;;  %v2467_v58 = vadd.f32 %v2466_v53, %v2465_v51 }
 0x15a   : > { %v3163_v59 = vadd.f32 %v2464_v48, %v1497_v54  ;;  %v1500_v62 = vadd.f32 %v2409_v55, %v1411_v44 }
 0x15c   : > { %v3165_v2 = vadd.f32 %v2467_v58, %v1500_v62  ;;  %v2410_v3 = vpop.f32.mrb[36].mxu1  ;;  %v2468_v4 = vpop.f32.mrb[40].mxu0 }
 0x15d   : > { %v2411_v40 = vpop.f32.mrb[37].mxu1  ;;  %v2469_v50 = vpop.f32.mrb[41].mxu0 }
 0x15e   : > { %v2412_v6 = vadd.f32 %v2411_v40, %v2410_v3  ;;  %v2470_v7 = vadd.f32 %v2469_v50, %v2468_v4  ;;  %v2413_v8 = vpop.f32.mrb[38].mxu1  ;;  %v2471_v9 = vpop.f32.mrb[42].mxu0 }
 0x15f   : > { %v2414_v45 = vpop.f32.mrb[39].mxu1  ;;  %v2472_v56 = vpop.f32.mrb[43].mxu0 }
 0x160   : > { %v1505_v11 = vadd.f32 %v2412_v6, %v1416_v5  ;;  %v2415_v12 = vadd.f32 %v2414_v45, %v2413_v8  ;;  %v2473_v13 = vadd.f32 %v2472_v56, %v2471_v9 }
 0x162   : > { %v3171_v14 = vadd.f32 %v2470_v7, %v1505_v11  ;;  %v1508_v17 = vadd.f32 %v2415_v12, %v1419_v10 }
 0x164   : > { %v3173_v20 = vadd.f32 %v2473_v13, %v1508_v17  ;;  %v2490_v21 = vpop.f32.mrb[40].mxu1  ;;  %v2548_v52 = vpop.f32.mrb[44].mxu0 }
 0x165   : > { %v2491_v60 = vpop.f32.mrb[41].mxu1  ;;  %v2549_v22 = vpop.f32.mrb[45].mxu0 }
 0x166   : > { %v2492_v23 = vadd.f32 %v2491_v60, %v2490_v21  ;;  %v2550_v24 = vadd.f32 %v2549_v22, %v2548_v52  ;;  %v2493_v25 = vpop.f32.mrb[42].mxu1  ;;  %v2551_v26 = vpop.f32.mrb[46].mxu0 }
 0x167   : > { %v2494_v28 = vpop.f32.mrb[43].mxu1  ;;  %v2552_v63 = vpop.f32.mrb[47].mxu0 }
 0x168   : > { %v1635_v57 = vadd.f32 %v2492_v23, %v3127_v16  ;;  %v2495_v0 = vadd.f32 %v2494_v28, %v2493_v25  ;;  %v2553_v29 = vadd.f32 %v2552_v63, %v2551_v26 }
 0x16a   : > { %v1724_v30 = vadd.f32 %v2550_v24, %v1635_v57  ;;  %v1638_v31 = vadd.f32 %v2495_v0, %v3129_v18 }
 0x16c   : > { %v1727_v32 = vadd.f32 %v2553_v29, %v1638_v31  ;;  %v2496_v34 = vpop.f32.mrb[44].mxu1  ;;  %v2554_v37 = vpop.f32.mrb[48].mxu0  ;;  %v1778_v27 = vmax.f32 %v1724_v30, 0.0 }
 0x16d   : > { %v2497_v42 = vpop.f32.mrb[45].mxu1  ;;  %v2555_v43 = vpop.f32.mrb[49].mxu0 }
 0x16e   : > { %v1779_v38 = vmax.f32 %v1727_v32, 0.0  ;;  %v2498_v46 = vadd.f32 %v2497_v42, %v2496_v34  ;;  %v2556_v47 = vadd.f32 %v2555_v43, %v2554_v37  ;;  %v2499_v48 = vpop.f32.mrb[46].mxu1  ;;  %v2557_v49 = vpop.f32.mrb[50].mxu0 }
 0x16f   : > { %v2500_v51 = vpop.f32.mrb[47].mxu1  ;;  %v2558_v16 = vpop.f32.mrb[51].mxu0 }
 0x170   : > { %v2262_v33 = vpack.c.bf16 %v1779_v38, %v1778_v27  ;;  %v1643_v53 = vadd.f32 %v2498_v46, %v3133_v36  ;;  %v2501_v44 = vadd.f32 %v2500_v51, %v2499_v48  ;;  %v2559_v54 = vadd.f32 %v2558_v16, %v2557_v49 }
 0x172   : > { %2263 = vst [vmem:[%s3179_s10] sm:$0xff] %v2262_v33   ;;  %v1732_v18 = vadd.f32 %v2556_v47, %v1643_v53  ;;  %v1646_v55 = vadd.f32 %v2501_v44, %v3135_v39 }
 0x174   : > { %v1735_v58 = vadd.f32 %v2559_v54, %v1646_v55  ;;  %v2502_v62 = vpop.f32.mrb[48].mxu1  ;;  %v2560_v3 = vpop.f32.mrb[52].mxu0  ;;  %v1780_v50 = vmax.f32 %v1732_v18, 0.0 }
 0x175   : > { %v2503_v4 = vpop.f32.mrb[49].mxu1  ;;  %v2561_v40 = vpop.f32.mrb[53].mxu0 }
 0x176   : > { %v1781_v5 = vmax.f32 %v1735_v58, 0.0  ;;  %v2504_v6 = vadd.f32 %v2503_v4, %v2502_v62  ;;  %v2562_v7 = vadd.f32 %v2561_v40, %v2560_v3  ;;  %v2505_v36 = vpop.f32.mrb[50].mxu1  ;;  %v2563_v8 = vpop.f32.mrb[54].mxu0 }
 0x177   : > { %v2506_v9 = vpop.f32.mrb[51].mxu1  ;;  %v2564_v45 = vpop.f32.mrb[55].mxu0 }
 0x178   : > { %v2267_v56 = vpack.c.bf16 %v1781_v5, %v1780_v50  ;;  %v1651_v10 = vadd.f32 %v2504_v6, %v3139_v61  ;;  %v2507_v11 = vadd.f32 %v2506_v9, %v2505_v36  ;;  %v2565_v12 = vadd.f32 %v2564_v45, %v2563_v8 }
 0x17a   : > { %2294 = vst [vmem:[%s3179_s10 + $0x8] sm:$0xff] %v2267_v56   ;;  %v1740_v39 = vadd.f32 %v2562_v7, %v1651_v10  ;;  %v1654_v13 = vadd.f32 %v2507_v11, %v3141_v1 }
 0x17c   : > { %v1743_v17 = vadd.f32 %v2565_v12, %v1654_v13  ;;  %v2508_v21 = vpop.f32.mrb[52].mxu1  ;;  %v2566_v52 = vpop.f32.mrb[56].mxu0  ;;  %v1782_v23 = vmax.f32 %v1740_v39, 0.0 }
 0x17d   : > { %v2509_v60 = vpop.f32.mrb[53].mxu1  ;;  %v2567_v22 = vpop.f32.mrb[57].mxu0 }
 0x17e   : > { %v1783_v24 = vmax.f32 %v1743_v17, 0.0  ;;  %v2510_v25 = vadd.f32 %v2509_v60, %v2508_v21  ;;  %v2568_v26 = vadd.f32 %v2567_v22, %v2566_v52  ;;  %v2511_v28 = vpop.f32.mrb[54].mxu1  ;;  %v2569_v63 = vpop.f32.mrb[58].mxu0 }
 0x17f   : > { %v2512_v57 = vpop.f32.mrb[55].mxu1  ;;  %v2570_v61 = vpop.f32.mrb[59].mxu0 }
 0x180   : > { %v2272_v0 = vpack.c.bf16 %v1783_v24, %v1782_v23  ;;  %v1659_v29 = vadd.f32 %v2510_v25, %v3147_v15  ;;  %v2513_v30 = vadd.f32 %v2512_v57, %v2511_v28  ;;  %v2571_v31 = vadd.f32 %v2570_v61, %v2569_v63 }
 0x182   : > { %2295 = vst [vmem:[%s3179_s10 + $0x10] sm:$0xff] %v2272_v0   ;;  %v1748_v1 = vadd.f32 %v2568_v26, %v1659_v29  ;;  %v1662_v32 = vadd.f32 %v2513_v30, %v3149_v19 }
 0x184   : > { %v1751_v34 = vadd.f32 %v2571_v31, %v1662_v32  ;;  %v2514_v37 = vpop.f32.mrb[56].mxu1  ;;  %v2572_v42 = vpop.f32.mrb[60].mxu0  ;;  %v1784_v38 = vmax.f32 %v1748_v1, 0.0  ;;  %v1894_v32 = vld [vmem:[%s3179_s10 + $0x8] sm:$0xf] (%p2926_p3) }
 0x185   : > { %v2515_v43 = vpop.f32.mrb[57].mxu1  ;;  %v2573_v27 = vpop.f32.mrb[61].mxu0  ;;  %1895 = vst [vmem:[%s1874_s19 + $0x10] sm:$0xf] (%p2926_p3), %v1894_v32 }
 0x186   : > { %v1785_v46 = vmax.f32 %v1751_v34, 0.0  ;;  %v2516_v47 = vadd.f32 %v2515_v43, %v2514_v37  ;;  %v2574_v48 = vadd.f32 %v2573_v27, %v2572_v42  ;;  %v2517_v49 = vpop.f32.mrb[58].mxu1  ;;  %v2575_v51 = vpop.f32.mrb[62].mxu0  ;;  %v1896_v34 = vld [vmem:[%s3179_s10 + $0xc] sm:$0xf] (%p2926_p3) }
 0x187   : > { %v2518_v16 = vpop.f32.mrb[59].mxu1  ;;  %v2576_v15 = vpop.f32.mrb[63].mxu0  ;;  %1897 = vst [vmem:[%s1874_s19 + $0x18] sm:$0xf] (%p2926_p3), %v1896_v34 }
 0x188   : > { %v2277_v33 = vpack.c.bf16 %v1785_v46, %v1784_v38  ;;  %v1667_v53 = vadd.f32 %v2516_v47, %v3155_v35  ;;  %v2519_v44 = vadd.f32 %v2518_v16, %v2517_v49  ;;  %v2577_v54 = vadd.f32 %v2576_v15, %v2575_v51 }
 0x189   : > { %v1898_v37 = vld [vmem:[%s3179_s10 + $0x10] sm:$0xf] (%p2926_p3)  ;;  %v1900_v42 = vld [vmem:[%s3179_s10 + $0x14] sm:$0xf] (%p2926_p3) }
 0x18a   : > { %2296 = vst [vmem:[%s3179_s10 + $0x18] sm:$0xff] %v2277_v33   ;;  %v1756_v19 = vadd.f32 %v2574_v48, %v1667_v53  ;;  %v1670_v18 = vadd.f32 %v2519_v44, %v3157_v41  ;;  %1899 = vst [vmem:[%s1874_s19 + $0x20] sm:$0xf] (%p2926_p3), %v1898_v37 }
 0x18b   : > { %1901 = vst [vmem:[%s1874_s19 + $0x28] sm:$0xf] (%p2926_p3), %v1900_v42 }
 0x18c   : > { %v1759_v55 = vadd.f32 %v2577_v54, %v1670_v18  ;;  %v2520_v58 = vpop.f32.mrb[60].mxu1  ;;  %v2578_v62 = vpop.f32.mrb[64].mxu0  ;;  %v1786_v40 = vmax.f32 %v1756_v19, 0.0 }
 0x18d   : > { %v2521_v3 = vpop.f32.mrb[61].mxu1  ;;  %v2579_v4 = vpop.f32.mrb[65].mxu0 }
 0x18e   : > { %v1787_v50 = vmax.f32 %v1759_v55, 0.0  ;;  %v2522_v5 = vadd.f32 %v2521_v3, %v2520_v58  ;;  %v2580_v6 = vadd.f32 %v2579_v4, %v2578_v62  ;;  %v2523_v7 = vpop.f32.mrb[62].mxu1  ;;  %v2581_v36 = vpop.f32.mrb[66].mxu0 }
 0x18f   : > { %v2524_v8 = vpop.f32.mrb[63].mxu1  ;;  %v2582_v35 = vpop.f32.mrb[67].mxu0 }
 0x190   : > { %v2282_v9 = vpack.c.bf16 %v1787_v50, %v1786_v40  ;;  %v1675_v45 = vadd.f32 %v2522_v5, %v3163_v59  ;;  %v2525_v56 = vadd.f32 %v2524_v8, %v2523_v7  ;;  %v2583_v10 = vadd.f32 %v2582_v35, %v2581_v36 }
 0x191   : > { %v1902_v43 = vld [vmem:[%s3179_s10 + $0x18] sm:$0xf] (%p2926_p3)  ;;  %v1904_v27 = vld [vmem:[%s3179_s10 + $0x1c] sm:$0xf] (%p2926_p3) }
 0x192   : > { %2297 = vst [vmem:[%s3179_s10 + $0x20] sm:$0xff] %v2282_v9   ;;  %v1764_v41 = vadd.f32 %v2580_v6, %v1675_v45  ;;  %v1678_v11 = vadd.f32 %v2525_v56, %v3165_v2  ;;  %1903 = vst [vmem:[%s1874_s19 + $0x30] sm:$0xf] (%p2926_p3), %v1902_v43 }
 0x193   : > { %1905 = vst [vmem:[%s1874_s19 + $0x38] sm:$0xf] (%p2926_p3), %v1904_v27 }
 0x194   : > { %v1767_v12 = vadd.f32 %v2583_v10, %v1678_v11  ;;  %v2526_v39 = vpop.f32.mrb[64].mxu1  ;;  %v2584_v13 = vpop.f32.mrb[68].mxu0  ;;  %v1788_v52 = vmax.f32 %v1764_v41, 0.0 }
 0x195   : > { %v2527_v17 = vpop.f32.mrb[65].mxu1  ;;  %v2585_v21 = vpop.f32.mrb[69].mxu0 }
 0x196   : > { %v1789_v60 = vmax.f32 %v1767_v12, 0.0  ;;  %v2528_v22 = vadd.f32 %v2527_v17, %v2526_v39  ;;  %v2586_v23 = vadd.f32 %v2585_v21, %v2584_v13  ;;  %v2529_v24 = vpop.f32.mrb[66].mxu1  ;;  %v2587_v25 = vpop.f32.mrb[70].mxu0 }
 0x197   : > { %v2530_v59 = vpop.f32.mrb[67].mxu1  ;;  %v2588_v26 = vpop.f32.mrb[71].mxu0 }
 0x198   : > { %v2287_v28 = vpack.c.bf16 %v1789_v60, %v1788_v52  ;;  %v1683_v63 = vadd.f32 %v2528_v22, %v3171_v14  ;;  %v2531_v57 = vadd.f32 %v2530_v59, %v2529_v24  ;;  %v2589_v2 = vadd.f32 %v2588_v26, %v2587_v25  ;;  %v1890_v14 = vld [vmem:[%s3179_s10] sm:$0xf] (%p2926_p3) }
 0x199   : > { %1891 = vst [vmem:[%s1874_s19] sm:$0xf] (%p2926_p3), %v1890_v14  ;;  %v1906_v38 = vld [vmem:[%s3179_s10 + $0x20] sm:$0xf] (%p2926_p3)  ;;  %v1908_v46 = vld [vmem:[%s3179_s10 + $0x24] sm:$0xf] (%p2926_p3) }
 0x19a   : > { %2298 = vst [vmem:[%s3179_s10 + $0x28] sm:$0xff] %v2287_v28   ;;  %v1772_v61 = vadd.f32 %v2586_v23, %v1683_v63  ;;  %v1686_v0 = vadd.f32 %v2531_v57, %v3173_v20  ;;  %v1892_v20 = vld [vmem:[%s3179_s10 + $0x4] sm:$0xf] (%p2926_p3)  ;;  %1907 = vst [vmem:[%s1874_s19 + $0x40] sm:$0xf] (%p2926_p3), %v1906_v38 }
 0x19b   : > { %1893 = vst [vmem:[%s1874_s19 + $0x8] sm:$0xf] (%p2926_p3), %v1892_v20  ;;  %1909 = vst [vmem:[%s1874_s19 + $0x48] sm:$0xf] (%p2926_p3), %v1908_v46 }
 0x19c   : > { %v1775_v29 = vadd.f32 %v2589_v2, %v1686_v0  ;;  %v1790_v30 = vmax.f32 %v1772_v61, 0.0  ;;  %1868 = sbr.rel (!%p2926_p3) target bundleno = 427 (0x1ab), region = 36 }
 0x19e   : > { %v1791_v31 = vmax.f32 %v1775_v29, 0.0 }
 0x1a0   : > { %v2292_v1 = vpack.c.bf16 %v1791_v31, %v1790_v30 }
 0x1a1   : > { %v1910_v47 = vld [vmem:[%s3179_s10 + $0x28] sm:$0xf] (%p2926_p3)  ;;  %v1912_v48 = vld [vmem:[%s3179_s10 + $0x2c] sm:$0xf] (%p2926_p3) }
 0x1a2   : > { %2299 = vst [vmem:[%s3179_s10 + $0x30] sm:$0xff] %v2292_v1   ;;  %1911 = vst [vmem:[%s1874_s19 + $0x50] sm:$0xf] (%p2926_p3), %v1910_v47 }
 0x1a3   : > { %1913 = vst [vmem:[%s1874_s19 + $0x58] sm:$0xf] %v1912_v48 }
 0x1a9   : > { %v1914_v49 = vld [vmem:[%s3179_s10 + $0x30] sm:$0xf]  ;;  %v1916_v51 = vld [vmem:[%s3179_s10 + $0x34] sm:$0xf] }
 0x1aa   : > { %1915 = vst [vmem:[%s1874_s19 + $0x60] sm:$0xf] %v1914_v49  ;;  %1917 = vst [vmem:[%s1874_s19 + $0x68] sm:$0xf] %v1916_v51 }
 0x1ab PF: > { %s13_s16 = sadd.s32 1, %s2872_s16   ;;  %s3239_s12 = smov %s2860_s13 }
 0x1ac   : > { %p10_p9 = scmp.ge.s32.totalorder %s13_s16, 4   ;;  %s3240_s13 = smov %s2935_s22 }
 0x1ad   : > { %s3241_s14 = smov %s2868_s15  ;;  %s3242_s15 = smov %s3244_s18 }
 0x1ae   :  { %12 = sbr.rel (!%p10_p9) target bundleno = 3 (0x3), region = 109 }

// kernel: features_forward.11
= control target key start
LH: loop header
LB: loop body
LE: loop exit
PB: predicated region body
PF: predicated region fallthrough
CT: control target
= control target key end

     0   :  { %s856_s15 = smov 0   ;;  %s1006_s0 = inlined_call_operand.vmem [shape: bf16[2,4,4,256], index: 0, kind: input, shape index: {}]   ;;  %s1007_s1 = inlined_call_operand.vmem [shape: bf16[2,4,3,256], index: 1, kind: input, shape index: {}]   ;;  %s1008_s2 = inlined_call_operand.vmem [shape: bf16[2,3,4,256], index: 2, kind: input, shape index: {}]   ;;  %s1009_s3 = inlined_call_operand.vmem [shape: bf16[2,3,3,256], index: 3, kind: input, shape index: {}]   ;;  %s1010_s4 = inlined_call_operand.vmem [shape: bf16[2,3,3,256], index: 4, kind: output, shape index: {}]  }
   0x1 LB: > { %s736_s16 = sadd.s32 4294967295, %s824_s15   ;;  %p740_p0 = scmp.ge.s32.totalorder %s824_s15, 1  ;;  %s824_s15 = sphi %s856_s15, %s14_s15  }
   0x2   : > { %p192_p1 = scmp.lt.s32.totalorder %s824_s15, 3 }
   0x4   : > { %p193_p2 = pnand %p740_p0, %p192_p1 }
   0x5   : > { %p233_p3 = scmp.lt.s32.totalorder (!%p193_p2), %s736_s16, 1  ;;  %s826_s5 = smov (!%p193_p2), 127  }
   0x6   : > { %196 = sbr.rel (%p193_p2) target bundleno = 264 (0x108), region = 36  ;;  %s827_s6 = smov (!%p193_p2), 1  }
   0x7   : > { %s828_s7 = smov (!%p193_p2), 126   ;;  %s829_s8 = smov (!%p193_p2), 2  }
   0xd   : > { %s1012_s16 = smov (!%p233_p3, %s736_s16), 1 }
   0xe   : > { %s758_s17 = sshll.u32 %s1012_s16, 4  ;;  %s864_s18 = smul.u32 12, %s1012_s16 }
   0xf   : > { %s237_s21 = scalar_lea.vmem %s1006_s0, %s758_s17  ;;  %s242_s24 = scalar_lea.vmem %s1007_s1, %s758_s17 }
  0x10   : > { %s247_s27 = scalar_lea.vmem %s1008_s2, %s864_s18  ;;  %s252_s30 = scalar_lea.vmem %s1009_s3, %s864_s18  ;;  %v784_v0 = vld [vmem:[%s237_s21 + $0x8] sm:$0xff]   ;;  %v769_v1 = vld [vmem:[%s242_s24] sm:$0xff]  }
  0x11   : > { %v785_v2 = vld [vmem:[%s242_s24 + $0x8] sm:$0xff]   ;;  %v766_v3 = vunpack.c.l.bf16 %v784_v0  ;;  %v770_v4 = vunpack.c.l.bf16 %v769_v1  ;;  %v781_v6 = vld [vmem:[%s252_s30] sm:$0xff]   ;;  %v771_v8 = vunpack.c.h.bf16 %v769_v1  ;;  %v767_v35 = vunpack.c.h.bf16 %v784_v0  ;;  %s257_s11 = scalar_lea.vmem %s1010_s4, %s864_s18 }
  0x12   : > { %v276_v5 = vld [vmem:[%s247_s27 + $0x8] sm:$0xf]  ;;  %v774_v9 = vunpack.c.l.bf16 %v785_v2  ;;  %v782_v11 = vunpack.c.l.bf16 %v781_v6  ;;  %v775_v12 = vunpack.c.h.bf16 %v785_v2  ;;  %v783_v13 = vunpack.c.h.bf16 %v781_v6  ;;  %v761_v15 = vld [vmem:[%s237_s21] sm:$0xff]  }
  0x13   : > { %v282_v7 = vld [vmem:[%s252_s30 + $0x8] sm:$0xf]  ;;  %v279_v10 = vunpack.c.l.bf16 %v276_v5  ;;  %v777_v16 = vld [vmem:[%s247_s27] sm:$0xff]   ;;  %v763_v18 = vunpack.c.h.bf16 %v761_v15  ;;  %v320_v21 = vrot.slane %v766_v3, 5  ;;  %v762_v24 = vunpack.c.l.bf16 %v761_v15 }
  0x14   : > { %v285_v14 = vunpack.c.l.bf16 %v282_v7  ;;  %v286_v17 = vmax.f32 %v782_v11, %v770_v4  ;;  %v287_v19 = vmax.f32 %v783_v13, %v771_v8  ;;  %v778_v22 = vunpack.c.l.bf16 %v777_v16 }
  0x15   : > { %v750_v23 = vrot.slane %v279_v10, 9  ;;  %v779_v26 = vunpack.c.h.bf16 %v777_v16  ;;  %v318_v29 = vrot.slane %v763_v18, 5  ;;  %v751_v37 = vrot.slane %v762_v24, 9 }
  0x16   : > { %v288_v20 = vmax.f32 %v285_v14, %v774_v9  ;;  %v289_v25 = vmax.f32 %v286_v17, %v771_v8  ;;  %v748_v28 = vrot.slane %v778_v22, 9  ;;  %v290_v30 = vmax.f32 %v287_v19, %v774_v9 }
  0x17   : > { %v749_v32 = vrot.slane %v779_v26, 9  ;;  %v321_v39 = vrot.slane %v320_v21, 4  ;;  %v319_v40 = vrot.slane %v318_v29, 4  ;;  %v752_v47 = vrot.slane %v767_v35, 9 }
  0x18   : > { %v291_v27 = vmax.f32 %v288_v20, %v775_v12  ;;  %v292_v31 = vmax.f32 %v289_v25, %v778_v22  ;;  %v293_v34 = vmax.f32 %v290_v30, %v779_v26  ;;  %v341_v6 = vlaneseq }
  0x1a   : > { %v294_v33 = vmax.f32 %v291_v27, %v279_v10  ;;  %v307_v36 = vmax.f32 %v292_v31, %v748_v28  ;;  %v308_v41 = vmax.f32 %v293_v34, %v749_v32  ;;  %v917_v9 = vand.u32 127, %v341_v6 }
  0x1c   : > { %v309_v38 = vmax.f32 %v294_v33, %v750_v23  ;;  %v310_v42 = vmax.f32 %v307_v36, %v762_v24  ;;  %v311_v44 = vmax.f32 %v308_v41, %v763_v18  ;;  %v343_v12 = vadd.s32 128, %v917_v9 }
  0x1d   : > { %vm365_vm0 = vcmp.lt.s32.totalorder %v917_v9, 127  ;;  %vm407_vm1 = vcmp.lt.s32.totalorder %v917_v9, 1  ;;  %vm414_vm3 = vcmp.ge.s32.totalorder %v917_v9, 1  ;;  %vm449_vm4 = vcmp.lt.s32.totalorder %v917_v9, 126 }
  0x1e   : > { %v312_v43 = vmax.f32 %v309_v38, %v766_v3  ;;  %v325_v45 = vmax.f32 %v310_v42, %v751_v37  ;;  %v326_v48 = vmax.f32 %v311_v44, %v319_v40  ;;  %vm373_vm2 = vcmp.lt.s32.totalorder %v343_v12, 255 }
  0x1f   : > { %vm457_vm5 = vcmp.lt.s32.totalorder %v343_v12, 254  ;;  %vm491_vm6 = vcmp.lt.s32.totalorder %v917_v9, 2  ;;  %vm498_vm7 = vcmp.ge.s32.totalorder %v917_v9, 2 }
  0x20   : > { %v327_v46 = vmax.f32 %v312_v43, %v321_v39  ;;  %v328_v49 = vmax.f32 %v325_v45, %v763_v18  ;;  %v329_v51 = vmax.f32 %v326_v48, %v766_v3 }
  0x22   : > { %v330_v50 = vmax.f32 %v327_v46, %v767_v35  ;;  %v880_v52 = vmax.f32 %v328_v49, %v319_v40  ;;  %v884_v54 = vmax.f32 %v329_v51, %v321_v39 }
  0x24   : > { %v882_v53 = vmax.f32 %v330_v50, %v752_v47  ;;  %v888_v55 = vmul.f32 %v880_v52, %v880_v52  ;;  %v897_v57 = vmul.f32 %v884_v54, %v884_v54 }
  0x26   : > { %v892_v56 = vmul.f32 %v882_v53, %v882_v53  ;;  %353 = vrot.lane.b32.xlu0 %v888_v55, %s826_s5  ;;  %v347_v58 = vcombine.high %v888_v55, %v888_v55  ;;  %v348_v60 = vcombine.high %v897_v57, %v897_v57 }
  0x28   : > { %357 = vrot.lane.b32.xlu1 %v892_v56, %s826_s5  ;;  %v349_v59 = vcombine.high %v892_v56, %v892_v56 }
  0x2a   : > { %355 = vrot.lane.b32.xlu0 %v897_v57, %s826_s5 }
  0x2c   : > { %397 = vrot.lane.b32.xlu1 %v897_v57, %s827_s6 }
  0x2e   : > { %395 = vrot.lane.b32.xlu0 %v888_v55, %s827_s6 }
  0x30   : > { %439 = vrot.lane.b32.xlu1 %v897_v57, %s828_s7 }
  0x32   : > { %399 = vrot.lane.b32.xlu0 %v892_v56, %s827_s6 }
  0x34   : > { %359 = vrot.lane.b32.xlu1 %v347_v58, %s826_s5 }
  0x36   : > { %437 = vrot.lane.b32.xlu0 %v888_v55, %s828_s7 }
  0x38   : > { %363 = vrot.lane.b32.xlu1 %v349_v59, %s826_s5 }
  0x3a   : > { %441 = vrot.lane.b32.xlu0 %v892_v56, %s828_s7 }
  0x3c   : > { %401 = vrot.lane.b32.xlu1 %v347_v58, %s827_s6 }
  0x3e   : > { %361 = vrot.lane.b32.xlu0 %v348_v60, %s826_s5 }
  0x40   : > { %405 = vrot.lane.b32.xlu1 %v349_v59, %s827_s6 }
  0x42   : > { %403 = vrot.lane.b32.xlu0 %v348_v60, %s827_s6 }
  0x44   : > { %443 = vrot.lane.b32.xlu1 %v347_v58, %s828_s7 }
  0x46   : > { %445 = vrot.lane.b32.xlu0 %v348_v60, %s828_s7 }
  0x48   : > { %447 = vrot.lane.b32.xlu1 %v349_v59, %s828_s7 }
  0x4a   : > { %479 = vrot.lane.b32.xlu0 %v888_v55, %s829_s8 }
  0x4c   : > { %481 = vrot.lane.b32.xlu1 %v897_v57, %s829_s8 }
  0x4e   : > { %483 = vrot.lane.b32.xlu0 %v892_v56, %s829_s8 }
  0x50   : > { %485 = vrot.lane.b32.xlu1 %v347_v58, %s829_s8 }
  0x52   : > { %487 = vrot.lane.b32.xlu0 %v348_v60, %s829_s8 }
  0x54   : > { %489 = vrot.lane.b32.xlu1 %v349_v59, %s829_s8 }
  0x98   : > { %v354_v61 = vpop.permute.xlu0 %353 }
  0x9a   : > { %v358_v62 = vpop.permute.xlu1 %357 }
  0x9c   : > { %v356_v63 = vpop.permute.xlu0 %355 }
  0x9e   : > { %v398_v0 = vpop.permute.xlu1 %397 }
  0xa0   : > { %v396_v1 = vpop.permute.xlu0 %395 }
  0xa2   : > { %v440_v2 = vpop.permute.xlu1 %439 }
  0xa4   : > { %v400_v3 = vpop.permute.xlu0 %399 }
  0xa6   : > { %v360_v4 = vpop.permute.xlu1 %359 }
  0xa7   : > { %v369_v15 = vsel %vm365_vm0, %v360_v4, %v354_v61  ;;  %v366_v18 = vsel %vm365_vm0, %v354_v61, %v360_v4 }
  0xa8   : > { %v438_v5 = vpop.permute.xlu0 %437  ;;  %v375_v19 = vsel %vm373_vm2, %v369_v15, 0.0 }
  0xa9   : > { %v386_v27 = vcombine.low %v366_v18, %v375_v19 }
  0xaa   : > { %v364_v7 = vpop.permute.xlu1 %363 }
  0xab   : > { %v371_v21 = vsel %vm365_vm0, %v364_v7, %v358_v62  ;;  %v368_v28 = vsel %vm365_vm0, %v358_v62, %v364_v7  ;;  %v392_v47 = vadd.f32 %v386_v27, %v888_v55 }
  0xac   : > { %v442_v8 = vpop.permute.xlu0 %441  ;;  %v379_v31 = vsel %vm373_vm2, %v371_v21, 0.0 }
  0xad   : > { %v388_v45 = vcombine.low %v368_v28, %v379_v31 }
  0xae   : > { %v402_v10 = vpop.permute.xlu1 %401 }
  0xaf   : > { %v411_v17 = vsel %vm407_vm1, %v402_v10, %v396_v1  ;;  %v408_v22 = vsel %vm407_vm1, %v396_v1, %v402_v10  ;;  %v394_v1 = vadd.f32 %v388_v45, %v892_v56 }
  0xb0   : > { %v362_v11 = vpop.permute.xlu0 %361  ;;  %v416_v23 = vsel %vm414_vm3, %v411_v17, 0.0 }
  0xb1   : > { %v370_v24 = vsel %vm365_vm0, %v362_v11, %v356_v63  ;;  %v428_v32 = vcombine.low %v416_v23, %v408_v22  ;;  %v367_v33 = vsel %vm365_vm0, %v356_v63, %v362_v11 }
  0xb2   : > { %v406_v13 = vpop.permute.xlu1 %405  ;;  %v377_v34 = vsel %vm373_vm2, %v370_v24, 0.0 }
  0xb3   : > { %v413_v29 = vsel %vm407_vm1, %v406_v13, %v400_v3  ;;  %v410_v36 = vsel %vm407_vm1, %v400_v3, %v406_v13  ;;  %v387_v46 = vcombine.low %v367_v33, %v377_v34  ;;  %v434_v63 = vadd.f32 %v428_v32, %v392_v47 }
  0xb4   : > { %v404_v14 = vpop.permute.xlu0 %403  ;;  %v420_v41 = vsel %vm414_vm3, %v413_v29, 0.0 }
  0xb5   : > { %v412_v30 = vsel %vm407_vm1, %v404_v14, %v398_v0  ;;  %v409_v42 = vsel %vm407_vm1, %v398_v0, %v404_v14  ;;  %v430_v58 = vcombine.low %v420_v41, %v410_v36 }
  0xb6   : > { %v444_v16 = vpop.permute.xlu1 %443  ;;  %v418_v43 = vsel %vm414_vm3, %v412_v30, 0.0 }
  0xb7   : > { %v453_v26 = vsel %vm449_vm4, %v444_v16, %v438_v5  ;;  %v450_v37 = vsel %vm449_vm4, %v438_v5, %v444_v16  ;;  %v429_v59 = vcombine.low %v418_v43, %v409_v42  ;;  %v436_v11 = vadd.f32 %v430_v58, %v394_v1 }
  0xb8   : > { %v446_v20 = vpop.permute.xlu0 %445  ;;  %v459_v38 = vsel %vm457_vm5, %v453_v26, 0.0 }
  0xb9   : > { %v454_v39 = vsel %vm449_vm4, %v446_v20, %v440_v2  ;;  %v470_v48 = vcombine.low %v450_v37, %v459_v38  ;;  %v451_v49 = vsel %vm449_vm4, %v440_v2, %v446_v20  ;;  %v393_v2 = vadd.f32 %v387_v46, %v897_v57 }
  0xba   : > { %v448_v25 = vpop.permute.xlu1 %447  ;;  %v461_v50 = vsel %vm457_vm5, %v454_v39, 0.0 }
  0xbb   : > { %v455_v44 = vsel %vm449_vm4, %v448_v25, %v442_v8  ;;  %v452_v60 = vsel %vm449_vm4, %v442_v8, %v448_v25  ;;  %v471_v3 = vcombine.low %v451_v49, %v461_v50  ;;  %v476_v5 = vadd.f32 %v470_v48, %v434_v63 }
  0xbc   : > { %v480_v35 = vpop.permute.xlu0 %479  ;;  %v463_v61 = vsel %vm457_vm5, %v455_v44, 0.0  ;;  %v435_v12 = vadd.f32 %v429_v59, %v393_v2  ;;  %vm629_vm4 = vcmask 1041408   ;;  %vm630_vm5 = vsmask.f32 1280 }
  0xbd   : > { %v472_v7 = vcombine.low %v452_v60, %v463_v61 }
  0xbe   : > { %v482_v40 = vpop.permute.xlu1 %481  ;;  %v477_v18 = vadd.f32 %v471_v3, %v435_v12  ;;  %v607_v12 = vshrl.u32 %v341_v6, 7 }
  0xbf   : > { %v478_v21 = vadd.f32 %v472_v7, %v436_v11  ;;  %v830_v7 = vmov 1983009808  }
  0xc0   : > { %v484_v51 = vpop.permute.xlu0 %483 }
  0xc2   : > { %v486_v62 = vpop.permute.xlu1 %485 }
  0xc3   : > { %v492_v0 = vsel %vm491_vm6, %v480_v35, %v486_v62  ;;  %v495_v55 = vsel %vm491_vm6, %v486_v62, %v480_v35 }
  0xc4   : > { %v500_v4 = vsel %vm498_vm7, %v495_v55, 0.0  ;;  %v488_v10 = vpop.permute.xlu0 %487 }
  0xc5   : > { %v512_v8 = vcombine.low %v500_v4, %v492_v0  ;;  %v493_v13 = vsel %vm491_vm6, %v482_v40, %v488_v10  ;;  %v496_v14 = vsel %vm491_vm6, %v488_v10, %v482_v40 }
  0xc6   : > { %v490_v15 = vpop.permute.xlu1 %489  ;;  %v502_v57 = vsel %vm498_vm7, %v496_v14, 0.0 }
  0xc7   : > { %v518_v56 = vadd.f32 %v512_v8, %v476_v5  ;;  %v494_v16 = vsel %vm491_vm6, %v484_v51, %v490_v15  ;;  %v497_v17 = vsel %vm491_vm6, %v490_v15, %v484_v51  ;;  %v513_v19 = vcombine.low %v502_v57, %v493_v13 }
  0xc8   : > { %v504_v20 = vsel %vm498_vm7, %v497_v17, 0.0  ;;  %v604_v8 = vunpack.c.l.s4 %v830_v7  ;;  %vm632_vm6 = vcmask 1043458   ;;  %vm633_vm7 = vsmask.f32 3328 }
  0xc9   : > { %v521_v22 = vmul.f32 2e-05, %v518_v56  ;;  %v514_v23 = vcombine.low %v504_v20, %v494_v16  ;;  %v519_v24 = vadd.f32 %v513_v19, %v477_v18  ;;  %v636_v18 = vld [vmem:[%s257_s11] sm:$0xf] }
  0xca   : > { %v605_v11 = vunpack.c.0.s8 %v604_v8 }
  0xcb   : > { %v524_v25 = vadd.f32 1.0, %v521_v22  ;;  %v520_v26 = vadd.f32 %v514_v23, %v478_v21  ;;  %v522_v27 = vmul.f32 2e-05, %v519_v24  ;;  %v639_v22 = vld [vmem:[%s257_s11 + $0x4] sm:$0xf] }
  0xcc   : > { %v608_v56 = vsub.s32 %v605_v11, %v607_v12 }
  0xcd   : > { %v527_v28 = vmul.f32 %v524_v25, %v524_v25  ;;  %v523_v29 = vmul.f32 2e-05, %v520_v26  ;;  %v525_v30 = vadd.f32 1.0, %v522_v27  ;;  %v642_v27 = vld [vmem:[%s257_s11 + $0x8] sm:$0xf] }
  0xcf   : > { %v530_v31 = vmul.f32 %v527_v28, %v524_v25  ;;  %v526_v32 = vadd.f32 1.0, %v523_v29  ;;  %v528_v33 = vmul.f32 %v525_v30, %v525_v30 }
  0xd1   : > { %800 = vrsqrt.f32 %v530_v31  ;;  %v531_v34 = vmul.f32 %v528_v33, %v525_v30  ;;  %v529_v35 = vmul.f32 %v526_v32, %v526_v32  ;;  %vm535_vm8 = vcmp.eq.f32.partialorder %v530_v31, inf }
  0xd2   : > { %v538_v38 = vand.u32 2147483648, %v530_v31  ;;  %vm537_vm9 = vcmp.eq.f32.partialorder %v530_v31, 0.0 }
  0xd3   : > { %802 = vrsqrt.f32 %v531_v34  ;;  %v532_v36 = vmul.f32 %v529_v35, %v526_v32  ;;  %vm542_vm10 = vcmp.eq.f32.partialorder %v531_v34, inf  ;;  %v545_v43 = vand.u32 2147483648, %v531_v34 }
  0xd4   : > { %vm544_vm11 = vcmp.eq.f32.partialorder %v531_v34, 0.0 }
  0xd5   : > { %804 = vrsqrt.f32 %v532_v36  ;;  %vm549_vm12 = vcmp.eq.f32.partialorder %v532_v36, inf  ;;  %v552_v48 = vand.u32 2147483648, %v532_v36  ;;  %vm551_vm13 = vcmp.eq.f32.partialorder %v532_v36, 0.0 }
  0xdb   : > { %v801_v9 = vpop.eup %800 }
  0xdc   : > { %v534_v37 = vmul.f32 %v801_v9, %v530_v31 }
  0xdd   : > { %v803_v39 = vpop.eup %802 }
  0xde   : > { %v536_v40 = vsel %vm535_vm8, %v530_v31, %v534_v37  ;;  %v541_v42 = vmul.f32 %v803_v39, %v531_v34  ;;  %vm631_vm8 = vmand %vm629_vm4, %vm630_vm5 }
  0xdf   : > { %v539_v41 = vsel %vm537_vm9, %v538_v38, %v536_v40  ;;  %v805_v44 = vpop.eup %804  ;;  %vm634_vm9 = vmand %vm632_vm6, %vm633_vm7 }
  0xe0   : > { %806 = vrsqrt.f32 %v539_v41  ;;  %v543_v45 = vsel %vm542_vm10, %v531_v34, %v541_v42  ;;  %v548_v47 = vmul.f32 %v805_v44, %v532_v36  ;;  %vm556_vm14 = vcmp.eq.f32.partialorder %v539_v41, inf  ;;  %vm635_vm10 = vmor %vm634_vm9, %vm631_vm8 }
  0xe1   : > { %v546_v46 = vsel %vm544_vm11, %v545_v43, %v543_v45  ;;  %v559_v59 = vand.u32 2147483648, %v539_v41  ;;  %vm558_vm15 = vcmp.eq.f32.partialorder %v539_v41, 0.0 }
  0xe2   : > { %808 = vrsqrt.f32 %v546_v46  ;;  %v550_v49 = vsel %vm549_vm12, %v532_v36, %v548_v47  ;;  %vm563_vm0 = vcmp.eq.f32.partialorder %v546_v46, inf  ;;  %v566_v0 = vand.u32 2147483648, %v546_v46 }
  0xe3   : > { %v553_v50 = vsel %vm551_vm13, %v552_v48, %v550_v49  ;;  %vm565_vm1 = vcmp.eq.f32.partialorder %v546_v46, 0.0 }
  0xe4   : > { %810 = vrsqrt.f32 %v553_v50  ;;  %vm570_vm2 = vcmp.eq.f32.partialorder %v553_v50, inf  ;;  %v573_v4 = vand.u32 2147483648, %v553_v50  ;;  %vm572_vm3 = vcmp.eq.f32.partialorder %v553_v50, 0.0 }
  0xea   : > { %v807_v51 = vpop.eup %806 }
  0xeb   : > { %v555_v58 = vmul.f32 %v807_v51, %v539_v41 }
  0xec   : > { %v809_v60 = vpop.eup %808 }
  0xed   : > { %v557_v61 = vsel %vm556_vm14, %v539_v41, %v555_v58  ;;  %v562_v63 = vmul.f32 %v809_v60, %v546_v46 }
  0xee   : > { %v560_v62 = vsel %vm558_vm15, %v559_v59, %v557_v61  ;;  %v811_v55 = vpop.eup %810 }
  0xef   : > { %812 = vrcp.f32 %v560_v62  ;;  %v564_v1 = vsel %vm563_vm0, %v546_v46, %v562_v63  ;;  %v569_v3 = vmul.f32 %v811_v55, %v553_v50 }
  0xf0   : > { %v567_v2 = vsel %vm565_vm1, %v566_v0, %v564_v1 }
  0xf1   : > { %814 = vrcp.f32 %v567_v2  ;;  %v571_v5 = vsel %vm570_vm2, %v553_v50, %v569_v3 }
  0xf2   : > { %v574_v10 = vsel %vm572_vm3, %v573_v4, %v571_v5 }
  0xf3   : > { %816 = vrcp.f32 %v574_v10 }
  0xf9   : > { %v813_v13 = vpop.eup %812 }
  0xfa   : > { %v578_v14 = vmul.f32 %v813_v13, %v880_v52 }
  0xfb   : > { %v815_v15 = vpop.eup %814 }
  0xfc   : > { %v584_v57 = vcombine.high %v578_v14, %v578_v14  ;;  %v579_v16 = vmul.f32 %v815_v15, %v884_v54 }
  0xfd   : > { %v817_v6 = vpop.eup %816 }
  0xfe   : > { %v753_v17 = vpack.c.bf16 %v584_v57, %v578_v14  ;;  %v585_v19 = vcombine.high %v579_v16, %v579_v16  ;;  %v580_v21 = vmul.f32 %v817_v6, %v882_v53 }
 0x100   : > { %v609_v20 = vrot.slane %v753_v17, %v608_v56  ;;  %v754_v52 = vpack.c.bf16 %v585_v19, %v579_v16  ;;  %v586_v24 = vcombine.high %v580_v21, %v580_v21 }
 0x102   : > { %v637_v23 = vsel %vm635_vm10, %v609_v20, %v636_v18  ;;  %v617_v25 = vrot.slane %v754_v52, %v608_v56  ;;  %v755_v26 = vpack.c.bf16 %v586_v24, %v580_v21 }
 0x103   : > { %638 = vst [vmem:[%s257_s11] sm:$0xf] %v637_v23 }
 0x104   : > { %v640_v28 = vsel %vm635_vm10, %v617_v25, %v639_v22  ;;  %v625_v29 = vrot.slane %v755_v26, %v608_v56 }
 0x105   : > { %641 = vst [vmem:[%s257_s11 + $0x4] sm:$0xf] %v640_v28 }
 0x106   : > { %v643_v54 = vsel %vm635_vm10, %v625_v29, %v642_v27 }
 0x107   : > { %644 = vst [vmem:[%s257_s11 + $0x8] sm:$0xf] %v643_v54 }
 0x108 PF: > { %s14_s15 = sadd.s32 1, %s824_s15  }
 0x109   : > { %p11_p4 = scmp.ge.s32.totalorder %s14_s15, 4  }
 0x10b   :  { %13 = sbr.rel (!%p11_p4) target bundleno = 1 (0x1), region = 75 }

// kernel: features_forward.12
= control target key start
LH: loop header
LB: loop body
LE: loop exit
PB: predicated region body
PF: predicated region fallthrough
CT: control target
= control target key end

     0   :  { %s7197_s1 = inlined_call_operand.vmem [shape: bf16[1,2304,384], index: 1, kind: input, shape index: {}]   ;;  %s7198_s0 = inlined_call_operand.vmem [shape: bf16[1,32,2304], index: 0, kind: input, shape index: {}]   ;;  %s7199_s2 = inlined_call_operand.vmem [shape: f32[1,1,384], index: 2, kind: input, shape index: {}]   ;;  %s7200_s3 = inlined_call_operand.vmem [shape: bf16[32,384], index: 3, kind: output, shape index: {}]  }
   0x1   :  { %v4954_v0 = vld [vmem:[%s7197_s1 + $0x4] ss:$12 sps:$4 sm:$0xff]   ;;  %v4958_v2 = vld [vmem:[%s7197_s1] ss:$12 sps:$4 sm:$0xff]   ;;  %v4960_v4 = vld [vmem:[%s7197_s1 + $0x1c] ss:$12 sps:$4 sm:$0xff]  }
   0x2   :  { %v4956_v1 = vld [vmem:[%s7197_s1 + $0x304] ss:$12 sps:$4 sm:$0xff]   ;;  %3142 = vmatprep.subr.bf16.mxu1 %v4954_v0  ;;  %v4959_v3 = vld [vmem:[%s7197_s1 + $0x300] ss:$12 sps:$4 sm:$0xff]   ;;  %v4962_v5 = vld [vmem:[%s7197_s1 + $0x31c] ss:$12 sps:$4 sm:$0xff]  }
   0x3   :  { %3248 = vmatprep.subr.bf16.mxu0 %v4956_v1  ;;  %3143 = vmatpush1.bf16.msra.mxu1 %v4958_v2  ;;  %v4964_v6 = vld [vmem:[%s7197_s1 + $0x18] ss:$12 sps:$4 sm:$0xff]   ;;  %v4966_v8 = vld [vmem:[%s7197_s1 + $0x34] ss:$12 sps:$4 sm:$0xff]   ;;  %v4970_v10 = vld [vmem:[%s7197_s1 + $0x30] ss:$12 sps:$4 sm:$0xff]  }
   0x4   :  { %3249 = vmatpush1.bf16.msra.mxu0 %v4959_v3  ;;  %3144 = vmatprep.subr.bf16.mxu1 %v4960_v4  ;;  %v4965_v7 = vld [vmem:[%s7197_s1 + $0x318] ss:$12 sps:$4 sm:$0xff]   ;;  %v4968_v9 = vld [vmem:[%s7197_s1 + $0x334] ss:$12 sps:$4 sm:$0xff]   ;;  %v4971_v11 = vld [vmem:[%s7197_s1 + $0x330] ss:$12 sps:$4 sm:$0xff]  }
   0x5   :  { %3250 = vmatprep.subr.bf16.mxu0 %v4962_v5  ;;  %v4972_v12 = vld [vmem:[%s7197_s1 + $0x4c] ss:$12 sps:$4 sm:$0xff]   ;;  %v4976_v14 = vld [vmem:[%s7197_s1 + $0x48] ss:$12 sps:$4 sm:$0xff]   ;;  %v4978_v16 = vld [vmem:[%s7197_s1 + $0x64] ss:$12 sps:$4 sm:$0xff]  }
   0x6   :  { %v4974_v13 = vld [vmem:[%s7197_s1 + $0x34c] ss:$12 sps:$4 sm:$0xff]   ;;  %v4977_v15 = vld [vmem:[%s7197_s1 + $0x348] ss:$12 sps:$4 sm:$0xff]   ;;  %v4980_v17 = vld [vmem:[%s7197_s1 + $0x364] ss:$12 sps:$4 sm:$0xff]  }
   0x7   :  { %3145 = vmatpush1.bf16.msra.mxu1 %v4964_v6  ;;  %v4982_v18 = vld [vmem:[%s7197_s1 + $0x60] ss:$12 sps:$4 sm:$0xff]   ;;  %v4984_v20 = vld [vmem:[%s7197_s1 + $0x7c] ss:$12 sps:$4 sm:$0xff]   ;;  %v4988_v22 = vld [vmem:[%s7197_s1 + $0x78] ss:$12 sps:$4 sm:$0xff]  }
   0x8   :  { %3251 = vmatpush1.bf16.msra.mxu0 %v4965_v7  ;;  %3146 = vmatprep.subr.bf16.mxu1 %v4966_v8  ;;  %v4983_v19 = vld [vmem:[%s7197_s1 + $0x360] ss:$12 sps:$4 sm:$0xff]   ;;  %v4986_v21 = vld [vmem:[%s7197_s1 + $0x37c] ss:$12 sps:$4 sm:$0xff]   ;;  %v4989_v23 = vld [vmem:[%s7197_s1 + $0x378] ss:$12 sps:$4 sm:$0xff]  }
   0x9   :  { %3252 = vmatprep.subr.bf16.mxu0 %v4968_v9  ;;  %v4990_v24 = vld [vmem:[%s7197_s1 + $0x94] ss:$12 sps:$4 sm:$0xff]   ;;  %v4994_v26 = vld [vmem:[%s7197_s1 + $0x90] ss:$12 sps:$4 sm:$0xff]   ;;  %v4996_v28 = vld [vmem:[%s7197_s1 + $0xac] ss:$12 sps:$4 sm:$0xff]  }
   0xa   :  { %v4992_v25 = vld [vmem:[%s7197_s1 + $0x394] ss:$12 sps:$4 sm:$0xff]   ;;  %v4995_v27 = vld [vmem:[%s7197_s1 + $0x390] ss:$12 sps:$4 sm:$0xff]   ;;  %v4998_v29 = vld [vmem:[%s7197_s1 + $0x3ac] ss:$12 sps:$4 sm:$0xff]  }
   0xb   :  { %3147 = vmatpush1.bf16.msra.mxu1 %v4970_v10  ;;  %v5000_v30 = vld [vmem:[%s7197_s1 + $0xa8] ss:$12 sps:$4 sm:$0xff]   ;;  %v5002_v32 = vld [vmem:[%s7197_s1 + $0xc4] ss:$12 sps:$4 sm:$0xff]   ;;  %v5006_v34 = vld [vmem:[%s7197_s1 + $0xc0] ss:$12 sps:$4 sm:$0xff]  }
   0xc   :  { %3253 = vmatpush1.bf16.msra.mxu0 %v4971_v11  ;;  %3148 = vmatprep.subr.bf16.mxu1 %v4972_v12  ;;  %v5001_v31 = vld [vmem:[%s7197_s1 + $0x3a8] ss:$12 sps:$4 sm:$0xff]   ;;  %v5004_v33 = vld [vmem:[%s7197_s1 + $0x3c4] ss:$12 sps:$4 sm:$0xff]   ;;  %v5007_v35 = vld [vmem:[%s7197_s1 + $0x3c0] ss:$12 sps:$4 sm:$0xff]  }
   0xd   :  { %3254 = vmatprep.subr.bf16.mxu0 %v4974_v13  ;;  %v5008_v36 = vld [vmem:[%s7197_s1 + $0xdc] ss:$12 sps:$4 sm:$0xff]   ;;  %v5012_v38 = vld [vmem:[%s7197_s1 + $0xd8] ss:$12 sps:$4 sm:$0xff]   ;;  %v5014_v40 = vld [vmem:[%s7197_s1 + $0xf4] ss:$12 sps:$4 sm:$0xff]  }
   0xe   :  { %v5010_v37 = vld [vmem:[%s7197_s1 + $0x3dc] ss:$12 sps:$4 sm:$0xff]   ;;  %v5013_v39 = vld [vmem:[%s7197_s1 + $0x3d8] ss:$12 sps:$4 sm:$0xff]   ;;  %v5016_v41 = vld [vmem:[%s7197_s1 + $0x3f4] ss:$12 sps:$4 sm:$0xff]  }
   0xf   :  { %3149 = vmatpush1.bf16.msra.mxu1 %v4976_v14  ;;  %v5018_v42 = vld [vmem:[%s7197_s1 + $0xf0] ss:$12 sps:$4 sm:$0xff]   ;;  %v5020_v44 = vld [vmem:[%s7197_s1 + $0x10c] ss:$12 sps:$4 sm:$0xff]   ;;  %v5024_v46 = vld [vmem:[%s7197_s1 + $0x108] ss:$12 sps:$4 sm:$0xff]  }
  0x10   :  { %3255 = vmatpush1.bf16.msra.mxu0 %v4977_v15  ;;  %3150 = vmatprep.subr.bf16.mxu1 %v4978_v16  ;;  %v5019_v43 = vld [vmem:[%s7197_s1 + $0x3f0] ss:$12 sps:$4 sm:$0xff]   ;;  %v5022_v45 = vld [vmem:[%s7197_s1 + $0x40c] ss:$12 sps:$4 sm:$0xff]   ;;  %v5025_v47 = vld [vmem:[%s7197_s1 + $0x408] ss:$12 sps:$4 sm:$0xff]  }
  0x11   :  { %3256 = vmatprep.subr.bf16.mxu0 %v4980_v17  ;;  %v5757_v48 = vld [vmem:[%s7198_s0 + $0x4] ss:$72 sps:$4 sm:$0xff]   ;;  %v5058_v51 = vld [vmem:[%s7198_s0 + $0x14] ss:$72 sps:$4 sm:$0xff]   ;;  %v5820_v4 = vld [vmem:[%s7198_s0] ss:$72 sps:$4 sm:$0xff]  }
  0x12   :  { %v5026_v49 = vld [vmem:[%s7197_s1 + $0x124] ss:$12 sps:$4 sm:$0xff]   ;;  %3174 = vmatprep.mubr.bf16.mxu1 %v5757_v48  ;;  %v5030_v52 = vld [vmem:[%s7197_s1 + $0x120] ss:$12 sps:$4 sm:$0xff]   ;;  %v5032_v54 = vld [vmem:[%s7197_s1 + $0x13c] ss:$12 sps:$4 sm:$0xff]   ;;  %3280 = vmatprep.mubr.bf16.mxu0 %v5058_v51 }
  0x13   :  { %3151 = vmatpush1.bf16.msra.mxu1 %v4982_v18  ;;  %v5028_v50 = vld [vmem:[%s7197_s1 + $0x424] ss:$12 sps:$4 sm:$0xff]   ;;  %v5031_v53 = vld [vmem:[%s7197_s1 + $0x420] ss:$12 sps:$4 sm:$0xff]   ;;  %v5034_v55 = vld [vmem:[%s7197_s1 + $0x43c] ss:$12 sps:$4 sm:$0xff]  }
  0x14   :  { %3257 = vmatpush1.bf16.msra.mxu0 %v4983_v19  ;;  %3152 = vmatprep.subr.bf16.mxu1 %v4984_v20  ;;  %v5036_v56 = vld [vmem:[%s7197_s1 + $0x138] ss:$12 sps:$4 sm:$0xff]   ;;  %v5038_v58 = vld [vmem:[%s7197_s1 + $0x154] ss:$12 sps:$4 sm:$0xff]   ;;  %v5042_v60 = vld [vmem:[%s7197_s1 + $0x150] ss:$12 sps:$4 sm:$0xff]  }
  0x15   :  { %3258 = vmatprep.subr.bf16.mxu0 %v4986_v21  ;;  %v5037_v57 = vld [vmem:[%s7197_s1 + $0x438] ss:$12 sps:$4 sm:$0xff]   ;;  %v5040_v59 = vld [vmem:[%s7197_s1 + $0x454] ss:$12 sps:$4 sm:$0xff]   ;;  %v5043_v61 = vld [vmem:[%s7197_s1 + $0x450] ss:$12 sps:$4 sm:$0xff]  }
  0x16   :  { %v5044_v62 = vld [vmem:[%s7197_s1 + $0x16c] ss:$12 sps:$4 sm:$0xff]   ;;  %v5048_v0 = vld [vmem:[%s7197_s1 + $0x168] ss:$12 sps:$4 sm:$0xff]   ;;  %v5055_v2 = vld [vmem:[%s7197_s1 + $0x184] ss:$12 sps:$4 sm:$0xff]  }
  0x17   :  { %3153 = vmatpush1.bf16.msra.mxu1 %v4988_v22  ;;  %v5046_v63 = vld [vmem:[%s7197_s1 + $0x46c] ss:$12 sps:$4 sm:$0xff]   ;;  %v5049_v1 = vld [vmem:[%s7197_s1 + $0x468] ss:$12 sps:$4 sm:$0xff]   ;;  %v5061_v3 = vld [vmem:[%s7197_s1 + $0x484] ss:$12 sps:$4 sm:$0xff]  }
  0x18   :  { %3259 = vmatpush1.bf16.msra.mxu0 %v4989_v23  ;;  %3154 = vmatprep.subr.bf16.mxu1 %v4990_v24  ;;  %v5053_v5 = vld [vmem:[%s7197_s1 + $0x180] ss:$12 sps:$4 sm:$0xff]   ;;  %v5056_v6 = vld [vmem:[%s7198_s0 + $0x10] ss:$72 sps:$4 sm:$0xff]   ;;  %v5064_v8 = vld [vmem:[%s7197_s1 + $0x19c] ss:$12 sps:$4 sm:$0xff]  }
  0x19   :  { %3260 = vmatprep.subr.bf16.mxu0 %v4992_v25  ;;  %v5059_v7 = vld [vmem:[%s7197_s1 + $0x480] ss:$12 sps:$4 sm:$0xff]   ;;  %v5067_v9 = vld [vmem:[%s7197_s1 + $0x49c] ss:$12 sps:$4 sm:$0xff]   ;;  %v5062_v10 = vld [vmem:[%s7197_s1 + $0x198] ss:$12 sps:$4 sm:$0xff]  }
  0x1a   :  { %v5065_v11 = vld [vmem:[%s7197_s1 + $0x498] ss:$12 sps:$4 sm:$0xff]   ;;  %v5070_v12 = vld [vmem:[%s7197_s1 + $0x1b4] ss:$12 sps:$4 sm:$0xff]   ;;  %v5068_v14 = vld [vmem:[%s7197_s1 + $0x1b0] ss:$12 sps:$4 sm:$0xff]  }
  0x1b   :  { %3155 = vmatpush1.bf16.msra.mxu1 %v4994_v26  ;;  %v5073_v13 = vld [vmem:[%s7197_s1 + $0x4b4] ss:$12 sps:$4 sm:$0xff]   ;;  %v5071_v15 = vld [vmem:[%s7197_s1 + $0x4b0] ss:$12 sps:$4 sm:$0xff]   ;;  %v5076_v16 = vld [vmem:[%s7197_s1 + $0x1cc] ss:$12 sps:$4 sm:$0xff]  }
  0x1c   :  { %3261 = vmatpush1.bf16.msra.mxu0 %v4995_v27  ;;  %3156 = vmatprep.subr.bf16.mxu1 %v4996_v28  ;;  %v5079_v17 = vld [vmem:[%s7197_s1 + $0x4cc] ss:$12 sps:$4 sm:$0xff]   ;;  %v5074_v18 = vld [vmem:[%s7197_s1 + $0x1c8] ss:$12 sps:$4 sm:$0xff]   ;;  %v5082_v20 = vld [vmem:[%s7197_s1 + $0x1e4] ss:$12 sps:$4 sm:$0xff]  }
  0x1d   :  { %3262 = vmatprep.subr.bf16.mxu0 %v4998_v29  ;;  %v5077_v19 = vld [vmem:[%s7197_s1 + $0x4c8] ss:$12 sps:$4 sm:$0xff]   ;;  %v5085_v21 = vld [vmem:[%s7197_s1 + $0x4e4] ss:$12 sps:$4 sm:$0xff]   ;;  %v5080_v22 = vld [vmem:[%s7197_s1 + $0x1e0] ss:$12 sps:$4 sm:$0xff]  }
  0x1e   :  { %v5083_v23 = vld [vmem:[%s7197_s1 + $0x4e0] ss:$12 sps:$4 sm:$0xff]   ;;  %v5088_v24 = vld [vmem:[%s7197_s1 + $0x1fc] ss:$12 sps:$4 sm:$0xff]   ;;  %v5086_v26 = vld [vmem:[%s7197_s1 + $0x1f8] ss:$12 sps:$4 sm:$0xff]  }
  0x1f   :  { %3157 = vmatpush1.bf16.msra.mxu1 %v5000_v30  ;;  %v5091_v25 = vld [vmem:[%s7197_s1 + $0x4fc] ss:$12 sps:$4 sm:$0xff]   ;;  %v5089_v27 = vld [vmem:[%s7197_s1 + $0x4f8] ss:$12 sps:$4 sm:$0xff]   ;;  %v5094_v30 = vld [vmem:[%s7197_s1 + $0x214] ss:$12 sps:$4 sm:$0xff]  }
  0x20   :  { %3263 = vmatpush1.bf16.msra.mxu0 %v5001_v31  ;;  %3158 = vmatprep.subr.bf16.mxu1 %v5002_v32  ;;  %v5895_v28 = vld [vmem:[%s7198_s0 + $0x94] ss:$72 sps:$4 sm:$0xff]   ;;  %v5900_v29 = vld [vmem:[%s7198_s0 + $0x90] ss:$72 sps:$4 sm:$0xff]   ;;  %v5146_v32 = vld [vmem:[%s7198_s0 + $0xa4] ss:$72 sps:$4 sm:$0xff]  }
  0x21   :  { %3264 = vmatprep.subr.bf16.mxu0 %v5004_v33  ;;  %v5097_v31 = vld [vmem:[%s7197_s1 + $0x514] ss:$12 sps:$4 sm:$0xff]   ;;  %v5092_v33 = vld [vmem:[%s7197_s1 + $0x210] ss:$12 sps:$4 sm:$0xff]  }
  0x22   :  { %v5118_v51 = vld [vmem:[%s7197_s1 + $0x274] ss:$12 sps:$4 sm:$0xff]  }
  0x23   :  { %3159 = vmatpush1.bf16.msra.mxu1 %v5006_v34  ;;  %v5095_v34 = vld [vmem:[%s7197_s1 + $0x510] ss:$12 sps:$4 sm:$0xff]  }
  0x24   :  { %3265 = vmatpush1.bf16.msra.mxu0 %v5007_v35  ;;  %3160 = vmatprep.subr.bf16.mxu1 %v5008_v36  ;;  %v5151_v35 = vld [vmem:[%s7198_s0 + $0xa0] ss:$72 sps:$4 sm:$0xff]   ;;  %v5100_v36 = vld [vmem:[%s7197_s1 + $0x22c] ss:$12 sps:$4 sm:$0xff]  }
  0x25   :  { %3266 = vmatprep.subr.bf16.mxu0 %v5010_v37  ;;  %v5103_v37 = vld [vmem:[%s7197_s1 + $0x52c] ss:$12 sps:$4 sm:$0xff]  }
  0x27   :  { %3161 = vmatpush1.bf16.msra.mxu1 %v5012_v38  ;;  %v5098_v38 = vld [vmem:[%s7197_s1 + $0x228] ss:$12 sps:$4 sm:$0xff]  }
  0x28   :  { %3267 = vmatpush1.bf16.msra.mxu0 %v5013_v39  ;;  %3162 = vmatprep.subr.bf16.mxu1 %v5014_v40  ;;  %v5101_v39 = vld [vmem:[%s7197_s1 + $0x528] ss:$12 sps:$4 sm:$0xff]   ;;  %v5106_v40 = vld [vmem:[%s7197_s1 + $0x244] ss:$12 sps:$4 sm:$0xff]  }
  0x29   :  { %3268 = vmatprep.subr.bf16.mxu0 %v5016_v41  ;;  %v5940_v41 = vld [vmem:[%s7198_s0 + $0xc] ss:$72 sps:$4 sm:$0xff]  }
  0x2b   :  { %3163 = vmatpush1.bf16.msra.mxu1 %v5018_v42  ;;  %v5109_v42 = vld [vmem:[%s7197_s1 + $0x544] ss:$12 sps:$4 sm:$0xff]  }
  0x2c   :  { %3269 = vmatpush1.bf16.msra.mxu0 %v5019_v43  ;;  %3164 = vmatprep.subr.bf16.mxu1 %v5020_v44  ;;  %v5163_v43 = vld [vmem:[%s7198_s0 + $0x1c] ss:$72 sps:$4 sm:$0xff]   ;;  %v5104_v44 = vld [vmem:[%s7197_s1 + $0x240] ss:$12 sps:$4 sm:$0xff]  }
  0x2d   :  { %3270 = vmatprep.subr.bf16.mxu0 %v5022_v45  ;;  %v5107_v45 = vld [vmem:[%s7197_s1 + $0x540] ss:$12 sps:$4 sm:$0xff]  }
  0x2f   :  { %3165 = vmatpush1.bf16.msra.mxu1 %v5024_v46  ;;  %v5112_v46 = vld [vmem:[%s7197_s1 + $0x25c] ss:$12 sps:$4 sm:$0xff]  }
  0x30   :  { %3271 = vmatpush1.bf16.msra.mxu0 %v5025_v47  ;;  %3166 = vmatprep.subr.bf16.mxu1 %v5026_v49  ;;  %v5115_v47 = vld [vmem:[%s7197_s1 + $0x55c] ss:$12 sps:$4 sm:$0xff]   ;;  %v5110_v49 = vld [vmem:[%s7197_s1 + $0x258] ss:$12 sps:$4 sm:$0xff]  }
  0x31   :  { %3272 = vmatprep.subr.bf16.mxu0 %v5028_v50  ;;  %v5113_v50 = vld [vmem:[%s7197_s1 + $0x558] ss:$12 sps:$4 sm:$0xff]  }
  0x33   :  { %3167 = vmatpush1.bf16.msra.mxu1 %v5030_v52  ;;  %v5121_v52 = vld [vmem:[%s7197_s1 + $0x574] ss:$12 sps:$4 sm:$0xff]  }
  0x34   :  { %3273 = vmatpush1.bf16.msra.mxu0 %v5031_v53  ;;  %3168 = vmatprep.subr.bf16.mxu1 %v5032_v54  ;;  %v5116_v53 = vld [vmem:[%s7197_s1 + $0x270] ss:$12 sps:$4 sm:$0xff]  }
  0x35   :  { %3274 = vmatprep.subr.bf16.mxu0 %v5034_v55  ;;  %v5119_v54 = vld [vmem:[%s7197_s1 + $0x570] ss:$12 sps:$4 sm:$0xff]   ;;  %v5124_v55 = vld [vmem:[%s7197_s1 + $0x28c] ss:$12 sps:$4 sm:$0xff]  }
  0x37   :  { %3169 = vmatpush1.bf16.msra.mxu1 %v5036_v56  ;;  %v5127_v56 = vld [vmem:[%s7197_s1 + $0x58c] ss:$12 sps:$4 sm:$0xff]  }
  0x38   :  { %3275 = vmatpush1.bf16.msra.mxu0 %v5037_v57  ;;  %3170 = vmatprep.subr.bf16.mxu1 %v5038_v58  ;;  %v5122_v57 = vld [vmem:[%s7197_s1 + $0x288] ss:$12 sps:$4 sm:$0xff]  }
  0x39   :  { %3276 = vmatprep.subr.bf16.mxu0 %v5040_v59  ;;  %v5125_v58 = vld [vmem:[%s7197_s1 + $0x588] ss:$12 sps:$4 sm:$0xff]   ;;  %v5130_v59 = vld [vmem:[%s7197_s1 + $0x2a4] ss:$12 sps:$4 sm:$0xff]  }
  0x3b   :  { %3171 = vmatpush1.bf16.msra.mxu1 %v5042_v60  ;;  %v5133_v60 = vld [vmem:[%s7197_s1 + $0x5a4] ss:$12 sps:$4 sm:$0xff]  }
  0x3c   :  { %3277 = vmatpush1.bf16.msra.mxu0 %v5043_v61  ;;  %3172 = vmatprep.subr.bf16.mxu1 %v5044_v62  ;;  %v5128_v61 = vld [vmem:[%s7197_s1 + $0x2a0] ss:$12 sps:$4 sm:$0xff]  }
  0x3d   :  { %3278 = vmatprep.subr.bf16.mxu0 %v5046_v63  ;;  %v5131_v62 = vld [vmem:[%s7197_s1 + $0x5a0] ss:$12 sps:$4 sm:$0xff]   ;;  %v5136_v63 = vld [vmem:[%s7197_s1 + $0x2bc] ss:$12 sps:$4 sm:$0xff]  }
  0x3f   :  { %3173 = vmatpush1.bf16.msra.mxu1 %v5048_v0  ;;  %v5139_v0 = vld [vmem:[%s7197_s1 + $0x5bc] ss:$12 sps:$4 sm:$0xff]  }
  0x40   :  { %3279 = vmatpush1.bf16.msra.mxu0 %v5049_v1  ;;  %3195 = vmatprep.subr.bf16.mxu1 %v5055_v2  ;;  %v5134_v1 = vld [vmem:[%s7197_s1 + $0x2b8] ss:$12 sps:$4 sm:$0xff]  }
  0x41   :  { %3301 = vmatprep.subr.bf16.mxu0 %v5061_v3  ;;  %v5137_v2 = vld [vmem:[%s7197_s1 + $0x5b8] ss:$12 sps:$4 sm:$0xff]   ;;  %v5145_v3 = vld [vmem:[%s7197_s1 + $0x2d4] ss:$12 sps:$4 sm:$0xff]  }
  0x42   :  { %3175 = vmatmul.mubr.bf16.vlgmr.msra.gmra.mrb[0].mxu1 %v5820_v4 }
  0x43   :  { %3281 = vmatmul.mubr.bf16.vlgmr.msra.gmra.mrb[0].mxu0 %v5056_v6  ;;  %3196 = vmatpush1.bf16.msra.mxu1 %v5053_v5  ;;  %v5150_v5 = vld [vmem:[%s7197_s1 + $0x5d4] ss:$12 sps:$4 sm:$0xff]   ;;  %v5143_v6 = vld [vmem:[%s7197_s1 + $0x2d0] ss:$12 sps:$4 sm:$0xff]  }
  0x44   :  { %3302 = vmatpush1.bf16.msra.mxu0 %v5059_v7  ;;  %3197 = vmatprep.subr.bf16.mxu1 %v5064_v8  ;;  %v5148_v7 = vld [vmem:[%s7197_s1 + $0x5d0] ss:$12 sps:$4 sm:$0xff]   ;;  %v5154_v8 = vld [vmem:[%s7197_s1 + $0x2ec] ss:$12 sps:$4 sm:$0xff]  }
  0x45   :  { %3303 = vmatprep.subr.bf16.mxu0 %v5067_v9  ;;  %3184 = vmatprep.mubr.bf16.mxu1 %v5895_v28  ;;  %v5157_v9 = vld [vmem:[%s7197_s1 + $0x5ec] ss:$12 sps:$4 sm:$0xff]  }
  0x46   :  { %3290 = vmatprep.mubr.bf16.mxu0 %v5146_v32  ;;  %v5179_v32 = vld [vmem:[%s7197_s1 + $0x648] ss:$12 sps:$4 sm:$0xff]  }
  0x47   :  { %3198 = vmatpush1.bf16.msra.mxu1 %v5062_v10  ;;  %v5152_v10 = vld [vmem:[%s7197_s1 + $0x2e8] ss:$12 sps:$4 sm:$0xff]  }
  0x48   :  { %3304 = vmatpush1.bf16.msra.mxu0 %v5065_v11  ;;  %3199 = vmatprep.subr.bf16.mxu1 %v5070_v12  ;;  %v5155_v11 = vld [vmem:[%s7197_s1 + $0x5e8] ss:$12 sps:$4 sm:$0xff]  }
  0x49   :  { %3305 = vmatprep.subr.bf16.mxu0 %v5073_v13  ;;  %v6042_v12 = vld [vmem:[%s7198_s0 + $0x8] ss:$72 sps:$4 sm:$0xff]   ;;  %v5161_v13 = vld [vmem:[%s7198_s0 + $0x18] ss:$72 sps:$4 sm:$0xff]  }
  0x4a   :  { %3185 = vmatmul.mubr.bf16.gmra.mrb[4].mxu1 %v5900_v29 }
  0x4b   :  { %3200 = vmatpush1.bf16.msra.mxu1 %v5068_v14  ;;  %3291 = vmatmul.mubr.bf16.gmra.mrb[4].mxu0 %v5151_v35  ;;  %v5166_v14 = vld [vmem:[%s7197_s1 + $0x604] ss:$12 sps:$4 sm:$0xff]   ;;  %v5187_v35 = vld [vmem:[%s7197_s1 + $0x128] ss:$12 sps:$4 sm:$0xff]  }
  0x4c   :  { %3306 = vmatpush1.bf16.msra.mxu0 %v5071_v15  ;;  %3201 = vmatprep.subr.bf16.mxu1 %v5076_v16  ;;  %v5167_v15 = vld [vmem:[%s7197_s1 + $0xc8] ss:$12 sps:$4 sm:$0xff]   ;;  %v5164_v16 = vld [vmem:[%s7197_s1 + $0x600] ss:$12 sps:$4 sm:$0xff]  }
  0x4d   :  { %3307 = vmatprep.subr.bf16.mxu0 %v5079_v17  ;;  %3227 = vmatprep.mubr.bf16.mxu1 %v5940_v41  ;;  %v5168_v17 = vld [vmem:[%s7197_s1 + $0x8] ss:$12 sps:$4 sm:$0xff]  }
  0x4e   :  { %3333 = vmatprep.mubr.bf16.mxu0 %v5163_v43  ;;  %v5196_v43 = vld [vmem:[%s7197_s1 + $0x80] ss:$12 sps:$4 sm:$0xff]  }
  0x4f   :  { %3202 = vmatpush1.bf16.msra.mxu1 %v5074_v18  ;;  %v5171_v18 = vld [vmem:[%s7197_s1 + $0x61c] ss:$12 sps:$4 sm:$0xff]  }
  0x50   :  { %3308 = vmatpush1.bf16.msra.mxu0 %v5077_v19  ;;  %3203 = vmatprep.subr.bf16.mxu1 %v5082_v20  ;;  %v5172_v19 = vld [vmem:[%s7197_s1 + $0xe0] ss:$12 sps:$4 sm:$0xff]   ;;  %v6068_v20 = vld [vmem:[%s7198_s0 + $0x9c] ss:$72 sps:$4 sm:$0xff]  }
  0x51   :  { %3309 = vmatprep.subr.bf16.mxu0 %v5085_v21  ;;  %v5169_v21 = vld [vmem:[%s7197_s1 + $0x618] ss:$12 sps:$4 sm:$0xff]  }
  0x53   :  { %3204 = vmatpush1.bf16.msra.mxu1 %v5080_v22  ;;  %v5173_v22 = vld [vmem:[%s7197_s1 + $0x20] ss:$12 sps:$4 sm:$0xff]  }
  0x54   :  { %3310 = vmatpush1.bf16.msra.mxu0 %v5083_v23  ;;  %3205 = vmatprep.subr.bf16.mxu1 %v5088_v24  ;;  %v5176_v23 = vld [vmem:[%s7197_s1 + $0x634] ss:$12 sps:$4 sm:$0xff]   ;;  %v5177_v24 = vld [vmem:[%s7197_s1 + $0xf8] ss:$12 sps:$4 sm:$0xff]  }
  0x55   :  { %3311 = vmatprep.subr.bf16.mxu0 %v5091_v25  ;;  %v5174_v25 = vld [vmem:[%s7197_s1 + $0x630] ss:$12 sps:$4 sm:$0xff]  }
  0x57   :  { %3206 = vmatpush1.bf16.msra.mxu1 %v5086_v26  ;;  %v5178_v26 = vld [vmem:[%s7197_s1 + $0x38] ss:$12 sps:$4 sm:$0xff]  }
  0x58   :  { %3312 = vmatpush1.bf16.msra.mxu0 %v5089_v27  ;;  %3207 = vmatprep.subr.bf16.mxu1 %v5094_v30  ;;  %v6093_v27 = vld [vmem:[%s7198_s0 + $0x98] ss:$72 sps:$4 sm:$0xff]  }
  0x59   :  { %3313 = vmatprep.subr.bf16.mxu0 %v5097_v31  ;;  %v5181_v30 = vld [vmem:[%s7197_s1 + $0x64c] ss:$12 sps:$4 sm:$0xff]   ;;  %v5182_v31 = vld [vmem:[%s7197_s1 + $0x110] ss:$12 sps:$4 sm:$0xff]  }
  0x5b   :  { %3208 = vmatpush1.bf16.msra.mxu1 %v5092_v33  ;;  %v5183_v33 = vld [vmem:[%s7197_s1 + $0x50] ss:$12 sps:$4 sm:$0xff]  }
  0x5c   :  { %3314 = vmatpush1.bf16.msra.mxu0 %v5095_v34  ;;  %3209 = vmatprep.subr.bf16.mxu1 %v5100_v36  ;;  %v5186_v34 = vld [vmem:[%s7197_s1 + $0x664] ss:$12 sps:$4 sm:$0xff]   ;;  %v6118_v36 = vld [vmem:[%s7198_s0 + $0xac] ss:$72 sps:$4 sm:$0xff]  }
  0x5d   :  { %3315 = vmatprep.subr.bf16.mxu0 %v5103_v37  ;;  %v5184_v37 = vld [vmem:[%s7197_s1 + $0x660] ss:$12 sps:$4 sm:$0xff]  }
  0x5f   :  { %3210 = vmatpush1.bf16.msra.mxu1 %v5098_v38  ;;  %v5188_v38 = vld [vmem:[%s7197_s1 + $0x68] ss:$12 sps:$4 sm:$0xff]  }
  0x60   :  { %3316 = vmatpush1.bf16.msra.mxu0 %v5101_v39  ;;  %3211 = vmatprep.subr.bf16.mxu1 %v5106_v40  ;;  %v5194_v39 = vld [vmem:[%s7197_s1 + $0x67c] ss:$12 sps:$4 sm:$0xff]   ;;  %v5195_v40 = vld [vmem:[%s7197_s1 + $0x140] ss:$12 sps:$4 sm:$0xff]  }
  0x61   :  { %3317 = vmatprep.subr.bf16.mxu0 %v5109_v42  ;;  %v5192_v42 = vld [vmem:[%s7197_s1 + $0x678] ss:$12 sps:$4 sm:$0xff]  }
  0x63   :  { %3212 = vmatpush1.bf16.msra.mxu1 %v5104_v44  ;;  %v5199_v44 = vld [vmem:[%s7197_s1 + $0x694] ss:$12 sps:$4 sm:$0xff]  }
  0x64   :  { %3318 = vmatpush1.bf16.msra.mxu0 %v5107_v45  ;;  %3213 = vmatprep.subr.bf16.mxu1 %v5112_v46  ;;  %v5200_v45 = vld [vmem:[%s7197_s1 + $0x158] ss:$12 sps:$4 sm:$0xff]  }
  0x65   :  { %3319 = vmatprep.subr.bf16.mxu0 %v5115_v47  ;;  %v6154_v46 = vld [vmem:[%s7198_s0 + $0x24] ss:$72 sps:$4 sm:$0xff]   ;;  %v5197_v47 = vld [vmem:[%s7197_s1 + $0x690] ss:$12 sps:$4 sm:$0xff]  }
  0x67   :  { %3214 = vmatpush1.bf16.msra.mxu1 %v5110_v49  ;;  %v5201_v49 = vld [vmem:[%s7197_s1 + $0x98] ss:$12 sps:$4 sm:$0xff]  }
  0x68   :  { %3320 = vmatpush1.bf16.msra.mxu0 %v5113_v50  ;;  %3215 = vmatprep.subr.bf16.mxu1 %v5118_v51  ;;  %v5204_v50 = vld [vmem:[%s7197_s1 + $0x6ac] ss:$12 sps:$4 sm:$0xff]   ;;  %v5205_v51 = vld [vmem:[%s7197_s1 + $0x170] ss:$12 sps:$4 sm:$0xff]  }
  0x69   :  { %3321 = vmatprep.subr.bf16.mxu0 %v5121_v52  ;;  %v5202_v52 = vld [vmem:[%s7197_s1 + $0x6a8] ss:$12 sps:$4 sm:$0xff]  }
  0x6b   :  { %3216 = vmatpush1.bf16.msra.mxu1 %v5116_v53  ;;  %v5206_v53 = vld [vmem:[%s7197_s1 + $0xb0] ss:$12 sps:$4 sm:$0xff]  }
  0x6c   :  { %3322 = vmatpush1.bf16.msra.mxu0 %v5119_v54  ;;  %3217 = vmatprep.subr.bf16.mxu1 %v5124_v55  ;;  %v5209_v54 = vld [vmem:[%s7197_s1 + $0x6c4] ss:$12 sps:$4 sm:$0xff]   ;;  %v5210_v55 = vld [vmem:[%s7197_s1 + $0x248] ss:$12 sps:$4 sm:$0xff]  }
  0x6d   :  { %3323 = vmatprep.subr.bf16.mxu0 %v5127_v56  ;;  %v5207_v56 = vld [vmem:[%s7197_s1 + $0x6c0] ss:$12 sps:$4 sm:$0xff]  }
  0x6f   :  { %3218 = vmatpush1.bf16.msra.mxu1 %v5122_v57  ;;  %v5211_v57 = vld [vmem:[%s7197_s1 + $0x188] ss:$12 sps:$4 sm:$0xff]  }
  0x70   :  { %3324 = vmatpush1.bf16.msra.mxu0 %v5125_v58  ;;  %3219 = vmatprep.subr.bf16.mxu1 %v5130_v59  ;;  %v5214_v58 = vld [vmem:[%s7197_s1 + $0x6dc] ss:$12 sps:$4 sm:$0xff]   ;;  %v5215_v59 = vld [vmem:[%s7197_s1 + $0x260] ss:$12 sps:$4 sm:$0xff]  }
  0x71   :  { %3325 = vmatprep.subr.bf16.mxu0 %v5133_v60  ;;  %v5212_v60 = vld [vmem:[%s7197_s1 + $0x6d8] ss:$12 sps:$4 sm:$0xff]  }
  0x73   :  { %3220 = vmatpush1.bf16.msra.mxu1 %v5128_v61  ;;  %v5216_v61 = vld [vmem:[%s7197_s1 + $0x1a0] ss:$12 sps:$4 sm:$0xff]  }
  0x74   :  { %3326 = vmatpush1.bf16.msra.mxu0 %v5131_v62  ;;  %3221 = vmatprep.subr.bf16.mxu1 %v5136_v63  ;;  %v5219_v62 = vld [vmem:[%s7197_s1 + $0x6f4] ss:$12 sps:$4 sm:$0xff]   ;;  %v5220_v63 = vld [vmem:[%s7197_s1 + $0x278] ss:$12 sps:$4 sm:$0xff]  }
  0x75   :  { %3327 = vmatprep.subr.bf16.mxu0 %v5139_v0  ;;  %v5221_v0 = vld [vmem:[%s7197_s1 + $0x1b8] ss:$12 sps:$4 sm:$0xff]  }
  0x77   :  { %3222 = vmatpush1.bf16.msra.mxu1 %v5134_v1  ;;  %v5224_v1 = vld [vmem:[%s7197_s1 + $0x70c] ss:$12 sps:$4 sm:$0xff]  }
  0x78   :  { %3328 = vmatpush1.bf16.msra.mxu0 %v5137_v2  ;;  %3223 = vmatprep.subr.bf16.mxu1 %v5145_v3  ;;  %v5222_v2 = vld [vmem:[%s7197_s1 + $0x708] ss:$12 sps:$4 sm:$0xff]   ;;  %v5226_v3 = vld [vmem:[%s7197_s1 + $0x1d0] ss:$12 sps:$4 sm:$0xff]  }
  0x79   :  { %3329 = vmatprep.subr.bf16.mxu0 %v5150_v5  ;;  %v5229_v5 = vld [vmem:[%s7197_s1 + $0x724] ss:$12 sps:$4 sm:$0xff]  }
  0x7b   :  { %3224 = vmatpush1.bf16.msra.mxu1 %v5143_v6  ;;  %v5230_v6 = vld [vmem:[%s7197_s1 + $0x2a8] ss:$12 sps:$4 sm:$0xff]  }
  0x7c   :  { %3330 = vmatpush1.bf16.msra.mxu0 %v5148_v7  ;;  %3225 = vmatprep.subr.bf16.mxu1 %v5154_v8  ;;  %v5227_v7 = vld [vmem:[%s7197_s1 + $0x720] ss:$12 sps:$4 sm:$0xff]   ;;  %v5234_v8 = vld [vmem:[%s7197_s1 + $0x73c] ss:$12 sps:$4 sm:$0xff]  }
  0x7d   :  { %3331 = vmatprep.subr.bf16.mxu0 %v5157_v9  ;;  %v5235_v9 = vld [vmem:[%s7197_s1 + $0x2c0] ss:$12 sps:$4 sm:$0xff]  }
  0x7f   :  { %3226 = vmatpush1.bf16.msra.mxu1 %v5152_v10  ;;  %v5236_v10 = vld [vmem:[%s7197_s1 + $0x200] ss:$12 sps:$4 sm:$0xff]  }
  0x80   :  { %3332 = vmatpush1.bf16.msra.mxu0 %v5155_v11  ;;  %4630 = vmatprep.subr.bf16.mxu1 %v5167_v15  ;;  %v5241_v11 = vld [vmem:[%s7197_s1 + $0x754] ss:$12 sps:$4 sm:$0xff]   ;;  %v5244_v15 = vld [vmem:[%s7197_s1 + $0x218] ss:$12 sps:$4 sm:$0xff]  }
  0x81   :  { %3354 = vmatprep.subr.bf16.mxu0 %v5166_v14  ;;  %v5239_v14 = vld [vmem:[%s7197_s1 + $0x750] ss:$12 sps:$4 sm:$0xff]  }
  0x82   :  { %3228 = vmatmul.mubr.bf16.vlgmr.msra.gmra.mrb[0].mxu1 %v6042_v12 }
  0x83   :  { %3334 = vmatmul.mubr.bf16.vlgmr.msra.gmra.mrb[0].mxu0 %v5161_v13  ;;  %4631 = vmatpush3.bf16.msra.mxu1 %v5168_v17  ;;  %v5242_v13 = vld [vmem:[%s7197_s1 + $0x2d8] ss:$12 sps:$4 sm:$0xff]   ;;  %v5248_v17 = vld [vmem:[%s7197_s1 + $0x2f0] ss:$12 sps:$4 sm:$0xff]  }
  0x84   :  { %3355 = vmatpush1.bf16.msra.mxu0 %v5164_v16  ;;  %4632 = vmatprep.subr.bf16.mxu1 %v5172_v19  ;;  %v5247_v16 = vld [vmem:[%s7197_s1 + $0x76c] ss:$12 sps:$4 sm:$0xff]   ;;  %v5249_v19 = vld [vmem:[%s7197_s1 + $0x230] ss:$12 sps:$4 sm:$0xff]  }
  0x85   :  { %3356 = vmatprep.subr.bf16.mxu0 %v5171_v18  ;;  %3237 = vmatprep.mubr.bf16.mxu1 %v6068_v20  ;;  %v5245_v18 = vld [vmem:[%s7197_s1 + $0x768] ss:$12 sps:$4 sm:$0xff]  }
  0x86   :  { %3343 = vmatprep.mubr.bf16.mxu0 %v6118_v36 }
  0x87   :  { %4633 = vmatpush3.bf16.msra.mxu1 %v5173_v22  ;;  %v5256_v22 = vld [vmem:[%s7197_s1 + $0x3c8] ss:$12 sps:$4 sm:$0xff]  }
  0x88   :  { %3357 = vmatpush1.bf16.msra.mxu0 %v5169_v21  ;;  %4634 = vmatprep.subr.bf16.mxu1 %v5177_v24  ;;  %v5255_v21 = vld [vmem:[%s7197_s1 + $0x784] ss:$12 sps:$4 sm:$0xff]   ;;  %v5253_v24 = vld [vmem:[%s7197_s1 + $0x780] ss:$12 sps:$4 sm:$0xff]  }
  0x89   :  { %3358 = vmatprep.subr.bf16.mxu0 %v5176_v23  ;;  %v6284_v23 = vld [vmem:[%s7198_s0 + $0x20] ss:$72 sps:$4 sm:$0xff]  }
  0x8a   :  { %3238 = vmatmul.mubr.bf16.gmra.mrb[4].mxu1 %v6093_v27 }
  0x8b   :  { %4635 = vmatpush3.bf16.msra.mxu1 %v5178_v26  ;;  %3651 = vmatprep.mubr.bf16.mxu1 %v5757_v48  ;;  %v6132_v48 = vld [vmem:[%s7198_s0 + $0xa8] ss:$72 sps:$4 sm:$0xff]  }
  0x8c   :  { %3359 = vmatpush1.bf16.msra.mxu0 %v5174_v25  ;;  %4636 = vmatprep.subr.bf16.mxu1 %v5182_v31  ;;  %v5257_v25 = vld [vmem:[%s7197_s1 + $0x308] ss:$12 sps:$4 sm:$0xff]   ;;  %v5258_v31 = vld [vmem:[%s7197_s1 + $0x798] ss:$12 sps:$4 sm:$0xff]  }
  0x8d   :  { %3360 = vmatprep.subr.bf16.mxu0 %v5181_v30  ;;  %3344 = vmatmul.mubr.bf16.gmra.mrb[4].mxu0 %v6132_v48  ;;  %v5260_v26 = vld [vmem:[%s7197_s1 + $0x79c] ss:$12 sps:$4 sm:$0xff]   ;;  %v5261_v30 = vld [vmem:[%s7197_s1 + $0x3e0] ss:$12 sps:$4 sm:$0xff]  }
  0x8e   :  { %3386 = vmatprep.mubr.bf16.mxu0 %v6154_v46 }
  0x8f   :  { %4637 = vmatpush3.bf16.msra.mxu1 %v5183_v33  ;;  %v5265_v33 = vld [vmem:[%s7197_s1 + $0x7b4] ss:$12 sps:$4 sm:$0xff]  }
  0x90   :  { %3361 = vmatpush1.bf16.msra.mxu0 %v5179_v32  ;;  %4638 = vmatprep.subr.bf16.mxu1 %v5187_v35  ;;  %v5262_v32 = vld [vmem:[%s7197_s1 + $0x320] ss:$12 sps:$4 sm:$0xff]   ;;  %v5263_v35 = vld [vmem:[%s7197_s1 + $0x7b0] ss:$12 sps:$4 sm:$0xff]  }
  0x91   :  { %3362 = vmatprep.subr.bf16.mxu0 %v5186_v34  ;;  %v5266_v34 = vld [vmem:[%s7197_s1 + $0x3f8] ss:$12 sps:$4 sm:$0xff]  }
  0x93   :  { %4639 = vmatpush3.bf16.msra.mxu1 %v5188_v38  ;;  %v5270_v38 = vld [vmem:[%s7197_s1 + $0x7cc] ss:$12 sps:$4 sm:$0xff]  }
  0x94   :  { %3363 = vmatpush1.bf16.msra.mxu0 %v5184_v37  ;;  %4640 = vmatprep.subr.bf16.mxu1 %v5195_v40  ;;  %v5267_v37 = vld [vmem:[%s7197_s1 + $0x338] ss:$12 sps:$4 sm:$0xff]   ;;  %v5268_v40 = vld [vmem:[%s7197_s1 + $0x7c8] ss:$12 sps:$4 sm:$0xff]  }
  0x95   :  { %3364 = vmatprep.subr.bf16.mxu0 %v5194_v39  ;;  %v5271_v39 = vld [vmem:[%s7197_s1 + $0x410] ss:$12 sps:$4 sm:$0xff]  }
  0x97   :  { %4641 = vmatpush3.bf16.msra.mxu1 %v5196_v43  ;;  %v5275_v43 = vld [vmem:[%s7197_s1 + $0x7e4] ss:$12 sps:$4 sm:$0xff]  }
  0x98   :  { %3365 = vmatpush1.bf16.msra.mxu0 %v5192_v42  ;;  %4642 = vmatprep.subr.bf16.mxu1 %v5200_v45  ;;  %v5272_v42 = vld [vmem:[%s7197_s1 + $0x350] ss:$12 sps:$4 sm:$0xff]  }
  0x99   :  { %3366 = vmatprep.subr.bf16.mxu0 %v5199_v44  ;;  %v5276_v44 = vld [vmem:[%s7197_s1 + $0x428] ss:$12 sps:$4 sm:$0xff]  }
  0x9a   :  { %v5584_v45 = vld [vmem:[%s7198_s0 + $0x14] ss:$72 sps:$4 sm:$0xff]  }
  0x9b   :  { %4643 = vmatpush3.bf16.msra.mxu1 %v5201_v49  ;;  %v5277_v49 = vld [vmem:[%s7197_s1 + $0x368] ss:$12 sps:$4 sm:$0xff]  }
  0x9c   :  { %3367 = vmatpush1.bf16.msra.mxu0 %v5197_v47  ;;  %4644 = vmatprep.subr.bf16.mxu1 %v5205_v51  ;;  %v5273_v47 = vld [vmem:[%s7197_s1 + $0x7e0] ss:$12 sps:$4 sm:$0xff]  }
  0x9d   :  { %3368 = vmatprep.subr.bf16.mxu0 %v5204_v50  ;;  %v5280_v50 = vld [vmem:[%s7197_s1 + $0x7fc] ss:$12 sps:$4 sm:$0xff]   ;;  %v5281_v51 = vld [vmem:[%s7197_s1 + $0x440] ss:$12 sps:$4 sm:$0xff]  }
  0x9f   :  { %4645 = vmatpush3.bf16.msra.mxu1 %v5206_v53  ;;  %v5282_v53 = vld [vmem:[%s7197_s1 + $0x380] ss:$12 sps:$4 sm:$0xff]  }
  0xa0   :  { %3369 = vmatpush1.bf16.msra.mxu0 %v5202_v52  ;;  %4658 = vmatprep.subr.bf16.mxu1 %v5210_v55  ;;  %v5278_v52 = vld [vmem:[%s7197_s1 + $0x7f8] ss:$12 sps:$4 sm:$0xff]  }
  0xa1   :  { %3370 = vmatprep.subr.bf16.mxu0 %v5209_v54  ;;  %v5285_v54 = vld [vmem:[%s7197_s1 + $0x814] ss:$12 sps:$4 sm:$0xff]   ;;  %v5286_v55 = vld [vmem:[%s7197_s1 + $0x458] ss:$12 sps:$4 sm:$0xff]  }
  0xa2   :  { %3652 = vmatmul.mubr.bf16.vlgmr.msra.gmra.mrb[8].mxu1 %v5820_v4  ;;  %v5217_v4 = vld [vmem:[%s7197_s1 + $0x6f0] ss:$12 sps:$4 sm:$0xff]  }
  0xa3   :  { %4659 = vmatpush3.bf16.msra.mxu1 %v5211_v57  ;;  %3659 = vmatprep.mubr.bf16.mxu1 %v5895_v28  ;;  %v5225_v28 = vld [vmem:[%s7197_s1 + $0x290] ss:$12 sps:$4 sm:$0xff]   ;;  %v5287_v57 = vld [vmem:[%s7197_s1 + $0x398] ss:$12 sps:$4 sm:$0xff]  }
  0xa4   :  { %3371 = vmatpush1.bf16.msra.mxu0 %v5207_v56  ;;  %4660 = vmatprep.subr.bf16.mxu1 %v5215_v59  ;;  %v5283_v56 = vld [vmem:[%s7197_s1 + $0x810] ss:$12 sps:$4 sm:$0xff]  }
  0xa5   :  { %3372 = vmatprep.subr.bf16.mxu0 %v5214_v58  ;;  %v5290_v58 = vld [vmem:[%s7197_s1 + $0x82c] ss:$12 sps:$4 sm:$0xff]   ;;  %v5291_v59 = vld [vmem:[%s7197_s1 + $0x470] ss:$12 sps:$4 sm:$0xff]  }
  0xa7   :  { %4661 = vmatpush3.bf16.msra.mxu1 %v5216_v61  ;;  %v5292_v61 = vld [vmem:[%s7197_s1 + $0x3b0] ss:$12 sps:$4 sm:$0xff]  }
  0xa8   :  { %3373 = vmatpush1.bf16.msra.mxu0 %v5212_v60  ;;  %4662 = vmatprep.subr.bf16.mxu1 %v5220_v63  ;;  %v5288_v60 = vld [vmem:[%s7197_s1 + $0x828] ss:$12 sps:$4 sm:$0xff]  }
  0xa9   :  { %3374 = vmatprep.subr.bf16.mxu0 %v5219_v62  ;;  %v5295_v62 = vld [vmem:[%s7197_s1 + $0x844] ss:$12 sps:$4 sm:$0xff]   ;;  %v5296_v63 = vld [vmem:[%s7197_s1 + $0x548] ss:$12 sps:$4 sm:$0xff]  }
  0xaa   :  { %3660 = vmatmul.mubr.bf16.gmra.mrb[12].mxu1 %v5900_v29  ;;  %v5231_v29 = vld [vmem:[%s7197_s1 + $0x1e8] ss:$12 sps:$4 sm:$0xff]  }
  0xab   :  { %4663 = vmatpush3.bf16.msra.mxu1 %v5221_v0  ;;  %3700 = vmatprep.mubr.bf16.mxu1 %v5940_v41  ;;  %v5232_v41 = vld [vmem:[%s7197_s1 + $0x738] ss:$12 sps:$4 sm:$0xff]   ;;  %v5297_v0 = vld [vmem:[%s7197_s1 + $0x488] ss:$12 sps:$4 sm:$0xff]  }
  0xac   :  { %3375 = vmatpush1.bf16.msra.mxu0 %v5217_v4  ;;  %4664 = vmatprep.subr.bf16.mxu1 %v5225_v28  ;;  %v5293_v4 = vld [vmem:[%s7197_s1 + $0x840] ss:$12 sps:$4 sm:$0xff]  }
  0xad   :  { %3376 = vmatprep.subr.bf16.mxu0 %v5224_v1  ;;  %v5300_v1 = vld [vmem:[%s7197_s1 + $0x85c] ss:$12 sps:$4 sm:$0xff]   ;;  %v5301_v28 = vld [vmem:[%s7197_s1 + $0x560] ss:$12 sps:$4 sm:$0xff]  }
  0xaf   :  { %4665 = vmatpush3.bf16.msra.mxu1 %v5226_v3  ;;  %v5298_v3 = vld [vmem:[%s7197_s1 + $0x858] ss:$12 sps:$4 sm:$0xff]  }
  0xb0   :  { %3377 = vmatpush1.bf16.msra.mxu0 %v5222_v2  ;;  %4666 = vmatprep.subr.bf16.mxu1 %v5230_v6  ;;  %v5585_v2 = vld [vmem:[%s7198_s0 + $0x10] ss:$72 sps:$4 sm:$0xff]   ;;  %v5305_v6 = vld [vmem:[%s7197_s1 + $0x874] ss:$12 sps:$4 sm:$0xff]  }
  0xb1   :  { %3378 = vmatprep.subr.bf16.mxu0 %v5229_v5  ;;  %v5302_v5 = vld [vmem:[%s7197_s1 + $0x4a0] ss:$12 sps:$4 sm:$0xff]  }
  0xb3   :  { %4667 = vmatpush3.bf16.msra.mxu1 %v5231_v29  ;;  %v5586_v29 = vld [vmem:[%s7198_s0 + $0xa4] ss:$72 sps:$4 sm:$0xff]  }
  0xb4   :  { %3379 = vmatpush1.bf16.msra.mxu0 %v5227_v7  ;;  %4668 = vmatprep.subr.bf16.mxu1 %v5235_v9  ;;  %v5306_v7 = vld [vmem:[%s7197_s1 + $0x578] ss:$12 sps:$4 sm:$0xff]  }
  0xb5   :  { %3380 = vmatprep.subr.bf16.mxu0 %v5234_v8  ;;  %v5303_v8 = vld [vmem:[%s7197_s1 + $0x870] ss:$12 sps:$4 sm:$0xff]   ;;  %v5307_v9 = vld [vmem:[%s7197_s1 + $0x4b8] ss:$12 sps:$4 sm:$0xff]  }
  0xb7   :  { %4669 = vmatpush3.bf16.msra.mxu1 %v5236_v10  ;;  %v5311_v10 = vld [vmem:[%s7197_s1 + $0x590] ss:$12 sps:$4 sm:$0xff]  }
  0xb8   :  { %3381 = vmatpush1.bf16.msra.mxu0 %v5232_v41  ;;  %4670 = vmatprep.subr.bf16.mxu1 %v5242_v13  ;;  %v5310_v41 = vld [vmem:[%s7197_s1 + $0x88c] ss:$12 sps:$4 sm:$0xff]   ;;  %v5308_v13 = vld [vmem:[%s7197_s1 + $0x888] ss:$12 sps:$4 sm:$0xff]  }
  0xb9   :  { %3382 = vmatprep.subr.bf16.mxu0 %v5241_v11  ;;  %v5587_v11 = vld [vmem:[%s7198_s0 + $0xa0] ss:$72 sps:$4 sm:$0xff]  }
  0xbb   :  { %4671 = vmatpush3.bf16.msra.mxu1 %v5244_v15  ;;  %v5315_v15 = vld [vmem:[%s7197_s1 + $0x8a4] ss:$12 sps:$4 sm:$0xff]  }
  0xbc   :  { %3383 = vmatpush1.bf16.msra.mxu0 %v5239_v14  ;;  %4672 = vmatprep.subr.bf16.mxu1 %v5248_v17  ;;  %v5312_v14 = vld [vmem:[%s7197_s1 + $0x4d0] ss:$12 sps:$4 sm:$0xff]   ;;  %v5313_v17 = vld [vmem:[%s7197_s1 + $0x8a0] ss:$12 sps:$4 sm:$0xff]  }
  0xbd   :  { %3384 = vmatprep.subr.bf16.mxu0 %v5247_v16  ;;  %v5316_v16 = vld [vmem:[%s7197_s1 + $0x5a8] ss:$12 sps:$4 sm:$0xff]  }
  0xbf   :  { %4673 = vmatpush3.bf16.msra.mxu1 %v5249_v19  ;;  %v5317_v19 = vld [vmem:[%s7197_s1 + $0x4e8] ss:$12 sps:$4 sm:$0xff]  }
  0xc0   :  { %3385 = vmatpush1.bf16.msra.mxu0 %v5245_v18  ;;  %4686 = vmatprep.subr.bf16.mxu1 %v5256_v22  ;;  %v5588_v18 = vld [vmem:[%s7198_s0 + $0x1c] ss:$72 sps:$4 sm:$0xff]   ;;  %v5321_v22 = vld [vmem:[%s7197_s1 + $0x5c0] ss:$12 sps:$4 sm:$0xff]  }
  0xc1   :  { %3407 = vmatprep.subr.bf16.mxu0 %v5255_v21  ;;  %v5320_v21 = vld [vmem:[%s7197_s1 + $0x8bc] ss:$12 sps:$4 sm:$0xff]  }
  0xc2   :  { %3701 = vmatmul.mubr.bf16.vlgmr.msra.gmra.mrb[16].mxu1 %v6042_v12  ;;  %v6316_v12 = vld [vmem:[%s7198_s0 + $0xb4] ss:$72 sps:$4 sm:$0xff]  }
  0xc3   :  { %3387 = vmatmul.mubr.bf16.vlgmr.msra.gmra.mrb[0].mxu0 %v6284_v23  ;;  %4687 = vmatpush3.bf16.msra.mxu1 %v5257_v25  ;;  %v5322_v25 = vld [vmem:[%s7197_s1 + $0x500] ss:$12 sps:$4 sm:$0xff]  }
  0xc4   :  { %3408 = vmatpush1.bf16.msra.mxu0 %v5253_v24  ;;  %4688 = vmatprep.subr.bf16.mxu1 %v5261_v30  ;;  %v5318_v24 = vld [vmem:[%s7197_s1 + $0x8b8] ss:$12 sps:$4 sm:$0xff]  }
  0xc5   :  { %3409 = vmatprep.subr.bf16.mxu0 %v5260_v26  ;;  %3708 = vmatprep.mubr.bf16.mxu1 %v6068_v20  ;;  %v6330_v20 = vld [vmem:[%s7198_s0 + $0xb0] ss:$72 sps:$4 sm:$0xff]   ;;  %v5327_v26 = vld [vmem:[%s7197_s1 + $0x8d4] ss:$12 sps:$4 sm:$0xff]  }
  0xc6   :  { %3396 = vmatprep.mubr.bf16.mxu0 %v6316_v12  ;;  %v5328_v30 = vld [vmem:[%s7197_s1 + $0x5d8] ss:$12 sps:$4 sm:$0xff]  }
  0xc7   :  { %4689 = vmatpush3.bf16.msra.mxu1 %v5262_v32  ;;  %v5330_v32 = vld [vmem:[%s7197_s1 + $0x518] ss:$12 sps:$4 sm:$0xff]  }
  0xc8   :  { %3410 = vmatpush1.bf16.msra.mxu0 %v5258_v31  ;;  %4690 = vmatprep.subr.bf16.mxu1 %v5266_v34  ;;  %v5325_v31 = vld [vmem:[%s7197_s1 + $0x8d0] ss:$12 sps:$4 sm:$0xff]  }
  0xc9   :  { %3411 = vmatprep.subr.bf16.mxu0 %v5265_v33  ;;  %v5333_v33 = vld [vmem:[%s7197_s1 + $0x8ec] ss:$12 sps:$4 sm:$0xff]   ;;  %v5334_v34 = vld [vmem:[%s7197_s1 + $0x5f0] ss:$12 sps:$4 sm:$0xff]  }
  0xca   :  { %3709 = vmatmul.mubr.bf16.gmra.mrb[20].mxu1 %v6093_v27  ;;  %v6356_v27 = vld [vmem:[%s7198_s0 + $0x2c] ss:$72 sps:$4 sm:$0xff]  }
  0xcb   :  { %3397 = vmatmul.mubr.bf16.gmra.mrb[4].mxu0 %v6330_v20  ;;  %4691 = vmatpush3.bf16.msra.mxu1 %v5267_v37  ;;  %v5335_v37 = vld [vmem:[%s7197_s1 + $0x530] ss:$12 sps:$4 sm:$0xff]  }
  0xcc   :  { %3412 = vmatpush1.bf16.msra.mxu0 %v5263_v35  ;;  %4692 = vmatprep.subr.bf16.mxu1 %v5271_v39  ;;  %v5331_v35 = vld [vmem:[%s7197_s1 + $0x8e8] ss:$12 sps:$4 sm:$0xff]  }
  0xcd   :  { %3413 = vmatprep.subr.bf16.mxu0 %v5270_v38  ;;  %3749 = vmatprep.mubr.bf16.mxu1 %v5584_v45  ;;  %v5341_v38 = vld [vmem:[%s7197_s1 + $0x904] ss:$12 sps:$4 sm:$0xff]   ;;  %v5342_v39 = vld [vmem:[%s7197_s1 + $0x6c8] ss:$12 sps:$4 sm:$0xff]   ;;  %v5347_v45 = vld [vmem:[%s7197_s1 + $0x6e0] ss:$12 sps:$4 sm:$0xff]  }
  0xce   :  { %3439 = vmatprep.mubr.bf16.mxu0 %v6356_v27 }
  0xcf   :  { %4693 = vmatpush3.bf16.msra.mxu1 %v5272_v42  ;;  %v5339_v42 = vld [vmem:[%s7197_s1 + $0x900] ss:$12 sps:$4 sm:$0xff]  }
  0xd0   :  { %3414 = vmatpush1.bf16.msra.mxu0 %v5268_v40  ;;  %4694 = vmatprep.subr.bf16.mxu1 %v5276_v44  ;;  %v6518_v40 = vld [vmem:[%s7198_s0 + $0x28] ss:$72 sps:$4 sm:$0xff]  }
  0xd1   :  { %3415 = vmatprep.subr.bf16.mxu0 %v5275_v43  ;;  %v5343_v43 = vld [vmem:[%s7197_s1 + $0x608] ss:$12 sps:$4 sm:$0xff]  }
  0xd2   :  { %v5346_v44 = vld [vmem:[%s7197_s1 + $0x91c] ss:$12 sps:$4 sm:$0xff]  }
  0xd3   :  { %4695 = vmatpush3.bf16.msra.mxu1 %v5277_v49  ;;  %v6538_v49 = vld [vmem:[%s7198_s0 + $0xbc] ss:$72 sps:$4 sm:$0xff]  }
  0xd4   :  { %3416 = vmatpush1.bf16.msra.mxu0 %v5273_v47  ;;  %4696 = vmatprep.subr.bf16.mxu1 %v5281_v51  ;;  %v5344_v47 = vld [vmem:[%s7197_s1 + $0x918] ss:$12 sps:$4 sm:$0xff]   ;;  %v5348_v51 = vld [vmem:[%s7197_s1 + $0x620] ss:$12 sps:$4 sm:$0xff]  }
  0xd5   :  { %3417 = vmatprep.subr.bf16.mxu0 %v5280_v50  ;;  %v5589_v50 = vld [vmem:[%s7198_s0 + $0x18] ss:$72 sps:$4 sm:$0xff]  }
  0xd7   :  { %4697 = vmatpush3.bf16.msra.mxu1 %v5282_v53  ;;  %v5352_v53 = vld [vmem:[%s7197_s1 + $0x6f8] ss:$12 sps:$4 sm:$0xff]  }
  0xd8   :  { %3418 = vmatpush1.bf16.msra.mxu0 %v5278_v52  ;;  %4698 = vmatprep.subr.bf16.mxu1 %v5286_v55  ;;  %v5351_v52 = vld [vmem:[%s7197_s1 + $0x934] ss:$12 sps:$4 sm:$0xff]   ;;  %v5353_v55 = vld [vmem:[%s7197_s1 + $0x638] ss:$12 sps:$4 sm:$0xff]  }
  0xd9   :  { %3419 = vmatprep.subr.bf16.mxu0 %v5285_v54  ;;  %v5349_v54 = vld [vmem:[%s7197_s1 + $0x930] ss:$12 sps:$4 sm:$0xff]  }
  0xdb   :  { %4699 = vmatpush3.bf16.msra.mxu1 %v5287_v57  ;;  %v5357_v57 = vld [vmem:[%s7197_s1 + $0x710] ss:$12 sps:$4 sm:$0xff]  }
  0xdc   :  { %3420 = vmatpush1.bf16.msra.mxu0 %v5283_v56  ;;  %4700 = vmatprep.subr.bf16.mxu1 %v5291_v59  ;;  %v6564_v56 = vld [vmem:[%s7198_s0 + $0xb8] ss:$72 sps:$4 sm:$0xff]   ;;  %v6578_v59 = vld [vmem:[%s7198_s0 + $0x34] ss:$72 sps:$4 sm:$0xff]  }
  0xdd   :  { %3421 = vmatprep.subr.bf16.mxu0 %v5290_v58  ;;  %v5354_v58 = vld [vmem:[%s7197_s1 + $0x948] ss:$12 sps:$4 sm:$0xff]  }
  0xdf   :  { %4701 = vmatpush3.bf16.msra.mxu1 %v5292_v61  ;;  %v5361_v61 = vld [vmem:[%s7197_s1 + $0x964] ss:$12 sps:$4 sm:$0xff]  }
  0xe0   :  { %3422 = vmatpush1.bf16.msra.mxu0 %v5288_v60  ;;  %4714 = vmatprep.subr.bf16.mxu1 %v5296_v63  ;;  %v5358_v60 = vld [vmem:[%s7197_s1 + $0x650] ss:$12 sps:$4 sm:$0xff]   ;;  %v5363_v63 = vld [vmem:[%s7197_s1 + $0x668] ss:$12 sps:$4 sm:$0xff]  }
  0xe1   :  { %3423 = vmatprep.subr.bf16.mxu0 %v5295_v62  ;;  %v5362_v62 = vld [vmem:[%s7197_s1 + $0x728] ss:$12 sps:$4 sm:$0xff]  }
  0xe2   :  { %3750 = vmatmul.mubr.bf16.vlgmr.msra.gmra.mrb[24].mxu1 %v5585_v2  ;;  %v5372_v2 = vld [vmem:[%s7197_s1 + $0x758] ss:$12 sps:$4 sm:$0xff]  }
  0xe3   :  { %4715 = vmatpush3.bf16.msra.mxu1 %v5297_v0  ;;  %3757 = vmatprep.mubr.bf16.mxu1 %v5586_v29  ;;  %v5364_v0 = vld [vmem:[%s7197_s1 + $0x978] ss:$12 sps:$4 sm:$0xff]   ;;  %v5374_v29 = vld [vmem:[%s7197_s1 + $0x9a8] ss:$12 sps:$4 sm:$0xff]  }
  0xe4   :  { %3424 = vmatpush1.bf16.msra.mxu0 %v5293_v4  ;;  %4716 = vmatprep.subr.bf16.mxu1 %v5301_v28  ;;  %v5366_v4 = vld [vmem:[%s7197_s1 + $0x97c] ss:$12 sps:$4 sm:$0xff]   ;;  %v5371_v28 = vld [vmem:[%s7197_s1 + $0x994] ss:$12 sps:$4 sm:$0xff]  }
  0xe5   :  { %3425 = vmatprep.subr.bf16.mxu0 %v5300_v1  ;;  %v5368_v1 = vld [vmem:[%s7197_s1 + $0x680] ss:$12 sps:$4 sm:$0xff]  }
  0xe7   :  { %4717 = vmatpush3.bf16.msra.mxu1 %v5302_v5  ;;  %v5373_v5 = vld [vmem:[%s7197_s1 + $0x698] ss:$12 sps:$4 sm:$0xff]  }
  0xe8   :  { %3426 = vmatpush1.bf16.msra.mxu0 %v5298_v3  ;;  %4718 = vmatprep.subr.bf16.mxu1 %v5306_v7  ;;  %v5369_v3 = vld [vmem:[%s7197_s1 + $0x990] ss:$12 sps:$4 sm:$0xff]  }
  0xe9   :  { %3427 = vmatprep.subr.bf16.mxu0 %v5305_v6  ;;  %v5376_v6 = vld [vmem:[%s7197_s1 + $0x9ac] ss:$12 sps:$4 sm:$0xff]   ;;  %v5377_v7 = vld [vmem:[%s7197_s1 + $0x770] ss:$12 sps:$4 sm:$0xff]  }
  0xea   :  { %3758 = vmatmul.mubr.bf16.gmra.mrb[28].mxu1 %v5587_v11  ;;  %v5383_v11 = vld [vmem:[%s7197_s1 + $0x788] ss:$12 sps:$4 sm:$0xff]  }
  0xeb   :  { %4719 = vmatpush3.bf16.msra.mxu1 %v5307_v9  ;;  %3798 = vmatprep.mubr.bf16.mxu1 %v5588_v18  ;;  %v5381_v9 = vld [vmem:[%s7197_s1 + $0x9c4] ss:$12 sps:$4 sm:$0xff]  }
  0xec   :  { %3428 = vmatpush1.bf16.msra.mxu0 %v5303_v8  ;;  %4720 = vmatprep.subr.bf16.mxu1 %v5311_v10  ;;  %v5378_v8 = vld [vmem:[%s7197_s1 + $0x6b0] ss:$12 sps:$4 sm:$0xff]   ;;  %v5379_v10 = vld [vmem:[%s7197_s1 + $0x9c0] ss:$12 sps:$4 sm:$0xff]   ;;  %v5392_v18 = vld [vmem:[%s7197_s1 + $0x878] ss:$12 sps:$4 sm:$0xff]  }
  0xed   :  { %3429 = vmatprep.subr.bf16.mxu0 %v5310_v41  ;;  %v5382_v41 = vld [vmem:[%s7197_s1 + $0x848] ss:$12 sps:$4 sm:$0xff]  }
  0xef   :  { %4721 = vmatpush3.bf16.msra.mxu1 %v5312_v14  ;;  %v5387_v14 = vld [vmem:[%s7197_s1 + $0x860] ss:$12 sps:$4 sm:$0xff]  }
  0xf0   :  { %3430 = vmatpush1.bf16.msra.mxu0 %v5308_v13  ;;  %4722 = vmatprep.subr.bf16.mxu1 %v5316_v16  ;;  %v5386_v13 = vld [vmem:[%s7197_s1 + $0x9dc] ss:$12 sps:$4 sm:$0xff]   ;;  %v5388_v16 = vld [vmem:[%s7197_s1 + $0x7a0] ss:$12 sps:$4 sm:$0xff]  }
  0xf1   :  { %3431 = vmatprep.subr.bf16.mxu0 %v5315_v15  ;;  %v5384_v15 = vld [vmem:[%s7197_s1 + $0x9d8] ss:$12 sps:$4 sm:$0xff]  }
  0xf3   :  { %4723 = vmatpush3.bf16.msra.mxu1 %v5317_v19  ;;  %v5393_v19 = vld [vmem:[%s7197_s1 + $0x7b8] ss:$12 sps:$4 sm:$0xff]  }
  0xf4   :  { %3432 = vmatpush1.bf16.msra.mxu0 %v5313_v17  ;;  %4724 = vmatprep.subr.bf16.mxu1 %v5321_v22  ;;  %v5391_v17 = vld [vmem:[%s7197_s1 + $0x9f4] ss:$12 sps:$4 sm:$0xff]  }
  0xf5   :  { %3433 = vmatprep.subr.bf16.mxu0 %v5320_v21  ;;  %v5396_v21 = vld [vmem:[%s7197_s1 + $0xa0c] ss:$12 sps:$4 sm:$0xff]   ;;  %v5394_v22 = vld [vmem:[%s7197_s1 + $0xa08] ss:$12 sps:$4 sm:$0xff]  }
  0xf7   :  { %4725 = vmatpush3.bf16.msra.mxu1 %v5322_v25  ;;  %v5401_v25 = vld [vmem:[%s7197_s1 + $0xa24] ss:$12 sps:$4 sm:$0xff]  }
  0xf8   :  { %3434 = vmatpush1.bf16.msra.mxu0 %v5318_v24  ;;  %4726 = vmatprep.subr.bf16.mxu1 %v5328_v30  ;;  %v5398_v24 = vld [vmem:[%s7197_s1 + $0x7d0] ss:$12 sps:$4 sm:$0xff]   ;;  %v5403_v30 = vld [vmem:[%s7197_s1 + $0x7e8] ss:$12 sps:$4 sm:$0xff]  }
  0xf9   :  { %3435 = vmatprep.subr.bf16.mxu0 %v5327_v26  ;;  %v5402_v26 = vld [vmem:[%s7197_s1 + $0x8a8] ss:$12 sps:$4 sm:$0xff]  }
  0xfb   :  { %4727 = vmatpush3.bf16.msra.mxu1 %v5330_v32  ;;  %v5404_v32 = vld [vmem:[%s7197_s1 + $0xa38] ss:$12 sps:$4 sm:$0xff]  }
  0xfc   :  { %3436 = vmatpush1.bf16.msra.mxu0 %v5325_v31  ;;  %4728 = vmatprep.subr.bf16.mxu1 %v5334_v34  ;;  %v5406_v31 = vld [vmem:[%s7197_s1 + $0xa3c] ss:$12 sps:$4 sm:$0xff]   ;;  %v5413_v34 = vld [vmem:[%s7197_s1 + $0xa54] ss:$12 sps:$4 sm:$0xff]  }
  0xfd   :  { %3437 = vmatprep.subr.bf16.mxu0 %v5333_v33  ;;  %v5408_v33 = vld [vmem:[%s7197_s1 + $0x800] ss:$12 sps:$4 sm:$0xff]  }
  0xff   :  { %4729 = vmatpush3.bf16.msra.mxu1 %v5335_v37  ;;  %v5411_v37 = vld [vmem:[%s7197_s1 + $0xa50] ss:$12 sps:$4 sm:$0xff]  }
 0x100   :  { %3438 = vmatpush1.bf16.msra.mxu0 %v5331_v35  ;;  %4742 = vmatprep.subr.bf16.mxu1 %v5342_v39  ;;  %v5414_v35 = vld [vmem:[%s7197_s1 + $0x8d8] ss:$12 sps:$4 sm:$0xff]  }
 0x101   :  { %3460 = vmatprep.subr.bf16.mxu0 %v5341_v38  ;;  %v5416_v38 = vld [vmem:[%s7197_s1 + $0x818] ss:$12 sps:$4 sm:$0xff]  }
 0x102   :  { %3799 = vmatmul.mubr.bf16.vlgmr.msra.gmra.mrb[32].mxu1 %v5589_v50  ;;  %v5419_v39 = vld [vmem:[%s7197_s1 + $0xa6c] ss:$12 sps:$4 sm:$0xff]  }
 0x103   :  { %3440 = vmatmul.mubr.bf16.vlgmr.msra.gmra.mrb[0].mxu0 %v6518_v40  ;;  %4743 = vmatpush3.bf16.msra.mxu1 %v5343_v43  ;;  %v5417_v43 = vld [vmem:[%s7197_s1 + $0xa68] ss:$12 sps:$4 sm:$0xff]   ;;  %v6744_v50 = vld [vmem:[%s7198_s0 + $0x30] ss:$72 sps:$4 sm:$0xff]  }
 0x104   :  { %3461 = vmatpush1.bf16.msra.mxu0 %v5339_v42  ;;  %4744 = vmatprep.subr.bf16.mxu1 %v5347_v45  ;;  %v5420_v42 = vld [vmem:[%s7197_s1 + $0x8f0] ss:$12 sps:$4 sm:$0xff]  }
 0x105   :  { %3462 = vmatprep.subr.bf16.mxu0 %v5346_v44  ;;  %3806 = vmatprep.mubr.bf16.mxu1 %v6118_v36  ;;  %v5356_v36 = vld [vmem:[%s7197_s1 + $0x94c] ss:$12 sps:$4 sm:$0xff]   ;;  %v5421_v44 = vld [vmem:[%s7197_s1 + $0x830] ss:$12 sps:$4 sm:$0xff]  }
 0x106   :  { %3449 = vmatprep.mubr.bf16.mxu0 %v6538_v49  ;;  %v5427_v45 = vld [vmem:[%s7197_s1 + $0xa84] ss:$12 sps:$4 sm:$0xff]  }
 0x107   :  { %4745 = vmatpush3.bf16.msra.mxu1 %v5348_v51  ;;  %v5425_v51 = vld [vmem:[%s7197_s1 + $0xa80] ss:$12 sps:$4 sm:$0xff]  }
 0x108   :  { %3463 = vmatpush1.bf16.msra.mxu0 %v5344_v47  ;;  %4746 = vmatprep.subr.bf16.mxu1 %v5352_v53  ;;  %v5428_v47 = vld [vmem:[%s7197_s1 + $0x9c8] ss:$12 sps:$4 sm:$0xff]  }
 0x109   :  { %3464 = vmatprep.subr.bf16.mxu0 %v5351_v52  ;;  %v5429_v52 = vld [vmem:[%s7197_s1 + $0x908] ss:$12 sps:$4 sm:$0xff]  }
 0x10a   :  { %3807 = vmatmul.mubr.bf16.gmra.mrb[36].mxu1 %v6132_v48  ;;  %v5359_v48 = vld [vmem:[%s7197_s1 + $0x960] ss:$12 sps:$4 sm:$0xff]   ;;  %v5432_v53 = vld [vmem:[%s7197_s1 + $0xa9c] ss:$12 sps:$4 sm:$0xff]  }
 0x10b   :  { %3450 = vmatmul.mubr.bf16.gmra.mrb[4].mxu0 %v6564_v56  ;;  %4747 = vmatpush3.bf16.msra.mxu1 %v5353_v55  ;;  %v5430_v55 = vld [vmem:[%s7197_s1 + $0xa98] ss:$12 sps:$4 sm:$0xff]  }
 0x10c   :  { %3465 = vmatpush1.bf16.msra.mxu0 %v5349_v54  ;;  %4748 = vmatprep.subr.bf16.mxu1 %v5357_v57  ;;  %v5433_v54 = vld [vmem:[%s7197_s1 + $0x9e0] ss:$12 sps:$4 sm:$0xff]  }
 0x10d   :  { %3466 = vmatprep.subr.bf16.mxu0 %v5356_v36  ;;  %3847 = vmatprep.mubr.bf16.mxu1 %v6154_v46  ;;  %v5367_v46 = vld [vmem:[%s7197_s1 + $0x740] ss:$12 sps:$4 sm:$0xff]  }
 0x10e   :  { %3492 = vmatprep.mubr.bf16.mxu0 %v6578_v59  ;;  %v5434_v36 = vld [vmem:[%s7197_s1 + $0x920] ss:$12 sps:$4 sm:$0xff]  }
 0x10f   :  { %4749 = vmatpush3.bf16.msra.mxu1 %v5358_v60  ;;  %v5437_v57 = vld [vmem:[%s7197_s1 + $0xab4] ss:$12 sps:$4 sm:$0xff]   ;;  %v5435_v60 = vld [vmem:[%s7197_s1 + $0xab0] ss:$12 sps:$4 sm:$0xff]  }
 0x110   :  { %3467 = vmatpush1.bf16.msra.mxu0 %v5354_v58  ;;  %4750 = vmatprep.subr.bf16.mxu1 %v5362_v62  ;;  %v6772_v58 = vld [vmem:[%s7198_s0 + $0xc4] ss:$72 sps:$4 sm:$0xff]  }
 0x111   :  { %3468 = vmatprep.subr.bf16.mxu0 %v5361_v61  ;;  %v5439_v61 = vld [vmem:[%s7197_s1 + $0x938] ss:$12 sps:$4 sm:$0xff]  }
 0x112   :  { %v5442_v62 = vld [vmem:[%s7197_s1 + $0xacc] ss:$12 sps:$4 sm:$0xff]  }
 0x113   :  { %4751 = vmatpush3.bf16.msra.mxu1 %v5363_v63  ;;  %v6799_v63 = vld [vmem:[%s7198_s0 + $0x3c] ss:$72 sps:$4 sm:$0xff]  }
 0x114   :  { %3469 = vmatpush1.bf16.msra.mxu0 %v5359_v48  ;;  %4752 = vmatprep.subr.bf16.mxu1 %v5367_v46  ;;  %v6794_v48 = vld [vmem:[%s7198_s0 + $0xc0] ss:$72 sps:$4 sm:$0xff]   ;;  %v5444_v46 = vld [vmem:[%s7197_s1 + $0x950] ss:$12 sps:$4 sm:$0xff]  }
 0x115   :  { %3470 = vmatprep.subr.bf16.mxu0 %v5366_v4  ;;  %v5440_v4 = vld [vmem:[%s7197_s1 + $0xac8] ss:$12 sps:$4 sm:$0xff]  }
 0x117   :  { %4753 = vmatpush3.bf16.msra.mxu1 %v5368_v1  ;;  %v5445_v1 = vld [vmem:[%s7197_s1 + $0xae0] ss:$12 sps:$4 sm:$0xff]  }
 0x118   :  { %3471 = vmatpush1.bf16.msra.mxu0 %v5364_v0  ;;  %4754 = vmatprep.subr.bf16.mxu1 %v5372_v2  ;;  %v5447_v0 = vld [vmem:[%s7197_s1 + $0xae4] ss:$12 sps:$4 sm:$0xff]   ;;  %v5452_v2 = vld [vmem:[%s7197_s1 + $0xafc] ss:$12 sps:$4 sm:$0xff]  }
 0x119   :  { %3472 = vmatprep.subr.bf16.mxu0 %v5371_v28  ;;  %v5449_v28 = vld [vmem:[%s7197_s1 + $0x968] ss:$12 sps:$4 sm:$0xff]  }
 0x11b   :  { %4755 = vmatpush3.bf16.msra.mxu1 %v5373_v5  ;;  %v5454_v5 = vld [vmem:[%s7197_s1 + $0x980] ss:$12 sps:$4 sm:$0xff]  }
 0x11c   :  { %3473 = vmatpush1.bf16.msra.mxu0 %v5369_v3  ;;  %4756 = vmatprep.subr.bf16.mxu1 %v5377_v7  ;;  %v5453_v3 = vld [vmem:[%s7197_s1 + $0xa40] ss:$12 sps:$4 sm:$0xff]   ;;  %v5458_v7 = vld [vmem:[%s7197_s1 + $0xa58] ss:$12 sps:$4 sm:$0xff]  }
 0x11d   :  { %3474 = vmatprep.subr.bf16.mxu0 %v5376_v6  ;;  %v5457_v6 = vld [vmem:[%s7197_s1 + $0xb14] ss:$12 sps:$4 sm:$0xff]  }
 0x11f   :  { %4757 = vmatpush3.bf16.msra.mxu1 %v5378_v8  ;;  %v5455_v8 = vld [vmem:[%s7197_s1 + $0xb10] ss:$12 sps:$4 sm:$0xff]  }
 0x120   :  { %3475 = vmatpush1.bf16.msra.mxu0 %v5374_v29  ;;  %4770 = vmatprep.subr.bf16.mxu1 %v5382_v41 }
 0x121   :  { %3476 = vmatprep.subr.bf16.mxu0 %v5381_v9 }
 0x122   :  { %3848 = vmatmul.mubr.bf16.vlgmr.msra.gmra.mrb[40].mxu1 %v6284_v23  ;;  %v5389_v23 = vld [vmem:[%s7197_s1 + $0x9f0] ss:$12 sps:$4 sm:$0xff]  }
 0x123   :  { %4771 = vmatpush3.bf16.msra.mxu1 %v5383_v11  ;;  %3855 = vmatprep.mubr.bf16.mxu1 %v6316_v12  ;;  %v5397_v12 = vld [vmem:[%s7197_s1 + $0x890] ss:$12 sps:$4 sm:$0xff]   ;;  %v5462_v11 = vld [vmem:[%s7197_s1 + $0xb2c] ss:$12 sps:$4 sm:$0xff]  }
 0x124   :  { %3477 = vmatpush1.bf16.msra.mxu0 %v5379_v10  ;;  %4772 = vmatprep.subr.bf16.mxu1 %v5387_v14  ;;  %v5459_v10 = vld [vmem:[%s7197_s1 + $0x998] ss:$12 sps:$4 sm:$0xff]   ;;  %v5463_v14 = vld [vmem:[%s7197_s1 + $0xa70] ss:$12 sps:$4 sm:$0xff]  }
 0x125   :  { %3478 = vmatprep.subr.bf16.mxu0 %v5386_v13 }
 0x127   :  { %4773 = vmatpush3.bf16.msra.mxu1 %v5388_v16  ;;  %v5464_v16 = vld [vmem:[%s7197_s1 + $0x9b0] ss:$12 sps:$4 sm:$0xff]  }
 0x128   :  { %3479 = vmatpush1.bf16.msra.mxu0 %v5384_v15  ;;  %4774 = vmatprep.subr.bf16.mxu1 %v5392_v18  ;;  %v5460_v15 = vld [vmem:[%s7197_s1 + $0xb28] ss:$12 sps:$4 sm:$0xff]  }
 0x129   :  { %3480 = vmatprep.subr.bf16.mxu0 %v5391_v17  ;;  %v5467_v17 = vld [vmem:[%s7197_s1 + $0xb44] ss:$12 sps:$4 sm:$0xff]   ;;  %v5468_v18 = vld [vmem:[%s7197_s1 + $0xb48] ss:$12 sps:$4 sm:$0xff]  }
 0x12a   :  { %3856 = vmatmul.mubr.bf16.gmra.mrb[44].mxu1 %v6330_v20  ;;  %v5399_v20 = vld [vmem:[%s7197_s1 + $0xa20] ss:$12 sps:$4 sm:$0xff]  }
 0x12b   :  { %4775 = vmatpush3.bf16.msra.mxu1 %v5393_v19  ;;  %3896 = vmatprep.mubr.bf16.mxu1 %v6356_v27  ;;  %v5407_v27 = vld [vmem:[%s7197_s1 + $0x8c0] ss:$12 sps:$4 sm:$0xff]  }
 0x12c   :  { %3481 = vmatpush1.bf16.msra.mxu0 %v5389_v23  ;;  %4776 = vmatprep.subr.bf16.mxu1 %v5397_v12  ;;  %v5465_v19 = vld [vmem:[%s7197_s1 + $0xb40] ss:$12 sps:$4 sm:$0xff]   ;;  %v5469_v12 = vld [vmem:[%s7197_s1 + $0xa88] ss:$12 sps:$4 sm:$0xff]  }
 0x12d   :  { %3482 = vmatprep.subr.bf16.mxu0 %v5396_v21 }
 0x12f   :  { %4777 = vmatpush3.bf16.msra.mxu1 %v5398_v24  ;;  %v5472_v24 = vld [vmem:[%s7197_s1 + $0xb5c] ss:$12 sps:$4 sm:$0xff]  }
 0x130   :  { %3483 = vmatpush1.bf16.msra.mxu0 %v5394_v22  ;;  %4778 = vmatprep.subr.bf16.mxu1 %v5402_v26 }
 0x131   :  { %3484 = vmatprep.subr.bf16.mxu0 %v5401_v25  ;;  %v5473_v25 = vld [vmem:[%s7197_s1 + $0xb60] ss:$12 sps:$4 sm:$0xff]  }
 0x133   :  { %4779 = vmatpush3.bf16.msra.mxu1 %v5403_v30  ;;  %v5474_v30 = vld [vmem:[%s7197_s1 + $0xaa0] ss:$12 sps:$4 sm:$0xff]  }
 0x134   :  { %3485 = vmatpush1.bf16.msra.mxu0 %v5399_v20  ;;  %4780 = vmatprep.subr.bf16.mxu1 %v5407_v27  ;;  %v5470_v20 = vld [vmem:[%s7197_s1 + $0xb58] ss:$12 sps:$4 sm:$0xff]  }
 0x135   :  { %3486 = vmatprep.subr.bf16.mxu0 %v5406_v31  ;;  %v5479_v31 = vld [vmem:[%s7197_s1 + $0xb74] ss:$12 sps:$4 sm:$0xff]   ;;  %v5481_v27 = vld [vmem:[%s7197_s1 + $0xb78] ss:$12 sps:$4 sm:$0xff]  }
 0x137   :  { %4781 = vmatpush3.bf16.msra.mxu1 %v5408_v33  ;;  %v5482_v33 = vld [vmem:[%s7197_s1 + $0xab8] ss:$12 sps:$4 sm:$0xff]  }
 0x138   :  { %3487 = vmatpush1.bf16.msra.mxu0 %v5404_v32  ;;  %4782 = vmatprep.subr.bf16.mxu1 %v5414_v35  ;;  %v5477_v32 = vld [vmem:[%s7197_s1 + $0xb70] ss:$12 sps:$4 sm:$0xff]  }
 0x139   :  { %3488 = vmatprep.subr.bf16.mxu0 %v5413_v34  ;;  %v5485_v34 = vld [vmem:[%s7197_s1 + $0xb8c] ss:$12 sps:$4 sm:$0xff]   ;;  %v5486_v35 = vld [vmem:[%s7197_s1 + $0xb90] ss:$12 sps:$4 sm:$0xff]  }
 0x13b   :  { %4783 = vmatpush3.bf16.msra.mxu1 %v5416_v38  ;;  %v5487_v38 = vld [vmem:[%s7197_s1 + $0xad0] ss:$12 sps:$4 sm:$0xff]  }
 0x13c   :  { %3489 = vmatpush1.bf16.msra.mxu0 %v5411_v37  ;;  %4784 = vmatprep.subr.bf16.mxu1 %v5420_v42  ;;  %v5483_v37 = vld [vmem:[%s7197_s1 + $0xb88] ss:$12 sps:$4 sm:$0xff]  }
 0x13d   :  { %3490 = vmatprep.subr.bf16.mxu0 %v5419_v39  ;;  %v5490_v39 = vld [vmem:[%s7197_s1 + $0xba4] ss:$12 sps:$4 sm:$0xff]   ;;  %v5491_v42 = vld [vmem:[%s7197_s1 + $0xba8] ss:$12 sps:$4 sm:$0xff]  }
 0x13f   :  { %4785 = vmatpush3.bf16.msra.mxu1 %v5421_v44  ;;  %v5492_v44 = vld [vmem:[%s7197_s1 + $0xae8] ss:$12 sps:$4 sm:$0xff]  }
 0x140   :  { %3491 = vmatpush1.bf16.msra.mxu0 %v5417_v43  ;;  %4798 = vmatprep.subr.bf16.mxu1 %v5428_v47  ;;  %v5488_v43 = vld [vmem:[%s7197_s1 + $0xba0] ss:$12 sps:$4 sm:$0xff]  }
 0x141   :  { %3513 = vmatprep.subr.bf16.mxu0 %v5427_v45  ;;  %v5495_v45 = vld [vmem:[%s7197_s1 + $0xbbc] ss:$12 sps:$4 sm:$0xff]   ;;  %v5496_v47 = vld [vmem:[%s7197_s1 + $0xbc0] ss:$12 sps:$4 sm:$0xff]  }
 0x142   :  { %3897 = vmatmul.mubr.bf16.vlgmr.msra.gmra.mrb[48].mxu1 %v6518_v40  ;;  %v5438_v40 = vld [vmem:[%s7197_s1 + $0x9f8] ss:$12 sps:$4 sm:$0xff]  }
 0x143   :  { %3493 = vmatmul.mubr.bf16.vlgmr.msra.gmra.mrb[0].mxu0 %v6744_v50  ;;  %4799 = vmatpush3.bf16.msra.mxu1 %v5429_v52  ;;  %v5500_v52 = vld [vmem:[%s7197_s1 + $0xbd4] ss:$12 sps:$4 sm:$0xff]  }
 0x144   :  { %3514 = vmatpush1.bf16.msra.mxu0 %v5425_v51  ;;  %4800 = vmatprep.subr.bf16.mxu1 %v5433_v54  ;;  %v5497_v51 = vld [vmem:[%s7197_s1 + $0xb00] ss:$12 sps:$4 sm:$0xff]  }
 0x145   :  { %3515 = vmatprep.subr.bf16.mxu0 %v5432_v53  ;;  %3904 = vmatprep.mubr.bf16.mxu1 %v6538_v49  ;;  %v5443_v49 = vld [vmem:[%s7197_s1 + $0xa10] ss:$12 sps:$4 sm:$0xff]   ;;  %v5501_v53 = vld [vmem:[%s7197_s1 + $0xbd8] ss:$12 sps:$4 sm:$0xff]  }
 0x146   :  { %3502 = vmatprep.mubr.bf16.mxu0 %v6772_v58 }
 0x147   :  { %4801 = vmatpush3.bf16.msra.mxu1 %v5434_v36  ;;  %v5498_v36 = vld [vmem:[%s7197_s1 + $0xbd0] ss:$12 sps:$4 sm:$0xff]  }
 0x148   :  { %3516 = vmatpush1.bf16.msra.mxu0 %v5430_v55  ;;  %4802 = vmatprep.subr.bf16.mxu1 %v5438_v40 }
 0x149   :  { %3517 = vmatprep.subr.bf16.mxu0 %v5437_v57  ;;  %v5502_v57 = vld [vmem:[%s7197_s1 + $0xb18] ss:$12 sps:$4 sm:$0xff]  }
 0x14a   :  { %3905 = vmatmul.mubr.bf16.gmra.mrb[52].mxu1 %v6564_v56  ;;  %v5448_v56 = vld [vmem:[%s7197_s1 + $0xa28] ss:$12 sps:$4 sm:$0xff]  }
 0x14b   :  { %3503 = vmatmul.mubr.bf16.gmra.mrb[4].mxu0 %v6794_v48  ;;  %4803 = vmatpush3.bf16.msra.mxu1 %v5439_v61  ;;  %v5506_v61 = vld [vmem:[%s7197_s1 + $0xbf0] ss:$12 sps:$4 sm:$0xff]  }
 0x14c   :  { %3518 = vmatpush1.bf16.msra.mxu0 %v5435_v60  ;;  %4804 = vmatprep.subr.bf16.mxu1 %v5443_v49  ;;  %v5505_v60 = vld [vmem:[%s7197_s1 + $0xbec] ss:$12 sps:$4 sm:$0xff]  }
 0x14d   :  { %3519 = vmatprep.subr.bf16.mxu0 %v5442_v62  ;;  %3945 = vmatprep.mubr.bf16.mxu1 %v6578_v59  ;;  %v5450_v59 = vld [vmem:[%s7197_s1 + $0xaf8] ss:$12 sps:$4 sm:$0xff]  }
 0x14e   :  { %3545 = vmatprep.mubr.bf16.mxu0 %v6799_v63 }
 0x14f   :  { %4805 = vmatpush3.bf16.msra.mxu1 %v5444_v46  ;;  %v5514_v46 = vld [vmem:[%s7197_s1 + $0xcc8] ss:$12 sps:$4 sm:$0xff]  }
 0x150   :  { %3520 = vmatpush1.bf16.msra.mxu0 %v5440_v4  ;;  %4806 = vmatprep.subr.bf16.mxu1 %v5448_v56  ;;  %v5513_v4 = vld [vmem:[%s7197_s1 + $0xc04] ss:$12 sps:$4 sm:$0xff]   ;;  %v5508_v56 = vld [vmem:[%s7198_s0 + $0x38] ss:$72 sps:$4 sm:$0xff]  }
 0x151   :  { %3521 = vmatprep.subr.bf16.mxu0 %v5447_v0 }
 0x153   :  { %4807 = vmatpush3.bf16.msra.mxu1 %v5449_v28  ;;  %v5511_v28 = vld [vmem:[%s7197_s1 + $0xc00] ss:$12 sps:$4 sm:$0xff]  }
 0x154   :  { %3522 = vmatpush1.bf16.msra.mxu0 %v5445_v1  ;;  %4808 = vmatprep.subr.bf16.mxu1 %v5453_v3 }
 0x155   :  { %3523 = vmatprep.subr.bf16.mxu0 %v5452_v2  ;;  %v6841_v29 = vpop.f32.mrb[0].mxu1  ;;  %v5515_v2 = vld [vmem:[%s7197_s1 + $0xc08] ss:$12 sps:$4 sm:$0xff]  }
 0x156   :  { %v6846_v9 = vpop.f32.mrb[1].mxu1 }
 0x157   :  { %v6848_v41 = vpop.f32.mrb[2].mxu1  ;;  %4809 = vmatpush3.bf16.msra.mxu1 %v5454_v5  ;;  %v5518_v5 = vld [vmem:[%s7197_s1 + $0xc1c] ss:$12 sps:$4 sm:$0xff]  }
 0x158   :  { %3524 = vmatpush1.bf16.msra.mxu0 %v5450_v59  ;;  %v6856_v13 = vpop.f32.mrb[3].mxu1  ;;  %4810 = vmatprep.subr.bf16.mxu1 %v5458_v7 }
 0x159   :  { %3525 = vmatprep.subr.bf16.mxu0 %v5457_v6  ;;  %v5519_v6 = vld [vmem:[%s7197_s1 + $0xce0] ss:$12 sps:$4 sm:$0xff]  }
 0x15b   :  { %4811 = vmatpush3.bf16.msra.mxu1 %v5459_v10 }
 0x15c   :  { %3526 = vmatpush1.bf16.msra.mxu0 %v5455_v8  ;;  %4812 = vmatprep.subr.bf16.mxu1 %v5463_v14  ;;  %v5521_v8 = vld [vmem:[%s7198_s0 + $0xcc] ss:$72 sps:$4 sm:$0xff]  }
 0x15d   :  { %3527 = vmatprep.subr.bf16.mxu0 %v5462_v11  ;;  %v6873_v23 = vpop.f32.mrb[4].mxu1  ;;  %v5516_v11 = vld [vmem:[%s7197_s1 + $0xc18] ss:$12 sps:$4 sm:$0xff]   ;;  %v5520_v14 = vld [vmem:[%s7197_s1 + $0xc20] ss:$12 sps:$4 sm:$0xff]  }
 0x15e   :  { %v6878_v21 = vpop.f32.mrb[5].mxu1 }
 0x15f   :  { %4813 = vmatpush3.bf16.msra.mxu1 %v5464_v16  ;;  %v6883_v22 = vpop.f32.mrb[6].mxu1  ;;  %v5527_v16 = vld [vmem:[%s7197_s1 + $0xcf8] ss:$12 sps:$4 sm:$0xff]  }
 0x160   :  { %3528 = vmatpush1.bf16.msra.mxu0 %v5460_v15  ;;  %4826 = vmatprep.subr.bf16.mxu1 %v5468_v18  ;;  %v6891_v26 = vpop.f32.mrb[7].mxu1  ;;  %v5525_v15 = vld [vmem:[%s7197_s1 + $0xc34] ss:$12 sps:$4 sm:$0xff]   ;;  %v643_v18 = vlaneseq }
 0x161   :  { %3529 = vmatprep.subr.bf16.mxu0 %v5467_v17  ;;  %v5526_v17 = vld [vmem:[%s7198_s0 + $0xc8] ss:$72 sps:$4 sm:$0xff]  }
 0x162   :  { %3946 = vmatmul.mubr.bf16.vlgmr.msra.gmra.mrb[56].mxu1 %v6744_v50  ;;  %v5493_v50 = vld [vmem:[%s7197_s1 + $0xbb8] ss:$12 sps:$4 sm:$0xff]  }
 0x163   :  { %4827 = vmatpush3.bf16.msra.mxu1 %v5469_v12  ;;  %3953 = vmatprep.mubr.bf16.mxu1 %v6772_v58  ;;  %v5528_v12 = vld [vmem:[%s7197_s1 + $0xc38] ss:$12 sps:$4 sm:$0xff]  }
 0x164   :  { %3530 = vmatpush1.bf16.msra.mxu0 %v5465_v19  ;;  %4828 = vmatprep.subr.bf16.mxu1 %v5473_v25  ;;  %v5523_v19 = vld [vmem:[%s7197_s1 + $0xc30] ss:$12 sps:$4 sm:$0xff]  }
 0x165   :  { %3531 = vmatprep.subr.bf16.mxu0 %v5472_v24  ;;  %v5531_v24 = vld [vmem:[%s7197_s1 + $0xc4c] ss:$12 sps:$4 sm:$0xff]   ;;  %v5532_v25 = vld [vmem:[%s7197_s1 + $0xd10] ss:$12 sps:$4 sm:$0xff]  }
 0x167   :  { %4829 = vmatpush3.bf16.msra.mxu1 %v5474_v30  ;;  %v7037_v30 = vshrl.u32 %v643_v18, 7  ;;  %v5565_v18 = vld [vmem:[%s7197_s1 + $0xcf0] ss:$12 sps:$4 sm:$0xff]  }
 0x168   :  { %3532 = vmatpush1.bf16.msra.mxu0 %v5470_v20  ;;  %4830 = vmatprep.subr.bf16.mxu1 %v5481_v27  ;;  %v5556_v20 = vld [vmem:[%s7198_s0 + $0x44] ss:$72 sps:$4 sm:$0xff]   ;;  %v5533_v27 = vld [vmem:[%s7197_s1 + $0xc50] ss:$12 sps:$4 sm:$0xff]  }
 0x169   :  { %3533 = vmatprep.subr.bf16.mxu0 %v5479_v31  ;;  %v5529_v31 = vld [vmem:[%s7197_s1 + $0xc48] ss:$12 sps:$4 sm:$0xff]  }
 0x16a   :  { %3954 = vmatmul.mubr.bf16.gmra.mrb[60].mxu1 %v6794_v48  ;;  %v5503_v48 = vld [vmem:[%s7197_s1 + $0xbe8] ss:$12 sps:$4 sm:$0xff]  }
 0x16b   :  { %4831 = vmatpush3.bf16.msra.mxu1 %v5482_v33  ;;  %3994 = vmatprep.mubr.bf16.mxu1 %v6799_v63  ;;  %v5507_v63 = vld [vmem:[%s7197_s1 + $0xb30] ss:$12 sps:$4 sm:$0xff]   ;;  %v5537_v33 = vld [vmem:[%s7197_s1 + $0xd28] ss:$12 sps:$4 sm:$0xff]  }
 0x16c   :  { %3534 = vmatpush1.bf16.msra.mxu0 %v5477_v32  ;;  %4832 = vmatprep.subr.bf16.mxu1 %v5486_v35  ;;  %v5536_v32 = vld [vmem:[%s7197_s1 + $0xc64] ss:$12 sps:$4 sm:$0xff]   ;;  %v5534_v35 = vld [vmem:[%s7197_s1 + $0xc60] ss:$12 sps:$4 sm:$0xff]  }
 0x16d   :  { %3535 = vmatprep.subr.bf16.mxu0 %v5485_v34  ;;  %v653_v34 = vsub.s32 2, %v7037_v30 }
 0x16f   :  { %4833 = vmatpush3.bf16.msra.mxu1 %v5487_v38  ;;  %v7061_v38 = vld [vmem:[%s7199_s2] sm:$0x7] }
 0x170   :  { %3536 = vmatpush1.bf16.msra.mxu0 %v5483_v37  ;;  %4834 = vmatprep.subr.bf16.mxu1 %v5491_v42  ;;  %v5538_v37 = vld [vmem:[%s7197_s1 + $0xc68] ss:$12 sps:$4 sm:$0xff]   ;;  %v5542_v42 = vld [vmem:[%s7197_s1 + $0xd40] ss:$12 sps:$4 sm:$0xff]  }
 0x171   :  { %3537 = vmatprep.subr.bf16.mxu0 %v5490_v39  ;;  %v5541_v39 = vld [vmem:[%s7197_s1 + $0xc7c] ss:$12 sps:$4 sm:$0xff]  }
 0x173   :  { %4835 = vmatpush3.bf16.msra.mxu1 %v5492_v44  ;;  %v5539_v44 = vld [vmem:[%s7197_s1 + $0xc78] ss:$12 sps:$4 sm:$0xff]  }
 0x174   :  { %3538 = vmatpush1.bf16.msra.mxu0 %v5488_v43  ;;  %4836 = vmatprep.subr.bf16.mxu1 %v5496_v47  ;;  %v654_v43 = vrot.slane %v7061_v38, %v653_v34  ;;  %v5546_v47 = vld [vmem:[%s7197_s1 + $0xc94] ss:$12 sps:$4 sm:$0xff]  }
 0x175   :  { %3539 = vmatprep.subr.bf16.mxu0 %v5495_v45  ;;  %v4646_v54 = vpop.f32.mrb[8].mxu1  ;;  %v5543_v45 = vld [vmem:[%s7197_s1 + $0xc80] ss:$12 sps:$4 sm:$0xff]  }
 0x176   :  { %v4647_v55 = vpop.f32.mrb[9].mxu1 }
 0x177   :  { %4837 = vmatpush3.bf16.msra.mxu1 %v5497_v51  ;;  %v6963_v58 = vadd.f32 %v4647_v55, %v4646_v54  ;;  %v4649_v40 = vpop.f32.mrb[10].mxu1 }
 0x178   :  { %3540 = vmatpush1.bf16.msra.mxu0 %v5493_v50  ;;  %4838 = vmatprep.subr.bf16.mxu1 %v5501_v53  ;;  %v4650_v62 = vpop.f32.mrb[11].mxu1  ;;  %v5547_v50 = vld [vmem:[%s7197_s1 + $0xd58] ss:$12 sps:$4 sm:$0xff]  }
 0x179   :  { %3541 = vmatprep.subr.bf16.mxu0 %v5500_v52  ;;  %v6971_v49 = vadd.f32 %v4650_v62, %v4649_v40  ;;  %v3654_v51 = vadd.f32 %v6963_v58, %v654_v43  ;;  %v5551_v58 = vld [vmem:[%s7197_s1 + $0xcac] ss:$12 sps:$4 sm:$0xff]  }
 0x17b   :  { %4839 = vmatpush3.bf16.msra.mxu1 %v5502_v57  ;;  %v5548_v57 = vld [vmem:[%s7197_s1 + $0xc98] ss:$12 sps:$4 sm:$0xff]  }
 0x17c   :  { %3542 = vmatpush1.bf16.msra.mxu0 %v5498_v36  ;;  %4840 = vmatprep.subr.bf16.mxu1 %v5506_v61  ;;  %v5544_v36 = vld [vmem:[%s7197_s1 + $0xc90] ss:$12 sps:$4 sm:$0xff]   ;;  %v3657_v61 = vadd.f32 %v6971_v49, %v654_v43 }
 0x17d   :  { %3543 = vmatprep.subr.bf16.mxu0 %v5505_v60  ;;  %v4652_v0 = vpop.f32.mrb[12].mxu1  ;;  %v5552_v60 = vld [vmem:[%s7197_s1 + $0xd70] ss:$12 sps:$4 sm:$0xff]  }
 0x17e   :  { %v4653_v1 = vpop.f32.mrb[13].mxu1 }
 0x17f   :  { %4841 = vmatpush3.bf16.msra.mxu1 %v5507_v63  ;;  %v6994_v3 = vadd.f32 %v4653_v1, %v4652_v0  ;;  %v4655_v59 = vpop.f32.mrb[14].mxu1  ;;  %v5559_v0 = vld [vmem:[%s7197_s1 + $0xcc4] ss:$12 sps:$4 sm:$0xff]   ;;  %v5554_v1 = vld [vmem:[%s7198_s0 + $0x40] ss:$72 sps:$4 sm:$0xff]  }
 0x180   :  { %3544 = vmatpush1.bf16.msra.mxu0 %v5503_v48  ;;  %4854 = vmatprep.subr.bf16.mxu1 %v5514_v46  ;;  %v4656_v7 = vpop.f32.mrb[15].mxu1  ;;  %v5553_v46 = vld [vmem:[%s7197_s1 + $0xcb0] ss:$12 sps:$4 sm:$0xff]  }
 0x181   :  { %3566 = vmatprep.subr.bf16.mxu0 %v5513_v4  ;;  %v7005_v10 = vadd.f32 %v4656_v7, %v4655_v59  ;;  %v5549_v4 = vld [vmem:[%s7197_s1 + $0xca8] ss:$12 sps:$4 sm:$0xff]   ;;  %v3662_v49 = vadd.f32 %v6994_v3, %v654_v43  ;;  %v5557_v59 = vld [vmem:[%s7197_s1 + $0xcc0] ss:$12 sps:$4 sm:$0xff]  }
 0x182   :  { %3995 = vmatmul.mubr.bf16.vlgmr.msra.gmra.mrb[64].mxu1 %v5508_v56  ;;  %v5562_v7 = vld [vmem:[%s7197_s1 + $0xcdc] ss:$12 sps:$4 sm:$0xff]  }
 0x183   :  { %3546 = vmatmul.mubr.bf16.vlgmr.msra.gmra.mrb[0].mxu0 %v5508_v56  ;;  %4855 = vmatpush3.bf16.msra.mxu1 %v5515_v2  ;;  %v3665_v2 = vadd.f32 %v7005_v10, %v654_v43 }
 0x184   :  { %3567 = vmatpush1.bf16.msra.mxu0 %v5511_v28  ;;  %4856 = vmatprep.subr.bf16.mxu1 %v5519_v6 }
 0x185   :  { %3568 = vmatprep.subr.bf16.mxu0 %v5518_v5  ;;  %4002 = vmatprep.mubr.bf16.mxu1 %v5521_v8  ;;  %v5563_v5 = vld [vmem:[%s7198_s0 + $0xd4] ss:$72 sps:$4 sm:$0xff]  }
 0x186   :  { %3555 = vmatprep.mubr.bf16.mxu0 %v5521_v8 }
 0x187   :  { %4857 = vmatpush3.bf16.msra.mxu1 %v5520_v14  ;;  %v5560_v14 = vld [vmem:[%s7197_s1 + $0xcd8] ss:$12 sps:$4 sm:$0xff]  }
 0x188   :  { %3569 = vmatpush1.bf16.msra.mxu0 %v5516_v11  ;;  %4858 = vmatprep.subr.bf16.mxu1 %v5527_v16  ;;  %v5567_v16 = vld [vmem:[%s7197_s1 + $0xcf4] ss:$12 sps:$4 sm:$0xff]  }
 0x189   :  { %3570 = vmatprep.subr.bf16.mxu0 %v5525_v15 }
 0x18a   :  { %4003 = vmatmul.mubr.bf16.gmra.mrb[68].mxu1 %v5526_v17 }
 0x18b   :  { %3556 = vmatmul.mubr.bf16.gmra.mrb[4].mxu0 %v5526_v17  ;;  %4859 = vmatpush3.bf16.msra.mxu1 %v5528_v12  ;;  %v5568_v17 = vld [vmem:[%s7198_s0 + $0xd0] ss:$72 sps:$4 sm:$0xff]   ;;  %v5569_v12 = vld [vmem:[%s7197_s1 + $0xd08] ss:$12 sps:$4 sm:$0xff]  }
 0x18c   :  { %3571 = vmatpush1.bf16.msra.mxu0 %v5523_v19  ;;  %4860 = vmatprep.subr.bf16.mxu1 %v5532_v25  ;;  %v5571_v19 = vld [vmem:[%s7197_s1 + $0xd0c] ss:$12 sps:$4 sm:$0xff]  }
 0x18d   :  { %3572 = vmatprep.subr.bf16.mxu0 %v5531_v24  ;;  %4043 = vmatprep.mubr.bf16.mxu1 %v5556_v20  ;;  %v5574_v24 = vld [vmem:[%s7197_s1 + $0xd24] ss:$12 sps:$4 sm:$0xff]   ;;  %v5572_v25 = vld [vmem:[%s7197_s1 + $0xd20] ss:$12 sps:$4 sm:$0xff]  }
 0x18e   :  { %3598 = vmatprep.mubr.bf16.mxu0 %v5556_v20  ;;  %v5577_v20 = vld [vmem:[%s7197_s1 + $0xd3c] ss:$12 sps:$4 sm:$0xff]  }
 0x18f   :  { %4861 = vmatpush3.bf16.msra.mxu1 %v5533_v27  ;;  %v5580_v27 = vld [vmem:[%s7197_s1 + $0xd54] ss:$12 sps:$4 sm:$0xff]  }
 0x190   :  { %3573 = vmatpush1.bf16.msra.mxu0 %v5529_v31  ;;  %4862 = vmatprep.subr.bf16.mxu1 %v5537_v33  ;;  %v5575_v31 = vld [vmem:[%s7197_s1 + $0xd38] ss:$12 sps:$4 sm:$0xff]  }
 0x191   :  { %3574 = vmatprep.subr.bf16.mxu0 %v5536_v32 }
 0x193   :  { %4863 = vmatpush3.bf16.msra.mxu1 %v5538_v37  ;;  %v5578_v37 = vld [vmem:[%s7197_s1 + $0xd50] ss:$12 sps:$4 sm:$0xff]  }
 0x194   :  { %3575 = vmatpush1.bf16.msra.mxu0 %v5534_v35  ;;  %4864 = vmatprep.subr.bf16.mxu1 %v5542_v42  ;;  %v5583_v42 = vld [vmem:[%s7197_s1 + $0xd6c] ss:$12 sps:$4 sm:$0xff]  }
 0x195   :  { %3576 = vmatprep.subr.bf16.mxu0 %v5541_v39  ;;  %v4674_v52 = vpop.f32.mrb[16].mxu1 }
 0x196   :  { %v4675_v53 = vpop.f32.mrb[17].mxu1 }
 0x197   :  { %v4676_v54 = vadd.f32 %v4675_v53, %v4674_v52  ;;  %v4677_v55 = vpop.f32.mrb[18].mxu1  ;;  %4865 = vmatpush3.bf16.msra.mxu1 %v5543_v45 }
 0x198   :  { %3577 = vmatpush1.bf16.msra.mxu0 %v5539_v44  ;;  %v4678_v40 = vpop.f32.mrb[19].mxu1  ;;  %4866 = vmatprep.subr.bf16.mxu1 %v5547_v50 }
 0x199   :  { %3578 = vmatprep.subr.bf16.mxu0 %v5546_v47  ;;  %v3703_v62 = vadd.f32 %v4676_v54, %v3654_v51  ;;  %v4679_v48 = vadd.f32 %v4678_v40, %v4677_v55  ;;  %v5581_v47 = vld [vmem:[%s7197_s1 + $0xd68] ss:$12 sps:$4 sm:$0xff]  }
 0x19b   :  { %v3706_v63 = vadd.f32 %v4679_v48, %v3657_v61  ;;  %4867 = vmatpush3.bf16.msra.mxu1 %v5548_v57 }
 0x19c   :  { %3579 = vmatpush1.bf16.msra.mxu0 %v5544_v36  ;;  %4868 = vmatprep.subr.bf16.mxu1 %v5552_v60 }
 0x19d   :  { %3580 = vmatprep.subr.bf16.mxu0 %v5551_v58  ;;  %v4680_v56 = vpop.f32.mrb[20].mxu1 }
 0x19e   :  { %v4681_v28 = vpop.f32.mrb[21].mxu1 }
 0x19f   :  { %4869 = vmatpush3.bf16.msra.mxu1 %v5553_v46  ;;  %v4682_v6 = vadd.f32 %v4681_v28, %v4680_v56  ;;  %v4683_v3 = vpop.f32.mrb[22].mxu1 }
 0x1a0   :  { %3581 = vmatpush1.bf16.msra.mxu0 %v5549_v4  ;;  %v4684_v8 = vpop.f32.mrb[23].mxu1 }
 0x1a1   :  { %3582 = vmatprep.subr.bf16.mxu0 %v5559_v0  ;;  %v3711_v11 = vadd.f32 %v4682_v6, %v3662_v49  ;;  %v4685_v10 = vadd.f32 %v4684_v8, %v4683_v3 }
 0x1a2   :  { %4044 = vmatmul.mubr.bf16.vlgmr.msra.gmra.mrb[72].mxu1 %v5554_v1 }
 0x1a3   :  { %4051 = vmatprep.mubr.bf16.mxu1 %v5563_v5  ;;  %v3714_v15 = vadd.f32 %v4685_v10, %v3665_v2 }
 0x1a4   :  { %3583 = vmatpush1.bf16.msra.mxu0 %v5557_v59 }
 0x1a5   :  { %3584 = vmatprep.subr.bf16.mxu0 %v5562_v7 }
 0x1a8   :  { %3585 = vmatpush1.bf16.msra.mxu0 %v5560_v14 }
 0x1a9   :  { %3586 = vmatprep.subr.bf16.mxu0 %v5567_v16 }
 0x1aa   :  { %4052 = vmatmul.mubr.bf16.gmra.mrb[76].mxu1 %v5568_v17 }
 0x1ac   :  { %3587 = vmatpush1.bf16.msra.mxu0 %v5565_v18 }
 0x1ad   :  { %3588 = vmatprep.subr.bf16.mxu0 %v5571_v19 }
 0x1b0   :  { %3589 = vmatpush1.bf16.msra.mxu0 %v5569_v12 }
 0x1b1   :  { %3590 = vmatprep.subr.bf16.mxu0 %v5574_v24 }
 0x1b4   :  { %3591 = vmatpush1.bf16.msra.mxu0 %v5572_v25 }
 0x1b5   :  { %3592 = vmatprep.subr.bf16.mxu0 %v5577_v20  ;;  %v4702_v32 = vpop.f32.mrb[24].mxu1 }
 0x1b6   :  { %v4703_v33 = vpop.f32.mrb[25].mxu1 }
 0x1b7   :  { %v4704_v34 = vadd.f32 %v4703_v33, %v4702_v32  ;;  %v4705_v35 = vpop.f32.mrb[26].mxu1 }
 0x1b8   :  { %3593 = vmatpush1.bf16.msra.mxu0 %v5575_v31  ;;  %v4706_v39 = vpop.f32.mrb[27].mxu1 }
 0x1b9   :  { %3594 = vmatprep.subr.bf16.mxu0 %v5580_v27  ;;  %v3752_v43 = vadd.f32 %v4704_v34, %v3703_v62  ;;  %v4707_v44 = vadd.f32 %v4706_v39, %v4705_v35 }
 0x1bb   :  { %v3755_v45 = vadd.f32 %v4707_v44, %v3706_v63 }
 0x1bc   :  { %3595 = vmatpush1.bf16.msra.mxu0 %v5578_v37 }
 0x1bd   :  { %3596 = vmatprep.subr.bf16.mxu0 %v5583_v42  ;;  %v4708_v50 = vpop.f32.mrb[28].mxu1 }
 0x1be   :  { %v4709_v51 = vpop.f32.mrb[29].mxu1 }
 0x1bf   :  { %v4710_v52 = vadd.f32 %v4709_v51, %v4708_v50  ;;  %v4711_v53 = vpop.f32.mrb[30].mxu1 }
 0x1c0   :  { %3597 = vmatpush1.bf16.msra.mxu0 %v5581_v47  ;;  %v4712_v54 = vpop.f32.mrb[31].mxu1 }
 0x1c1   :  { %v3760_v55 = vadd.f32 %v4710_v52, %v3711_v11  ;;  %v4713_v36 = vadd.f32 %v4712_v54, %v4711_v53 }
 0x1c3   :  { %3599 = vmatmul.mubr.bf16.vlgmr.msra.gmra.mrb[0].mxu0 %v5554_v1  ;;  %v3763_v57 = vadd.f32 %v4713_v36, %v3714_v15 }
 0x1c4   :  { %3608 = vmatprep.mubr.bf16.mxu0 %v5563_v5 }
 0x1cb   :  { %3609 = vmatmul.mubr.bf16.gmra.mrb[4].mxu0 %v5568_v17 }
 0x1d5   :  { %v4730_v40 = vpop.f32.mrb[32].mxu1 }
 0x1d6   :  { %v4731_v58 = vpop.f32.mrb[33].mxu1 }
 0x1d7   :  { %v4732_v60 = vadd.f32 %v4731_v58, %v4730_v40  ;;  %v4733_v61 = vpop.f32.mrb[34].mxu1 }
 0x1d8   :  { %v4734_v62 = vpop.f32.mrb[35].mxu1 }
 0x1d9   :  { %v3801_v48 = vadd.f32 %v4732_v60, %v3752_v43  ;;  %v4735_v63 = vadd.f32 %v4734_v62, %v4733_v61 }
 0x1db   :  { %v3804_v4 = vadd.f32 %v4735_v63, %v3755_v45 }
 0x1dd   :  { %v4736_v46 = vpop.f32.mrb[36].mxu1 }
 0x1de   :  { %v4737_v0 = vpop.f32.mrb[37].mxu1 }
 0x1df   :  { %v4738_v49 = vadd.f32 %v4737_v0, %v4736_v46  ;;  %v4739_v56 = vpop.f32.mrb[38].mxu1 }
 0x1e0   :  { %v4740_v28 = vpop.f32.mrb[39].mxu1 }
 0x1e1   :  { %v3809_v2 = vadd.f32 %v4738_v49, %v3760_v55  ;;  %v4741_v59 = vadd.f32 %v4740_v28, %v4739_v56 }
 0x1e3   :  { %v3812_v6 = vadd.f32 %v4741_v59, %v3763_v57 }
 0x1f5   :  { %v4758_v1 = vpop.f32.mrb[40].mxu1 }
 0x1f6   :  { %v4759_v3 = vpop.f32.mrb[41].mxu1 }
 0x1f7   :  { %v4760_v5 = vadd.f32 %v4759_v3, %v4758_v1  ;;  %v4761_v7 = vpop.f32.mrb[42].mxu1 }
 0x1f8   :  { %v4762_v8 = vpop.f32.mrb[43].mxu1 }
 0x1f9   :  { %v3850_v11 = vadd.f32 %v4760_v5, %v3801_v48  ;;  %v4763_v10 = vadd.f32 %v4762_v8, %v4761_v7 }
 0x1fb   :  { %v3853_v14 = vadd.f32 %v4763_v10, %v3804_v4 }
 0x1fd   :  { %v4764_v15 = vpop.f32.mrb[44].mxu1 }
 0x1fe   :  { %v4765_v16 = vpop.f32.mrb[45].mxu1 }
 0x1ff   :  { %v4766_v17 = vadd.f32 %v4765_v16, %v4764_v15  ;;  %v4767_v18 = vpop.f32.mrb[46].mxu1 }
 0x200   :  { %v4768_v19 = vpop.f32.mrb[47].mxu1 }
 0x201   :  { %v3858_v12 = vadd.f32 %v4766_v17, %v3809_v2  ;;  %v4769_v24 = vadd.f32 %v4768_v19, %v4767_v18 }
 0x203   :  { %v3861_v25 = vadd.f32 %v4769_v24, %v3812_v6 }
 0x215   :  { %v4786_v20 = vpop.f32.mrb[48].mxu1 }
 0x216   :  { %v4787_v31 = vpop.f32.mrb[49].mxu1 }
 0x217   :  { %v4788_v27 = vadd.f32 %v4787_v31, %v4786_v20  ;;  %v4789_v32 = vpop.f32.mrb[50].mxu1 }
 0x218   :  { %v4790_v33 = vpop.f32.mrb[51].mxu1 }
 0x219   :  { %v3899_v34 = vadd.f32 %v4788_v27, %v3850_v11  ;;  %v4791_v35 = vadd.f32 %v4790_v33, %v4789_v32 }
 0x21b   :  { %v3902_v37 = vadd.f32 %v4791_v35, %v3853_v14 }
 0x21d   :  { %v4792_v39 = vpop.f32.mrb[52].mxu1 }
 0x21e   :  { %v4793_v42 = vpop.f32.mrb[53].mxu1 }
 0x21f   :  { %v4794_v43 = vadd.f32 %v4793_v42, %v4792_v39  ;;  %v4795_v44 = vpop.f32.mrb[54].mxu1 }
 0x220   :  { %v4796_v45 = vpop.f32.mrb[55].mxu1 }
 0x221   :  { %v3907_v47 = vadd.f32 %v4794_v43, %v3858_v12  ;;  %v4797_v50 = vadd.f32 %v4796_v45, %v4795_v44 }
 0x223   :  { %v3910_v51 = vadd.f32 %v4797_v50, %v3861_v25 }
 0x235   :  { %v4814_v52 = vpop.f32.mrb[56].mxu1 }
 0x236   :  { %v4815_v53 = vpop.f32.mrb[57].mxu1 }
 0x237   :  { %v4816_v54 = vadd.f32 %v4815_v53, %v4814_v52  ;;  %v4817_v55 = vpop.f32.mrb[58].mxu1 }
 0x238   :  { %v4818_v36 = vpop.f32.mrb[59].mxu1 }
 0x239   :  { %v3948_v57 = vadd.f32 %v4816_v54, %v3899_v34  ;;  %v4819_v40 = vadd.f32 %v4818_v36, %v4817_v55  ;;  %v645_v54 = vsub.s32 0, %v7037_v30  ;;  %v649_v55 = vsub.s32 1, %v7037_v30 }
 0x23b   :  { %v3951_v58 = vadd.f32 %v4819_v40, %v3902_v37  ;;  %v646_v36 = vrot.slane %v7061_v38, %v645_v54 }
 0x23d   :  { %v4820_v60 = vpop.f32.mrb[60].mxu1  ;;  %v4882_v40 = vadd.f32 %v6841_v29, %v646_v36  ;;  %v4890_v29 = vadd.f32 %v6873_v23, %v646_v36 }
 0x23e   :  { %v4821_v61 = vpop.f32.mrb[61].mxu1 }
 0x23f   :  { %v4822_v62 = vadd.f32 %v4821_v61, %v4820_v60  ;;  %v4823_v48 = vpop.f32.mrb[62].mxu1  ;;  %v4886_v61 = vadd.f32 %v6848_v41, %v646_v36 }
 0x240   :  { %v4824_v63 = vpop.f32.mrb[63].mxu1 }
 0x241   :  { %v3956_v4 = vadd.f32 %v4822_v62, %v3907_v47  ;;  %v4825_v46 = vadd.f32 %v4824_v63, %v4823_v48 }
 0x243   :  { %v3959_v0 = vadd.f32 %v4825_v46, %v3910_v51 }
 0x255   :  { %v4842_v49 = vpop.f32.mrb[64].mxu1 }
 0x256   :  { %v4843_v56 = vpop.f32.mrb[65].mxu1 }
 0x257   :  { %v4844_v28 = vadd.f32 %v4843_v56, %v4842_v49  ;;  %v4845_v2 = vpop.f32.mrb[66].mxu1 }
 0x258   :  { %v4846_v59 = vpop.f32.mrb[67].mxu1 }
 0x259   :  { %v3997_v6 = vadd.f32 %v4844_v28, %v3948_v57  ;;  %v4847_v1 = vadd.f32 %v4846_v59, %v4845_v2  ;;  %v650_v57 = vrot.slane %v7061_v38, %v649_v55 }
 0x25b   :  { %v4000_v3 = vadd.f32 %v4847_v1, %v3951_v58  ;;  %v4884_v58 = vadd.f32 %v6846_v9, %v650_v57  ;;  %v4888_v63 = vadd.f32 %v6856_v13, %v650_v57  ;;  %v4892_v9 = vadd.f32 %v6878_v21, %v650_v57 }
 0x25d   :  { %v4848_v5 = vpop.f32.mrb[68].mxu1 }
 0x25e   :  { %v4849_v7 = vpop.f32.mrb[69].mxu1 }
 0x25f   :  { %v4850_v8 = vadd.f32 %v4849_v7, %v4848_v5  ;;  %v4851_v11 = vpop.f32.mrb[70].mxu1  ;;  %v4896_v5 = vadd.f32 %v6891_v26, %v650_v57 }
 0x260   :  { %v4852_v10 = vpop.f32.mrb[71].mxu1 }
 0x261   :  { %v4005_v14 = vadd.f32 %v4850_v8, %v3956_v4  ;;  %v4853_v15 = vadd.f32 %v4852_v10, %v4851_v11 }
 0x263   :  { %v4008_v16 = vadd.f32 %v4853_v15, %v3959_v0 }
 0x275   :  { %v4870_v17 = vpop.f32.mrb[72].mxu1 }
 0x276   :  { %v4871_v18 = vpop.f32.mrb[73].mxu1 }
 0x277   :  { %v4872_v19 = vadd.f32 %v4871_v18, %v4870_v17  ;;  %v4873_v12 = vpop.f32.mrb[74].mxu1 }
 0x278   :  { %v4874_v24 = vpop.f32.mrb[75].mxu1 }
 0x279   :  { %v4046_v25 = vadd.f32 %v4872_v19, %v3997_v6  ;;  %v4875_v20 = vadd.f32 %v4874_v24, %v4873_v12  ;;  %v4894_v6 = vadd.f32 %v6883_v22, %v646_v36 }
 0x27b   :  { %v4062_v31 = vmax.f32 %v4046_v25, 0.0  ;;  %v4049_v27 = vadd.f32 %v4875_v20, %v4000_v3 }
 0x27d   :  { %v4623_v32 = vpack.c.bf16 %v4062_v31, %v4062_v31  ;;  %v4065_v33 = vmax.f32 %v4049_v27, 0.0  ;;  %v4876_v34 = vpop.f32.mrb[76].mxu1 }
 0x27e   :  { %v4877_v35 = vpop.f32.mrb[77].mxu1 }
 0x27f   :  { %4113 = vst [vmem:[%s7200_s3 + $0x8] sm:$0xf] %v4623_v32  ;;  %v4625_v37 = vpack.c.bf16 %v4065_v33, %v4065_v33  ;;  %v4878_v39 = vadd.f32 %v4877_v35, %v4876_v34  ;;  %v4879_v42 = vpop.f32.mrb[78].mxu1 }
 0x280   :  { %v4880_v43 = vpop.f32.mrb[79].mxu1 }
 0x281   :  { %4115 = vst [vmem:[%s7200_s3 + $0x14] sm:$0xf] %v4625_v37  ;;  %v4054_v44 = vadd.f32 %v4878_v39, %v4005_v14  ;;  %v4881_v45 = vadd.f32 %v4880_v43, %v4879_v42 }
 0x283   :  { %v4068_v47 = vmax.f32 %v4054_v44, 0.0  ;;  %v4057_v50 = vadd.f32 %v4881_v45, %v4008_v16 }
 0x285   :  { %v4627_v51 = vpack.c.bf16 %v4068_v47, %v4068_v47  ;;  %v4071_v52 = vmax.f32 %v4057_v50, 0.0 }
 0x287   :  { %4117 = vst [vmem:[%s7200_s3 + $0x20] sm:$0xf] %v4627_v51  ;;  %v4629_v53 = vpack.c.bf16 %v4071_v52, %v4071_v52 }
 0x289   :  { %4119 = vst [vmem:[%s7200_s3 + $0x2c] sm:$0xf] %v4629_v53 }
 0x296   :  { %v3600_v60 = vpop.f32.mrb[0].mxu0 }
 0x297   :  { %v4883_v62 = vadd.f32 %v4882_v40, %v3600_v60  ;;  %v3602_v48 = vpop.f32.mrb[1].mxu0 }
 0x298   :  { %v4885_v4 = vadd.f32 %v4884_v58, %v3602_v48  ;;  %v3604_v46 = vpop.f32.mrb[2].mxu0 }
 0x299   :  { %v4060_v0 = vmax.f32 %v4883_v62, 0.0  ;;  %v4887_v49 = vadd.f32 %v4886_v61, %v3604_v46  ;;  %v3606_v30 = vpop.f32.mrb[3].mxu0 }
 0x29a   :  { %v4061_v56 = vmax.f32 %v4885_v4, 0.0  ;;  %v4889_v28 = vadd.f32 %v4888_v63, %v3606_v30 }
 0x29b   :  { %v4063_v2 = vmax.f32 %v4887_v49, 0.0 }
 0x29c   :  { %v4622_v38 = vpack.c.bf16 %v4061_v56, %v4060_v0  ;;  %v4064_v59 = vmax.f32 %v4889_v28, 0.0 }
 0x29e   :  { %4112 = vst [vmem:[%s7200_s3] sm:$0xff] %v4622_v38  ;;  %v4624_v41 = vpack.c.bf16 %v4064_v59, %v4063_v2  ;;  %v3610_v13 = vpop.f32.mrb[4].mxu0 }
 0x29f   :  { %v4891_v1 = vadd.f32 %v4890_v29, %v3610_v13  ;;  %v3612_v3 = vpop.f32.mrb[5].mxu0 }
 0x2a0   :  { %4114 = vst [vmem:[%s7200_s3 + $0xc] sm:$0xff] %v4624_v41  ;;  %v4893_v7 = vadd.f32 %v4892_v9, %v3612_v3  ;;  %v3614_v23 = vpop.f32.mrb[6].mxu0 }
 0x2a1   :  { %v4066_v8 = vmax.f32 %v4891_v1, 0.0  ;;  %v4895_v21 = vadd.f32 %v4894_v6, %v3614_v23  ;;  %v3616_v11 = vpop.f32.mrb[7].mxu0 }
 0x2a2   :  { %v4067_v10 = vmax.f32 %v4893_v7, 0.0  ;;  %v4897_v14 = vadd.f32 %v4896_v5, %v3616_v11 }
 0x2a3   :  { %v4069_v15 = vmax.f32 %v4895_v21, 0.0 }
 0x2a4   :  { %v4626_v16 = vpack.c.bf16 %v4067_v10, %v4066_v8  ;;  %v4070_v17 = vmax.f32 %v4897_v14, 0.0 }
 0x2a6   :  { %4116 = vst [vmem:[%s7200_s3 + $0x18] sm:$0xff] %v4626_v16  ;;  %v4628_v22 = vpack.c.bf16 %v4070_v17, %v4069_v15 }
 0x2a8   :  { %4118 = vst [vmem:[%s7200_s3 + $0x24] sm:$0xff] %v4628_v22 }

// kernel: features_forward.13
= control target key start
LH: loop header
LB: loop body
LE: loop exit
PB: predicated region body
PF: predicated region fallthrough
CT: control target
= control target key end

     0   :  { %s3219_s12 = smov 0   ;;  %s3221_s13 = smov 0   ;;  %s3556_s0 = inlined_call_operand.vmem [shape: bf16[2,32,1792], index: 0, kind: input, shape index: {}]   ;;  %s3557_s1 = inlined_call_operand.vmem [shape: bf16[2,1792,256], index: 1, kind: input, shape index: {}]   ;;  %s3558_s2 = inlined_call_operand.vmem [shape: f32[2,1,256], index: 2, kind: input, shape index: {}]   ;;  %s3559_s3 = inlined_call_operand.vmem [shape: bf16[32,512], index: 3, kind: output, shape index: {}]  }
   0x1   :  { %s3223_s14 = smov 0   ;;  %s3225_s15 = smov 0  }
   0x2   :  { %s3227_s16 = smov 0  }
   0x3 LB: > { %s2376_s17 = sadd.s32 4294967295, %s3197_s16   ;;  %s32_s18 = sadd.s32 1, %s3193_s15  ;;  %s3197_s16 = sphi %s3227_s16, %s13_s16   ;;  %s3193_s15 = sphi %s3225_s15, %s3564_s15   ;;  %s3189_s14 = sphi %s3223_s14, %s3563_s14   ;;  %s3185_s13 = sphi %s3221_s13, %s3562_s13   ;;  %s3181_s12 = sphi %s3219_s12, %s3561_s12  }
   0x4   : > { %p34_p0 = scmp.ge.s32.totalorder %s32_s18, 2  ;;  %s127_s19 = sadd.s32 1, %s3185_s13 }
   0x5   : > { %p137_p1 = scmp.ne.s32.totalorder %s3185_s13, %s3181_s12  ;;  %p138_p2 = scmp.eq.s32.totalorder %s2376_s17, 1 }
   0x6   : > { %s3566_s18 = smov (%p34_p0, %s32_s18), 0  ;;  %p2380_p4 = scmp.ge.s32.totalorder %s3197_s16, 1 }
   0x7   : > { %p3251_p3 = por %p138_p2, %p137_p1  ;;  %s123_s21 = ssub.s32 %s3193_s15, %s3566_s18 }
   0x8   : > { %p201_p5 = scmp.lt.s32.totalorder %s3197_s16, 3  ;;  %p125_p6 = scmp.eq.s32.totalorder %s123_s21, 0 }
   0xa   : > { %p202_p7 = pnand %p2380_p4, %p201_p5 }
   0xb   : > { %s3260_s22 = scalar_select %p125_p6, %s3185_s13, %s127_s19  }
   0xc   : > { %205 = sbr.rel (%p202_p7) target bundleno = 512 (0x200), region = 32  ;;  %p247_p8 = scmp.lt.s32.totalorder (!%p202_p7), %s3189_s14, 1 }
   0xd   : > { %s243_s9 = sand.u32 (!%p202_p7), 1, %s3181_s12  }
   0xe   : > { %s2381_s10 = sshll.u32 (!%p202_p7), %s243_s9, 5 }
   0xf   : > { %s245_s11 = scalar_lea.vmem (!%p202_p7), [#allocation2], %s2381_s10 }
  0x13   : > { %s3264_s23 = scalar_select %p247_p8, %s3189_s14, 1 }
  0x14   : > { %s2650_s12 = sshll.u32 (%p3251_p3), %s3189_s14, 3 }
  0x15   : > { %s2740_s24 = smul.u32 1792, %s3264_s23  ;;  %s2384_s5 = sshll.u32 %s3264_s23, 1 }
  0x16   : > { %s2739_s28 = smul.u32 224, %s3264_s23  ;;  %s274_s8 = scalar_lea.vmem %s3558_s2, %s2384_s5 }
  0x17   : > { %s3270_s27 = scalar_lea.vmem %s3557_s1, %s2740_s24  ;;  %s2223_s21 = scalar_lea.vmem (%p3251_p3), %s3559_s3, %s2650_s12 }
  0x18   : > { %v2781_v0 = vld [vmem:[%s3270_s27 + $0x4] ss:$8 sps:$4 sm:$0xff]   ;;  %v2785_v2 = vld [vmem:[%s3270_s27] ss:$8 sps:$4 sm:$0xff]   ;;  %v2787_v4 = vld [vmem:[%s3270_s27 + $0x14] ss:$8 sps:$4 sm:$0xff]   ;;  %s3321_s4 = scalar_lea.vmem %s3556_s0, %s2739_s28 }
  0x19   : > { %v2783_v1 = vld [vmem:[%s3270_s27 + $0x304] ss:$8 sps:$4 sm:$0xff]   ;;  %1803 = vmatprep.subr.bf16.mxu1 %v2781_v0  ;;  %v2786_v3 = vld [vmem:[%s3270_s27 + $0x300] ss:$8 sps:$4 sm:$0xff]   ;;  %v2789_v5 = vld [vmem:[%s3270_s27 + $0x314] ss:$8 sps:$4 sm:$0xff]  }
  0x1a   : > { %1962 = vmatprep.subr.bf16.mxu0 %v2783_v1  ;;  %1804 = vmatpush1.bf16.msra.mxu1 %v2785_v2  ;;  %v2791_v6 = vld [vmem:[%s3270_s27 + $0x10] ss:$8 sps:$4 sm:$0xff]   ;;  %v2793_v8 = vld [vmem:[%s3270_s27 + $0x24] ss:$8 sps:$4 sm:$0xff]   ;;  %v2797_v10 = vld [vmem:[%s3270_s27 + $0x20] ss:$8 sps:$4 sm:$0xff]  }
  0x1b   : > { %1963 = vmatpush1.bf16.msra.mxu0 %v2786_v3  ;;  %1805 = vmatprep.subr.bf16.mxu1 %v2787_v4  ;;  %v2792_v7 = vld [vmem:[%s3270_s27 + $0x310] ss:$8 sps:$4 sm:$0xff]   ;;  %v2795_v9 = vld [vmem:[%s3270_s27 + $0x324] ss:$8 sps:$4 sm:$0xff]   ;;  %v2798_v11 = vld [vmem:[%s3270_s27 + $0x320] ss:$8 sps:$4 sm:$0xff]  }
  0x1c   : > { %1964 = vmatprep.subr.bf16.mxu0 %v2789_v5  ;;  %v2799_v12 = vld [vmem:[%s3270_s27 + $0x34] ss:$8 sps:$4 sm:$0xff]   ;;  %v2803_v14 = vld [vmem:[%s3270_s27 + $0x30] ss:$8 sps:$4 sm:$0xff]   ;;  %v2805_v16 = vld [vmem:[%s3270_s27 + $0x44] ss:$8 sps:$4 sm:$0xff]  }
  0x1d   : > { %v2801_v13 = vld [vmem:[%s3270_s27 + $0x334] ss:$8 sps:$4 sm:$0xff]   ;;  %v2804_v15 = vld [vmem:[%s3270_s27 + $0x330] ss:$8 sps:$4 sm:$0xff]   ;;  %v2807_v17 = vld [vmem:[%s3270_s27 + $0x344] ss:$8 sps:$4 sm:$0xff]  }
  0x1e   : > { %1806 = vmatpush1.bf16.msra.mxu1 %v2791_v6  ;;  %v2809_v18 = vld [vmem:[%s3270_s27 + $0x40] ss:$8 sps:$4 sm:$0xff]   ;;  %v2811_v20 = vld [vmem:[%s3270_s27 + $0x54] ss:$8 sps:$4 sm:$0xff]   ;;  %v2815_v22 = vld [vmem:[%s3270_s27 + $0x50] ss:$8 sps:$4 sm:$0xff]  }
  0x1f   : > { %1965 = vmatpush1.bf16.msra.mxu0 %v2792_v7  ;;  %1807 = vmatprep.subr.bf16.mxu1 %v2793_v8  ;;  %v2810_v19 = vld [vmem:[%s3270_s27 + $0x340] ss:$8 sps:$4 sm:$0xff]   ;;  %v2813_v21 = vld [vmem:[%s3270_s27 + $0x354] ss:$8 sps:$4 sm:$0xff]   ;;  %v2816_v23 = vld [vmem:[%s3270_s27 + $0x350] ss:$8 sps:$4 sm:$0xff]  }
  0x20   : > { %1966 = vmatprep.subr.bf16.mxu0 %v2795_v9  ;;  %v2817_v24 = vld [vmem:[%s3270_s27 + $0x64] ss:$8 sps:$4 sm:$0xff]   ;;  %v2821_v26 = vld [vmem:[%s3270_s27 + $0x60] ss:$8 sps:$4 sm:$0xff]   ;;  %v2823_v28 = vld [vmem:[%s3270_s27 + $0x74] ss:$8 sps:$4 sm:$0xff]  }
  0x21   : > { %v2819_v25 = vld [vmem:[%s3270_s27 + $0x364] ss:$8 sps:$4 sm:$0xff]   ;;  %v2822_v27 = vld [vmem:[%s3270_s27 + $0x360] ss:$8 sps:$4 sm:$0xff]   ;;  %v2825_v29 = vld [vmem:[%s3270_s27 + $0x374] ss:$8 sps:$4 sm:$0xff]  }
  0x22   : > { %1808 = vmatpush1.bf16.msra.mxu1 %v2797_v10  ;;  %v2827_v30 = vld [vmem:[%s3270_s27 + $0x70] ss:$8 sps:$4 sm:$0xff]   ;;  %v2829_v32 = vld [vmem:[%s3270_s27 + $0x84] ss:$8 sps:$4 sm:$0xff]   ;;  %v2833_v34 = vld [vmem:[%s3270_s27 + $0x80] ss:$8 sps:$4 sm:$0xff]  }
  0x23   : > { %1967 = vmatpush1.bf16.msra.mxu0 %v2798_v11  ;;  %1809 = vmatprep.subr.bf16.mxu1 %v2799_v12  ;;  %v2828_v31 = vld [vmem:[%s3270_s27 + $0x370] ss:$8 sps:$4 sm:$0xff]   ;;  %v2831_v33 = vld [vmem:[%s3270_s27 + $0x384] ss:$8 sps:$4 sm:$0xff]   ;;  %v2834_v35 = vld [vmem:[%s3270_s27 + $0x380] ss:$8 sps:$4 sm:$0xff]  }
  0x24   : > { %1968 = vmatprep.subr.bf16.mxu0 %v2801_v13  ;;  %v2835_v36 = vld [vmem:[%s3270_s27 + $0x94] ss:$8 sps:$4 sm:$0xff]   ;;  %v2839_v38 = vld [vmem:[%s3270_s27 + $0x90] ss:$8 sps:$4 sm:$0xff]   ;;  %v2841_v40 = vld [vmem:[%s3270_s27 + $0xa4] ss:$8 sps:$4 sm:$0xff]  }
  0x25   : > { %v2837_v37 = vld [vmem:[%s3270_s27 + $0x394] ss:$8 sps:$4 sm:$0xff]   ;;  %v2840_v39 = vld [vmem:[%s3270_s27 + $0x390] ss:$8 sps:$4 sm:$0xff]   ;;  %v2843_v41 = vld [vmem:[%s3270_s27 + $0x3a4] ss:$8 sps:$4 sm:$0xff]  }
  0x26   : > { %1810 = vmatpush1.bf16.msra.mxu1 %v2803_v14  ;;  %v2845_v42 = vld [vmem:[%s3270_s27 + $0xa0] ss:$8 sps:$4 sm:$0xff]   ;;  %v2847_v44 = vld [vmem:[%s3270_s27 + $0xb4] ss:$8 sps:$4 sm:$0xff]   ;;  %v2851_v46 = vld [vmem:[%s3270_s27 + $0xb0] ss:$8 sps:$4 sm:$0xff]  }
  0x27   : > { %1969 = vmatpush1.bf16.msra.mxu0 %v2804_v15  ;;  %1811 = vmatprep.subr.bf16.mxu1 %v2805_v16  ;;  %v2846_v43 = vld [vmem:[%s3270_s27 + $0x3a0] ss:$8 sps:$4 sm:$0xff]   ;;  %v2849_v45 = vld [vmem:[%s3270_s27 + $0x3b4] ss:$8 sps:$4 sm:$0xff]   ;;  %v2852_v47 = vld [vmem:[%s3270_s27 + $0x3b0] ss:$8 sps:$4 sm:$0xff]  }
  0x28   : > { %1970 = vmatprep.subr.bf16.mxu0 %v2807_v17  ;;  %v2879_v48 = vld [vmem:[%s3321_s4 + $0x4] ss:$56 sps:$4 sm:$0xff]   ;;  %v2857_v52 = vld [vmem:[%s3270_s27 + $0xc0] ss:$8 sps:$4 sm:$0xff]   ;;  %v2863_v56 = vld [vmem:[%s3270_s27 + $0xd0] ss:$8 sps:$4 sm:$0xff]  }
  0x29   : > { %v2853_v49 = vld [vmem:[%s3270_s27 + $0xc4] ss:$8 sps:$4 sm:$0xff]   ;;  %1835 = vmatprep.mubr.bf16.mxu1 %v2879_v48  ;;  %v2885_v51 = vld [vmem:[%s3321_s4 + $0x1c] ss:$56 sps:$4 sm:$0xff]   ;;  %v2858_v53 = vld [vmem:[%s3270_s27 + $0x3c0] ss:$8 sps:$4 sm:$0xff]  }
  0x2a   : > { %1812 = vmatpush1.bf16.msra.mxu1 %v2809_v18  ;;  %v2855_v50 = vld [vmem:[%s3270_s27 + $0x3c4] ss:$8 sps:$4 sm:$0xff]   ;;  %v2859_v54 = vld [vmem:[%s3270_s27 + $0xd4] ss:$8 sps:$4 sm:$0xff]   ;;  %1994 = vmatprep.mubr.bf16.mxu0 %v2885_v51  ;;  %v2864_v57 = vld [vmem:[%s3270_s27 + $0x3d0] ss:$8 sps:$4 sm:$0xff]  }
  0x2b   : > { %1971 = vmatpush1.bf16.msra.mxu0 %v2810_v19  ;;  %1813 = vmatprep.subr.bf16.mxu1 %v2811_v20  ;;  %v2861_v55 = vld [vmem:[%s3270_s27 + $0x3d4] ss:$8 sps:$4 sm:$0xff]   ;;  %v2865_v58 = vld [vmem:[%s3270_s27 + $0xe4] ss:$8 sps:$4 sm:$0xff]   ;;  %v2869_v60 = vld [vmem:[%s3270_s27 + $0xe0] ss:$8 sps:$4 sm:$0xff]  }
  0x2c   : > { %1972 = vmatprep.subr.bf16.mxu0 %v2813_v21  ;;  %v2867_v59 = vld [vmem:[%s3270_s27 + $0x3e4] ss:$8 sps:$4 sm:$0xff]   ;;  %v2870_v61 = vld [vmem:[%s3270_s27 + $0x3e0] ss:$8 sps:$4 sm:$0xff]   ;;  %v2871_v62 = vld [vmem:[%s3270_s27 + $0xf4] ss:$8 sps:$4 sm:$0xff]  }
  0x2d   : > { %v2873_v63 = vld [vmem:[%s3270_s27 + $0x3f4] ss:$8 sps:$4 sm:$0xff]   ;;  %v2875_v0 = vld [vmem:[%s3270_s27 + $0xf0] ss:$8 sps:$4 sm:$0xff]   ;;  %v2882_v2 = vld [vmem:[%s3270_s27 + $0x104] ss:$8 sps:$4 sm:$0xff]  }
  0x2e   : > { %1814 = vmatpush1.bf16.msra.mxu1 %v2815_v22  ;;  %v2876_v1 = vld [vmem:[%s3270_s27 + $0x3f0] ss:$8 sps:$4 sm:$0xff]   ;;  %v2888_v3 = vld [vmem:[%s3270_s27 + $0x404] ss:$8 sps:$4 sm:$0xff]   ;;  %v2880_v5 = vld [vmem:[%s3270_s27 + $0x100] ss:$8 sps:$4 sm:$0xff]  }
  0x2f   : > { %1973 = vmatpush1.bf16.msra.mxu0 %v2816_v23  ;;  %1815 = vmatprep.subr.bf16.mxu1 %v2817_v24  ;;  %v2877_v4 = vld [vmem:[%s3321_s4] ss:$56 sps:$4 sm:$0xff]   ;;  %v2891_v8 = vld [vmem:[%s3270_s27 + $0x114] ss:$8 sps:$4 sm:$0xff]   ;;  %v2897_v12 = vld [vmem:[%s3270_s27 + $0x124] ss:$8 sps:$4 sm:$0xff]  }
  0x30   : > { %1974 = vmatprep.subr.bf16.mxu0 %v2819_v25  ;;  %v2883_v6 = vld [vmem:[%s3321_s4 + $0x18] ss:$56 sps:$4 sm:$0xff]   ;;  %v2886_v7 = vld [vmem:[%s3270_s27 + $0x400] ss:$8 sps:$4 sm:$0xff]   ;;  %v2894_v9 = vld [vmem:[%s3270_s27 + $0x414] ss:$8 sps:$4 sm:$0xff]  }
  0x31   : > { %v2889_v10 = vld [vmem:[%s3270_s27 + $0x110] ss:$8 sps:$4 sm:$0xff]   ;;  %v2900_v13 = vld [vmem:[%s3270_s27 + $0x424] ss:$8 sps:$4 sm:$0xff]   ;;  %v2895_v14 = vld [vmem:[%s3270_s27 + $0x120] ss:$8 sps:$4 sm:$0xff]  }
  0x32   : > { %1816 = vmatpush1.bf16.msra.mxu1 %v2821_v26  ;;  %v2892_v11 = vld [vmem:[%s3270_s27 + $0x410] ss:$8 sps:$4 sm:$0xff]   ;;  %v2898_v15 = vld [vmem:[%s3270_s27 + $0x420] ss:$8 sps:$4 sm:$0xff]   ;;  %v2903_v16 = vld [vmem:[%s3270_s27 + $0x134] ss:$8 sps:$4 sm:$0xff]  }
  0x33   : > { %1975 = vmatpush1.bf16.msra.mxu0 %v2822_v27  ;;  %1817 = vmatprep.subr.bf16.mxu1 %v2823_v28  ;;  %v2906_v17 = vld [vmem:[%s3270_s27 + $0x434] ss:$8 sps:$4 sm:$0xff]   ;;  %v2901_v18 = vld [vmem:[%s3270_s27 + $0x130] ss:$8 sps:$4 sm:$0xff]   ;;  %v2909_v20 = vld [vmem:[%s3270_s27 + $0x144] ss:$8 sps:$4 sm:$0xff]  }
  0x34   : > { %1976 = vmatprep.subr.bf16.mxu0 %v2825_v29  ;;  %v2904_v19 = vld [vmem:[%s3270_s27 + $0x430] ss:$8 sps:$4 sm:$0xff]   ;;  %v2912_v21 = vld [vmem:[%s3270_s27 + $0x444] ss:$8 sps:$4 sm:$0xff]   ;;  %v2907_v22 = vld [vmem:[%s3270_s27 + $0x140] ss:$8 sps:$4 sm:$0xff]  }
  0x35   : > { %v2910_v23 = vld [vmem:[%s3270_s27 + $0x440] ss:$8 sps:$4 sm:$0xff]   ;;  %v2915_v24 = vld [vmem:[%s3270_s27 + $0x154] ss:$8 sps:$4 sm:$0xff]   ;;  %v2913_v26 = vld [vmem:[%s3270_s27 + $0x150] ss:$8 sps:$4 sm:$0xff]  }
  0x36   : > { %1818 = vmatpush1.bf16.msra.mxu1 %v2827_v30  ;;  %v2918_v25 = vld [vmem:[%s3270_s27 + $0x454] ss:$8 sps:$4 sm:$0xff]   ;;  %v2916_v27 = vld [vmem:[%s3270_s27 + $0x450] ss:$8 sps:$4 sm:$0xff]   ;;  %v2921_v29 = vld [vmem:[%s3270_s27 + $0x164] ss:$8 sps:$4 sm:$0xff]  }
  0x37   : > { %1977 = vmatpush1.bf16.msra.mxu0 %v2828_v31  ;;  %1819 = vmatprep.subr.bf16.mxu1 %v2829_v32  ;;  %v2967_v28 = vld [vmem:[%s3321_s4 + $0x74] ss:$56 sps:$4 sm:$0xff]   ;;  %v2919_v32 = vld [vmem:[%s3270_s27 + $0x160] ss:$8 sps:$4 sm:$0xff]   ;;  %v2937_v48 = vld [vmem:[%s3270_s27 + $0x190] ss:$8 sps:$4 sm:$0xff]  }
  0x38   : > { %1978 = vmatprep.subr.bf16.mxu0 %v2831_v33  ;;  %v2924_v30 = vld [vmem:[%s3270_s27 + $0x464] ss:$8 sps:$4 sm:$0xff]   ;;  %v2922_v33 = vld [vmem:[%s3270_s27 + $0x460] ss:$8 sps:$4 sm:$0xff]  }
  0x39   : > { %v2972_v31 = vld [vmem:[%s3321_s4 + $0x8c] ss:$56 sps:$4 sm:$0xff]  }
  0x3a   : > { %1820 = vmatpush1.bf16.msra.mxu1 %v2833_v34  ;;  %v2977_v34 = vld [vmem:[%s3321_s4 + $0x70] ss:$56 sps:$4 sm:$0xff]   ;;  %v2948_v51 = vld [vmem:[%s3270_s27 + $0x4a4] ss:$8 sps:$4 sm:$0xff]  }
  0x3b   : > { %1979 = vmatpush1.bf16.msra.mxu0 %v2834_v35  ;;  %1821 = vmatprep.subr.bf16.mxu1 %v2835_v36  ;;  %v2978_v35 = vld [vmem:[%s3321_s4 + $0x88] ss:$56 sps:$4 sm:$0xff]   ;;  %v2927_v36 = vld [vmem:[%s3270_s27 + $0x174] ss:$8 sps:$4 sm:$0xff]  }
  0x3c   : > { %1980 = vmatprep.subr.bf16.mxu0 %v2837_v37  ;;  %v2930_v37 = vld [vmem:[%s3270_s27 + $0x474] ss:$8 sps:$4 sm:$0xff]  }
  0x3e   : > { %1822 = vmatpush1.bf16.msra.mxu1 %v2839_v38  ;;  %v2925_v38 = vld [vmem:[%s3270_s27 + $0x170] ss:$8 sps:$4 sm:$0xff]  }
  0x3f   : > { %1981 = vmatpush1.bf16.msra.mxu0 %v2840_v39  ;;  %1823 = vmatprep.subr.bf16.mxu1 %v2841_v40  ;;  %v2928_v39 = vld [vmem:[%s3270_s27 + $0x470] ss:$8 sps:$4 sm:$0xff]   ;;  %v2987_v40 = vld [vmem:[%s3321_s4 + $0xc] ss:$56 sps:$4 sm:$0xff]  }
  0x40   : > { %1982 = vmatprep.subr.bf16.mxu0 %v2843_v41  ;;  %v2933_v41 = vld [vmem:[%s3270_s27 + $0x184] ss:$8 sps:$4 sm:$0xff]  }
  0x42   : > { %1824 = vmatpush1.bf16.msra.mxu1 %v2845_v42  ;;  %v2936_v42 = vld [vmem:[%s3270_s27 + $0x484] ss:$8 sps:$4 sm:$0xff]  }
  0x43   : > { %1983 = vmatpush1.bf16.msra.mxu0 %v2846_v43  ;;  %1825 = vmatprep.subr.bf16.mxu1 %v2847_v44  ;;  %v2993_v43 = vld [vmem:[%s3321_s4 + $0x24] ss:$56 sps:$4 sm:$0xff]   ;;  %v2931_v44 = vld [vmem:[%s3270_s27 + $0x180] ss:$8 sps:$4 sm:$0xff]  }
  0x44   : > { %1984 = vmatprep.subr.bf16.mxu0 %v2849_v45  ;;  %v2934_v45 = vld [vmem:[%s3270_s27 + $0x480] ss:$8 sps:$4 sm:$0xff]  }
  0x46   : > { %1826 = vmatpush1.bf16.msra.mxu1 %v2851_v46  ;;  %v2939_v46 = vld [vmem:[%s3270_s27 + $0x194] ss:$8 sps:$4 sm:$0xff]  }
  0x47   : > { %1985 = vmatpush1.bf16.msra.mxu0 %v2852_v47  ;;  %1827 = vmatprep.subr.bf16.mxu1 %v2853_v49  ;;  %v2942_v47 = vld [vmem:[%s3270_s27 + $0x494] ss:$8 sps:$4 sm:$0xff]   ;;  %v2940_v49 = vld [vmem:[%s3270_s27 + $0x490] ss:$8 sps:$4 sm:$0xff]  }
  0x48   : > { %1986 = vmatprep.subr.bf16.mxu0 %v2855_v50  ;;  %v2945_v50 = vld [vmem:[%s3270_s27 + $0x1a4] ss:$8 sps:$4 sm:$0xff]  }
  0x4a   : > { %1828 = vmatpush1.bf16.msra.mxu1 %v2857_v52  ;;  %v2943_v52 = vld [vmem:[%s3270_s27 + $0x1a0] ss:$8 sps:$4 sm:$0xff]  }
  0x4b   : > { %1987 = vmatpush1.bf16.msra.mxu0 %v2858_v53  ;;  %1829 = vmatprep.subr.bf16.mxu1 %v2859_v54  ;;  %v2946_v53 = vld [vmem:[%s3270_s27 + $0x4a0] ss:$8 sps:$4 sm:$0xff]   ;;  %v2951_v54 = vld [vmem:[%s3270_s27 + $0x1b4] ss:$8 sps:$4 sm:$0xff]  }
  0x4c   : > { %1988 = vmatprep.subr.bf16.mxu0 %v2861_v55  ;;  %v2954_v55 = vld [vmem:[%s3270_s27 + $0x4b4] ss:$8 sps:$4 sm:$0xff]  }
  0x4e   : > { %1830 = vmatpush1.bf16.msra.mxu1 %v2863_v56  ;;  %v2949_v56 = vld [vmem:[%s3270_s27 + $0x1b0] ss:$8 sps:$4 sm:$0xff]  }
  0x4f   : > { %1989 = vmatpush1.bf16.msra.mxu0 %v2864_v57  ;;  %1831 = vmatprep.subr.bf16.mxu1 %v2865_v58  ;;  %v2952_v57 = vld [vmem:[%s3270_s27 + $0x4b0] ss:$8 sps:$4 sm:$0xff]   ;;  %v2957_v58 = vld [vmem:[%s3270_s27 + $0x1c4] ss:$8 sps:$4 sm:$0xff]  }
  0x50   : > { %1990 = vmatprep.subr.bf16.mxu0 %v2867_v59  ;;  %v2960_v59 = vld [vmem:[%s3270_s27 + $0x4c4] ss:$8 sps:$4 sm:$0xff]  }
  0x52   : > { %1832 = vmatpush1.bf16.msra.mxu1 %v2869_v60  ;;  %v2955_v60 = vld [vmem:[%s3270_s27 + $0x1c0] ss:$8 sps:$4 sm:$0xff]  }
  0x53   : > { %1991 = vmatpush1.bf16.msra.mxu0 %v2870_v61  ;;  %1833 = vmatprep.subr.bf16.mxu1 %v2871_v62  ;;  %v2958_v61 = vld [vmem:[%s3270_s27 + $0x4c0] ss:$8 sps:$4 sm:$0xff]   ;;  %v2963_v62 = vld [vmem:[%s3270_s27 + $0x1d4] ss:$8 sps:$4 sm:$0xff]  }
  0x54   : > { %1992 = vmatprep.subr.bf16.mxu0 %v2873_v63  ;;  %v2966_v63 = vld [vmem:[%s3270_s27 + $0x4d4] ss:$8 sps:$4 sm:$0xff]  }
  0x56   : > { %1834 = vmatpush1.bf16.msra.mxu1 %v2875_v0  ;;  %v2961_v0 = vld [vmem:[%s3270_s27 + $0x1d0] ss:$8 sps:$4 sm:$0xff]  }
  0x57   : > { %1993 = vmatpush1.bf16.msra.mxu0 %v2876_v1  ;;  %1856 = vmatprep.subr.bf16.mxu1 %v2882_v2  ;;  %v2964_v1 = vld [vmem:[%s3270_s27 + $0x4d0] ss:$8 sps:$4 sm:$0xff]   ;;  %v2971_v2 = vld [vmem:[%s3270_s27 + $0x1e4] ss:$8 sps:$4 sm:$0xff]  }
  0x58   : > { %2015 = vmatprep.subr.bf16.mxu0 %v2888_v3  ;;  %v2976_v3 = vld [vmem:[%s3270_s27 + $0x4e4] ss:$8 sps:$4 sm:$0xff]  }
  0x59   : > { %1836 = vmatmul.mubr.bf16.vlgmr.msra.gmra.mrb[0].mxu1 %v2877_v4  ;;  %v2969_v4 = vld [vmem:[%s3270_s27 + $0x1e0] ss:$8 sps:$4 sm:$0xff]  }
  0x5a   : > { %1995 = vmatmul.mubr.bf16.vlgmr.msra.gmra.mrb[0].mxu0 %v2883_v6  ;;  %1857 = vmatpush1.bf16.msra.mxu1 %v2880_v5  ;;  %v2974_v5 = vld [vmem:[%s3270_s27 + $0x4e0] ss:$8 sps:$4 sm:$0xff]   ;;  %v2981_v6 = vld [vmem:[%s3270_s27 + $0x1f4] ss:$8 sps:$4 sm:$0xff]  }
  0x5b   : > { %2016 = vmatpush1.bf16.msra.mxu0 %v2886_v7  ;;  %1858 = vmatprep.subr.bf16.mxu1 %v2891_v8  ;;  %v2984_v7 = vld [vmem:[%s3270_s27 + $0x4f4] ss:$8 sps:$4 sm:$0xff]   ;;  %v2979_v8 = vld [vmem:[%s3270_s27 + $0x1f0] ss:$8 sps:$4 sm:$0xff]  }
  0x5c   : > { %2017 = vmatprep.subr.bf16.mxu0 %v2894_v9  ;;  %1845 = vmatprep.mubr.bf16.mxu1 %v2967_v28  ;;  %v2982_v9 = vld [vmem:[%s3270_s27 + $0x4f0] ss:$8 sps:$4 sm:$0xff]   ;;  %v3011_v28 = vld [vmem:[%s3270_s27 + $0x234] ss:$8 sps:$4 sm:$0xff]  }
  0x5d   : > { %2004 = vmatprep.mubr.bf16.mxu0 %v2972_v31  ;;  %v3012_v31 = vld [vmem:[%s3270_s27 + $0x530] ss:$8 sps:$4 sm:$0xff]  }
  0x5e   : > { %1859 = vmatpush1.bf16.msra.mxu1 %v2889_v10  ;;  %v2990_v10 = vld [vmem:[%s3270_s27 + $0x204] ss:$8 sps:$4 sm:$0xff]  }
  0x5f   : > { %2018 = vmatpush1.bf16.msra.mxu0 %v2892_v11  ;;  %1860 = vmatprep.subr.bf16.mxu1 %v2897_v12  ;;  %v2996_v11 = vld [vmem:[%s3270_s27 + $0x504] ss:$8 sps:$4 sm:$0xff]   ;;  %v2985_v12 = vld [vmem:[%s3321_s4 + $0x8] ss:$56 sps:$4 sm:$0xff]  }
  0x60   : > { %2019 = vmatprep.subr.bf16.mxu0 %v2900_v13  ;;  %v2988_v13 = vld [vmem:[%s3270_s27 + $0x200] ss:$8 sps:$4 sm:$0xff]  }
  0x61   : > { %1846 = vmatmul.mubr.bf16.gmra.mrb[4].mxu1 %v2977_v34  ;;  %v3020_v34 = vld [vmem:[%s3270_s27 + $0x544] ss:$8 sps:$4 sm:$0xff]  }
  0x62   : > { %1861 = vmatpush1.bf16.msra.mxu1 %v2895_v14  ;;  %2005 = vmatmul.mubr.bf16.gmra.mrb[4].mxu0 %v2978_v35  ;;  %v2991_v14 = vld [vmem:[%s3321_s4 + $0x20] ss:$56 sps:$4 sm:$0xff]   ;;  %v3098_v35 = vld [vmem:[%s3321_s4 + $0x2c] ss:$56 sps:$4 sm:$0xff]  }
  0x63   : > { %2020 = vmatpush1.bf16.msra.mxu0 %v2898_v15  ;;  %1862 = vmatprep.subr.bf16.mxu1 %v2903_v16  ;;  %v2994_v15 = vld [vmem:[%s3270_s27 + $0x500] ss:$8 sps:$4 sm:$0xff]   ;;  %v2999_v16 = vld [vmem:[%s3270_s27 + $0x214] ss:$8 sps:$4 sm:$0xff]  }
  0x64   : > { %2021 = vmatprep.subr.bf16.mxu0 %v2906_v17  ;;  %1888 = vmatprep.mubr.bf16.mxu1 %v2987_v40  ;;  %v3002_v17 = vld [vmem:[%s3270_s27 + $0x514] ss:$8 sps:$4 sm:$0xff]   ;;  %v3021_v40 = vld [vmem:[%s3270_s27 + $0x250] ss:$8 sps:$4 sm:$0xff]  }
  0x65   : > { %2047 = vmatprep.mubr.bf16.mxu0 %v2993_v43  ;;  %v3032_v43 = vld [vmem:[%s3270_s27 + $0x564] ss:$8 sps:$4 sm:$0xff]  }
  0x66   : > { %1863 = vmatpush1.bf16.msra.mxu1 %v2901_v18  ;;  %v2997_v18 = vld [vmem:[%s3270_s27 + $0x210] ss:$8 sps:$4 sm:$0xff]  }
  0x67   : > { %2022 = vmatpush1.bf16.msra.mxu0 %v2904_v19  ;;  %1864 = vmatprep.subr.bf16.mxu1 %v2909_v20  ;;  %v3000_v19 = vld [vmem:[%s3270_s27 + $0x510] ss:$8 sps:$4 sm:$0xff]   ;;  %v3075_v20 = vld [vmem:[%s3321_s4 + $0x7c] ss:$56 sps:$4 sm:$0xff]  }
  0x68   : > { %2023 = vmatprep.subr.bf16.mxu0 %v2912_v21  ;;  %v3005_v21 = vld [vmem:[%s3270_s27 + $0x224] ss:$8 sps:$4 sm:$0xff]  }
  0x6a   : > { %1865 = vmatpush1.bf16.msra.mxu1 %v2907_v22  ;;  %v3077_v22 = vld [vmem:[%s3321_s4 + $0x94] ss:$56 sps:$4 sm:$0xff]  }
  0x6b   : > { %2024 = vmatpush1.bf16.msra.mxu0 %v2910_v23  ;;  %1866 = vmatprep.subr.bf16.mxu1 %v2915_v24  ;;  %v3008_v23 = vld [vmem:[%s3270_s27 + $0x524] ss:$8 sps:$4 sm:$0xff]   ;;  %v3003_v24 = vld [vmem:[%s3270_s27 + $0x220] ss:$8 sps:$4 sm:$0xff]  }
  0x6c   : > { %2025 = vmatprep.subr.bf16.mxu0 %v2918_v25  ;;  %v3006_v25 = vld [vmem:[%s3270_s27 + $0x520] ss:$8 sps:$4 sm:$0xff]  }
  0x6e   : > { %1867 = vmatpush1.bf16.msra.mxu1 %v2913_v26  ;;  %v3079_v26 = vld [vmem:[%s3321_s4 + $0x78] ss:$56 sps:$4 sm:$0xff]  }
  0x6f   : > { %2026 = vmatpush1.bf16.msra.mxu0 %v2916_v27  ;;  %1868 = vmatprep.subr.bf16.mxu1 %v2921_v29  ;;  %v3083_v27 = vld [vmem:[%s3321_s4 + $0x90] ss:$56 sps:$4 sm:$0xff]   ;;  %v3014_v29 = vld [vmem:[%s3270_s27 + $0x534] ss:$8 sps:$4 sm:$0xff]  }
  0x70   : > { %2027 = vmatprep.subr.bf16.mxu0 %v2924_v30  ;;  %v3009_v30 = vld [vmem:[%s3270_s27 + $0x230] ss:$8 sps:$4 sm:$0xff]  }
  0x72   : > { %1869 = vmatpush1.bf16.msra.mxu1 %v2919_v32  ;;  %v3017_v32 = vld [vmem:[%s3270_s27 + $0x244] ss:$8 sps:$4 sm:$0xff]  }
  0x73   : > { %2028 = vmatpush1.bf16.msra.mxu0 %v2922_v33  ;;  %1870 = vmatprep.subr.bf16.mxu1 %v2927_v36  ;;  %v3095_v33 = vld [vmem:[%s3321_s4 + $0x14] ss:$56 sps:$4 sm:$0xff]   ;;  %v3015_v36 = vld [vmem:[%s3270_s27 + $0x240] ss:$8 sps:$4 sm:$0xff]  }
  0x74   : > { %2029 = vmatprep.subr.bf16.mxu0 %v2930_v37  ;;  %v3018_v37 = vld [vmem:[%s3270_s27 + $0x540] ss:$8 sps:$4 sm:$0xff]  }
  0x76   : > { %1871 = vmatpush1.bf16.msra.mxu1 %v2925_v38  ;;  %v3023_v38 = vld [vmem:[%s3270_s27 + $0x254] ss:$8 sps:$4 sm:$0xff]  }
  0x77   : > { %2030 = vmatpush1.bf16.msra.mxu0 %v2928_v39  ;;  %1872 = vmatprep.subr.bf16.mxu1 %v2933_v41  ;;  %v3026_v39 = vld [vmem:[%s3270_s27 + $0x554] ss:$8 sps:$4 sm:$0xff]   ;;  %v3024_v41 = vld [vmem:[%s3270_s27 + $0x550] ss:$8 sps:$4 sm:$0xff]  }
  0x78   : > { %2031 = vmatprep.subr.bf16.mxu0 %v2936_v42  ;;  %v3029_v42 = vld [vmem:[%s3270_s27 + $0x264] ss:$8 sps:$4 sm:$0xff]  }
  0x7a   : > { %1873 = vmatpush1.bf16.msra.mxu1 %v2931_v44  ;;  %v3027_v44 = vld [vmem:[%s3270_s27 + $0x260] ss:$8 sps:$4 sm:$0xff]  }
  0x7b   : > { %2032 = vmatpush1.bf16.msra.mxu0 %v2934_v45  ;;  %1874 = vmatprep.subr.bf16.mxu1 %v2939_v46  ;;  %v3030_v45 = vld [vmem:[%s3270_s27 + $0x560] ss:$8 sps:$4 sm:$0xff]   ;;  %v3035_v46 = vld [vmem:[%s3270_s27 + $0x274] ss:$8 sps:$4 sm:$0xff]  }
  0x7c   : > { %2033 = vmatprep.subr.bf16.mxu0 %v2942_v47  ;;  %v3038_v47 = vld [vmem:[%s3270_s27 + $0x574] ss:$8 sps:$4 sm:$0xff]  }
  0x7e   : > { %1875 = vmatpush1.bf16.msra.mxu1 %v2937_v48  ;;  %v3033_v48 = vld [vmem:[%s3270_s27 + $0x270] ss:$8 sps:$4 sm:$0xff]  }
  0x7f   : > { %2034 = vmatpush1.bf16.msra.mxu0 %v2940_v49  ;;  %1876 = vmatprep.subr.bf16.mxu1 %v2945_v50  ;;  %v3036_v49 = vld [vmem:[%s3270_s27 + $0x570] ss:$8 sps:$4 sm:$0xff]   ;;  %v3041_v50 = vld [vmem:[%s3270_s27 + $0x284] ss:$8 sps:$4 sm:$0xff]  }
  0x80   : > { %2035 = vmatprep.subr.bf16.mxu0 %v2948_v51  ;;  %v3044_v51 = vld [vmem:[%s3270_s27 + $0x584] ss:$8 sps:$4 sm:$0xff]  }
  0x82   : > { %1877 = vmatpush1.bf16.msra.mxu1 %v2943_v52  ;;  %v3039_v52 = vld [vmem:[%s3270_s27 + $0x280] ss:$8 sps:$4 sm:$0xff]  }
  0x83   : > { %2036 = vmatpush1.bf16.msra.mxu0 %v2946_v53  ;;  %1878 = vmatprep.subr.bf16.mxu1 %v2951_v54  ;;  %v3042_v53 = vld [vmem:[%s3270_s27 + $0x580] ss:$8 sps:$4 sm:$0xff]   ;;  %v3047_v54 = vld [vmem:[%s3270_s27 + $0x294] ss:$8 sps:$4 sm:$0xff]  }
  0x84   : > { %2037 = vmatprep.subr.bf16.mxu0 %v2954_v55  ;;  %v3050_v55 = vld [vmem:[%s3270_s27 + $0x594] ss:$8 sps:$4 sm:$0xff]  }
  0x86   : > { %1879 = vmatpush1.bf16.msra.mxu1 %v2949_v56  ;;  %v3045_v56 = vld [vmem:[%s3270_s27 + $0x290] ss:$8 sps:$4 sm:$0xff]  }
  0x87   : > { %2038 = vmatpush1.bf16.msra.mxu0 %v2952_v57  ;;  %1880 = vmatprep.subr.bf16.mxu1 %v2957_v58  ;;  %v3048_v57 = vld [vmem:[%s3270_s27 + $0x590] ss:$8 sps:$4 sm:$0xff]   ;;  %v3053_v58 = vld [vmem:[%s3270_s27 + $0x2a4] ss:$8 sps:$4 sm:$0xff]  }
  0x88   : > { %2039 = vmatprep.subr.bf16.mxu0 %v2960_v59  ;;  %v3056_v59 = vld [vmem:[%s3270_s27 + $0x5a4] ss:$8 sps:$4 sm:$0xff]  }
  0x8a   : > { %1881 = vmatpush1.bf16.msra.mxu1 %v2955_v60  ;;  %v3051_v60 = vld [vmem:[%s3270_s27 + $0x2a0] ss:$8 sps:$4 sm:$0xff]  }
  0x8b   : > { %2040 = vmatpush1.bf16.msra.mxu0 %v2958_v61  ;;  %1882 = vmatprep.subr.bf16.mxu1 %v2963_v62  ;;  %v3054_v61 = vld [vmem:[%s3270_s27 + $0x5a0] ss:$8 sps:$4 sm:$0xff]   ;;  %v3059_v62 = vld [vmem:[%s3270_s27 + $0x2b4] ss:$8 sps:$4 sm:$0xff]  }
  0x8c   : > { %2041 = vmatprep.subr.bf16.mxu0 %v2966_v63  ;;  %v3062_v63 = vld [vmem:[%s3270_s27 + $0x5b4] ss:$8 sps:$4 sm:$0xff]  }
  0x8e   : > { %1883 = vmatpush1.bf16.msra.mxu1 %v2961_v0  ;;  %v3057_v0 = vld [vmem:[%s3270_s27 + $0x2b0] ss:$8 sps:$4 sm:$0xff]  }
  0x8f   : > { %2042 = vmatpush1.bf16.msra.mxu0 %v2964_v1  ;;  %1884 = vmatprep.subr.bf16.mxu1 %v2971_v2  ;;  %v3060_v1 = vld [vmem:[%s3270_s27 + $0x5b0] ss:$8 sps:$4 sm:$0xff]   ;;  %v3065_v2 = vld [vmem:[%s3270_s27 + $0x2c4] ss:$8 sps:$4 sm:$0xff]  }
  0x90   : > { %2043 = vmatprep.subr.bf16.mxu0 %v2976_v3  ;;  %v3068_v3 = vld [vmem:[%s3270_s27 + $0x5c4] ss:$8 sps:$4 sm:$0xff]  }
  0x92   : > { %1885 = vmatpush1.bf16.msra.mxu1 %v2969_v4  ;;  %v3063_v4 = vld [vmem:[%s3270_s27 + $0x2c0] ss:$8 sps:$4 sm:$0xff]  }
  0x93   : > { %2044 = vmatpush1.bf16.msra.mxu0 %v2974_v5  ;;  %1886 = vmatprep.subr.bf16.mxu1 %v2981_v6  ;;  %v3066_v5 = vld [vmem:[%s3270_s27 + $0x5c0] ss:$8 sps:$4 sm:$0xff]   ;;  %v3071_v6 = vld [vmem:[%s3270_s27 + $0x2d4] ss:$8 sps:$4 sm:$0xff]  }
  0x94   : > { %2045 = vmatprep.subr.bf16.mxu0 %v2984_v7  ;;  %v3074_v7 = vld [vmem:[%s3270_s27 + $0x5d4] ss:$8 sps:$4 sm:$0xff]  }
  0x96   : > { %1887 = vmatpush1.bf16.msra.mxu1 %v2979_v8  ;;  %v3069_v8 = vld [vmem:[%s3270_s27 + $0x2d0] ss:$8 sps:$4 sm:$0xff]  }
  0x97   : > { %2046 = vmatpush1.bf16.msra.mxu0 %v2982_v9  ;;  %1909 = vmatprep.subr.bf16.mxu1 %v2990_v10  ;;  %v3072_v9 = vld [vmem:[%s3270_s27 + $0x5d0] ss:$8 sps:$4 sm:$0xff]   ;;  %v3082_v10 = vld [vmem:[%s3270_s27 + $0x2e4] ss:$8 sps:$4 sm:$0xff]  }
  0x98   : > { %2068 = vmatprep.subr.bf16.mxu0 %v2996_v11  ;;  %v3086_v11 = vld [vmem:[%s3270_s27 + $0x5e4] ss:$8 sps:$4 sm:$0xff]  }
  0x99   : > { %1889 = vmatmul.mubr.bf16.vlgmr.msra.gmra.mrb[0].mxu1 %v2985_v12  ;;  %v3080_v12 = vld [vmem:[%s3270_s27 + $0x2e0] ss:$8 sps:$4 sm:$0xff]  }
  0x9a   : > { %2048 = vmatmul.mubr.bf16.vlgmr.msra.gmra.mrb[0].mxu0 %v2991_v14  ;;  %1910 = vmatpush1.bf16.msra.mxu1 %v2988_v13  ;;  %v3084_v13 = vld [vmem:[%s3270_s27 + $0x5e0] ss:$8 sps:$4 sm:$0xff]   ;;  %v3089_v14 = vld [vmem:[%s3270_s27 + $0x2f4] ss:$8 sps:$4 sm:$0xff]  }
  0x9b   : > { %2069 = vmatpush1.bf16.msra.mxu0 %v2994_v15  ;;  %1911 = vmatprep.subr.bf16.mxu1 %v2999_v16  ;;  %v3092_v15 = vld [vmem:[%s3270_s27 + $0x5f4] ss:$8 sps:$4 sm:$0xff]   ;;  %v3087_v16 = vld [vmem:[%s3270_s27 + $0x2f0] ss:$8 sps:$4 sm:$0xff]  }
  0x9c   : > { %2070 = vmatprep.subr.bf16.mxu0 %v3002_v17  ;;  %1898 = vmatprep.mubr.bf16.mxu1 %v3075_v20  ;;  %v3090_v17 = vld [vmem:[%s3270_s27 + $0x5f0] ss:$8 sps:$4 sm:$0xff]   ;;  %v3096_v20 = vld [vmem:[%s3321_s4 + $0x28] ss:$56 sps:$4 sm:$0xff]  }
  0x9d   : > { %2057 = vmatprep.mubr.bf16.mxu0 %v3077_v22  ;;  %v3104_v22 = vld [vmem:[%s3270_s27 + $0x614] ss:$8 sps:$4 sm:$0xff]  }
  0x9e   : > { %1912 = vmatpush1.bf16.msra.mxu1 %v2997_v18  ;;  %v3101_v18 = vld [vmem:[%s3270_s27 + $0x604] ss:$8 sps:$4 sm:$0xff]  }
  0x9f   : > { %2071 = vmatpush1.bf16.msra.mxu0 %v3000_v19  ;;  %1913 = vmatprep.subr.bf16.mxu1 %v3005_v21  ;;  %v3093_v19 = vld [vmem:[%s3321_s4 + $0x10] ss:$56 sps:$4 sm:$0xff]  }
  0xa0   : > { %2072 = vmatprep.subr.bf16.mxu0 %v3008_v23  ;;  %v3099_v21 = vld [vmem:[%s3270_s27 + $0x600] ss:$8 sps:$4 sm:$0xff]   ;;  %v3105_v23 = vld [vmem:[%s3321_s4 + $0x84] ss:$56 sps:$4 sm:$0xff]  }
  0xa1   : > { %1899 = vmatmul.mubr.bf16.gmra.mrb[4].mxu1 %v3079_v26  ;;  %v3113_v26 = vld [vmem:[%s3270_s27 + $0x624] ss:$8 sps:$4 sm:$0xff]  }
  0xa2   : > { %2058 = vmatmul.mubr.bf16.gmra.mrb[4].mxu0 %v3083_v27  ;;  %1914 = vmatpush1.bf16.msra.mxu1 %v3003_v24  ;;  %v3107_v24 = vld [vmem:[%s3321_s4 + $0x9c] ss:$56 sps:$4 sm:$0xff]   ;;  %v3109_v27 = vld [vmem:[%s3321_s4 + $0x80] ss:$56 sps:$4 sm:$0xff]  }
  0xa3   : > { %2073 = vmatpush1.bf16.msra.mxu0 %v3006_v25  ;;  %1915 = vmatprep.subr.bf16.mxu1 %v3011_v28  ;;  %v3102_v25 = vld [vmem:[%s3270_s27 + $0x610] ss:$8 sps:$4 sm:$0xff]  }
  0xa4   : > { %2074 = vmatprep.subr.bf16.mxu0 %v3014_v29  ;;  %1941 = vmatprep.mubr.bf16.mxu1 %v3095_v33  ;;  %v3110_v28 = vld [vmem:[%s3321_s4 + $0x98] ss:$56 sps:$4 sm:$0xff]   ;;  %v3111_v29 = vld [vmem:[%s3270_s27 + $0x620] ss:$8 sps:$4 sm:$0xff]  }
  0xa5   : > { %2100 = vmatprep.mubr.bf16.mxu0 %v3098_v35  ;;  %v3114_v33 = vld [vmem:[%s3270_s27 + $0x630] ss:$8 sps:$4 sm:$0xff]   ;;  %v3117_v35 = vld [vmem:[%s3270_s27 + $0x640] ss:$8 sps:$4 sm:$0xff]  }
  0xa6   : > { %1916 = vmatpush1.bf16.msra.mxu1 %v3009_v30  ;;  %v3116_v30 = vld [vmem:[%s3270_s27 + $0x634] ss:$8 sps:$4 sm:$0xff]  }
  0xa7   : > { %2075 = vmatpush1.bf16.msra.mxu0 %v3012_v31  ;;  %1917 = vmatprep.subr.bf16.mxu1 %v3017_v32  ;;  %v3155_v31 = vld [vmem:[%s3321_s4 + $0x34] ss:$56 sps:$4 sm:$0xff]   ;;  %v3158_v32 = vld [vmem:[%s3321_s4 + $0xa4] ss:$56 sps:$4 sm:$0xff]  }
  0xa8   : > { %2076 = vmatprep.subr.bf16.mxu0 %v3020_v34  ;;  %v3119_v34 = vld [vmem:[%s3270_s27 + $0x644] ss:$8 sps:$4 sm:$0xff]  }
  0xaa   : > { %1918 = vmatpush1.bf16.msra.mxu1 %v3015_v36  ;;  %v3122_v36 = vld [vmem:[%s3270_s27 + $0x654] ss:$8 sps:$4 sm:$0xff]  }
  0xab   : > { %2077 = vmatpush1.bf16.msra.mxu0 %v3018_v37  ;;  %1919 = vmatprep.subr.bf16.mxu1 %v3023_v38  ;;  %v3120_v37 = vld [vmem:[%s3270_s27 + $0x650] ss:$8 sps:$4 sm:$0xff]   ;;  %v3125_v38 = vld [vmem:[%s3270_s27 + $0x664] ss:$8 sps:$4 sm:$0xff]  }
  0xac   : > { %2078 = vmatprep.subr.bf16.mxu0 %v3026_v39  ;;  %v3123_v39 = vld [vmem:[%s3270_s27 + $0x660] ss:$8 sps:$4 sm:$0xff]  }
  0xae   : > { %1920 = vmatpush1.bf16.msra.mxu1 %v3021_v40  ;;  %v3128_v40 = vld [vmem:[%s3270_s27 + $0x674] ss:$8 sps:$4 sm:$0xff]  }
  0xaf   : > { %2079 = vmatpush1.bf16.msra.mxu0 %v3024_v41  ;;  %1921 = vmatprep.subr.bf16.mxu1 %v3029_v42  ;;  %v3126_v41 = vld [vmem:[%s3270_s27 + $0x670] ss:$8 sps:$4 sm:$0xff]   ;;  %v3131_v42 = vld [vmem:[%s3270_s27 + $0x684] ss:$8 sps:$4 sm:$0xff]  }
  0xb0   : > { %2080 = vmatprep.subr.bf16.mxu0 %v3032_v43  ;;  %v3129_v43 = vld [vmem:[%s3270_s27 + $0x680] ss:$8 sps:$4 sm:$0xff]  }
  0xb2   : > { %1922 = vmatpush1.bf16.msra.mxu1 %v3027_v44  ;;  %v3134_v44 = vld [vmem:[%s3270_s27 + $0x694] ss:$8 sps:$4 sm:$0xff]  }
  0xb3   : > { %2081 = vmatpush1.bf16.msra.mxu0 %v3030_v45  ;;  %1923 = vmatprep.subr.bf16.mxu1 %v3035_v46  ;;  %v3132_v45 = vld [vmem:[%s3270_s27 + $0x690] ss:$8 sps:$4 sm:$0xff]   ;;  %v3137_v46 = vld [vmem:[%s3270_s27 + $0x6a4] ss:$8 sps:$4 sm:$0xff]  }
  0xb4   : > { %2082 = vmatprep.subr.bf16.mxu0 %v3038_v47  ;;  %v3135_v47 = vld [vmem:[%s3270_s27 + $0x6a0] ss:$8 sps:$4 sm:$0xff]  }
  0xb6   : > { %1924 = vmatpush1.bf16.msra.mxu1 %v3033_v48  ;;  %v3140_v48 = vld [vmem:[%s3270_s27 + $0x6b4] ss:$8 sps:$4 sm:$0xff]  }
  0xb7   : > { %2083 = vmatpush1.bf16.msra.mxu0 %v3036_v49  ;;  %1925 = vmatprep.subr.bf16.mxu1 %v3041_v50  ;;  %v3138_v49 = vld [vmem:[%s3270_s27 + $0x6b0] ss:$8 sps:$4 sm:$0xff]   ;;  %v3143_v50 = vld [vmem:[%s3270_s27 + $0x6c4] ss:$8 sps:$4 sm:$0xff]  }
  0xb8   : > { %2084 = vmatprep.subr.bf16.mxu0 %v3044_v51  ;;  %v3141_v51 = vld [vmem:[%s3270_s27 + $0x6c0] ss:$8 sps:$4 sm:$0xff]  }
  0xba   : > { %1926 = vmatpush1.bf16.msra.mxu1 %v3039_v52  ;;  %v3146_v52 = vld [vmem:[%s3270_s27 + $0x6d4] ss:$8 sps:$4 sm:$0xff]  }
  0xbb   : > { %2085 = vmatpush1.bf16.msra.mxu0 %v3042_v53  ;;  %1927 = vmatprep.subr.bf16.mxu1 %v3047_v54  ;;  %v3144_v53 = vld [vmem:[%s3270_s27 + $0x6d0] ss:$8 sps:$4 sm:$0xff]   ;;  %v3149_v54 = vld [vmem:[%s3270_s27 + $0x6e4] ss:$8 sps:$4 sm:$0xff]  }
  0xbc   : > { %2086 = vmatprep.subr.bf16.mxu0 %v3050_v55  ;;  %v3147_v55 = vld [vmem:[%s3270_s27 + $0x6e0] ss:$8 sps:$4 sm:$0xff]  }
  0xbe   : > { %1928 = vmatpush1.bf16.msra.mxu1 %v3045_v56  ;;  %v3152_v56 = vld [vmem:[%s3270_s27 + $0x6f4] ss:$8 sps:$4 sm:$0xff]  }
  0xbf   : > { %2087 = vmatpush1.bf16.msra.mxu0 %v3048_v57  ;;  %1929 = vmatprep.subr.bf16.mxu1 %v3053_v58  ;;  %v3150_v57 = vld [vmem:[%s3270_s27 + $0x6f0] ss:$8 sps:$4 sm:$0xff]  }
  0xc0   : > { %2088 = vmatprep.subr.bf16.mxu0 %v3056_v59  ;;  %v3153_v58 = vld [vmem:[%s3321_s4 + $0x30] ss:$56 sps:$4 sm:$0xff]   ;;  %v3156_v59 = vld [vmem:[%s3321_s4 + $0xa0] ss:$56 sps:$4 sm:$0xff]  }
  0xc2   : > { %1930 = vmatpush1.bf16.msra.mxu1 %v3051_v60  ;;  %v533_v60 = vlaneseq }
  0xc3   : > { %2089 = vmatpush1.bf16.msra.mxu0 %v3054_v61  ;;  %1931 = vmatprep.subr.bf16.mxu1 %v3059_v62 }
  0xc4   : > { %2090 = vmatprep.subr.bf16.mxu0 %v3062_v63  ;;  %v534_v61 = vshrl.u32 %v533_v60, 7 }
  0xc6   : > { %1932 = vmatpush1.bf16.msra.mxu1 %v3057_v0 }
  0xc7   : > { %2091 = vmatpush1.bf16.msra.mxu0 %v3060_v1  ;;  %1933 = vmatprep.subr.bf16.mxu1 %v3065_v2  ;;  %v535_v1 = vsub.s32 0, %v534_v61 }
  0xc8   : > { %2092 = vmatprep.subr.bf16.mxu0 %v3068_v3  ;;  %v531_v3 = vld [vmem:[%s274_s8] sm:$0x3] }
  0xca   : > { %1934 = vmatpush1.bf16.msra.mxu1 %v3063_v4  ;;  %v539_v4 = vsub.s32 1, %v534_v61 }
  0xcb   : > { %2093 = vmatpush1.bf16.msra.mxu0 %v3066_v5  ;;  %1935 = vmatprep.subr.bf16.mxu1 %v3071_v6  ;;  %v536_v5 = vrot.slane %v531_v3, %v535_v1 }
  0xcc   : > { %2094 = vmatprep.subr.bf16.mxu0 %v3074_v7  ;;  %v540_v6 = vrot.slane %v531_v3, %v539_v4 }
  0xce   : > { %1936 = vmatpush1.bf16.msra.mxu1 %v3069_v8 }
  0xcf   : > { %2095 = vmatpush1.bf16.msra.mxu0 %v3072_v9  ;;  %1937 = vmatprep.subr.bf16.mxu1 %v3082_v10 }
  0xd0   : > { %2096 = vmatprep.subr.bf16.mxu0 %v3086_v11 }
  0xd2   : > { %1938 = vmatpush1.bf16.msra.mxu1 %v3080_v12 }
  0xd3   : > { %2097 = vmatpush1.bf16.msra.mxu0 %v3084_v13  ;;  %1939 = vmatprep.subr.bf16.mxu1 %v3089_v14 }
  0xd4   : > { %2098 = vmatprep.subr.bf16.mxu0 %v3092_v15 }
  0xd6   : > { %1940 = vmatpush1.bf16.msra.mxu1 %v3087_v16 }
  0xd7   : > { %2099 = vmatpush1.bf16.msra.mxu0 %v3090_v17  ;;  %2651 = vmatprep.subr.bf16.mxu1 %v3101_v18 }
  0xd8   : > { %2121 = vmatprep.subr.bf16.mxu0 %v3101_v18 }
  0xd9   : > { %1942 = vmatmul.mubr.bf16.vlgmr.msra.gmra.mrb[0].mxu1 %v3093_v19 }
  0xda   : > { %2101 = vmatmul.mubr.bf16.vlgmr.msra.gmra.mrb[0].mxu0 %v3096_v20  ;;  %2667 = vmatpush1.bf16.msra.mxu1 %v3099_v21 }
  0xdb   : > { %2122 = vmatpush1.bf16.msra.mxu0 %v3099_v21  ;;  %2652 = vmatprep.subr.bf16.mxu1 %v3104_v22 }
  0xdc   : > { %2123 = vmatprep.subr.bf16.mxu0 %v3104_v22  ;;  %1951 = vmatprep.mubr.bf16.mxu1 %v3105_v23 }
  0xdd   : > { %2110 = vmatprep.mubr.bf16.mxu0 %v3107_v24 }
  0xde   : > { %2668 = vmatpush1.bf16.msra.mxu1 %v3102_v25 }
  0xdf   : > { %2124 = vmatpush1.bf16.msra.mxu0 %v3102_v25  ;;  %2653 = vmatprep.subr.bf16.mxu1 %v3113_v26 }
  0xe0   : > { %2125 = vmatprep.subr.bf16.mxu0 %v3113_v26 }
  0xe1   : > { %1952 = vmatmul.mubr.bf16.gmra.mrb[4].mxu1 %v3109_v27 }
  0xe2   : > { %2111 = vmatmul.mubr.bf16.gmra.mrb[4].mxu0 %v3110_v28  ;;  %2669 = vmatpush1.bf16.msra.mxu1 %v3111_v29 }
  0xe3   : > { %2126 = vmatpush1.bf16.msra.mxu0 %v3111_v29  ;;  %2654 = vmatprep.subr.bf16.mxu1 %v3116_v30 }
  0xe4   : > { %2127 = vmatprep.subr.bf16.mxu0 %v3116_v30  ;;  %2153 = vmatprep.mubr.bf16.mxu0 %v3155_v31 }
  0xe5   : > { %2163 = vmatprep.mubr.bf16.mxu1 %v3158_v32 }
  0xe6   : > { %2670 = vmatpush1.bf16.msra.mxu1 %v3114_v33 }
  0xe7   : > { %2128 = vmatpush1.bf16.msra.mxu0 %v3114_v33  ;;  %2655 = vmatprep.subr.bf16.mxu1 %v3119_v34 }
  0xe8   : > { %2129 = vmatprep.subr.bf16.mxu0 %v3119_v34 }
  0xea   : > { %2671 = vmatpush1.bf16.msra.mxu1 %v3117_v35 }
  0xeb   : > { %2130 = vmatpush1.bf16.msra.mxu0 %v3117_v35  ;;  %2656 = vmatprep.subr.bf16.mxu1 %v3122_v36 }
  0xec   : > { %2131 = vmatprep.subr.bf16.mxu0 %v3122_v36 }
  0xee   : > { %2672 = vmatpush1.bf16.msra.mxu1 %v3120_v37 }
  0xef   : > { %2132 = vmatpush1.bf16.msra.mxu0 %v3120_v37  ;;  %2657 = vmatprep.subr.bf16.mxu1 %v3125_v38 }
  0xf0   : > { %2133 = vmatprep.subr.bf16.mxu0 %v3125_v38 }
  0xf2   : > { %2673 = vmatpush1.bf16.msra.mxu1 %v3123_v39 }
  0xf3   : > { %2134 = vmatpush1.bf16.msra.mxu0 %v3123_v39  ;;  %2658 = vmatprep.subr.bf16.mxu1 %v3128_v40 }
  0xf4   : > { %2135 = vmatprep.subr.bf16.mxu0 %v3128_v40 }
  0xf6   : > { %2674 = vmatpush1.bf16.msra.mxu1 %v3126_v41 }
  0xf7   : > { %2136 = vmatpush1.bf16.msra.mxu0 %v3126_v41  ;;  %2659 = vmatprep.subr.bf16.mxu1 %v3131_v42 }
  0xf8   : > { %2137 = vmatprep.subr.bf16.mxu0 %v3131_v42 }
  0xfa   : > { %2675 = vmatpush1.bf16.msra.mxu1 %v3129_v43 }
  0xfb   : > { %2138 = vmatpush1.bf16.msra.mxu0 %v3129_v43  ;;  %2660 = vmatprep.subr.bf16.mxu1 %v3134_v44 }
  0xfc   : > { %2139 = vmatprep.subr.bf16.mxu0 %v3134_v44 }
  0xfe   : > { %2676 = vmatpush1.bf16.msra.mxu1 %v3132_v45 }
  0xff   : > { %2140 = vmatpush1.bf16.msra.mxu0 %v3132_v45  ;;  %2661 = vmatprep.subr.bf16.mxu1 %v3137_v46 }
 0x100   : > { %2141 = vmatprep.subr.bf16.mxu0 %v3137_v46 }
 0x102   : > { %2677 = vmatpush1.bf16.msra.mxu1 %v3135_v47 }
 0x103   : > { %2142 = vmatpush1.bf16.msra.mxu0 %v3135_v47  ;;  %2662 = vmatprep.subr.bf16.mxu1 %v3140_v48 }
 0x104   : > { %2143 = vmatprep.subr.bf16.mxu0 %v3140_v48 }
 0x106   : > { %2678 = vmatpush1.bf16.msra.mxu1 %v3138_v49 }
 0x107   : > { %2144 = vmatpush1.bf16.msra.mxu0 %v3138_v49  ;;  %2663 = vmatprep.subr.bf16.mxu1 %v3143_v50 }
 0x108   : > { %2145 = vmatprep.subr.bf16.mxu0 %v3143_v50 }
 0x10a   : > { %2679 = vmatpush1.bf16.msra.mxu1 %v3141_v51 }
 0x10b   : > { %2146 = vmatpush1.bf16.msra.mxu0 %v3141_v51  ;;  %2664 = vmatprep.subr.bf16.mxu1 %v3146_v52 }
 0x10c   : > { %2147 = vmatprep.subr.bf16.mxu0 %v3146_v52 }
 0x10e   : > { %2680 = vmatpush1.bf16.msra.mxu1 %v3144_v53 }
 0x10f   : > { %2148 = vmatpush1.bf16.msra.mxu0 %v3144_v53  ;;  %2665 = vmatprep.subr.bf16.mxu1 %v3149_v54 }
 0x110   : > { %2149 = vmatprep.subr.bf16.mxu0 %v3149_v54 }
 0x112   : > { %2681 = vmatpush1.bf16.msra.mxu1 %v3147_v55 }
 0x113   : > { %2150 = vmatpush1.bf16.msra.mxu0 %v3147_v55  ;;  %2666 = vmatprep.subr.bf16.mxu1 %v3152_v56 }
 0x114   : > { %2151 = vmatprep.subr.bf16.mxu0 %v3152_v56 }
 0x116   : > { %2682 = vmatpush1.bf16.msra.mxu1 %v3150_v57 }
 0x117   : > { %2152 = vmatpush1.bf16.msra.mxu0 %v3150_v57 }
 0x119   : > { %2164 = vmatmul.mubr.bf16.vlgmr.msra.gmra.mrb[8].mxu1 %v3156_v59 }
 0x11a   : > { %2154 = vmatmul.mubr.bf16.vlgmr.msra.gmra.mrb[0].mxu0 %v3153_v58 }
 0x1ac   : > { %v1943_v62 = vpop.f32.mrb[0].mxu1 }
 0x1ad   : > { %v1945_v63 = vpop.f32.mrb[1].mxu1  ;;  %v2683_v23 = vadd.f32 %v1943_v62, %v536_v5 }
 0x1ae   : > { %v1947_v0 = vpop.f32.mrb[2].mxu1  ;;  %v2685_v24 = vadd.f32 %v1945_v63, %v540_v6 }
 0x1af   : > { %v1949_v2 = vpop.f32.mrb[3].mxu1  ;;  %v2687_v27 = vadd.f32 %v1947_v0, %v536_v5 }
 0x1b0   : > { %v2689_v32 = vadd.f32 %v1949_v2, %v540_v6 }
 0x1b4   : > { %v1953_v7 = vpop.f32.mrb[4].mxu1 }
 0x1b5   : > { %v2112_v8 = vpop.f32.mrb[4].mxu0  ;;  %v2691_v9 = vadd.f32 %v1953_v7, %v536_v5  ;;  %v1955_v10 = vpop.f32.mrb[5].mxu1 }
 0x1b6   : > { %v2114_v11 = vpop.f32.mrb[5].mxu0  ;;  %v2694_v12 = vadd.f32 %v1955_v10, %v540_v6  ;;  %v1957_v13 = vpop.f32.mrb[6].mxu1 }
 0x1b7   : > { %v2116_v14 = vpop.f32.mrb[6].mxu0  ;;  %v2692_v15 = vadd.f32 %v2691_v9, %v2112_v8  ;;  %v2697_v16 = vadd.f32 %v1957_v13, %v536_v5  ;;  %v1959_v17 = vpop.f32.mrb[7].mxu1 }
 0x1b8   : > { %v2118_v18 = vpop.f32.mrb[7].mxu0  ;;  %v2695_v19 = vadd.f32 %v2694_v12, %v2114_v11  ;;  %v2700_v20 = vadd.f32 %v1959_v17, %v540_v6 }
 0x1b9   : > { %v2698_v21 = vadd.f32 %v2697_v16, %v2116_v14 }
 0x1ba   : > { %v2701_v22 = vadd.f32 %v2700_v20, %v2118_v18 }
 0x1ec   : > { %v2165_v26 = vpop.f32.mrb[8].mxu1 }
 0x1ed   : > { %v2155_v25 = vpop.f32.mrb[0].mxu0  ;;  %v2693_v29 = vadd.f32 %v2692_v15, %v2165_v26  ;;  %v2167_v31 = vpop.f32.mrb[9].mxu1 }
 0x1ee   : > { %v2684_v28 = vadd.f32 %v2683_v23, %v2155_v25  ;;  %v2157_v30 = vpop.f32.mrb[1].mxu0  ;;  %v2696_v34 = vadd.f32 %v2695_v19, %v2167_v31  ;;  %v2169_v36 = vpop.f32.mrb[10].mxu1 }
 0x1ef   : > { %v2686_v33 = vadd.f32 %v2685_v24, %v2157_v30  ;;  %v2159_v35 = vpop.f32.mrb[2].mxu0  ;;  %v2178_v38 = vmax.f32 %v2693_v29, 0.0  ;;  %v2699_v40 = vadd.f32 %v2698_v21, %v2169_v36  ;;  %v2171_v42 = vpop.f32.mrb[11].mxu1 }
 0x1f0   : > { %v2174_v37 = vmax.f32 %v2684_v28, 0.0  ;;  %v2688_v39 = vadd.f32 %v2687_v27, %v2159_v35  ;;  %v2161_v41 = vpop.f32.mrb[3].mxu0  ;;  %v2179_v44 = vmax.f32 %v2696_v34, 0.0  ;;  %v2702_v46 = vadd.f32 %v2701_v22, %v2171_v42 }
 0x1f1   : > { %v2175_v43 = vmax.f32 %v2686_v33, 0.0  ;;  %v2690_v45 = vadd.f32 %v2689_v32, %v2161_v41  ;;  %v2180_v48 = vmax.f32 %v2699_v40, 0.0  ;;  %2216 = sbr.rel (!%p3251_p3) target bundleno = 512 (0x200), region = 36 }
 0x1f2   : > { %v2176_v47 = vmax.f32 %v2688_v39, 0.0  ;;  %v2648_v50 = vpack.c.bf16 %v2179_v44, %v2178_v38  ;;  %v2181_v52 = vmax.f32 %v2702_v46, 0.0 }
 0x1f3   : > { %v2646_v49 = vpack.c.bf16 %v2175_v43, %v2174_v37  ;;  %v2177_v51 = vmax.f32 %v2690_v45, 0.0 }
 0x1f4   : > { %2208 = vst [vmem:[%s245_s11 + $0x10] sm:$0xff] %v2648_v50  ;;  %v2649_v54 = vpack.c.bf16 %v2181_v52, %v2180_v48 }
 0x1f5   : > { %2206 = vst [vmem:[%s245_s11] sm:$0xff] %v2646_v49  ;;  %v2647_v53 = vpack.c.bf16 %v2177_v51, %v2176_v47 }
 0x1f6   : > { %2209 = vst [vmem:[%s245_s11 + $0x18] sm:$0xff] %v2649_v54 }
 0x1f7   : > { %2207 = vst [vmem:[%s245_s11 + $0x8] sm:$0xff] %v2647_v53 }
 0x1fb   : > { %v2261_v57 = vld [vmem:[%s245_s11 + $0x10] sm:$0xff] }
 0x1fc   : > { %v2257_v55 = vld [vmem:[%s245_s11] sm:$0xff]  ;;  %2262 = vst [vmem:[%s2223_s21 + $0x20] sm:$0xff] %v2261_v57 }
 0x1fd   : > { %v2263_v58 = vld [vmem:[%s245_s11 + $0x18] sm:$0xff]  ;;  %2258 = vst [vmem:[%s2223_s21] sm:$0xff] %v2257_v55 }
 0x1fe   : > { %v2259_v56 = vld [vmem:[%s245_s11 + $0x8] sm:$0xff]  ;;  %2264 = vst [vmem:[%s2223_s21 + $0x30] sm:$0xff] %v2263_v58 }
 0x1ff   : > { %2260 = vst [vmem:[%s2223_s21 + $0x10] sm:$0xff] %v2259_v56 }
 0x200 PF: > { %s13_s16 = sadd.s32 1, %s3197_s16   ;;  %s3561_s12 = smov %s3185_s13 }
 0x201   : > { %p10_p9 = scmp.ge.s32.totalorder %s13_s16, 4   ;;  %s3562_s13 = smov %s3260_s22 }
 0x202   : > { %s3563_s14 = smov %s3193_s15  ;;  %s3564_s15 = smov %s3566_s18 }
 0x203   :  { %12 = sbr.rel (!%p10_p9) target bundleno = 3 (0x3), region = 106 }

// kernel: features_forward.15
= control target key start
LH: loop header
LB: loop body
LE: loop exit
PB: predicated region body
PF: predicated region fallthrough
CT: control target
= control target key end

     0   :  { %s451_s15 = smov 0   ;;  %s477_s0 = inlined_call_operand.vmem [shape: f32[2,2,2,256], index: 0, kind: input, shape index: {}]   ;;  %s478_s1 = inlined_call_operand.vmem [shape: f32[2,2,1,256], index: 1, kind: input, shape index: {}]   ;;  %s479_s2 = inlined_call_operand.vmem [shape: f32[2,1,2,256], index: 2, kind: input, shape index: {}]   ;;  %s480_s3 = inlined_call_operand.vmem [shape: f32[2,1,1,256], index: 3, kind: input, shape index: {}]   ;;  %s481_s4 = inlined_call_operand.vmem [shape: f32[2,1,1,256], index: 4, kind: output, shape index: {}]  }
   0x1 LB: > { %s391_s16 = sadd.s32 4294967295, %s424_s15   ;;  %p395_p0 = scmp.ge.s32.totalorder %s424_s15, 1  ;;  %s424_s15 = sphi %s451_s15, %s14_s15  }
   0x2   : > { %p190_p1 = scmp.lt.s32.totalorder %s424_s15, 3 }
   0x4   : > { %p191_p2 = pnand %p395_p0, %p190_p1 }
   0x5   : > { %p228_p3 = scmp.lt.s32.totalorder (!%p191_p2), %s391_s16, 1  ;;  %v297_v13 = vlaneseq (!%p191_p2) }
   0x6   : > { %194 = sbr.rel (%p191_p2) target bundleno = 36 (0x24), region = 36 }
   0x7   : > { %vm299_vm0 = vcmp.lt.s32.totalorder (!%p191_p2), %v297_v13, 256 }
   0xd   : > { %s483_s16 = smov (!%p228_p3, %s391_s16), 1 }
   0xe   : > { %s398_s17 = sshll.u32 %s483_s16, 2  ;;  %s401_s24 = sshll.u32 %s483_s16, 1 }
   0xf   : > { %s236_s20 = scalar_lea.vmem %s478_s1, %s398_s17  ;;  %s241_s23 = scalar_lea.vmem %s479_s2, %s398_s17 }
  0x10   : > { %s408_s25 = sshll.u32 %s483_s16, 3  ;;  %s245_s28 = scalar_lea.vmem %s480_s3, %s401_s24  ;;  %v252_v0 = vld [vmem:[%s236_s20] sm:$0x3]  ;;  %v253_v1 = vld [vmem:[%s236_s20 + $0x2] sm:$0x3] }
  0x11   : > { %v403_v2 = vld.sshfl [vmem:[%s241_s23] sm:$0x33 pattern:$0x75316420]  ;;  %s232_s5 = scalar_lea.vmem %s477_s0, %s408_s25  ;;  %s249_s8 = scalar_lea.vmem %s481_s4, %s401_s24 }
  0x12   : > { %v255_v3 = vld [vmem:[%s245_s28] sm:$0x3]  ;;  %v268_v6 = vcombine.high %v403_v2, %v403_v2  ;;  %v405_v11 = vld.sshfl [vmem:[%s232_s5 + $0x4] sm:$0x33 pattern:$0x75316420] }
  0x13   : > { %v256_v4 = vmax.f32 %v255_v3, %v252_v0  ;;  %v404_v7 = vld.sshfl [vmem:[%s232_s5] sm:$0x33 pattern:$0x75316420]  ;;  %v294_v15 = vcombine.high %v405_v11, %v405_v11 }
  0x14   : > { %v281_v10 = vcombine.high %v404_v7, %v404_v7 }
  0x15   : > { %v257_v5 = vmax.f32 %v256_v4, %v253_v1 }
  0x17   : > { %v267_v8 = vmax.f32 %v257_v5, %v403_v2 }
  0x19   : > { %v270_v9 = vmax.f32 %v267_v8, %v268_v6 }
  0x1b   : > { %v280_v12 = vmax.f32 %v270_v9, %v404_v7 }
  0x1d   : > { %v283_v14 = vmax.f32 %v280_v12, %v281_v10 }
  0x1f   : > { %v293_v16 = vmax.f32 %v283_v14, %v405_v11 }
  0x21   : > { %v296_v17 = vmax.f32 %v293_v16, %v294_v15 }
  0x23   : > { %301 = vst.msk [vmem:[%s249_s8] sm:$0x3] %vm299_vm0, %v296_v17 }
  0x24 PF: > { %s14_s15 = sadd.s32 1, %s424_s15  }
  0x25   : > { %p11_p4 = scmp.ge.s32.totalorder %s14_s15, 4  }
  0x27   :  { %13 = sbr.rel (!%p11_p4) target bundleno = 1 (0x1), region = 75 }

// kernel: features_forward.14
= control target key start
LH: loop header
LB: loop body
LE: loop exit
PB: predicated region body
PF: predicated region fallthrough
CT: control target
= control target key end

     0   :  { %s2470_s12 = smov 0   ;;  %s2472_s13 = smov 0   ;;  %s2695_s0 = inlined_call_operand.vmem [shape: bf16[2,32,1792], index: 0, kind: input, shape index: {}]   ;;  %s2696_s1 = inlined_call_operand.vmem [shape: bf16[2,1792,128], index: 1, kind: input, shape index: {}]   ;;  %s2697_s2 = inlined_call_operand.vmem [shape: f32[2,1,128], index: 2, kind: input, shape index: {}]   ;;  %s2698_s3 = inlined_call_operand.vmem [shape: f32[32,256], index: 3, kind: output, shape index: {}]  }
   0x1   :  { %s2474_s14 = smov 0   ;;  %s2476_s15 = smov 0  }
   0x2   :  { %s2478_s16 = smov 0  }
   0x3 LB: > { %s1849_s17 = sadd.s32 4294967295, %s2448_s16   ;;  %s32_s18 = sadd.s32 1, %s2444_s15  ;;  %s2448_s16 = sphi %s2478_s16, %s13_s16   ;;  %s2444_s15 = sphi %s2476_s15, %s2703_s15   ;;  %s2440_s14 = sphi %s2474_s14, %s2702_s14   ;;  %s2436_s13 = sphi %s2472_s13, %s2701_s13   ;;  %s2432_s12 = sphi %s2470_s12, %s2700_s12  }
   0x4   : > { %p34_p0 = scmp.ge.s32.totalorder %s32_s18, 2  ;;  %s127_s19 = sadd.s32 1, %s2436_s13 }
   0x5   : > { %p137_p1 = scmp.ne.s32.totalorder %s2436_s13, %s2432_s12  ;;  %p138_p2 = scmp.eq.s32.totalorder %s1849_s17, 1 }
   0x6   : > { %s2705_s18 = smov (%p34_p0, %s32_s18), 0  ;;  %p1853_p4 = scmp.ge.s32.totalorder %s2448_s16, 1 }
   0x7   : > { %p2502_p3 = por %p138_p2, %p137_p1  ;;  %s123_s21 = ssub.s32 %s2444_s15, %s2705_s18 }
   0x8   : > { %p196_p5 = scmp.lt.s32.totalorder %s2448_s16, 3  ;;  %p125_p6 = scmp.eq.s32.totalorder %s123_s21, 0 }
   0xa   : > { %p197_p7 = pnand %p1853_p4, %p196_p5 }
   0xb   : > { %s2511_s22 = scalar_select %p125_p6, %s2436_s13, %s127_s19  }
   0xc   : > { %200 = sbr.rel (%p197_p7) target bundleno = 385 (0x181), region = 32  ;;  %p239_p8 = scmp.lt.s32.totalorder (!%p197_p7), %s2440_s14, 1 }
   0xd   : > { %s235_s8 = sand.u32 (!%p197_p7), 1, %s2432_s12  }
   0xe   : > { %s1854_s9 = sshll.u32 (!%p197_p7), %s235_s8, 5 }
   0xf   : > { %s237_s10 = scalar_lea.vmem (!%p197_p7), [#allocation2], %s1854_s9 }
  0x13   : > { %s2515_s23 = scalar_select %p239_p8, %s2440_s14, 1 }
  0x14   : > { %s1999_s11 = sshll.u32 (%p2502_p3), %s2440_s14, 3 }
  0x15   : > { %s2215_s24 = smul.u32 896, %s2515_s23  ;;  %s262_s7 = scalar_lea.vmem %s2697_s2, %s2515_s23 }
  0x16   : > { %s2214_s28 = smul.u32 224, %s2515_s23  ;;  %s1700_s19 = scalar_lea.vmem (%p2502_p3), %s2698_s3, %s1999_s11 }
  0x17   : > { %s2521_s27 = scalar_lea.vmem %s2696_s1, %s2215_s24 }
  0x18   : > { %v2256_v0 = vld [vmem:[%s2521_s27 + $0x40] sm:$0xff]   ;;  %v2260_v4 = vld [vmem:[%s2521_s27 + $0x48] sm:$0xff]   ;;  %v2264_v8 = vld [vmem:[%s2521_s27 + $0x50] sm:$0xff]   ;;  %s2557_s4 = scalar_lea.vmem %s2695_s0, %s2214_s28 }
  0x19   : > { %v2257_v1 = vld [vmem:[%s2521_s27 + $0xc0] sm:$0xff]   ;;  %2002 = vmatprep.subr.bf16.mxu0 %v2256_v0  ;;  %v2261_v5 = vld [vmem:[%s2521_s27 + $0xc8] sm:$0xff]   ;;  %v2265_v9 = vld [vmem:[%s2521_s27 + $0xd0] sm:$0xff]  }
  0x1a   : > { %v2258_v2 = vld [vmem:[%s2521_s27] sm:$0xff]   ;;  %2030 = vmatprep.subr.bf16.mxu1 %v2257_v1  ;;  %v2262_v6 = vld [vmem:[%s2521_s27 + $0x8] sm:$0xff]   ;;  %v2266_v10 = vld [vmem:[%s2521_s27 + $0x10] sm:$0xff]  }
  0x1b   : > { %v2259_v3 = vld [vmem:[%s2521_s27 + $0x80] sm:$0xff]   ;;  %2003 = vmatpush3.bf16.msra.mxu0 %v2258_v2  ;;  %v2263_v7 = vld [vmem:[%s2521_s27 + $0x88] sm:$0xff]   ;;  %v2267_v11 = vld [vmem:[%s2521_s27 + $0x90] sm:$0xff]  }
  0x1c   : > { %2031 = vmatpush3.bf16.msra.mxu1 %v2259_v3  ;;  %2004 = vmatprep.subr.bf16.mxu0 %v2260_v4  ;;  %v2268_v12 = vld [vmem:[%s2521_s27 + $0x58] sm:$0xff]   ;;  %v2272_v16 = vld [vmem:[%s2521_s27 + $0x60] sm:$0xff]   ;;  %v2276_v20 = vld [vmem:[%s2521_s27 + $0x68] sm:$0xff]  }
  0x1d   : > { %2032 = vmatprep.subr.bf16.mxu1 %v2261_v5  ;;  %v2269_v13 = vld [vmem:[%s2521_s27 + $0xd8] sm:$0xff]   ;;  %v2273_v17 = vld [vmem:[%s2521_s27 + $0xe0] sm:$0xff]   ;;  %v2277_v21 = vld [vmem:[%s2521_s27 + $0xe8] sm:$0xff]  }
  0x1e   : > { %v2270_v14 = vld [vmem:[%s2521_s27 + $0x18] sm:$0xff]   ;;  %v2274_v18 = vld [vmem:[%s2521_s27 + $0x20] sm:$0xff]   ;;  %v2278_v22 = vld [vmem:[%s2521_s27 + $0x28] sm:$0xff]  }
  0x1f   : > { %2005 = vmatpush3.bf16.msra.mxu0 %v2262_v6  ;;  %v2271_v15 = vld [vmem:[%s2521_s27 + $0x98] sm:$0xff]   ;;  %v2275_v19 = vld [vmem:[%s2521_s27 + $0xa0] sm:$0xff]   ;;  %v2279_v23 = vld [vmem:[%s2521_s27 + $0xa8] sm:$0xff]  }
  0x20   : > { %2033 = vmatpush3.bf16.msra.mxu1 %v2263_v7  ;;  %2006 = vmatprep.subr.bf16.mxu0 %v2264_v8  ;;  %v2280_v24 = vld [vmem:[%s2521_s27 + $0x70] sm:$0xff]   ;;  %v2284_v28 = vld [vmem:[%s2521_s27 + $0x78] sm:$0xff]   ;;  %v2291_v34 = vld [vmem:[%s2557_s4 + $0x8] ss:$56 sps:$4 sm:$0xff]  }
  0x21   : > { %2034 = vmatprep.subr.bf16.mxu1 %v2265_v9  ;;  %v2281_v25 = vld [vmem:[%s2521_s27 + $0xf0] sm:$0xff]   ;;  %v2285_v29 = vld [vmem:[%s2521_s27 + $0xf8] sm:$0xff]   ;;  %v2293_v35 = vld [vmem:[%s2557_s4 + $0xc] ss:$56 sps:$4 sm:$0xff]  }
  0x22   : > { %v2282_v26 = vld [vmem:[%s2521_s27 + $0x30] sm:$0xff]   ;;  %v2286_v30 = vld [vmem:[%s2521_s27 + $0x38] sm:$0xff]   ;;  %v2294_v36 = vld [vmem:[%s2521_s27 + $0x140] sm:$0xff]   ;;  %1418 = vmatprep.mubr.bf16.mxu1 %v2293_v35 }
  0x23   : > { %2007 = vmatpush3.bf16.msra.mxu0 %v2266_v10  ;;  %v2283_v27 = vld [vmem:[%s2521_s27 + $0xb0] sm:$0xff]   ;;  %v2287_v31 = vld [vmem:[%s2521_s27 + $0xb8] sm:$0xff]   ;;  %v2295_v37 = vld [vmem:[%s2521_s27 + $0x1c0] sm:$0xff]  }
  0x24   : > { %2035 = vmatpush3.bf16.msra.mxu1 %v2267_v11  ;;  %2008 = vmatprep.subr.bf16.mxu0 %v2268_v12  ;;  %v2288_v32 = vld [vmem:[%s2557_s4] ss:$56 sps:$4 sm:$0xff]   ;;  %v2290_v33 = vld [vmem:[%s2557_s4 + $0x4] ss:$56 sps:$4 sm:$0xff]   ;;  %v2298_v40 = vld [vmem:[%s2521_s27 + $0x148] sm:$0xff]  }
  0x25   : > { %2036 = vmatprep.subr.bf16.mxu1 %v2269_v13  ;;  %1369 = vmatprep.mubr.bf16.mxu0 %v2290_v33  ;;  %v2296_v38 = vld [vmem:[%s2521_s27 + $0x100] sm:$0xff]   ;;  %v2299_v41 = vld [vmem:[%s2521_s27 + $0x1c8] sm:$0xff]   ;;  %v2302_v44 = vld [vmem:[%s2521_s27 + $0x150] sm:$0xff]  }
  0x26   : > { %v2297_v39 = vld [vmem:[%s2521_s27 + $0x180] sm:$0xff]   ;;  %v2300_v42 = vld [vmem:[%s2521_s27 + $0x108] sm:$0xff]   ;;  %v2303_v45 = vld [vmem:[%s2521_s27 + $0x1d0] sm:$0xff]  }
  0x27   : > { %2009 = vmatpush3.bf16.msra.mxu0 %v2270_v14  ;;  %v2301_v43 = vld [vmem:[%s2521_s27 + $0x188] sm:$0xff]   ;;  %v2304_v46 = vld [vmem:[%s2521_s27 + $0x110] sm:$0xff]   ;;  %v2306_v48 = vld [vmem:[%s2521_s27 + $0x158] sm:$0xff]  }
  0x28   : > { %2037 = vmatpush3.bf16.msra.mxu1 %v2271_v15  ;;  %2010 = vmatprep.subr.bf16.mxu0 %v2272_v16  ;;  %v2305_v47 = vld [vmem:[%s2521_s27 + $0x190] sm:$0xff]   ;;  %v2307_v49 = vld [vmem:[%s2521_s27 + $0x1d8] sm:$0xff]   ;;  %v2310_v52 = vld [vmem:[%s2521_s27 + $0x160] sm:$0xff]  }
  0x29   : > { %2038 = vmatprep.subr.bf16.mxu1 %v2273_v17  ;;  %v2308_v50 = vld [vmem:[%s2521_s27 + $0x118] sm:$0xff]   ;;  %v2311_v53 = vld [vmem:[%s2521_s27 + $0x1e0] sm:$0xff]   ;;  %v2314_v56 = vld [vmem:[%s2557_s4 + $0x74] ss:$56 sps:$4 sm:$0xff]  }
  0x2a   : > { %v2309_v51 = vld [vmem:[%s2521_s27 + $0x198] sm:$0xff]   ;;  %v2312_v54 = vld [vmem:[%s2521_s27 + $0x120] sm:$0xff]   ;;  %v2316_v57 = vld [vmem:[%s2557_s4 + $0x70] ss:$56 sps:$4 sm:$0xff]  }
  0x2b   : > { %2011 = vmatpush3.bf16.msra.mxu0 %v2274_v18  ;;  %v2313_v55 = vld [vmem:[%s2521_s27 + $0x1a0] sm:$0xff]   ;;  %v2317_v58 = vld [vmem:[%s2521_s27 + $0x168] sm:$0xff]   ;;  %v2319_v60 = vld [vmem:[%s2557_s4 + $0x7c] ss:$56 sps:$4 sm:$0xff]  }
  0x2c   : > { %2039 = vmatpush3.bf16.msra.mxu1 %v2275_v19  ;;  %2012 = vmatprep.subr.bf16.mxu0 %v2276_v20  ;;  %v2318_v59 = vld [vmem:[%s2521_s27 + $0x1e8] sm:$0xff]   ;;  %v2323_v63 = vld [vmem:[%s2557_s4 + $0x78] ss:$56 sps:$4 sm:$0xff]   ;;  %v2337_v11 = vld [vmem:[%s2557_s4 + $0x1c] ss:$56 sps:$4 sm:$0xff]  }
  0x2d   : > { %2040 = vmatprep.subr.bf16.mxu1 %v2277_v21  ;;  %v2321_v61 = vld [vmem:[%s2521_s27 + $0x128] sm:$0xff]   ;;  %v2324_v0 = vld [vmem:[%s2521_s27 + $0x170] sm:$0xff]   ;;  %v2328_v4 = vld [vmem:[%s2521_s27 + $0x178] sm:$0xff]  }
  0x2e   : > { %v2322_v62 = vld [vmem:[%s2521_s27 + $0x1a8] sm:$0xff]   ;;  %v2325_v1 = vld [vmem:[%s2521_s27 + $0x1f0] sm:$0xff]   ;;  %v2329_v5 = vld [vmem:[%s2521_s27 + $0x1f8] sm:$0xff]  }
  0x2f   : > { %2013 = vmatpush3.bf16.msra.mxu0 %v2278_v22  ;;  %v2326_v2 = vld [vmem:[%s2521_s27 + $0x130] sm:$0xff]   ;;  %v2330_v6 = vld [vmem:[%s2521_s27 + $0x138] sm:$0xff]   ;;  %v2338_v12 = vld [vmem:[%s2521_s27 + $0x240] sm:$0xff]  }
  0x30   : > { %2041 = vmatpush3.bf16.msra.mxu1 %v2279_v23  ;;  %2014 = vmatprep.subr.bf16.mxu0 %v2280_v24  ;;  %v2327_v3 = vld [vmem:[%s2521_s27 + $0x1b0] sm:$0xff]   ;;  %v2331_v7 = vld [vmem:[%s2521_s27 + $0x1b8] sm:$0xff]   ;;  %v2339_v13 = vld [vmem:[%s2521_s27 + $0x2c0] sm:$0xff]  }
  0x31   : > { %2042 = vmatprep.subr.bf16.mxu1 %v2281_v25  ;;  %v2332_v8 = vld [vmem:[%s2557_s4 + $0x10] ss:$56 sps:$4 sm:$0xff]   ;;  %v2334_v9 = vld [vmem:[%s2557_s4 + $0x14] ss:$56 sps:$4 sm:$0xff]   ;;  %v2340_v14 = vld [vmem:[%s2521_s27 + $0x200] sm:$0xff]  }
  0x32   : > { %v2335_v10 = vld [vmem:[%s2557_s4 + $0x18] ss:$56 sps:$4 sm:$0xff]   ;;  %v2341_v15 = vld [vmem:[%s2521_s27 + $0x280] sm:$0xff]   ;;  %v2342_v16 = vld [vmem:[%s2521_s27 + $0x248] sm:$0xff]  }
  0x33   : > { %2015 = vmatpush3.bf16.msra.mxu0 %v2282_v26  ;;  %v2343_v17 = vld [vmem:[%s2521_s27 + $0x2c8] sm:$0xff]   ;;  %v2346_v20 = vld [vmem:[%s2557_s4 + $0x84] ss:$56 sps:$4 sm:$0xff]   ;;  %v2348_v21 = vld [vmem:[%s2557_s4 + $0x80] ss:$56 sps:$4 sm:$0xff]  }
  0x34   : > { %2043 = vmatpush3.bf16.msra.mxu1 %v2283_v27  ;;  %2016 = vmatprep.subr.bf16.mxu0 %v2284_v28  ;;  %v2344_v18 = vld [vmem:[%s2521_s27 + $0x208] sm:$0xff]   ;;  %v2349_v22 = vld [vmem:[%s2521_s27 + $0x250] sm:$0xff]   ;;  %v2356_v28 = vld [vmem:[%s2521_s27 + $0x258] sm:$0xff]  }
  0x35   : > { %2044 = vmatprep.subr.bf16.mxu1 %v2285_v29  ;;  %v2345_v19 = vld [vmem:[%s2521_s27 + $0x288] sm:$0xff]   ;;  %v2350_v23 = vld [vmem:[%s2521_s27 + $0x2d0] sm:$0xff]   ;;  %v2357_v29 = vld [vmem:[%s2521_s27 + $0x2d8] sm:$0xff]  }
  0x36   : > { %v2351_v24 = vld [vmem:[%s2557_s4 + $0x8c] ss:$56 sps:$4 sm:$0xff]   ;;  %v2353_v25 = vld [vmem:[%s2521_s27 + $0x210] sm:$0xff]   ;;  %v2355_v27 = vld [vmem:[%s2557_s4 + $0x88] ss:$56 sps:$4 sm:$0xff]  }
  0x37   : > { %2017 = vmatpush3.bf16.msra.mxu0 %v2286_v30  ;;  %v2354_v26 = vld [vmem:[%s2521_s27 + $0x290] sm:$0xff]   ;;  %v2358_v30 = vld [vmem:[%s2521_s27 + $0x218] sm:$0xff]   ;;  %v2361_v33 = vld [vmem:[%s2521_s27 + $0x2e0] sm:$0xff]  }
  0x38   : > { %2045 = vmatpush3.bf16.msra.mxu1 %v2287_v31  ;;  %2058 = vmatprep.subr.bf16.mxu0 %v2294_v36  ;;  %v2359_v31 = vld [vmem:[%s2521_s27 + $0x298] sm:$0xff]   ;;  %v2363_v35 = vld [vmem:[%s2521_s27 + $0x2a0] sm:$0xff]   ;;  %v2364_v36 = vld [vmem:[%s2521_s27 + $0x268] sm:$0xff]  }
  0x39   : > { %2086 = vmatprep.subr.bf16.mxu1 %v2295_v37  ;;  %v2365_v37 = vld [vmem:[%s2521_s27 + $0x2e8] sm:$0xff]  }
  0x3a   : > { %1370 = vmatmul.mubr.bf16.vlgmr.msra.gmra.mrb[0].mxu0 %v2288_v32  ;;  %v2360_v32 = vld [vmem:[%s2521_s27 + $0x260] sm:$0xff]  }
  0x3b   : > { %1419 = vmatmul.mubr.bf16.vlgmr.msra.gmra.mrb[0].mxu1 %v2291_v34  ;;  %2059 = vmatpush3.bf16.msra.mxu0 %v2296_v38  ;;  %v2362_v34 = vld [vmem:[%s2521_s27 + $0x220] sm:$0xff]   ;;  %v2366_v38 = vld [vmem:[%s2521_s27 + $0x228] sm:$0xff]  }
  0x3c   : > { %2087 = vmatpush3.bf16.msra.mxu1 %v2297_v39  ;;  %2060 = vmatprep.subr.bf16.mxu0 %v2298_v40  ;;  %v2367_v39 = vld [vmem:[%s2521_s27 + $0x2a8] sm:$0xff]   ;;  %v2368_v40 = vld [vmem:[%s2521_s27 + $0x270] sm:$0xff]  }
  0x3d   : > { %2088 = vmatprep.subr.bf16.mxu1 %v2299_v41  ;;  %1377 = vmatprep.mubr.bf16.mxu0 %v2314_v56  ;;  %v2369_v41 = vld [vmem:[%s2521_s27 + $0x2f0] sm:$0xff]  }
  0x3e   : > { %1426 = vmatprep.mubr.bf16.mxu1 %v2319_v60  ;;  %v2386_v56 = vld [vmem:[%s2557_s4 + $0x94] ss:$56 sps:$4 sm:$0xff]  }
  0x3f   : > { %2061 = vmatpush3.bf16.msra.mxu0 %v2300_v42  ;;  %v2370_v42 = vld [vmem:[%s2521_s27 + $0x230] sm:$0xff]  }
  0x40   : > { %2089 = vmatpush3.bf16.msra.mxu1 %v2301_v43  ;;  %2062 = vmatprep.subr.bf16.mxu0 %v2302_v44  ;;  %v2371_v43 = vld [vmem:[%s2521_s27 + $0x2b0] sm:$0xff]   ;;  %v2372_v44 = vld [vmem:[%s2521_s27 + $0x278] sm:$0xff]  }
  0x41   : > { %2090 = vmatprep.subr.bf16.mxu1 %v2303_v45  ;;  %v2373_v45 = vld [vmem:[%s2521_s27 + $0x2f8] sm:$0xff]   ;;  %v2392_v60 = vld [vmem:[%s2521_s27 + $0x310] sm:$0xff]  }
  0x42   : > { %1378 = vmatmul.mubr.bf16.gmra.mrb[4].mxu0 %v2316_v57  ;;  %v2388_v57 = vld [vmem:[%s2557_s4 + $0x90] ss:$56 sps:$4 sm:$0xff]  }
  0x43   : > { %2063 = vmatpush3.bf16.msra.mxu0 %v2304_v46  ;;  %1427 = vmatmul.mubr.bf16.gmra.mrb[4].mxu1 %v2323_v63  ;;  %v2374_v46 = vld [vmem:[%s2521_s27 + $0x238] sm:$0xff]  }
  0x44   : > { %2091 = vmatpush3.bf16.msra.mxu1 %v2305_v47  ;;  %2064 = vmatprep.subr.bf16.mxu0 %v2306_v48  ;;  %v2375_v47 = vld [vmem:[%s2521_s27 + $0x2b8] sm:$0xff]  }
  0x45   : > { %2092 = vmatprep.subr.bf16.mxu1 %v2307_v49  ;;  %1467 = vmatprep.mubr.bf16.mxu0 %v2334_v9  ;;  %v2376_v48 = vld [vmem:[%s2557_s4 + $0x20] ss:$56 sps:$4 sm:$0xff]   ;;  %v2378_v49 = vld [vmem:[%s2557_s4 + $0x24] ss:$56 sps:$4 sm:$0xff]  }
  0x46   : > { %1516 = vmatprep.mubr.bf16.mxu1 %v2337_v11  ;;  %v2395_v63 = vld [vmem:[%s2521_s27 + $0x318] sm:$0xff]  }
  0x47   : > { %2065 = vmatpush3.bf16.msra.mxu0 %v2308_v50  ;;  %v2379_v50 = vld [vmem:[%s2557_s4 + $0x28] ss:$56 sps:$4 sm:$0xff]   ;;  %v2403_v9 = vld [vmem:[%s2521_s27 + $0x338] sm:$0xff]  }
  0x48   : > { %2093 = vmatpush3.bf16.msra.mxu1 %v2309_v51  ;;  %2066 = vmatprep.subr.bf16.mxu0 %v2310_v52  ;;  %v2381_v51 = vld [vmem:[%s2557_s4 + $0x2c] ss:$56 sps:$4 sm:$0xff]   ;;  %v2407_v11 = vld [vmem:[%s2557_s4 + $0xa0] ss:$56 sps:$4 sm:$0xff]  }
  0x49   : > { %2094 = vmatprep.subr.bf16.mxu1 %v2311_v53  ;;  %v2382_v52 = vld [vmem:[%s2521_s27 + $0x340] sm:$0xff]  }
  0x4a   : > { %v2383_v53 = vld [vmem:[%s2521_s27 + $0x300] sm:$0xff]  }
  0x4b   : > { %2067 = vmatpush3.bf16.msra.mxu0 %v2312_v54  ;;  %v2384_v54 = vld [vmem:[%s2521_s27 + $0x348] sm:$0xff]  }
  0x4c   : > { %2095 = vmatpush3.bf16.msra.mxu1 %v2313_v55  ;;  %2068 = vmatprep.subr.bf16.mxu0 %v2317_v58  ;;  %v2385_v55 = vld [vmem:[%s2521_s27 + $0x308] sm:$0xff]   ;;  %v2389_v58 = vld [vmem:[%s2521_s27 + $0x350] sm:$0xff]  }
  0x4d   : > { %2096 = vmatprep.subr.bf16.mxu1 %v2318_v59  ;;  %v2390_v59 = vld [vmem:[%s2557_s4 + $0x9c] ss:$56 sps:$4 sm:$0xff]  }
  0x4f   : > { %2069 = vmatpush3.bf16.msra.mxu0 %v2321_v61  ;;  %v2393_v61 = vld [vmem:[%s2557_s4 + $0x98] ss:$56 sps:$4 sm:$0xff]  }
  0x50   : > { %2097 = vmatpush3.bf16.msra.mxu1 %v2322_v62  ;;  %2070 = vmatprep.subr.bf16.mxu0 %v2324_v0  ;;  %v2394_v62 = vld [vmem:[%s2521_s27 + $0x358] sm:$0xff]   ;;  %v2396_v0 = vld [vmem:[%s2521_s27 + $0x360] sm:$0xff]  }
  0x51   : > { %2098 = vmatprep.subr.bf16.mxu1 %v2325_v1  ;;  %v2397_v1 = vld [vmem:[%s2521_s27 + $0x320] sm:$0xff]  }
  0x53   : > { %2071 = vmatpush3.bf16.msra.mxu0 %v2326_v2  ;;  %v2398_v2 = vld [vmem:[%s2521_s27 + $0x368] sm:$0xff]  }
  0x54   : > { %2099 = vmatpush3.bf16.msra.mxu1 %v2327_v3  ;;  %2072 = vmatprep.subr.bf16.mxu0 %v2328_v4  ;;  %v2399_v3 = vld [vmem:[%s2521_s27 + $0x328] sm:$0xff]  }
  0x55   : > { %2100 = vmatprep.subr.bf16.mxu1 %v2329_v5  ;;  %v2406_v4 = vld [vmem:[%s2557_s4 + $0x34] ss:$56 sps:$4 sm:$0xff]  }
  0x56   : > { %v2400_v5 = vld [vmem:[%s2521_s27 + $0x370] sm:$0xff]  }
  0x57   : > { %2073 = vmatpush3.bf16.msra.mxu0 %v2330_v6  ;;  %v2409_v6 = vld [vmem:[%s2557_s4 + $0xa4] ss:$56 sps:$4 sm:$0xff]  }
  0x58   : > { %2101 = vmatpush3.bf16.msra.mxu1 %v2331_v7  ;;  %2114 = vmatprep.subr.bf16.mxu0 %v2338_v12  ;;  %v2401_v7 = vld [vmem:[%s2521_s27 + $0x330] sm:$0xff]  }
  0x59   : > { %2142 = vmatprep.subr.bf16.mxu1 %v2339_v13 }
  0x5a   : > { %1468 = vmatmul.mubr.bf16.vlgmr.msra.gmra.mrb[8].mxu0 %v2332_v8  ;;  %v2402_v8 = vld [vmem:[%s2521_s27 + $0x378] sm:$0xff]  }
  0x5b   : > { %1517 = vmatmul.mubr.bf16.vlgmr.msra.gmra.mrb[8].mxu1 %v2335_v10  ;;  %2115 = vmatpush3.bf16.msra.mxu0 %v2340_v14  ;;  %v2404_v10 = vld [vmem:[%s2557_s4 + $0x30] ss:$56 sps:$4 sm:$0xff]   ;;  %v1857_v14 = vld [vmem:[%s262_s7] ss:$0 sm:$0xff] }
  0x5c   : > { %2143 = vmatpush3.bf16.msra.mxu1 %v2341_v15  ;;  %2116 = vmatprep.subr.bf16.mxu0 %v2342_v16 }
  0x5d   : > { %2144 = vmatprep.subr.bf16.mxu1 %v2343_v17  ;;  %1475 = vmatprep.mubr.bf16.mxu0 %v2346_v20 }
  0x5e   : > { %1524 = vmatprep.mubr.bf16.mxu1 %v2351_v24 }
  0x5f   : > { %2117 = vmatpush3.bf16.msra.mxu0 %v2344_v18 }
  0x60   : > { %2145 = vmatpush3.bf16.msra.mxu1 %v2345_v19  ;;  %2118 = vmatprep.subr.bf16.mxu0 %v2349_v22 }
  0x61   : > { %2146 = vmatprep.subr.bf16.mxu1 %v2350_v23 }
  0x62   : > { %1476 = vmatmul.mubr.bf16.gmra.mrb[12].mxu0 %v2348_v21 }
  0x63   : > { %2119 = vmatpush3.bf16.msra.mxu0 %v2353_v25  ;;  %1525 = vmatmul.mubr.bf16.gmra.mrb[12].mxu1 %v2355_v27 }
  0x64   : > { %2147 = vmatpush3.bf16.msra.mxu1 %v2354_v26  ;;  %2120 = vmatprep.subr.bf16.mxu0 %v2356_v28 }
  0x65   : > { %2148 = vmatprep.subr.bf16.mxu1 %v2357_v29  ;;  %1565 = vmatprep.mubr.bf16.mxu0 %v2378_v49 }
  0x66   : > { %1614 = vmatprep.mubr.bf16.mxu1 %v2381_v51 }
  0x67   : > { %2121 = vmatpush3.bf16.msra.mxu0 %v2358_v30 }
  0x68   : > { %2149 = vmatpush3.bf16.msra.mxu1 %v2359_v31  ;;  %2122 = vmatprep.subr.bf16.mxu0 %v2360_v32 }
  0x69   : > { %2150 = vmatprep.subr.bf16.mxu1 %v2361_v33 }
  0x6b   : > { %2123 = vmatpush3.bf16.msra.mxu0 %v2362_v34 }
  0x6c   : > { %2151 = vmatpush3.bf16.msra.mxu1 %v2363_v35  ;;  %2124 = vmatprep.subr.bf16.mxu0 %v2364_v36 }
  0x6d   : > { %2152 = vmatprep.subr.bf16.mxu1 %v2365_v37 }
  0x6f   : > { %2125 = vmatpush3.bf16.msra.mxu0 %v2366_v38 }
  0x70   : > { %2153 = vmatpush3.bf16.msra.mxu1 %v2367_v39  ;;  %2126 = vmatprep.subr.bf16.mxu0 %v2368_v40 }
  0x71   : > { %2154 = vmatprep.subr.bf16.mxu1 %v2369_v41 }
  0x73   : > { %2127 = vmatpush3.bf16.msra.mxu0 %v2370_v42 }
  0x74   : > { %2155 = vmatpush3.bf16.msra.mxu1 %v2371_v43  ;;  %2128 = vmatprep.subr.bf16.mxu0 %v2372_v44 }
  0x75   : > { %2156 = vmatprep.subr.bf16.mxu1 %v2373_v45 }
  0x77   : > { %2129 = vmatpush3.bf16.msra.mxu0 %v2374_v46 }
  0x78   : > { %2157 = vmatpush3.bf16.msra.mxu1 %v2375_v47  ;;  %2170 = vmatprep.subr.bf16.mxu0 %v2382_v52 }
  0x79   : > { %2198 = vmatprep.subr.bf16.mxu1 %v2382_v52 }
  0x7a   : > { %1566 = vmatmul.mubr.bf16.vlgmr.msra.gmra.mrb[16].mxu0 %v2376_v48 }
  0x7b   : > { %1615 = vmatmul.mubr.bf16.vlgmr.msra.gmra.mrb[16].mxu1 %v2379_v50  ;;  %2171 = vmatpush3.bf16.msra.mxu0 %v2383_v53 }
  0x7c   : > { %2206 = vmatpush3.bf16.msra.mxu1 %v2383_v53  ;;  %2172 = vmatprep.subr.bf16.mxu0 %v2384_v54 }
  0x7d   : > { %2199 = vmatprep.subr.bf16.mxu1 %v2384_v54  ;;  %1573 = vmatprep.mubr.bf16.mxu0 %v2386_v56 }
  0x7e   : > { %1622 = vmatprep.mubr.bf16.mxu1 %v2390_v59 }
  0x7f   : > { %2173 = vmatpush3.bf16.msra.mxu0 %v2385_v55 }
  0x80   : > { %2207 = vmatpush3.bf16.msra.mxu1 %v2385_v55  ;;  %2174 = vmatprep.subr.bf16.mxu0 %v2389_v58 }
  0x81   : > { %2200 = vmatprep.subr.bf16.mxu1 %v2389_v58 }
  0x82   : > { %1574 = vmatmul.mubr.bf16.gmra.mrb[20].mxu0 %v2388_v57 }
  0x83   : > { %2175 = vmatpush3.bf16.msra.mxu0 %v2392_v60  ;;  %1623 = vmatmul.mubr.bf16.gmra.mrb[20].mxu1 %v2393_v61 }
  0x84   : > { %2208 = vmatpush3.bf16.msra.mxu1 %v2392_v60  ;;  %2176 = vmatprep.subr.bf16.mxu0 %v2394_v62 }
  0x85   : > { %2201 = vmatprep.subr.bf16.mxu1 %v2394_v62  ;;  %1663 = vmatprep.mubr.bf16.mxu0 %v2406_v4 }
  0x86   : > { %1671 = vmatprep.mubr.bf16.mxu1 %v2409_v6 }
  0x87   : > { %2177 = vmatpush3.bf16.msra.mxu0 %v2395_v63 }
  0x88   : > { %2209 = vmatpush3.bf16.msra.mxu1 %v2395_v63  ;;  %2178 = vmatprep.subr.bf16.mxu0 %v2396_v0 }
  0x89   : > { %2202 = vmatprep.subr.bf16.mxu1 %v2396_v0 }
  0x8b   : > { %2179 = vmatpush3.bf16.msra.mxu0 %v2397_v1 }
  0x8c   : > { %2210 = vmatpush3.bf16.msra.mxu1 %v2397_v1  ;;  %2180 = vmatprep.subr.bf16.mxu0 %v2398_v2 }
  0x8d   : > { %2203 = vmatprep.subr.bf16.mxu1 %v2398_v2 }
  0x8f   : > { %2181 = vmatpush3.bf16.msra.mxu0 %v2399_v3 }
  0x90   : > { %2211 = vmatpush3.bf16.msra.mxu1 %v2399_v3  ;;  %2182 = vmatprep.subr.bf16.mxu0 %v2400_v5 }
  0x91   : > { %2204 = vmatprep.subr.bf16.mxu1 %v2400_v5 }
  0x93   : > { %2183 = vmatpush3.bf16.msra.mxu0 %v2401_v7 }
  0x94   : > { %2212 = vmatpush3.bf16.msra.mxu1 %v2401_v7  ;;  %2184 = vmatprep.subr.bf16.mxu0 %v2402_v8 }
  0x95   : > { %2205 = vmatprep.subr.bf16.mxu1 %v2402_v8 }
  0x97   : > { %2185 = vmatpush3.bf16.msra.mxu0 %v2403_v9 }
  0x98   : > { %2213 = vmatpush3.bf16.msra.mxu1 %v2403_v9 }
  0x9a   : > { %1664 = vmatmul.mubr.bf16.vlgmr.msra.gmra.mrb[24].mxu0 %v2404_v10 }
  0x9b   : > { %1672 = vmatmul.mubr.bf16.vlgmr.msra.gmra.mrb[24].mxu1 %v2407_v11 }
 0x10d   : > { %v2018_v12 = vpop.f32.mrb[0].mxu0 }
 0x10e   : > { %v2046_v13 = vpop.f32.mrb[0].mxu1  ;;  %v2019_v15 = vpop.f32.mrb[1].mxu0 }
 0x10f   : > { %v2020_v16 = vadd.f32 %v2019_v15, %v2018_v12  ;;  %v2047_v17 = vpop.f32.mrb[1].mxu1  ;;  %v2021_v18 = vpop.f32.mrb[2].mxu0 }
 0x110   : > { %v2048_v19 = vadd.f32 %v2047_v17, %v2046_v13  ;;  %v2049_v20 = vpop.f32.mrb[2].mxu1  ;;  %v2022_v21 = vpop.f32.mrb[3].mxu0 }
 0x111   : > { %v1372_v22 = vadd.f32 %v2020_v16, %v1857_v14  ;;  %v2023_v23 = vadd.f32 %v2022_v21, %v2021_v18  ;;  %v2050_v24 = vpop.f32.mrb[3].mxu1 }
 0x112   : > { %v2051_v25 = vadd.f32 %v2050_v24, %v2049_v20 }
 0x113   : > { %v1421_v26 = vadd.f32 %v2048_v19, %v1372_v22  ;;  %v1375_v27 = vadd.f32 %v2023_v23, %v1857_v14 }
 0x115   : > { %v1424_v28 = vadd.f32 %v2051_v25, %v1375_v27  ;;  %v2024_v29 = vpop.f32.mrb[4].mxu0 }
 0x116   : > { %v2025_v30 = vpop.f32.mrb[5].mxu0  ;;  %v2052_v36 = vpop.f32.mrb[4].mxu1 }
 0x117   : > { %v2026_v31 = vadd.f32 %v2025_v30, %v2024_v29  ;;  %v2027_v32 = vpop.f32.mrb[6].mxu0  ;;  %v2053_v37 = vpop.f32.mrb[5].mxu1 }
 0x118   : > { %v2028_v33 = vpop.f32.mrb[7].mxu0  ;;  %v2054_v39 = vadd.f32 %v2053_v37, %v2052_v36  ;;  %v2055_v40 = vpop.f32.mrb[6].mxu1 }
 0x119   : > { %v2029_v34 = vadd.f32 %v2028_v33, %v2027_v32  ;;  %v1380_v35 = vadd.f32 %v2026_v31, %v1857_v14  ;;  %v2056_v41 = vpop.f32.mrb[7].mxu1 }
 0x11a   : > { %v2057_v43 = vadd.f32 %v2056_v41, %v2055_v40 }
 0x11b   : > { %v1383_v38 = vadd.f32 %v2029_v34, %v1857_v14  ;;  %v1429_v42 = vadd.f32 %v2054_v39, %v1380_v35 }
 0x11d   : > { %v1432_v44 = vadd.f32 %v2057_v43, %v1383_v38 }
 0x12d   : > { %v2074_v45 = vpop.f32.mrb[8].mxu0 }
 0x12e   : > { %v2102_v46 = vpop.f32.mrb[8].mxu1  ;;  %v2075_v47 = vpop.f32.mrb[9].mxu0 }
 0x12f   : > { %v2076_v48 = vadd.f32 %v2075_v47, %v2074_v45  ;;  %v2103_v49 = vpop.f32.mrb[9].mxu1  ;;  %v2077_v50 = vpop.f32.mrb[10].mxu0 }
 0x130   : > { %v2104_v51 = vadd.f32 %v2103_v49, %v2102_v46  ;;  %v2105_v52 = vpop.f32.mrb[10].mxu1  ;;  %v2078_v53 = vpop.f32.mrb[11].mxu0 }
 0x131   : > { %v1470_v54 = vadd.f32 %v2076_v48, %v1421_v26  ;;  %v2079_v55 = vadd.f32 %v2078_v53, %v2077_v50  ;;  %v2106_v56 = vpop.f32.mrb[11].mxu1 }
 0x132   : > { %v2107_v57 = vadd.f32 %v2106_v56, %v2105_v52 }
 0x133   : > { %v1519_v58 = vadd.f32 %v2104_v51, %v1470_v54  ;;  %v1473_v59 = vadd.f32 %v2079_v55, %v1424_v28 }
 0x135   : > { %v1522_v60 = vadd.f32 %v2107_v57, %v1473_v59  ;;  %v2080_v61 = vpop.f32.mrb[12].mxu0 }
 0x136   : > { %v2081_v62 = vpop.f32.mrb[13].mxu0  ;;  %v2108_v4 = vpop.f32.mrb[12].mxu1 }
 0x137   : > { %v2082_v63 = vadd.f32 %v2081_v62, %v2080_v61  ;;  %v2083_v0 = vpop.f32.mrb[14].mxu0  ;;  %v2109_v6 = vpop.f32.mrb[13].mxu1 }
 0x138   : > { %v2084_v1 = vpop.f32.mrb[15].mxu0  ;;  %v2110_v7 = vadd.f32 %v2109_v6, %v2108_v4  ;;  %v2111_v8 = vpop.f32.mrb[14].mxu1 }
 0x139   : > { %v1478_v2 = vadd.f32 %v2082_v63, %v1429_v42  ;;  %v2085_v3 = vadd.f32 %v2084_v1, %v2083_v0  ;;  %v2112_v9 = vpop.f32.mrb[15].mxu1 }
 0x13a   : > { %v2113_v11 = vadd.f32 %v2112_v9, %v2111_v8 }
 0x13b   : > { %v1481_v5 = vadd.f32 %v2085_v3, %v1432_v44  ;;  %v1527_v10 = vadd.f32 %v2110_v7, %v1478_v2 }
 0x13d   : > { %v1530_v12 = vadd.f32 %v2113_v11, %v1481_v5 }
 0x14d   : > { %v2130_v13 = vpop.f32.mrb[16].mxu0 }
 0x14e   : > { %v2131_v14 = vpop.f32.mrb[17].mxu0  ;;  %v2158_v15 = vpop.f32.mrb[16].mxu1 }
 0x14f   : > { %v2132_v16 = vadd.f32 %v2131_v14, %v2130_v13  ;;  %v2133_v17 = vpop.f32.mrb[18].mxu0  ;;  %v2159_v18 = vpop.f32.mrb[17].mxu1 }
 0x150   : > { %v2134_v19 = vpop.f32.mrb[19].mxu0  ;;  %v2160_v21 = vadd.f32 %v2159_v18, %v2158_v15  ;;  %v2161_v22 = vpop.f32.mrb[18].mxu1 }
 0x151   : > { %v1568_v20 = vadd.f32 %v2132_v16, %v1519_v58  ;;  %v2135_v23 = vadd.f32 %v2134_v19, %v2133_v17  ;;  %v2162_v24 = vpop.f32.mrb[19].mxu1 }
 0x152   : > { %v2163_v27 = vadd.f32 %v2162_v24, %v2161_v22 }
 0x153   : > { %v1617_v25 = vadd.f32 %v2160_v21, %v1568_v20  ;;  %v1571_v26 = vadd.f32 %v2135_v23, %v1522_v60 }
 0x155   : > { %v1620_v28 = vadd.f32 %v2163_v27, %v1571_v26  ;;  %v2136_v29 = vpop.f32.mrb[20].mxu0 }
 0x156   : > { %v2137_v30 = vpop.f32.mrb[21].mxu0  ;;  %v2164_v33 = vpop.f32.mrb[20].mxu1 }
 0x157   : > { %v2138_v31 = vadd.f32 %v2137_v30, %v2136_v29  ;;  %v2139_v32 = vpop.f32.mrb[22].mxu0  ;;  %v2165_v37 = vpop.f32.mrb[21].mxu1 }
 0x158   : > { %v2140_v34 = vpop.f32.mrb[23].mxu0  ;;  %v2166_v38 = vadd.f32 %v2165_v37, %v2164_v33  ;;  %v2167_v39 = vpop.f32.mrb[22].mxu1 }
 0x159   : > { %v1576_v35 = vadd.f32 %v2138_v31, %v1527_v10  ;;  %v2141_v36 = vadd.f32 %v2140_v34, %v2139_v32  ;;  %v2168_v41 = vpop.f32.mrb[23].mxu1 }
 0x15a   : > { %v2169_v43 = vadd.f32 %v2168_v41, %v2167_v39 }
 0x15b   : > { %v1579_v40 = vadd.f32 %v2141_v36, %v1530_v12  ;;  %v1625_v42 = vadd.f32 %v2166_v38, %v1576_v35 }
 0x15d   : > { %v1628_v44 = vadd.f32 %v2169_v43, %v1579_v40 }
 0x16d   : > { %v2186_v45 = vpop.f32.mrb[24].mxu0 }
 0x16e   : > { %v2192_v46 = vpop.f32.mrb[24].mxu1  ;;  %v2187_v47 = vpop.f32.mrb[25].mxu0 }
 0x16f   : > { %v2188_v48 = vadd.f32 %v2187_v47, %v2186_v45  ;;  %v2193_v49 = vpop.f32.mrb[25].mxu1  ;;  %v2189_v50 = vpop.f32.mrb[26].mxu0 }
 0x170   : > { %v2194_v51 = vadd.f32 %v2193_v49, %v2192_v46  ;;  %v2195_v52 = vpop.f32.mrb[26].mxu1  ;;  %v2190_v53 = vpop.f32.mrb[27].mxu0 }
 0x171   : > { %v1666_v54 = vadd.f32 %v2188_v48, %v1617_v25  ;;  %v2191_v55 = vadd.f32 %v2190_v53, %v2189_v50  ;;  %v2196_v56 = vpop.f32.mrb[27].mxu1 }
 0x172   : > { %v1674_v57 = vadd.f32 %v2194_v51, %v1625_v42  ;;  %v2197_v58 = vadd.f32 %v2196_v56, %v2195_v52  ;;  %1694 = sbr.rel (!%p2502_p3) target bundleno = 385 (0x181), region = 36 }
 0x173   : > { %v1680_v59 = vmax.f32 %v1666_v54, 0.0  ;;  %v1669_v60 = vadd.f32 %v2191_v55, %v1620_v28 }
 0x174   : > { %v1682_v61 = vmax.f32 %v1674_v57, 0.0  ;;  %v1677_v62 = vadd.f32 %v2197_v58, %v1628_v44 }
 0x175   : > { %1684 = vst [vmem:[%s237_s10] sm:$0xff] %v1680_v59  ;;  %v1681_v63 = vmax.f32 %v1669_v60, 0.0 }
 0x176   : > { %1686 = vst [vmem:[%s237_s10 + $0x10] sm:$0xff] %v1682_v61  ;;  %v1683_v0 = vmax.f32 %v1677_v62, 0.0 }
 0x177   : > { %1685 = vst [vmem:[%s237_s10 + $0x8] sm:$0xff] %v1681_v63 }
 0x178   : > { %1687 = vst [vmem:[%s237_s10 + $0x18] sm:$0xff] %v1683_v0 }
 0x17c   : > { %v1734_v1 = vld [vmem:[%s237_s10] sm:$0xff] }
 0x17d   : > { %v1738_v3 = vld [vmem:[%s237_s10 + $0x10] sm:$0xff]  ;;  %1735 = vst [vmem:[%s1700_s19] sm:$0xff] %v1734_v1 }
 0x17e   : > { %v1736_v2 = vld [vmem:[%s237_s10 + $0x8] sm:$0xff]  ;;  %1739 = vst [vmem:[%s1700_s19 + $0x20] sm:$0xff] %v1738_v3 }
 0x17f   : > { %v1740_v4 = vld [vmem:[%s237_s10 + $0x18] sm:$0xff]  ;;  %1737 = vst [vmem:[%s1700_s19 + $0x10] sm:$0xff] %v1736_v2 }
 0x180   : > { %1741 = vst [vmem:[%s1700_s19 + $0x30] sm:$0xff] %v1740_v4 }
 0x181 PF: > { %s13_s16 = sadd.s32 1, %s2448_s16   ;;  %s2700_s12 = smov %s2436_s13 }
 0x182   : > { %p10_p9 = scmp.ge.s32.totalorder %s13_s16, 4   ;;  %s2701_s13 = smov %s2511_s22 }
 0x183   : > { %s2702_s14 = smov %s2444_s15  ;;  %s2703_s15 = smov %s2705_s18 }
 0x184   :  { %12 = sbr.rel (!%p10_p9) target bundleno = 3 (0x3), region = 106 }

</bundles_post_ra>
